<compile_context>
chip_gen: v6e
topology: v6e:2x2x1
jax: 0.10.0
libtpu: 0.0.40
codegen_flags: <defaults>
</compile_context>

<pallas_src>
import math
from functools import partial

import numpy as np
import jax
import jax.numpy as jnp
from jax import lax
from jax.experimental import pallas as pl
from jax.experimental.pallas import tpu as pltpu

LANES = 128  # canonical lane-frame width (one full vreg lane dimension)


def _round_up(n: int, m: int) -> int:
    return ((n + m - 1) // m) * m


def _default_num_batch_tiles() -> int:
    # v5e/v6e have a single TensorCore: one big tile (a second tile would only
    # add grid-step + DMA overhead).  v7x has two TCs: two tiles so the
    # "parallel" batch axis shards across cores.
    try:
        kind = jax.devices()[0].device_kind.lower()
    except Exception:
        return 1
    return 2 if "v7" in kind else 1


# ---------------------------------------------------------------------------
# Pallas kernel: one batch tile, all L layers.
# ---------------------------------------------------------------------------
def _realnvp_stacked_kernel(
    x_ref,      # (TB, LANES)        f32   input tile, canonical lane frame
    w1_ref,     # (L, LANES, 2H)           fused+folded first-linear weights
    w2_ref,     # (L, 2H, 2*LANES)         fused block-diag second-linear weights
    b1_ref,     # (L, 1, 2H)         f32
    b2_ref,     # (L, 1, 2*LANES)    f32   (exact zeros on untouched lanes)
    out_ref,    # (TB, LANES)        f32   lanes 0..D-1 = v, D = log_pz, D+1 = log_jac
    *,
    num_layers: int,
    flow_dims: int,
    lanes: int,
    compute_dtype,
):
    v = x_ref[...]                                   # (TB, LANES) f32
    lj = jnp.zeros((v.shape[0], 1), jnp.float32)     # running log|det J|

    # Fully unrolled layer loop (L is small); weights stay VMEM-resident.
    for l in range(num_layers):
        v_c = v.astype(compute_dtype)                # MXU operand dtype
        # Fused sig|mu first Linear + tanh (permutation folded into W1).
        h = jnp.tanh(
            jnp.dot(v_c, w1_ref[l], preferred_element_type=jnp.float32)
            + b1_ref[l])
        # Fused block-diagonal second Linear: lanes [0,LANES) = scattered sig,
        # lanes [LANES, 2*LANES) = scattered mu; zeros elsewhere.
        o2 = (jnp.dot(h.astype(compute_dtype), w2_ref[l],
                      preferred_element_type=jnp.float32)
              + b2_ref[l])
        S = o2[:, :lanes]                            # lane-aligned slices
        M = o2[:, lanes:]
        # Affine coupling on the canonical frame; untouched / pad lanes see
        # exp(0)=1 and +0 (exact identity).  exp is intentionally unclamped,
        # matching the PyTorch module.
        v = v * jnp.exp(S) + M
        lj = lj + jnp.sum(S, axis=-1, keepdims=True)     # == sum(sig)

    # base_dist = standard isotropic Normal; pad lanes of v are exactly zero,
    # and z_hat is a permutation of the real lanes, so ||z_hat||^2 == ||v||^2.
    log_pz = (-0.5 * jnp.sum(v * v, axis=-1, keepdims=True)
              - 0.5 * flow_dims * math.log(2.0 * math.pi))

    # Single lane-dense 128-wide store: v in lanes 0..D-1 (pad lanes are zero),
    # log_pz in lane D, log_jac in lane D+1.
    lane = lax.broadcasted_iota(jnp.int32, out_ref.shape, 1)
    out_ref[...] = jnp.where(lane == flow_dims, log_pz,
                             jnp.where(lane == flow_dims + 1, lj, v))

    # TODO(synk): class_condition=True path (class-wise log-prob mixture via
    # base_dist.log_probs_classwise) and inverse() are not implemented; this
    # kernel covers the default class_condition=False forward pass.


# ---------------------------------------------------------------------------
# Wrapper
# ---------------------------------------------------------------------------
def realnvp_stacked_forward(x, folded, *, num_batch_tiles=None):
    """Stacked RealNVP forward pass in a single Pallas kernel.

    Returns (z_hat, log_pz, sum_of_log_jacobs) with shapes (B, D), (B,), (B,),
    matching the PyTorch module.
    """
    B, D = x.shape
    L, lanes, H2 = folded["w1"].shape
    compute_dtype = folded["w1"].dtype
    assert D == int(folded["dims"])
    assert lanes >= D + 2

    nb = _default_num_batch_tiles() if num_batch_tiles is None else int(num_batch_tiles)
    nb = max(1, nb)
    TB = _round_up(pl.cdiv(B, nb), 8)
    B_pad = nb * TB

    # Zero-padded canonical lane frame: real features in lanes [0, D).  Padded
    # batch rows are all-zero; they flow through exp(0)=1 harmlessly and are
    # sliced off below (do not read their stats lanes).
    x128 = jnp.zeros((B_pad, lanes), jnp.float32).at[:B, :D].set(
        x.astype(jnp.float32))

    kernel = partial(_realnvp_stacked_kernel, num_layers=L, flow_dims=D,
                     lanes=lanes, compute_dtype=compute_dtype)

    w_item = jnp.dtype(compute_dtype).itemsize
    flops = 2 * L * B_pad * (lanes * H2 + H2 * 2 * lanes)
    transcendentals = L * B_pad * (H2 + lanes)      # tanh(2H) + exp(LANES) per row
    bytes_accessed = (2 * B_pad * lanes * 4                       # x in, slab out
                      + L * (lanes * H2 + H2 * 2 * lanes) * w_item  # weights (once)
                      + L * (H2 + 2 * lanes) * 4)                   # biases

    out = pl.pallas_call(
        kernel,
        out_shape=jax.ShapeDtypeStruct((B_pad, lanes), jnp.float32),
        grid_spec=pltpu.PrefetchScalarGridSpec(
            num_scalar_prefetch=0,
            grid=(nb,),
            in_specs=[
                pl.BlockSpec((TB, lanes), lambda b: (b, 0)),          # x tile
                # Weight blocks use the same index every grid step -> fetched
                # once, reused across batch tiles.
                pl.BlockSpec((L, lanes, H2), lambda b: (0, 0, 0)),    # W1_cat
                pl.BlockSpec((L, H2, 2 * lanes), lambda b: (0, 0, 0)),  # W2_cat
                pl.BlockSpec((L, 1, H2), lambda b: (0, 0, 0)),        # b1_cat
                pl.BlockSpec((L, 1, 2 * lanes), lambda b: (0, 0, 0)),  # b2_cat
            ],
            out_specs=pl.BlockSpec((TB, lanes), lambda b: (b, 0)),
        ),
        compiler_params=pltpu.CompilerParams(
            dimension_semantics=("parallel",)),
        cost_estimate=pl.CostEstimate(
            flops=flops, transcendentals=transcendentals,
            bytes_accessed=bytes_accessed),
    )(x128, folded["w1"], folded["w2"], folded["b1"], folded["b2"])

    # One static lane gather maps the canonical-frame state to the last
    # layer's z_hat ordering (all out_perm indices are < D, so the stat lanes
    # D / D+1 are never touched).
    z_hat = jnp.take(out[:B], folded["out_perm"], axis=1)
    return z_hat, out[:B, D], out[:B, D + 1]


# ---------------------------------------------------------------------------
# Host-side (trace-time) folding: permutations + sig/mu fusion into weights.
# ---------------------------------------------------------------------------
def fold_params(raw, perms, compute_dtype=jnp.bfloat16, lanes=LANES):
    L, Dh, H = raw["w1_sig"].shape
    D = 2 * Dh
    assert lanes >= D + 2, "need two spare lanes for (log_pz, log_jac)"
    Q = np.arange(D)

    w1_l, w2_l, b1_l, b2_l = [], [], [], []
    for l in range(L):
        p = np.asarray(perms[l])
        R1 = Q[p[:Dh]]          # canonical lanes feeding the coupling nets
        R2 = Q[p[Dh:]]          # canonical lanes updated by this layer

        # First Linear, fused [sig | mu], gather folded in (zero rows elsewhere).
        w1 = np.zeros((lanes, 2 * H), np.float32)
        w1[R1, :H] = np.asarray(raw["w1_sig"][l], np.float32)
        w1[R1, H:] = np.asarray(raw["w1_mu"][l], np.float32)
        b1 = np.concatenate([np.asarray(raw["b1_sig"][l], np.float32),
                             np.asarray(raw["b1_mu"][l], np.float32)])[None, :]

        # Second Linear, block-diagonal: sig hidden -> S lanes, mu hidden -> M
        # lanes, scattered onto the layer's R2 lanes (zeros elsewhere).
        w2 = np.zeros((2 * H, 2 * lanes), np.float32)
        w2[:H, R2] = np.asarray(raw["w2_sig"][l], np.float32)
        w2[H:, lanes + R2] = np.asarray(raw["w2_mu"][l], np.float32)
        b2 = np.zeros((2 * lanes,), np.float32)
        b2[R2] = np.asarray(raw["b2_sig"][l], np.float32)
        b2[lanes + R2] = np.asarray(raw["b2_mu"][l], np.float32)

        w1_l.append(w1); w2_l.append(w2); b1_l.append(b1); b2_l.append(b2)
        Q = np.concatenate([R1, R2])   # cumulative permutation for next layer

    return dict(
        w1=jnp.asarray(np.stack(w1_l), compute_dtype),            # (L, lanes, 2H)
        w2=jnp.asarray(np.stack(w2_l), compute_dtype),            # (L, 2H, 2*lanes)
        b1=jnp.asarray(np.stack(b1_l), jnp.float32),               # (L, 1, 2H)
        b2=jnp.asarray(np.stack(b2_l), jnp.float32)[:, None, :],   # (L, 1, 2*lanes)
        out_perm=jnp.asarray(Q, jnp.int32),
        dims=D,
    )


# ---------------------------------------------------------------------------
# Pure-JAX reference that mirrors the PyTorch forward (unfolded weights).
# ---------------------------------------------------------------------------
def realnvp_stacked_reference(x, raw, perms):
    D = x.shape[1]
    Dh = D // 2
    log_jac = jnp.zeros((x.shape[0],), jnp.float32)
    log_pz = None
    for l in range(len(perms)):
        xp = x[:, perms[l]]
        x1, x2 = xp[:, :Dh], xp[:, Dh:]
        sig = jnp.tanh(x1 @ raw["w1_sig"][l] + raw["b1_sig"][l]) @ raw["w2_sig"][l] + raw["b2_sig"][l]
        mu = jnp.tanh(x1 @ raw["w1_mu"][l] + raw["b1_mu"][l]) @ raw["w2_mu"][l] + raw["b2_mu"][l]
        z2 = x2 * jnp.exp(sig) + mu
        x = jnp.concatenate([x1, z2], axis=-1)
        log_pz = -0.5 * jnp.sum(x * x, axis=-1) - 0.5 * D * math.log(2.0 * math.pi)
        log_jac = log_jac + jnp.sum(sig, axis=-1)
    return x, log_pz, log_jac


# ---------------------------------------------------------------------------
# Deterministic synthetic parameters (no checkpoints).
# ---------------------------------------------------------------------------
def make_raw_params(key, num_layers, dims, hidden):
    Dh = dims // 2
    keys = jax.random.split(key, 9)
    scale = 0.1  # keep exp(sig) well-behaved
    pkeys = jax.random.split(keys[0], num_layers)
    perms = [jax.random.permutation(pkeys[l], dims) for l in range(num_layers)]

    def w(k, shape):
        return scale * jax.random.normal(k, shape, jnp.float32)

    raw = dict(
        w1_sig=w(keys[1], (num_layers, Dh, hidden)),
        b1_sig=w(keys[2], (num_layers, hidden)),
        w2_sig=w(keys[3], (num_layers, hidden, Dh)),
        b2_sig=w(keys[4], (num_layers, Dh)),
        w1_mu=w(keys[5], (num_layers, Dh, hidden)),
        b1_mu=w(keys[6], (num_layers, hidden)),
        w2_mu=w(keys[7], (num_layers, hidden, Dh)),
        b2_mu=w(keys[8], (num_layers, Dh)),
    )
    return raw, perms


if __name__ == "__main__":
    key = jax.random.PRNGKey(0)
    k_param, k_x = jax.random.split(key)

    B, D, H, L = 512, 16, 32, 4   # batch, flow dims, coupling-net hidden, layers
    raw, perms = make_raw_params(k_param, L, D, H)
    x = jax.random.normal(k_x, (B, D), jnp.float32)

    with jax.default_matmul_precision("highest"):
        z_ref, lp_ref, lj_ref = realnvp_stacked_reference(x, raw, perms)
    jax.block_until_ready((z_ref, lp_ref, lj_ref))

    # float32 MXU-operand path: tight check (small slack for the fused/folded
    # weights' different summation order).
    folded32 = fold_params(raw, perms, compute_dtype=jnp.float32)
    z32, lp32, lj32 = realnvp_stacked_forward(x, folded32)
    jax.block_until_ready((z32, lp32, lj32))
    assert jnp.allclose(z32, z_ref, atol=1e-3, rtol=1e-3)
    assert jnp.allclose(lp32, lp_ref, atol=1e-3, rtol=1e-3)
    assert jnp.allclose(lj32, lj_ref, atol=1e-3, rtol=1e-3)

    # Exercise the multi-tile (multi-TensorCore on v7x) path explicitly.
    z2t, lp2t, lj2t = realnvp_stacked_forward(x, folded32, num_batch_tiles=2)
    jax.block_until_ready((z2t, lp2t, lj2t))
    assert jnp.allclose(z2t, z_ref, atol=1e-3, rtol=1e-3)
    assert jnp.allclose(lp2t, lp_ref, atol=1e-3, rtol=1e-3)
    assert jnp.allclose(lj2t, lj_ref, atol=1e-3, rtol=1e-3)

    # bf16 MXU-operand path (f32 accumulation, f32 element-wise): loose check.
    folded16 = fold_params(raw, perms, compute_dtype=jnp.bfloat16)
    z16, lp16, lj16 = realnvp_stacked_forward(x, folded16)
    jax.block_until_ready((z16, lp16, lj16))
    assert jnp.allclose(z16, z_ref, atol=5e-2, rtol=5e-2)
    assert jnp.allclose(lp16, lp_ref, atol=7.5e-1, rtol=5e-2)
    assert jnp.allclose(lj16, lj_ref, atol=3e-1, rtol=5e-2)

    print("KERNEL_OK")
</pallas_src>

<mosaic_0001>
module attributes {stable_mosaic.version = 11 : i64} {
  func.func @_realnvp_stacked_kernel(%arg0: i32, %arg1: memref<512x128xf32, #tpu.memory_space<vmem>>, %arg2: memref<4x128x64xf32, #tpu.memory_space<vmem>>, %arg3: memref<4x64x256xf32, #tpu.memory_space<vmem>>, %arg4: memref<4x1x64xf32, #tpu.memory_space<vmem>>, %arg5: memref<4x1x256xf32, #tpu.memory_space<vmem>>, %arg6: memref<512x128xf32, #tpu.memory_space<vmem>>) attributes {dimension_semantics = [#tpu.dimension_semantics<parallel>], iteration_bounds = array<i64: 1>, scalar_prefetch = 0 : i64, scratch_operands = 0 : i64, tpu.core_type = #tpu.core_type<tc>, window_params = [{transform_indices = @transform_0, window_bounds = array<i64: 512, 128>}, {pipeline_mode = #tpu.pipeline_mode<synchronous>, transform_indices = @transform_1, window_bounds = array<i64: 4, 128, 64>}, {pipeline_mode = #tpu.pipeline_mode<synchronous>, transform_indices = @transform_2, window_bounds = array<i64: 4, 64, 256>}, {pipeline_mode = #tpu.pipeline_mode<synchronous>, transform_indices = @transform_3, window_bounds = array<i64: 4, 1, 64>}, {pipeline_mode = #tpu.pipeline_mode<synchronous>, transform_indices = @transform_4, window_bounds = array<i64: 4, 1, 256>}, {transform_indices = @transform_5, window_bounds = array<i64: 512, 128>}]} {
    %c0 = arith.constant 0 : index
    %c0_0 = arith.constant 0 : index
    %0 = vector.load %arg1[%c0, %c0_0] : memref<512x128xf32, #tpu.memory_space<vmem>>, vector<512x128xf32>
    %cst = arith.constant 0.000000e+00 : f32
    %1 = vector.broadcast %cst : f32 to vector<512x1xf32>
    %c0_1 = arith.constant 0 : index
    %c0_2 = arith.constant 0 : index
    %c0_3 = arith.constant 0 : index
    %2 = vector.load %arg2[%c0_1, %c0_2, %c0_3] : memref<4x128x64xf32, #tpu.memory_space<vmem>>, vector<1x128x64xf32>
    %3 = vector.shape_cast %2 : vector<1x128x64xf32> to vector<128x64xf32>
    %cst_4 = arith.constant dense<0.000000e+00> : vector<512x64xf32>
    %4 = tpu.matmul %0, %3, %cst_4 {dimension_numbers = #tpu.dot_dimension_numbers<[1], [0], [0], [1], [0, 0, 1, 1], [], []>} : vector<512x128xf32>, vector<128x64xf32>, vector<512x64xf32> -> vector<512x64xf32>
    %c0_5 = arith.constant 0 : index
    %c0_6 = arith.constant 0 : index
    %c0_7 = arith.constant 0 : index
    %5 = vector.load %arg4[%c0_5, %c0_6, %c0_7] : memref<4x1x64xf32, #tpu.memory_space<vmem>>, vector<1x1x64xf32>
    %6 = vector.shape_cast %5 : vector<1x1x64xf32> to vector<1x64xf32>
    %7 = vector.broadcast %6 : vector<1x64xf32> to vector<512x64xf32>
    %8 = arith.addf %4, %7 : vector<512x64xf32>
    %9 = math.tanh %8 : vector<512x64xf32>
    %c0_8 = arith.constant 0 : index
    %c0_9 = arith.constant 0 : index
    %c0_10 = arith.constant 0 : index
    %10 = vector.load %arg3[%c0_8, %c0_9, %c0_10] : memref<4x64x256xf32, #tpu.memory_space<vmem>>, vector<1x64x256xf32>
    %11 = vector.shape_cast %10 : vector<1x64x256xf32> to vector<64x256xf32>
    %cst_11 = arith.constant dense<0.000000e+00> : vector<512x256xf32>
    %12 = tpu.matmul %9, %11, %cst_11 {dimension_numbers = #tpu.dot_dimension_numbers<[1], [0], [0], [1], [0, 0, 1, 1], [], []>} : vector<512x64xf32>, vector<64x256xf32>, vector<512x256xf32> -> vector<512x256xf32>
    %c0_12 = arith.constant 0 : index
    %c0_13 = arith.constant 0 : index
    %c0_14 = arith.constant 0 : index
    %13 = vector.load %arg5[%c0_12, %c0_13, %c0_14] : memref<4x1x256xf32, #tpu.memory_space<vmem>>, vector<1x1x256xf32>
    %14 = vector.shape_cast %13 : vector<1x1x256xf32> to vector<1x256xf32>
    %15 = vector.broadcast %14 : vector<1x256xf32> to vector<512x256xf32>
    %16 = arith.addf %12, %15 : vector<512x256xf32>
    %17 = vector.extract_strided_slice %16 {offsets = [0, 0], sizes = [512, 128], strides = [1, 1]} : vector<512x256xf32> to vector<512x128xf32>
    %18 = vector.extract_strided_slice %16 {offsets = [0, 128], sizes = [512, 128], strides = [1, 1]} : vector<512x256xf32> to vector<512x128xf32>
    %19 = math.exp %17 : vector<512x128xf32>
    %20 = arith.mulf %0, %19 : vector<512x128xf32>
    %21 = arith.addf %20, %18 : vector<512x128xf32>
    %cst_15 = arith.constant dense<0.000000e+00> : vector<512xf32>
    %22 = vector.multi_reduction <add>, %17, %cst_15 [1] : vector<512x128xf32> to vector<512xf32>
    %23 = vector.shape_cast %22 : vector<512xf32> to vector<512x1xf32>
    %24 = arith.addf %1, %23 : vector<512x1xf32>
    %c1 = arith.constant 1 : index
    %c0_16 = arith.constant 0 : index
    %c0_17 = arith.constant 0 : index
    %25 = vector.load %arg2[%c1, %c0_16, %c0_17] : memref<4x128x64xf32, #tpu.memory_space<vmem>>, vector<1x128x64xf32>
    %26 = vector.shape_cast %25 : vector<1x128x64xf32> to vector<128x64xf32>
    %cst_18 = arith.constant dense<0.000000e+00> : vector<512x64xf32>
    %27 = tpu.matmul %21, %26, %cst_18 {dimension_numbers = #tpu.dot_dimension_numbers<[1], [0], [0], [1], [0, 0, 1, 1], [], []>} : vector<512x128xf32>, vector<128x64xf32>, vector<512x64xf32> -> vector<512x64xf32>
    %c1_19 = arith.constant 1 : index
    %c0_20 = arith.constant 0 : index
    %c0_21 = arith.constant 0 : index
    %28 = vector.load %arg4[%c1_19, %c0_20, %c0_21] : memref<4x1x64xf32, #tpu.memory_space<vmem>>, vector<1x1x64xf32>
    %29 = vector.shape_cast %28 : vector<1x1x64xf32> to vector<1x64xf32>
    %30 = vector.broadcast %29 : vector<1x64xf32> to vector<512x64xf32>
    %31 = arith.addf %27, %30 : vector<512x64xf32>
    %32 = math.tanh %31 : vector<512x64xf32>
    %c1_22 = arith.constant 1 : index
    %c0_23 = arith.constant 0 : index
    %c0_24 = arith.constant 0 : index
    %33 = vector.load %arg3[%c1_22, %c0_23, %c0_24] : memref<4x64x256xf32, #tpu.memory_space<vmem>>, vector<1x64x256xf32>
    %34 = vector.shape_cast %33 : vector<1x64x256xf32> to vector<64x256xf32>
    %cst_25 = arith.constant dense<0.000000e+00> : vector<512x256xf32>
    %35 = tpu.matmul %32, %34, %cst_25 {dimension_numbers = #tpu.dot_dimension_numbers<[1], [0], [0], [1], [0, 0, 1, 1], [], []>} : vector<512x64xf32>, vector<64x256xf32>, vector<512x256xf32> -> vector<512x256xf32>
    %c1_26 = arith.constant 1 : index
    %c0_27 = arith.constant 0 : index
    %c0_28 = arith.constant 0 : index
    %36 = vector.load %arg5[%c1_26, %c0_27, %c0_28] : memref<4x1x256xf32, #tpu.memory_space<vmem>>, vector<1x1x256xf32>
    %37 = vector.shape_cast %36 : vector<1x1x256xf32> to vector<1x256xf32>
    %38 = vector.broadcast %37 : vector<1x256xf32> to vector<512x256xf32>
    %39 = arith.addf %35, %38 : vector<512x256xf32>
    %40 = vector.extract_strided_slice %39 {offsets = [0, 0], sizes = [512, 128], strides = [1, 1]} : vector<512x256xf32> to vector<512x128xf32>
    %41 = vector.extract_strided_slice %39 {offsets = [0, 128], sizes = [512, 128], strides = [1, 1]} : vector<512x256xf32> to vector<512x128xf32>
    %42 = math.exp %40 : vector<512x128xf32>
    %43 = arith.mulf %21, %42 : vector<512x128xf32>
    %44 = arith.addf %43, %41 : vector<512x128xf32>
    %cst_29 = arith.constant dense<0.000000e+00> : vector<512xf32>
    %45 = vector.multi_reduction <add>, %40, %cst_29 [1] : vector<512x128xf32> to vector<512xf32>
    %46 = vector.shape_cast %45 : vector<512xf32> to vector<512x1xf32>
    %47 = arith.addf %24, %46 : vector<512x1xf32>
    %c2 = arith.constant 2 : index
    %c0_30 = arith.constant 0 : index
    %c0_31 = arith.constant 0 : index
    %48 = vector.load %arg2[%c2, %c0_30, %c0_31] : memref<4x128x64xf32, #tpu.memory_space<vmem>>, vector<1x128x64xf32>
    %49 = vector.shape_cast %48 : vector<1x128x64xf32> to vector<128x64xf32>
    %cst_32 = arith.constant dense<0.000000e+00> : vector<512x64xf32>
    %50 = tpu.matmul %44, %49, %cst_32 {dimension_numbers = #tpu.dot_dimension_numbers<[1], [0], [0], [1], [0, 0, 1, 1], [], []>} : vector<512x128xf32>, vector<128x64xf32>, vector<512x64xf32> -> vector<512x64xf32>
    %c2_33 = arith.constant 2 : index
    %c0_34 = arith.constant 0 : index
    %c0_35 = arith.constant 0 : index
    %51 = vector.load %arg4[%c2_33, %c0_34, %c0_35] : memref<4x1x64xf32, #tpu.memory_space<vmem>>, vector<1x1x64xf32>
    %52 = vector.shape_cast %51 : vector<1x1x64xf32> to vector<1x64xf32>
    %53 = vector.broadcast %52 : vector<1x64xf32> to vector<512x64xf32>
    %54 = arith.addf %50, %53 : vector<512x64xf32>
    %55 = math.tanh %54 : vector<512x64xf32>
    %c2_36 = arith.constant 2 : index
    %c0_37 = arith.constant 0 : index
    %c0_38 = arith.constant 0 : index
    %56 = vector.load %arg3[%c2_36, %c0_37, %c0_38] : memref<4x64x256xf32, #tpu.memory_space<vmem>>, vector<1x64x256xf32>
    %57 = vector.shape_cast %56 : vector<1x64x256xf32> to vector<64x256xf32>
    %cst_39 = arith.constant dense<0.000000e+00> : vector<512x256xf32>
    %58 = tpu.matmul %55, %57, %cst_39 {dimension_numbers = #tpu.dot_dimension_numbers<[1], [0], [0], [1], [0, 0, 1, 1], [], []>} : vector<512x64xf32>, vector<64x256xf32>, vector<512x256xf32> -> vector<512x256xf32>
    %c2_40 = arith.constant 2 : index
    %c0_41 = arith.constant 0 : index
    %c0_42 = arith.constant 0 : index
    %59 = vector.load %arg5[%c2_40, %c0_41, %c0_42] : memref<4x1x256xf32, #tpu.memory_space<vmem>>, vector<1x1x256xf32>
    %60 = vector.shape_cast %59 : vector<1x1x256xf32> to vector<1x256xf32>
    %61 = vector.broadcast %60 : vector<1x256xf32> to vector<512x256xf32>
    %62 = arith.addf %58, %61 : vector<512x256xf32>
    %63 = vector.extract_strided_slice %62 {offsets = [0, 0], sizes = [512, 128], strides = [1, 1]} : vector<512x256xf32> to vector<512x128xf32>
    %64 = vector.extract_strided_slice %62 {offsets = [0, 128], sizes = [512, 128], strides = [1, 1]} : vector<512x256xf32> to vector<512x128xf32>
    %65 = math.exp %63 : vector<512x128xf32>
    %66 = arith.mulf %44, %65 : vector<512x128xf32>
    %67 = arith.addf %66, %64 : vector<512x128xf32>
    %cst_43 = arith.constant dense<0.000000e+00> : vector<512xf32>
    %68 = vector.multi_reduction <add>, %63, %cst_43 [1] : vector<512x128xf32> to vector<512xf32>
    %69 = vector.shape_cast %68 : vector<512xf32> to vector<512x1xf32>
    %70 = arith.addf %47, %69 : vector<512x1xf32>
    %c3 = arith.constant 3 : index
    %c0_44 = arith.constant 0 : index
    %c0_45 = arith.constant 0 : index
    %71 = vector.load %arg2[%c3, %c0_44, %c0_45] : memref<4x128x64xf32, #tpu.memory_space<vmem>>, vector<1x128x64xf32>
    %72 = vector.shape_cast %71 : vector<1x128x64xf32> to vector<128x64xf32>
    %cst_46 = arith.constant dense<0.000000e+00> : vector<512x64xf32>
    %73 = tpu.matmul %67, %72, %cst_46 {dimension_numbers = #tpu.dot_dimension_numbers<[1], [0], [0], [1], [0, 0, 1, 1], [], []>} : vector<512x128xf32>, vector<128x64xf32>, vector<512x64xf32> -> vector<512x64xf32>
    %c3_47 = arith.constant 3 : index
    %c0_48 = arith.constant 0 : index
    %c0_49 = arith.constant 0 : index
    %74 = vector.load %arg4[%c3_47, %c0_48, %c0_49] : memref<4x1x64xf32, #tpu.memory_space<vmem>>, vector<1x1x64xf32>
    %75 = vector.shape_cast %74 : vector<1x1x64xf32> to vector<1x64xf32>
    %76 = vector.broadcast %75 : vector<1x64xf32> to vector<512x64xf32>
    %77 = arith.addf %73, %76 : vector<512x64xf32>
    %78 = math.tanh %77 : vector<512x64xf32>
    %c3_50 = arith.constant 3 : index
    %c0_51 = arith.constant 0 : index
    %c0_52 = arith.constant 0 : index
    %79 = vector.load %arg3[%c3_50, %c0_51, %c0_52] : memref<4x64x256xf32, #tpu.memory_space<vmem>>, vector<1x64x256xf32>
    %80 = vector.shape_cast %79 : vector<1x64x256xf32> to vector<64x256xf32>
    %cst_53 = arith.constant dense<0.000000e+00> : vector<512x256xf32>
    %81 = tpu.matmul %78, %80, %cst_53 {dimension_numbers = #tpu.dot_dimension_numbers<[1], [0], [0], [1], [0, 0, 1, 1], [], []>} : vector<512x64xf32>, vector<64x256xf32>, vector<512x256xf32> -> vector<512x256xf32>
    %c3_54 = arith.constant 3 : index
    %c0_55 = arith.constant 0 : index
    %c0_56 = arith.constant 0 : index
    %82 = vector.load %arg5[%c3_54, %c0_55, %c0_56] : memref<4x1x256xf32, #tpu.memory_space<vmem>>, vector<1x1x256xf32>
    %83 = vector.shape_cast %82 : vector<1x1x256xf32> to vector<1x256xf32>
    %84 = vector.broadcast %83 : vector<1x256xf32> to vector<512x256xf32>
    %85 = arith.addf %81, %84 : vector<512x256xf32>
    %86 = vector.extract_strided_slice %85 {offsets = [0, 0], sizes = [512, 128], strides = [1, 1]} : vector<512x256xf32> to vector<512x128xf32>
    %87 = vector.extract_strided_slice %85 {offsets = [0, 128], sizes = [512, 128], strides = [1, 1]} : vector<512x256xf32> to vector<512x128xf32>
    %88 = math.exp %86 : vector<512x128xf32>
    %89 = arith.mulf %67, %88 : vector<512x128xf32>
    %90 = arith.addf %89, %87 : vector<512x128xf32>
    %cst_57 = arith.constant dense<0.000000e+00> : vector<512xf32>
    %91 = vector.multi_reduction <add>, %86, %cst_57 [1] : vector<512x128xf32> to vector<512xf32>
    %92 = vector.shape_cast %91 : vector<512xf32> to vector<512x1xf32>
    %93 = arith.addf %70, %92 : vector<512x1xf32>
    %94 = arith.mulf %90, %90 : vector<512x128xf32>
    %cst_58 = arith.constant dense<0.000000e+00> : vector<512xf32>
    %95 = vector.multi_reduction <add>, %94, %cst_58 [1] : vector<512x128xf32> to vector<512xf32>
    %96 = vector.shape_cast %95 : vector<512xf32> to vector<512x1xf32>
    %cst_59 = arith.constant -5.000000e-01 : f32
    %97 = vector.broadcast %cst_59 : f32 to vector<512x1xf32>
    %98 = arith.mulf %97, %96 : vector<512x1xf32>
    %cst_60 = arith.constant 14.7030163 : f32
    %99 = vector.broadcast %cst_60 : f32 to vector<512x1xf32>
    %100 = arith.subf %98, %99 : vector<512x1xf32>
    %101 = tpu.iota {dimensions = array<i32: 1>} : vector<512x128xi32>
    %c16_i32 = arith.constant 16 : i32
    %102 = vector.broadcast %c16_i32 : i32 to vector<512x128xi32>
    %103 = arith.cmpi eq, %101, %102 : vector<512x128xi32>
    %c17_i32 = arith.constant 17 : i32
    %104 = vector.broadcast %c17_i32 : i32 to vector<512x128xi32>
    %105 = arith.cmpi eq, %101, %104 : vector<512x128xi32>
    %106 = vector.shape_cast %93 : vector<512x1xf32> to vector<512x1xf32>
    %107 = vector.broadcast %106 : vector<512x1xf32> to vector<512x128xf32>
    %108 = arith.select %105, %107, %90 : vector<512x128xi1>, vector<512x128xf32>
    %109 = vector.shape_cast %100 : vector<512x1xf32> to vector<512x1xf32>
    %110 = vector.broadcast %109 : vector<512x1xf32> to vector<512x128xf32>
    %111 = arith.select %103, %110, %108 : vector<512x128xi1>, vector<512x128xf32>
    %c0_61 = arith.constant 0 : index
    %c0_62 = arith.constant 0 : index
    %112 = vector.load %arg6[%c0_61, %c0_62] : memref<512x128xf32, #tpu.memory_space<vmem>>, vector<512x128xf32>
    tpu.vector_store %arg6[%c0_61, %c0_62], %111 {strides = array<i32>} : memref<512x128xf32, #tpu.memory_space<vmem>>, vector<512x128xf32>,
    return
  }
  func.func @transform_0(%arg0: i32) -> (i32, i32) {
    %c0_i32 = arith.constant 0 : i32
    %c0_i32_0 = arith.constant 0 : i32
    return %arg0, %c0_i32 : i32, i32
  }
  func.func @transform_1(%arg0: i32) -> (i32, i32, i32) {
    %c0_i32 = arith.constant 0 : i32
    %c0_i32_0 = arith.constant 0 : i32
    %c0_i32_1 = arith.constant 0 : i32
    %c0_i32_2 = arith.constant 0 : i32
    return %c0_i32, %c0_i32_0, %c0_i32_1 : i32, i32, i32
  }
  func.func @transform_2(%arg0: i32) -> (i32, i32, i32) {
    %c0_i32 = arith.constant 0 : i32
    %c0_i32_0 = arith.constant 0 : i32
    %c0_i32_1 = arith.constant 0 : i32
    %c0_i32_2 = arith.constant 0 : i32
    return %c0_i32, %c0_i32_0, %c0_i32_1 : i32, i32, i32
  }
  func.func @transform_3(%arg0: i32) -> (i32, i32, i32) {
    %c0_i32 = arith.constant 0 : i32
    %c0_i32_0 = arith.constant 0 : i32
    %c0_i32_1 = arith.constant 0 : i32
    %c0_i32_2 = arith.constant 0 : i32
    return %c0_i32, %c0_i32_0, %c0_i32_1 : i32, i32, i32
  }
  func.func @transform_4(%arg0: i32) -> (i32, i32, i32) {
    %c0_i32 = arith.constant 0 : i32
    %c0_i32_0 = arith.constant 0 : i32
    %c0_i32_1 = arith.constant 0 : i32
    %c0_i32_2 = arith.constant 0 : i32
    return %c0_i32, %c0_i32_0, %c0_i32_1 : i32, i32, i32
  }
  func.func @transform_5(%arg0: i32) -> (i32, i32) {
    %c0_i32 = arith.constant 0 : i32
    %c0_i32_0 = arith.constant 0 : i32
    return %arg0, %c0_i32 : i32, i32
  }
}

</mosaic_0001>

<bundles_post_ra>
// kernel: tpu_custom_call.1
= control target key start
LH: loop header
LB: loop body
LE: loop exit
PB: predicated region body
PF: predicated region fallthrough
CT: control target
= control target key end

     0   :  { %10 = vsyncpa [#allocation3], 0  ;;  %s13850_s0 = inlined_call_operand.vmem [shape: f32[512,128], index: 0, kind: input, shape index: {}]   ;;  %s13851_s1 = inlined_call_operand.vmem [shape: f32[4,128,64], index: 1, kind: input, shape index: {}]   ;;  %s13852_s2 = inlined_call_operand.hbm [shape: f32[4,64,256], index: 2, kind: input, shape index: {}]   ;;  %s13853_s3 = inlined_call_operand.vmem [shape: f32[4,1,64], index: 3, kind: input, shape index: {}]   ;;  %s13854_s4 = inlined_call_operand.vmem [shape: f32[4,1,256], index: 4, kind: input, shape index: {}]   ;;  %s13855_s5 = inlined_call_operand.hbm [shape: f32[512,128], index: 5, kind: output, shape index: {}]  }
   0x1   :  { %11 = vsyncpa [#allocation4], 0  ;;  %s9369_s18 = smov [#allocation2]  }
   0x2   :  { %s21_s19 = sshll.u32 %s9369_s18, 4  ;;  %s22_s19 = int_to_ptr.vmem [resolvable:$true] %s21_s19 }
   0x3   :  { %s9333_s20 = scalar_lea.vmem %s22_s19, 8192  ;;  %p9338_p1 = scmp.lt.s32.totalorder %s22_s19, %s22_s19 }
   0x4   :  { %p9334_p0 = scmp.ne.s32.totalorder %s22_s19, %s9333_s20  ;;  %p9339_p2 = scmp.lt.s32.totalorder %s9333_s20, %s9333_s20 }
   0x6   :  { %p9340_p3 = por %p9339_p2, %p9338_p1 }
   0x8   :  { %p9341_p4 = pnand %p9340_p3, %p9334_p0 }
   0xa   :  { %9344 = shalt.err (!%p9341_p4)
}
   0xb   :  { %s9370_s21 = smov 256   ;;  %s9371_s22 = smov 16  }
   0xc   :  { %27 = dma.hbm_to_vmem [thread:$0]  %s13852_s2, 8192, %s22_s19, [#allocation3], %s9370_s21, %s9370_s21, %s9371_s22  }
   0xd   :  { %9365 = dma.done.wait [#allocation3], 8192  }
   0xe   :  { %9366 = vsyncadd [#allocation3], 4294959104  ;;  %v114_v0 = vld [vmem:[%s13851_s1 + $0x78] sm:$0xff]  ;;  %v113_v1 = vld [vmem:[%s13851_s1 + $0x70] sm:$0xff]  ;;  %vm599_vm0 = vcmask 523264  }
   0xf   :  { %7699 = vmatprep.subr.mxu0 %v114_v0  ;;  %v112_v2 = vld [vmem:[%s13851_s1 + $0x68] sm:$0xff]  ;;  %v111_v3 = vld [vmem:[%s13851_s1 + $0x60] sm:$0xff]  ;;  %v110_v5 = vld [vmem:[%s13851_s1 + $0x58] sm:$0xff] }
  0x10   :  { %7700 = vmatpush3.msra.mxu0 %v114_v0  ;;  %v35_v4 = vld [vmem:[%s13850_s0] sm:$0xff]  ;;  %v109_v6 = vld [vmem:[%s13851_s1 + $0x50] sm:$0xff]  ;;  %v108_v7 = vld [vmem:[%s13851_s1 + $0x48] sm:$0xff] }
  0x11   :  { %7701 = vmatprep.subr.mxu0 %v113_v1  ;;  %7731 = vmatprep.mubr.f32.mxu0 %v35_v4  ;;  %v107_v8 = vld [vmem:[%s13851_s1 + $0x40] sm:$0xff]  ;;  %v106_v9 = vld [vmem:[%s13851_s1 + $0x38] sm:$0xff]  ;;  %v105_v10 = vld [vmem:[%s13851_s1 + $0x30] sm:$0xff] }
  0x12   :  { %7702 = vmatpush3.msra.mxu0 %v113_v1  ;;  %v586_v11 = vld [vmem:[#allocation2 + $0x78] sm:$0xff]  ;;  %v104_v12 = vld [vmem:[%s13851_s1 + $0x28] sm:$0xff]  ;;  %v585_v13 = vld [vmem:[#allocation2 + $0x70] sm:$0xff] }
  0x13   :  { %7703 = vmatprep.subr.mxu0 %v112_v2  ;;  %8211 = vmatprep.subr.mxu1 %v586_v11  ;;  %v584_v14 = vld [vmem:[#allocation2 + $0x68] sm:$0xff]  ;;  %v103_v15 = vld [vmem:[%s13851_s1 + $0x20] sm:$0xff]  ;;  %v582_v17 = vld [vmem:[#allocation2 + $0x58] sm:$0xff] }
  0x14   :  { %7704 = vmatpush3.msra.mxu0 %v112_v2  ;;  %8219 = vmatpush1.msra.mxu1 %v585_v13  ;;  %v583_v16 = vld [vmem:[#allocation2 + $0x60] sm:$0xff]  ;;  %v102_v18 = vld [vmem:[%s13851_s1 + $0x18] sm:$0xff]  ;;  %v581_v19 = vld [vmem:[#allocation2 + $0x50] sm:$0xff] }
  0x15   :  { %7705 = vmatprep.subr.mxu0 %v111_v3  ;;  %8212 = vmatprep.subr.mxu1 %v584_v14  ;;  %v580_v20 = vld [vmem:[#allocation2 + $0x48] sm:$0xff]  ;;  %v101_v21 = vld [vmem:[%s13851_s1 + $0x10] sm:$0xff]  ;;  %v579_v22 = vld [vmem:[#allocation2 + $0x40] sm:$0xff] }
  0x16   :  { %7706 = vmatpush3.msra.mxu0 %v111_v3  ;;  %8220 = vmatpush1.msra.mxu1 %v583_v16  ;;  %v578_v23 = vld [vmem:[#allocation2 + $0x38] sm:$0xff]  ;;  %v100_v24 = vld [vmem:[%s13851_s1 + $0x8] sm:$0xff]  ;;  %v577_v25 = vld [vmem:[#allocation2 + $0x30] sm:$0xff] }
  0x17   :  { %7707 = vmatprep.subr.mxu0 %v110_v5  ;;  %8213 = vmatprep.subr.mxu1 %v582_v17  ;;  %v576_v26 = vld [vmem:[#allocation2 + $0x28] sm:$0xff]  ;;  %v99_v27 = vld [vmem:[%s13851_s1] sm:$0xff]  ;;  %v574_v29 = vld [vmem:[#allocation2 + $0x18] sm:$0xff] }
  0x18   :  { %7708 = vmatpush3.msra.mxu0 %v110_v5  ;;  %8221 = vmatpush1.msra.mxu1 %v581_v19  ;;  %v575_v28 = vld [vmem:[#allocation2 + $0x20] sm:$0xff]  ;;  %v36_v30 = vld [vmem:[%s13850_s0 + $0x8] sm:$0xff]  ;;  %v573_v31 = vld [vmem:[#allocation2 + $0x10] sm:$0xff] }
  0x19   :  { %7709 = vmatprep.subr.mxu0 %v109_v6  ;;  %8214 = vmatprep.subr.mxu1 %v580_v20  ;;  %v37_v32 = vld [vmem:[%s13850_s0 + $0x10] sm:$0xff]  ;;  %v38_v33 = vld [vmem:[%s13850_s0 + $0x18] sm:$0xff]  ;;  %v39_v34 = vld [vmem:[%s13850_s0 + $0x20] sm:$0xff] }
  0x1a   :  { %7710 = vmatpush3.msra.mxu0 %v109_v6  ;;  %8222 = vmatpush1.msra.mxu1 %v579_v22  ;;  %v40_v35 = vld [vmem:[%s13850_s0 + $0x28] sm:$0xff]  ;;  %v41_v36 = vld [vmem:[%s13850_s0 + $0x30] sm:$0xff]  ;;  %v42_v37 = vld [vmem:[%s13850_s0 + $0x38] sm:$0xff] }
  0x1b   :  { %7711 = vmatprep.subr.mxu0 %v108_v7  ;;  %8215 = vmatprep.subr.mxu1 %v578_v23  ;;  %v43_v38 = vld [vmem:[%s13850_s0 + $0x40] sm:$0xff]  ;;  %v44_v39 = vld [vmem:[%s13850_s0 + $0x48] sm:$0xff]  ;;  %v45_v40 = vld [vmem:[%s13850_s0 + $0x50] sm:$0xff] }
  0x1c   :  { %7712 = vmatpush3.msra.mxu0 %v108_v7  ;;  %8223 = vmatpush1.msra.mxu1 %v577_v25  ;;  %v46_v41 = vld [vmem:[%s13850_s0 + $0x58] sm:$0xff]  ;;  %v47_v42 = vld [vmem:[%s13850_s0 + $0x60] sm:$0xff]  ;;  %v48_v43 = vld [vmem:[%s13850_s0 + $0x68] sm:$0xff] }
  0x1d   :  { %7713 = vmatprep.subr.mxu0 %v107_v8  ;;  %8216 = vmatprep.subr.mxu1 %v576_v26  ;;  %v49_v44 = vld [vmem:[%s13850_s0 + $0x70] sm:$0xff]  ;;  %v50_v45 = vld [vmem:[%s13850_s0 + $0x78] sm:$0xff]  ;;  %v51_v46 = vld [vmem:[%s13850_s0 + $0x80] sm:$0xff] }
  0x1e   :  { %7714 = vmatpush3.msra.mxu0 %v107_v8  ;;  %8224 = vmatpush1.msra.mxu1 %v575_v28  ;;  %v52_v47 = vld [vmem:[%s13850_s0 + $0x88] sm:$0xff]  ;;  %v53_v48 = vld [vmem:[%s13850_s0 + $0x90] sm:$0xff]  ;;  %v54_v49 = vld [vmem:[%s13850_s0 + $0x98] sm:$0xff] }
  0x1f   :  { %7715 = vmatprep.subr.mxu0 %v106_v9  ;;  %8217 = vmatprep.subr.mxu1 %v574_v29  ;;  %v55_v50 = vld [vmem:[%s13850_s0 + $0xa0] sm:$0xff]  ;;  %v56_v51 = vld [vmem:[%s13850_s0 + $0xa8] sm:$0xff]  ;;  %v57_v52 = vld [vmem:[%s13850_s0 + $0xb0] sm:$0xff] }
  0x20   :  { %7716 = vmatpush3.msra.mxu0 %v106_v9  ;;  %8225 = vmatpush1.msra.mxu1 %v573_v31  ;;  %v58_v53 = vld [vmem:[%s13850_s0 + $0xb8] sm:$0xff]  ;;  %v59_v54 = vld [vmem:[%s13850_s0 + $0xc0] sm:$0xff]  ;;  %v60_v55 = vld [vmem:[%s13850_s0 + $0xc8] sm:$0xff] }
  0x21   :  { %7717 = vmatprep.subr.mxu0 %v105_v10  ;;  %v61_v56 = vld [vmem:[%s13850_s0 + $0xd0] sm:$0xff]  ;;  %v62_v57 = vld [vmem:[%s13850_s0 + $0xd8] sm:$0xff]  ;;  %v63_v58 = vld [vmem:[%s13850_s0 + $0xe0] sm:$0xff] }
  0x22   :  { %7718 = vmatpush3.msra.mxu0 %v105_v10  ;;  %v64_v59 = vld [vmem:[%s13850_s0 + $0xe8] sm:$0xff]  ;;  %v65_v60 = vld [vmem:[%s13850_s0 + $0xf0] sm:$0xff]  ;;  %v66_v61 = vld [vmem:[%s13850_s0 + $0xf8] sm:$0xff] }
  0x23   :  { %7719 = vmatprep.subr.mxu0 %v104_v12  ;;  %v67_v62 = vld [vmem:[%s13850_s0 + $0x100] sm:$0xff]  ;;  %v68_v63 = vld [vmem:[%s13850_s0 + $0x108] sm:$0xff]  ;;  %v69_v0 = vld [vmem:[%s13850_s0 + $0x110] sm:$0xff] }
  0x24   :  { %7720 = vmatpush3.msra.mxu0 %v104_v12  ;;  %v70_v1 = vld [vmem:[%s13850_s0 + $0x118] sm:$0xff]  ;;  %v71_v2 = vld [vmem:[%s13850_s0 + $0x120] sm:$0xff]  ;;  %v72_v3 = vld [vmem:[%s13850_s0 + $0x128] sm:$0xff] }
  0x25   :  { %7721 = vmatprep.subr.mxu0 %v103_v15  ;;  %v572_v4 = vld [vmem:[#allocation2 + $0x8] sm:$0xff]  ;;  %v571_v5 = vld [vmem:[#allocation2] sm:$0xff]  ;;  %v73_v6 = vld [vmem:[%s13850_s0 + $0x130] sm:$0xff] }
  0x26   :  { %7722 = vmatpush3.msra.mxu0 %v103_v15  ;;  %8218 = vmatprep.subr.mxu1 %v572_v4  ;;  %v74_v7 = vld [vmem:[%s13850_s0 + $0x138] sm:$0xff]  ;;  %v75_v8 = vld [vmem:[%s13850_s0 + $0x140] sm:$0xff]  ;;  %v76_v9 = vld [vmem:[%s13850_s0 + $0x148] sm:$0xff] }
  0x27   :  { %7723 = vmatprep.subr.mxu0 %v102_v18  ;;  %8226 = vmatpush1.msra.mxu1 %v571_v5  ;;  %v77_v10 = vld [vmem:[%s13850_s0 + $0x150] sm:$0xff]  ;;  %v79_v12 = vld [vmem:[%s13850_s0 + $0x160] sm:$0xff] }
  0x28   :  { %7724 = vmatpush3.msra.mxu0 %v102_v18  ;;  %v81_v15 = vld [vmem:[%s13850_s0 + $0x170] sm:$0xff]  ;;  %v84_v18 = vld [vmem:[%s13850_s0 + $0x188] sm:$0xff] }
  0x29   :  { %7725 = vmatprep.subr.mxu0 %v101_v21 }
  0x2a   :  { %7726 = vmatpush3.msra.mxu0 %v101_v21  ;;  %v87_v21 = vld [vmem:[%s13850_s0 + $0x1a0] sm:$0xff] }
  0x2b   :  { %7727 = vmatprep.subr.mxu0 %v100_v24 }
  0x2c   :  { %7728 = vmatpush3.msra.mxu0 %v100_v24  ;;  %v90_v24 = vld [vmem:[%s13850_s0 + $0x1b8] sm:$0xff] }
  0x2d   :  { %7729 = vmatprep.subr.mxu0 %v99_v27 }
  0x2e   :  { %7730 = vmatpush3.msra.mxu0 %v99_v27  ;;  %v93_v27 = vld [vmem:[%s13850_s0 + $0x1d0] sm:$0xff] }
  0x2f   :  { %7732 = vmatmul.mubr.f32.vlgmr.msra.gmra.mxu0 %v36_v30  ;;  %808 = vmatprep.subr.mxu0 %v586_v11  ;;  %v78_v11 = vld [vmem:[%s13850_s0 + $0x158] sm:$0xff]  ;;  %v96_v30 = vld [vmem:[%s13850_s0 + $0x1e8] sm:$0xff] }
  0x30   :  { %7734 = vmatprep.mubr.f32.mxu0 %v37_v32  ;;  %809 = vmatpush1.msra.mxu0 %v585_v13  ;;  %v13857_v13 = vmov 0.0   ;;  %v98_v32 = vld [vmem:[%s13850_s0 + $0x1f8] sm:$0xff] }
  0x31   :  { %810 = vmatprep.subr.mxu0 %v584_v14  ;;  %1036 = vmatprep.mubr.f32.mxu1 %v13857_v13  ;;  %v80_v14 = vld [vmem:[%s13850_s0 + $0x168] sm:$0xff] }
  0x32   :  { %811 = vmatpush1.msra.mxu0 %v583_v16  ;;  %v82_v16 = vld [vmem:[%s13850_s0 + $0x178] sm:$0xff] }
  0x33   :  { %7735 = vmatmul.mubr.f32.gmra.mxu0 %v38_v33  ;;  %812 = vmatprep.subr.mxu0 %v582_v17  ;;  %v83_v17 = vld [vmem:[%s13850_s0 + $0x180] sm:$0xff]  ;;  %v7081_v33 = vld [vmem:[%s13851_s1 + $0xf8] sm:$0xff] }
  0x34   :  { %7737 = vmatprep.mubr.f32.mxu0 %v39_v34  ;;  %813 = vmatpush1.msra.mxu0 %v581_v19  ;;  %v85_v19 = vld [vmem:[%s13850_s0 + $0x190] sm:$0xff] }
  0x35   :  { %814 = vmatprep.subr.mxu0 %v580_v20  ;;  %v86_v20 = vld [vmem:[%s13850_s0 + $0x198] sm:$0xff] }
  0x36   :  { %815 = vmatpush1.msra.mxu0 %v579_v22  ;;  %v88_v22 = vld [vmem:[%s13850_s0 + $0x1a8] sm:$0xff] }
  0x37   :  { %7738 = vmatmul.mubr.f32.gmra.mxu0 %v40_v35  ;;  %816 = vmatprep.subr.mxu0 %v578_v23  ;;  %v89_v23 = vld [vmem:[%s13850_s0 + $0x1b0] sm:$0xff]  ;;  %v9657_v35 = vld [vmem:[%s13853_s3] ss:$0 sm:$0xff] }
  0x38   :  { %7740 = vmatprep.mubr.f32.mxu0 %v41_v36  ;;  %817 = vmatpush1.msra.mxu0 %v577_v25  ;;  %v91_v25 = vld [vmem:[%s13850_s0 + $0x1c0] sm:$0xff] }
  0x39   :  { %818 = vmatprep.subr.mxu0 %v576_v26  ;;  %v92_v26 = vld [vmem:[%s13850_s0 + $0x1c8] sm:$0xff] }
  0x3a   :  { %819 = vmatpush1.msra.mxu0 %v575_v28  ;;  %v94_v28 = vld [vmem:[%s13850_s0 + $0x1d8] sm:$0xff] }
  0x3b   :  { %7741 = vmatmul.mubr.f32.gmra.mxu0 %v42_v37  ;;  %820 = vmatprep.subr.mxu0 %v574_v29  ;;  %v95_v29 = vld [vmem:[%s13850_s0 + $0x1e0] sm:$0xff] }
  0x3c   :  { %7743 = vmatprep.mubr.f32.mxu0 %v43_v38  ;;  %821 = vmatpush1.msra.mxu0 %v573_v31  ;;  %v97_v31 = vld [vmem:[%s13850_s0 + $0x1f0] sm:$0xff] }
  0x3d   :  { %822 = vmatprep.subr.mxu0 %v572_v4 }
  0x3e   :  { %823 = vmatpush1.msra.mxu0 %v571_v5  ;;  %v7075_v5 = vld [vmem:[%s13851_s1 + $0xc8] sm:$0xff] }
  0x3f   :  { %7744 = vmatmul.mubr.f32.gmra.mxu0 %v44_v39  ;;  %7827 = vmatprep.subr.mxu0 %v7081_v33 }
  0x40   :  { %7746 = vmatprep.mubr.f32.mxu0 %v45_v40 }
  0x43   :  { %7747 = vmatmul.mubr.f32.gmra.mxu0 %v46_v41 }
  0x44   :  { %7749 = vmatprep.mubr.f32.mxu0 %v47_v42 }
  0x47   :  { %7750 = vmatmul.mubr.f32.gmra.mxu0 %v48_v43 }
  0x48   :  { %7752 = vmatprep.mubr.f32.mxu0 %v49_v44 }
  0x4b   :  { %7753 = vmatmul.mubr.f32.gmra.mxu0 %v50_v45 }
  0x4c   :  { %7755 = vmatprep.mubr.f32.mxu0 %v51_v46 }
  0x4f   :  { %7756 = vmatmul.mubr.f32.gmra.mxu0 %v52_v47 }
  0x50   :  { %7758 = vmatprep.mubr.f32.mxu0 %v53_v48 }
  0x53   :  { %7759 = vmatmul.mubr.f32.gmra.mxu0 %v54_v49 }
  0x54   :  { %7761 = vmatprep.mubr.f32.mxu0 %v55_v50 }
  0x57   :  { %7762 = vmatmul.mubr.f32.gmra.mxu0 %v56_v51  ;;  %v7080_v51 = vld [vmem:[%s13851_s1 + $0xf0] sm:$0xff] }
  0x58   :  { %7764 = vmatprep.mubr.f32.mxu0 %v57_v52 }
  0x5b   :  { %7765 = vmatmul.mubr.f32.gmra.mxu0 %v58_v53  ;;  %v7079_v53 = vld [vmem:[%s13851_s1 + $0xe8] sm:$0xff] }
  0x5c   :  { %7767 = vmatprep.mubr.f32.mxu0 %v59_v54 }
  0x5f   :  { %7768 = vmatmul.mubr.f32.gmra.mxu0 %v60_v55 }
  0x60   :  { %7770 = vmatprep.mubr.f32.mxu0 %v61_v56 }
  0x63   :  { %7771 = vmatmul.mubr.f32.gmra.mxu0 %v62_v57  ;;  %v7078_v57 = vld [vmem:[%s13851_s1 + $0xe0] sm:$0xff] }
  0x64   :  { %7773 = vmatprep.mubr.f32.mxu0 %v63_v58 }
  0x67   :  { %7774 = vmatmul.mubr.f32.gmra.mxu0 %v64_v59  ;;  %v7077_v59 = vld [vmem:[%s13851_s1 + $0xd8] sm:$0xff] }
  0x68   :  { %7776 = vmatprep.mubr.f32.mxu0 %v65_v60 }
  0x6b   :  { %7777 = vmatmul.mubr.f32.gmra.mxu0 %v66_v61 }
  0x6c   :  { %7779 = vmatprep.mubr.f32.mxu0 %v67_v62 }
  0x6f   :  { %7780 = vmatmul.mubr.f32.gmra.mxu0 %v68_v63  ;;  %v7076_v63 = vld [vmem:[%s13851_s1 + $0xd0] sm:$0xff] }
  0x70   :  { %7782 = vmatprep.mubr.f32.mxu0 %v69_v0 }
  0x73   :  { %7783 = vmatmul.mubr.f32.gmra.mxu0 %v70_v1 }
  0x74   :  { %7785 = vmatprep.mubr.f32.mxu0 %v71_v2 }
  0x77   :  { %7786 = vmatmul.mubr.f32.gmra.mxu0 %v72_v3 }
  0x78   :  { %7788 = vmatprep.mubr.f32.mxu0 %v73_v6 }
  0x7b   :  { %7789 = vmatmul.mubr.f32.gmra.mxu0 %v74_v7 }
  0x7c   :  { %7791 = vmatprep.mubr.f32.mxu0 %v75_v8 }
  0x7f   :  { %7792 = vmatmul.mubr.f32.gmra.mxu0 %v76_v9 }
  0x80   :  { %7794 = vmatprep.mubr.f32.mxu0 %v77_v10 }
  0x83   :  { %7795 = vmatmul.mubr.f32.gmra.mxu0 %v78_v11 }
  0x84   :  { %7797 = vmatprep.mubr.f32.mxu0 %v79_v12 }
  0x87   :  { %7798 = vmatmul.mubr.f32.gmra.mxu0 %v80_v14 }
  0x88   :  { %7800 = vmatprep.mubr.f32.mxu0 %v81_v15  ;;  %v7074_v15 = vld [vmem:[%s13851_s1 + $0xc0] sm:$0xff] }
  0x8b   :  { %7801 = vmatmul.mubr.f32.gmra.mxu0 %v82_v16 }
  0x8c   :  { %7803 = vmatprep.mubr.f32.mxu0 %v83_v17 }
  0x8f   :  { %7804 = vmatmul.mubr.f32.gmra.mxu0 %v84_v18 }
  0x90   :  { %7806 = vmatprep.mubr.f32.mxu0 %v85_v19 }
  0x93   :  { %7807 = vmatmul.mubr.f32.gmra.mxu0 %v86_v20 }
  0x94   :  { %7809 = vmatprep.mubr.f32.mxu0 %v87_v21 }
  0x97   :  { %7810 = vmatmul.mubr.f32.gmra.mxu0 %v88_v22 }
  0x98   :  { %7812 = vmatprep.mubr.f32.mxu0 %v89_v23  ;;  %v7073_v23 = vld [vmem:[%s13851_s1 + $0xb8] sm:$0xff] }
  0x9b   :  { %7813 = vmatmul.mubr.f32.gmra.mxu0 %v90_v24 }
  0x9c   :  { %7815 = vmatprep.mubr.f32.mxu0 %v91_v25 }
  0x9f   :  { %7816 = vmatmul.mubr.f32.gmra.mxu0 %v92_v26 }
  0xa0   :  { %7818 = vmatprep.mubr.f32.mxu0 %v93_v27 }
  0xa3   :  { %7819 = vmatmul.mubr.f32.gmra.mxu0 %v94_v28 }
  0xa4   :  { %7821 = vmatprep.mubr.f32.mxu0 %v95_v29 }
  0xa7   :  { %7822 = vmatmul.mubr.f32.gmra.mxu0 %v96_v30 }
  0xa8   :  { %7824 = vmatprep.mubr.f32.mxu0 %v97_v31 }
  0xab   :  { %7825 = vmatmul.mubr.f32.gmra.mxu0 %v98_v32  ;;  %v7072_v32 = vld [vmem:[%s13851_s1 + $0xb0] sm:$0xff] }
  0xac   :  { %856 = vmatprep.mubr.f32.mxu0 %v13857_v13 }
  0xef   :  { %v7733_v34 = vpop.f32.mrf.mxu0 }
  0xf0   :  { %v194_v39 = vadd.f32 %v7733_v34, %v9657_v35 }
  0xf1   :  { %v188_v36 = vpop.f32.mrf.mxu0 }
  0xf2   :  { %v189_v37 = vadd.f32 %v9657_v35, %v188_v36 }
  0xf3   :  { %v7736_v38 = vpop.f32.mrf.mxu0 }
  0xf4   :  { %8234 = vtanh.f32 %v189_v37  ;;  %v204_v45 = vadd.f32 %v7736_v38, %v9657_v35 }
  0xf5   :  { %v198_v40 = vpop.f32.mrf.mxu0  ;;  %8236 = vtanh.f32 %v194_v39 }
  0xf6   :  { %v199_v42 = vadd.f32 %v9657_v35, %v198_v40 }
  0xf7   :  { %v7739_v41 = vpop.f32.mrf.mxu0 }
  0xf8   :  { %8238 = vtanh.f32 %v199_v42  ;;  %v214_v54 = vadd.f32 %v7739_v41, %v9657_v35 }
  0xf9   :  { %v208_v43 = vpop.f32.mrf.mxu0  ;;  %8240 = vtanh.f32 %v204_v45 }
  0xfa   :  { %v209_v48 = vadd.f32 %v9657_v35, %v208_v43 }
  0xfb   :  { %v7742_v44 = vpop.f32.mrf.mxu0 }
  0xfc   :  { %8242 = vtanh.f32 %v209_v48  ;;  %v224_v1 = vadd.f32 %v7742_v44, %v9657_v35  ;;  %v7071_v44 = vld [vmem:[%s13851_s1 + $0xa8] sm:$0xff] }
  0xfd   :  { %v218_v46 = vpop.f32.mrf.mxu0  ;;  %8244 = vtanh.f32 %v214_v54  ;;  %v7070_v54 = vld [vmem:[%s13851_s1 + $0xa0] sm:$0xff] }
  0xfe   :  { %v219_v60 = vadd.f32 %v9657_v35, %v218_v46 }
  0xff   :  { %v7745_v47 = vpop.f32.mrf.mxu0 }
 0x100   :  { %8246 = vtanh.f32 %v219_v60  ;;  %v234_v10 = vadd.f32 %v7745_v47, %v9657_v35 }
 0x101   :  { %v8235_v49 = vpop.eup %8234  ;;  %v228_v50 = vpop.f32.mrf.mxu0  ;;  %8248 = vtanh.f32 %v224_v1 }
 0x102   :  { %7002 = vmatmul.mubr.msk.f32.vlgmr.msra.gmra.mxu0 %vm599_vm0, %v8235_v49  ;;  %v8237_v55 = vpop.eup %8236  ;;  %v229_v6 = vadd.f32 %v9657_v35, %v228_v50 }
 0x103   :  { %v9668_v52 = vpop.f32.mrf.mxu0  ;;  %862 = vmatprep.mubr.f32.mxu0 %v13857_v13  ;;  %7828 = vmatpush3.msra.mxu0 %v7081_v33 }
 0x104   :  { %7829 = vmatprep.subr.mxu0 %v7080_v51  ;;  %8250 = vtanh.f32 %v229_v6  ;;  %v244_v20 = vadd.f32 %v9668_v52, %v9657_v35 }
 0x105   :  { %v238_v56 = vpop.f32.mrf.mxu0  ;;  %7830 = vmatpush3.msra.mxu0 %v7080_v51  ;;  %v8239_v61 = vpop.eup %8238  ;;  %8252 = vtanh.f32 %v234_v10 }
 0x106   :  { %7003 = vmatmul.mubr.msk.f32.gmra.mxu0 %vm599_vm0, %v8237_v55  ;;  %7831 = vmatprep.subr.mxu0 %v7079_v53  ;;  %v8241_v2 = vpop.eup %8240  ;;  %v239_v16 = vadd.f32 %v9657_v35, %v238_v56 }
 0x107   :  { %v9679_v58 = vpop.f32.mrf.mxu0  ;;  %868 = vmatprep.mubr.f32.mxu0 %v13857_v13  ;;  %7832 = vmatpush3.msra.mxu0 %v7079_v53 }
 0x108   :  { %7833 = vmatprep.subr.mxu0 %v7078_v57  ;;  %8254 = vtanh.f32 %v239_v16  ;;  %v254_v29 = vadd.f32 %v9679_v58, %v9657_v35 }
 0x109   :  { %v248_v62 = vpop.f32.mrf.mxu0  ;;  %7834 = vmatpush3.msra.mxu0 %v7078_v57  ;;  %v8243_v7 = vpop.eup %8242  ;;  %8256 = vtanh.f32 %v244_v20 }
 0x10a   :  { %7004 = vmatmul.mubr.msk.f32.gmra.mxu0 %vm599_vm0, %v8239_v61  ;;  %7835 = vmatprep.subr.mxu0 %v7077_v59  ;;  %v8245_v11 = vpop.eup %8244  ;;  %v249_v25 = vadd.f32 %v9657_v35, %v248_v62 }
 0x10b   :  { %v9690_v0 = vpop.f32.mrf.mxu0  ;;  %874 = vmatprep.mubr.f32.mxu0 %v13857_v13  ;;  %7836 = vmatpush3.msra.mxu0 %v7077_v59 }
 0x10c   :  { %7837 = vmatprep.subr.mxu0 %v7076_v63  ;;  %8258 = vtanh.f32 %v249_v25  ;;  %v264_v38 = vadd.f32 %v9690_v0, %v9657_v35  ;;  %v7069_v0 = vld [vmem:[%s13851_s1 + $0x98] sm:$0xff] }
 0x10d   :  { %v258_v3 = vpop.f32.mrf.mxu0  ;;  %7838 = vmatpush3.msra.mxu0 %v7076_v63  ;;  %v8247_v17 = vpop.eup %8246  ;;  %8260 = vtanh.f32 %v254_v29 }
 0x10e   :  { %7005 = vmatmul.mubr.msk.f32.gmra.mxu0 %vm599_vm0, %v8241_v2  ;;  %7839 = vmatprep.subr.mxu0 %v7075_v5  ;;  %v8249_v21 = vpop.eup %8248  ;;  %v259_v34 = vadd.f32 %v9657_v35, %v258_v3 }
 0x10f   :  { %v9695_v4 = vpop.f32.mrf.mxu0  ;;  %880 = vmatprep.mubr.f32.mxu0 %v13857_v13  ;;  %7840 = vmatpush3.msra.mxu0 %v7075_v5 }
 0x110   :  { %7841 = vmatprep.subr.mxu0 %v7074_v15  ;;  %8262 = vtanh.f32 %v259_v34  ;;  %v274_v51 = vadd.f32 %v9695_v4, %v9657_v35 }
 0x111   :  { %v9702_v8 = vpop.f32.mrf.mxu0  ;;  %7842 = vmatpush3.msra.mxu0 %v7074_v15  ;;  %v8251_v26 = vpop.eup %8250  ;;  %8264 = vtanh.f32 %v264_v38  ;;  %v7068_v38 = vld [vmem:[%s13851_s1 + $0x90] sm:$0xff] }
 0x112   :  { %7006 = vmatmul.mubr.msk.f32.gmra.mxu0 %vm599_vm0, %v8243_v7  ;;  %7843 = vmatprep.subr.mxu0 %v7073_v23  ;;  %v8253_v30 = vpop.eup %8252  ;;  %v269_v46 = vadd.f32 %v9657_v35, %v9702_v8 }
 0x113   :  { %v9705_v9 = vpop.f32.mrf.mxu0  ;;  %886 = vmatprep.mubr.f32.mxu0 %v13857_v13  ;;  %7844 = vmatpush3.msra.mxu0 %v7073_v23 }
 0x114   :  { %7845 = vmatprep.subr.mxu0 %v7072_v32  ;;  %v284_v61 = vadd.f32 %v9705_v9, %v9657_v35 }
 0x115   :  { %v9709_v12 = vpop.f32.mrf.mxu0  ;;  %7846 = vmatpush3.msra.mxu0 %v7072_v32  ;;  %v8255_v36 = vpop.eup %8254 }
 0x116   :  { %7007 = vmatmul.mubr.msk.f32.gmra.mxu0 %vm599_vm0, %v8245_v11  ;;  %v8257_v40 = vpop.eup %8256  ;;  %7847 = vmatprep.subr.mxu0 %v7071_v44  ;;  %v279_v56 = vadd.f32 %v9657_v35, %v9709_v12 }
 0x117   :  { %v9712_v14 = vpop.f32.mrf.mxu0  ;;  %892 = vmatprep.mubr.f32.mxu0 %v13857_v13  ;;  %7848 = vmatpush3.msra.mxu0 %v7071_v44 }
 0x118   :  { %7849 = vmatprep.subr.mxu0 %v7070_v54  ;;  %v294_v8 = vadd.f32 %v9712_v14, %v9657_v35 }
 0x119   :  { %v9719_v18 = vpop.f32.mrf.mxu0  ;;  %v8259_v47 = vpop.eup %8258  ;;  %7850 = vmatpush3.msra.mxu0 %v7070_v54 }
 0x11a   :  { %7008 = vmatmul.mubr.msk.f32.gmra.mxu0 %vm599_vm0, %v8247_v17  ;;  %v8261_v52 = vpop.eup %8260  ;;  %v289_v3 = vadd.f32 %v9657_v35, %v9719_v18  ;;  %7851 = vmatprep.subr.mxu0 %v7069_v0 }
 0x11b   :  { %v9722_v19 = vpop.f32.mrf.mxu0  ;;  %898 = vmatprep.mubr.f32.mxu0 %v13857_v13  ;;  %7852 = vmatpush3.msra.mxu0 %v7069_v0 }
 0x11c   :  { %v304_v20 = vadd.f32 %v9722_v19, %v9657_v35  ;;  %7853 = vmatprep.subr.mxu0 %v7068_v38 }
 0x11d   :  { %v9727_v22 = vpop.f32.mrf.mxu0  ;;  %v8263_v57 = vpop.eup %8262  ;;  %7854 = vmatpush3.msra.mxu0 %v7068_v38 }
 0x11e   :  { %7009 = vmatmul.mubr.msk.f32.gmra.mxu0 %vm599_vm0, %v8249_v21  ;;  %v8265_v60 = vpop.eup %8264  ;;  %v299_v15 = vadd.f32 %v9657_v35, %v9727_v22 }
 0x11f   :  { %v9733_v24 = vpop.f32.mrf.mxu0  ;;  %904 = vmatprep.mubr.f32.mxu0 %v13857_v13 }
 0x120   :  { %v314_v34 = vadd.f32 %v9733_v24, %v9657_v35 }
 0x121   :  { %v9737_v27 = vpop.f32.mrf.mxu0 }
 0x122   :  { %7010 = vmatmul.mubr.msk.f32.gmra.mxu0 %vm599_vm0, %v8251_v26  ;;  %v309_v26 = vadd.f32 %v9657_v35, %v9737_v27 }
 0x123   :  { %v9740_v28 = vpop.f32.mrf.mxu0  ;;  %910 = vmatprep.mubr.f32.mxu0 %v13857_v13 }
 0x125   :  { %v9745_v31 = vpop.f32.mrf.mxu0 }
 0x126   :  { %7011 = vmatmul.mubr.msk.f32.gmra.mxu0 %vm599_vm0, %v8253_v30  ;;  %v319_v24 = vadd.f32 %v9657_v35, %v9745_v31 }
 0x127   :  { %v9751_v33 = vpop.f32.mrf.mxu0  ;;  %916 = vmatprep.mubr.f32.mxu0 %v13857_v13 }
 0x129   :  { %v9755_v37 = vpop.f32.mrf.mxu0 }
 0x12a   :  { %7012 = vmatmul.mubr.msk.f32.gmra.mxu0 %vm599_vm0, %v8255_v36 }
 0x12b   :  { %v7778_v39 = vpop.f32.mrf.mxu0  ;;  %922 = vmatprep.mubr.f32.mxu0 %v13857_v13 }
 0x12c   :  { %v344_v42 = vadd.f32 %v7778_v39, %v9657_v35 }
 0x12d   :  { %v338_v41 = vpop.f32.mrf.mxu0 }
 0x12e   :  { %v339_v43 = vadd.f32 %v9657_v35, %v338_v41  ;;  %7013 = vmatmul.mubr.msk.f32.gmra.mxu0 %vm599_vm0, %v8257_v40 }
 0x12f   :  { %928 = vmatprep.mubr.f32.mxu0 %v13857_v13  ;;  %v7781_v45 = vpop.f32.mrf.mxu0 }
 0x130   :  { %8266 = vtanh.f32 %v339_v43  ;;  %v354_v53 = vadd.f32 %v7781_v45, %v9657_v35  ;;  %v324_v45 = vadd.f32 %v9740_v28, %v9657_v35 }
 0x131   :  { %v348_v48 = vpop.f32.mrf.mxu0  ;;  %8268 = vtanh.f32 %v344_v42  ;;  %v7067_v42 = vld [vmem:[%s13851_s1 + $0x88] sm:$0xff] }
 0x132   :  { %7014 = vmatmul.mubr.msk.f32.gmra.mxu0 %vm599_vm0, %v8259_v47  ;;  %v349_v49 = vadd.f32 %v9657_v35, %v348_v48  ;;  %8270 = vtanh.f32 %v269_v46  ;;  %7855 = vmatprep.subr.mxu0 %v7067_v42  ;;  %v7066_v47 = vld [vmem:[%s13851_s1 + $0x80] sm:$0xff] }
 0x133   :  { %934 = vmatprep.mubr.f32.mxu0 %v13857_v13  ;;  %v7784_v50 = vpop.f32.mrf.mxu0  ;;  %7856 = vmatpush3.msra.mxu0 %v7067_v42 }
 0x134   :  { %8272 = vtanh.f32 %v349_v49  ;;  %v364_v63 = vadd.f32 %v7784_v50, %v9657_v35  ;;  %v329_v50 = vadd.f32 %v9657_v35, %v9755_v37  ;;  %7857 = vmatprep.subr.mxu0 %v7066_v47 }
 0x135   :  { %v358_v55 = vpop.f32.mrf.mxu0  ;;  %8274 = vtanh.f32 %v274_v51  ;;  %7858 = vmatpush3.msra.mxu0 %v7066_v47 }
 0x136   :  { %7015 = vmatmul.mubr.msk.f32.gmra.mxu0 %vm599_vm0, %v8261_v52  ;;  %8276 = vtanh.f32 %v354_v53  ;;  %v359_v58 = vadd.f32 %v9657_v35, %v358_v55  ;;  %v334_v55 = vadd.f32 %v9751_v33, %v9657_v35 }
 0x137   :  { %940 = vmatprep.mubr.f32.mxu0 %v13857_v13  ;;  %v7787_v59 = vpop.f32.mrf.mxu0  ;;  %8278 = vtanh.f32 %v279_v56 }
 0x138   :  { %8280 = vtanh.f32 %v359_v58  ;;  %v374_v10 = vadd.f32 %v7787_v59, %v9657_v35 }
 0x139   :  { %v368_v2 = vpop.f32.mrf.mxu0  ;;  %8282 = vtanh.f32 %v284_v61 }
 0x13a   :  { %7016 = vmatmul.mubr.msk.f32.gmra.mxu0 %vm599_vm0, %v8263_v57  ;;  %8284 = vtanh.f32 %v364_v63  ;;  %v369_v5 = vadd.f32 %v9657_v35, %v368_v2 }
 0x13b   :  { %946 = vmatprep.mubr.f32.mxu0 %v13857_v13  ;;  %v7790_v7 = vpop.f32.mrf.mxu0  ;;  %8286 = vtanh.f32 %v289_v3 }
 0x13c   :  { %8288 = vtanh.f32 %v369_v5  ;;  %v384_v22 = vadd.f32 %v7790_v7, %v9657_v35 }
 0x13d   :  { %v8267_v62 = vpop.eup %8266  ;;  %v378_v12 = vpop.f32.mrf.mxu0  ;;  %8290 = vtanh.f32 %v294_v8 }
 0x13e   :  { %7017 = vmatmul.mubr.msk.f32.gmra.mxu0 %vm599_vm0, %v8265_v60  ;;  %7032 = vmatmul.mubr.msk.f32.vlgmr.msra.gmra.mxu1 %vm599_vm0, %v8267_v62  ;;  %v8269_v1 = vpop.eup %8268  ;;  %8292 = vtanh.f32 %v374_v10  ;;  %v379_v16 = vadd.f32 %v9657_v35, %v378_v12 }
 0x13f   :  { %952 = vmatprep.mubr.f32.mxu0 %v13857_v13  ;;  %1042 = vmatprep.mubr.f32.mxu1 %v13857_v13  ;;  %v8271_v4 = vpop.eup %8270  ;;  %v7793_v18 = vpop.f32.mrf.mxu0  ;;  %8294 = vtanh.f32 %v299_v15 }
 0x140   :  { %8296 = vtanh.f32 %v379_v16  ;;  %v394_v27 = vadd.f32 %v7793_v18, %v9657_v35 }
 0x141   :  { %v8273_v6 = vpop.eup %8272  ;;  %v388_v25 = vpop.f32.mrf.mxu0  ;;  %8298 = vtanh.f32 %v304_v20 }
 0x142   :  { %7018 = vmatmul.mubr.msk.f32.gmra.mxu0 %vm599_vm0, %v8271_v4  ;;  %7033 = vmatmul.mubr.msk.f32.gmra.mxu1 %vm599_vm0, %v8269_v1  ;;  %v8275_v9 = vpop.eup %8274  ;;  %8300 = vtanh.f32 %v384_v22  ;;  %v389_v29 = vadd.f32 %v9657_v35, %v388_v25 }
 0x143   :  { %958 = vmatprep.mubr.f32.mxu0 %v13857_v13  ;;  %1048 = vmatprep.mubr.f32.mxu1 %v13857_v13  ;;  %v8277_v11 = vpop.eup %8276  ;;  %v7796_v32 = vpop.f32.mrf.mxu0  ;;  %8302 = vtanh.f32 %v309_v26 }
 0x144   :  { %v8279_v14 = vpop.eup %8278  ;;  %8304 = vtanh.f32 %v389_v29  ;;  %v404_v48 = vadd.f32 %v7796_v32, %v9657_v35 }
 0x145   :  { %v8281_v17 = vpop.eup %8280  ;;  %v398_v40 = vpop.f32.mrf.mxu0  ;;  %8306 = vtanh.f32 %v314_v34 }
 0x146   :  { %7019 = vmatmul.mubr.msk.f32.gmra.mxu0 %vm599_vm0, %v8275_v9  ;;  %7034 = vmatmul.mubr.msk.f32.gmra.mxu1 %vm599_vm0, %v8273_v6  ;;  %v8283_v21 = vpop.eup %8282  ;;  %8308 = vtanh.f32 %v394_v27  ;;  %v399_v43 = vadd.f32 %v9657_v35, %v398_v40 }
 0x147   :  { %964 = vmatprep.mubr.f32.mxu0 %v13857_v13  ;;  %1054 = vmatprep.mubr.f32.mxu1 %v13857_v13  ;;  %v8285_v23 = vpop.eup %8284  ;;  %v7799_v31 = vpop.f32.mrf.mxu0  ;;  %8310 = vtanh.f32 %v319_v24 }
 0x148   :  { %v8287_v19 = vpop.eup %8286  ;;  %8312 = vtanh.f32 %v399_v43  ;;  %v414_v56 = vadd.f32 %v7799_v31, %v9657_v35 }
 0x149   :  { %v8289_v30 = vpop.eup %8288  ;;  %v408_v28 = vpop.f32.mrf.mxu0  ;;  %8314 = vtanh.f32 %v324_v45 }
 0x14a   :  { %7020 = vmatmul.mubr.msk.f32.gmra.mxu0 %vm599_vm0, %v8279_v14  ;;  %7035 = vmatmul.mubr.msk.f32.gmra.mxu1 %vm599_vm0, %v8277_v11  ;;  %v8291_v36 = vpop.eup %8290  ;;  %8316 = vtanh.f32 %v404_v48  ;;  %v409_v52 = vadd.f32 %v9657_v35, %v408_v28 }
 0x14b   :  { %970 = vmatprep.mubr.f32.mxu0 %v13857_v13  ;;  %1060 = vmatprep.mubr.f32.mxu1 %v13857_v13  ;;  %v8293_v39 = vpop.eup %8292  ;;  %v7802_v54 = vpop.f32.mrf.mxu0  ;;  %8318 = vtanh.f32 %v329_v50 }
 0x14c   :  { %v8295_v41 = vpop.eup %8294  ;;  %8320 = vtanh.f32 %v409_v52  ;;  %v424_v63 = vadd.f32 %v7802_v54, %v9657_v35 }
 0x14d   :  { %v8297_v44 = vpop.eup %8296  ;;  %v418_v58 = vpop.f32.mrf.mxu0  ;;  %8322 = vtanh.f32 %v334_v55  ;;  %v13856_v55 = vlaneseq }
 0x14e   :  { %7021 = vmatmul.mubr.msk.f32.gmra.mxu0 %vm599_vm0, %v8283_v21  ;;  %7036 = vmatmul.mubr.msk.f32.gmra.mxu1 %vm599_vm0, %v8281_v17  ;;  %v8299_v46 = vpop.eup %8298  ;;  %8324 = vtanh.f32 %v414_v56  ;;  %v419_v33 = vadd.f32 %v9657_v35, %v418_v58  ;;  %v2179_v56 = vld [vmem:[#allocation2 + $0xf8] sm:$0xff] }
 0x14f   :  { %976 = vmatprep.mubr.f32.mxu0 %v13857_v13  ;;  %1066 = vmatprep.mubr.f32.mxu1 %v13857_v13  ;;  %v8301_v49 = vpop.eup %8300  ;;  %v7805_v61 = vpop.f32.mrf.mxu0 }
 0x150   :  { %v8303_v51 = vpop.eup %8302  ;;  %8326 = vtanh.f32 %v419_v33  ;;  %v434_v7 = vadd.f32 %v7805_v61, %v9657_v35  ;;  %2401 = vmatprep.subr.mxu1 %v2179_v56  ;;  %v2178_v33 = vld [vmem:[#allocation2 + $0xf0] sm:$0xff] }
 0x151   :  { %v8305_v53 = vpop.eup %8304  ;;  %v428_v1 = vpop.f32.mrf.mxu0  ;;  %8328 = vtanh.f32 %v424_v63  ;;  %2402 = vmatpush1.msra.mxu1 %v2178_v33 }
 0x152   :  { %7022 = vmatmul.mubr.msk.f32.gmra.mxu0 %vm599_vm0, %v8287_v19  ;;  %7037 = vmatmul.mubr.msk.f32.gmra.mxu1 %vm599_vm0, %v8285_v23  ;;  %v8307_v37 = vpop.eup %8306  ;;  %v429_v3 = vadd.f32 %v9657_v35, %v428_v1 }
 0x153   :  { %982 = vmatprep.mubr.f32.mxu0 %v13857_v13  ;;  %1072 = vmatprep.mubr.f32.mxu1 %v13857_v13  ;;  %v8309_v57 = vpop.eup %8308  ;;  %v7808_v5 = vpop.f32.mrf.mxu0 }
 0x154   :  { %v8311_v59 = vpop.eup %8310  ;;  %8330 = vtanh.f32 %v429_v3  ;;  %v444_v15 = vadd.f32 %v7808_v5, %v9657_v35 }
 0x155   :  { %v8313_v60 = vpop.eup %8312  ;;  %v438_v9 = vpop.f32.mrf.mxu0  ;;  %8332 = vtanh.f32 %v434_v7 }
 0x156   :  { %7023 = vmatmul.mubr.msk.f32.gmra.mxu0 %vm599_vm0, %v8291_v36  ;;  %7038 = vmatmul.mubr.msk.f32.gmra.mxu1 %vm599_vm0, %v8289_v30  ;;  %v8315_v62 = vpop.eup %8314  ;;  %v439_v10 = vadd.f32 %v9657_v35, %v438_v9  ;;  %v2177_v9 = vld [vmem:[#allocation2 + $0xe8] sm:$0xff] }
 0x157   :  { %988 = vmatprep.mubr.f32.mxu0 %v13857_v13  ;;  %1078 = vmatprep.mubr.f32.mxu1 %v13857_v13  ;;  %v8317_v0 = vpop.eup %8316  ;;  %v7811_v12 = vpop.f32.mrf.mxu0 }
 0x158   :  { %v8319_v2 = vpop.eup %8318  ;;  %8334 = vtanh.f32 %v439_v10  ;;  %v454_v21 = vadd.f32 %v7811_v12, %v9657_v35  ;;  %v2176_v10 = vld [vmem:[#allocation2 + $0xe0] sm:$0xff]  ;;  %2403 = vmatprep.subr.mxu1 %v2177_v9 }
 0x159   :  { %v8321_v4 = vpop.eup %8320  ;;  %v448_v16 = vpop.f32.mrf.mxu0  ;;  %8336 = vtanh.f32 %v444_v15  ;;  %2404 = vmatpush1.msra.mxu1 %v2176_v10  ;;  %v9263_v10 = vld [vmem:[%s13850_s0 + $0x28] sm:$0xff] }
 0x15a   :  { %7024 = vmatmul.mubr.msk.f32.gmra.mxu0 %vm599_vm0, %v8295_v41  ;;  %7039 = vmatmul.mubr.msk.f32.gmra.mxu1 %vm599_vm0, %v8293_v39  ;;  %v8323_v6 = vpop.eup %8322  ;;  %v449_v17 = vadd.f32 %v9657_v35, %v448_v16 }
 0x15b   :  { %994 = vmatprep.mubr.f32.mxu0 %v13857_v13  ;;  %1084 = vmatprep.mubr.f32.mxu1 %v13857_v13  ;;  %v8325_v8 = vpop.eup %8324  ;;  %v7814_v20 = vpop.f32.mrf.mxu0 }
 0x15c   :  { %8338 = vtanh.f32 %v449_v17  ;;  %v464_v29 = vadd.f32 %v7814_v20, %v9657_v35 }
 0x15d   :  { %v8327_v11 = vpop.eup %8326  ;;  %v458_v23 = vpop.f32.mrf.mxu0  ;;  %8340 = vtanh.f32 %v454_v21 }
 0x15e   :  { %7025 = vmatmul.mubr.msk.f32.gmra.mxu0 %vm599_vm0, %v8299_v46  ;;  %7040 = vmatmul.mubr.msk.f32.gmra.mxu1 %vm599_vm0, %v8297_v44  ;;  %v8329_v14 = vpop.eup %8328  ;;  %v459_v25 = vadd.f32 %v9657_v35, %v458_v23 }
 0x15f   :  { %1000 = vmatprep.mubr.f32.mxu0 %v13857_v13  ;;  %1090 = vmatprep.mubr.f32.mxu1 %v13857_v13  ;;  %v7817_v19 = vpop.f32.mrf.mxu0 }
 0x160   :  { %8342 = vtanh.f32 %v459_v25  ;;  %v474_v38 = vadd.f32 %v7817_v19, %v9657_v35 }
 0x161   :  { %v8331_v18 = vpop.eup %8330  ;;  %v468_v32 = vpop.f32.mrf.mxu0  ;;  %8344 = vtanh.f32 %v464_v29 }
 0x162   :  { %7026 = vmatmul.mubr.msk.f32.gmra.mxu0 %vm599_vm0, %v8303_v51  ;;  %7041 = vmatmul.mubr.msk.f32.gmra.mxu1 %vm599_vm0, %v8301_v49  ;;  %v8333_v22 = vpop.eup %8332  ;;  %v469_v34 = vadd.f32 %v9657_v35, %v468_v32 }
 0x163   :  { %1006 = vmatprep.mubr.f32.mxu0 %v13857_v13  ;;  %1096 = vmatprep.mubr.f32.mxu1 %v13857_v13  ;;  %v7820_v27 = vpop.f32.mrf.mxu0 }
 0x164   :  { %8346 = vtanh.f32 %v469_v34  ;;  %v484_v43 = vadd.f32 %v7820_v27, %v9657_v35 }
 0x165   :  { %v8335_v26 = vpop.eup %8334  ;;  %v478_v40 = vpop.f32.mrf.mxu0  ;;  %8348 = vtanh.f32 %v474_v38 }
 0x166   :  { %7027 = vmatmul.mubr.msk.f32.gmra.mxu0 %vm599_vm0, %v8307_v37  ;;  %7042 = vmatmul.mubr.msk.f32.gmra.mxu1 %vm599_vm0, %v8305_v53  ;;  %v8337_v30 = vpop.eup %8336  ;;  %v479_v24 = vadd.f32 %v9657_v35, %v478_v40 }
 0x167   :  { %1012 = vmatprep.mubr.f32.mxu0 %v13857_v13  ;;  %1102 = vmatprep.mubr.f32.mxu1 %v13857_v13  ;;  %v7823_v42 = vpop.f32.mrf.mxu0 }
 0x168   :  { %8350 = vtanh.f32 %v479_v24  ;;  %v494_v48 = vadd.f32 %v7823_v42, %v9657_v35 }
 0x169   :  { %v8339_v36 = vpop.eup %8338  ;;  %v488_v31 = vpop.f32.mrf.mxu0  ;;  %8352 = vtanh.f32 %v484_v43 }
 0x16a   :  { %7028 = vmatmul.mubr.msk.f32.gmra.mxu0 %vm599_vm0, %v8311_v59  ;;  %7043 = vmatmul.mubr.msk.f32.gmra.mxu1 %vm599_vm0, %v8309_v57  ;;  %v8341_v39 = vpop.eup %8340  ;;  %v489_v45 = vadd.f32 %v9657_v35, %v488_v31  ;;  %v587_v59 = vld [vmem:[%s13854_s4] sm:$0x3]  ;;  %v2174_v31 = vld [vmem:[#allocation2 + $0xd0] sm:$0xff] }
 0x16b   :  { %1018 = vmatprep.mubr.f32.mxu0 %v13857_v13  ;;  %1108 = vmatprep.mubr.f32.mxu1 %v13857_v13  ;;  %v7826_v47 = vpop.f32.mrf.mxu0 }
 0x16c   :  { %8354 = vtanh.f32 %v489_v45  ;;  %v504_v52 = vadd.f32 %v7826_v47, %v9657_v35 }
 0x16d   :  { %v8343_v41 = vpop.eup %8342  ;;  %v498_v28 = vpop.f32.mrf.mxu0  ;;  %8356 = vtanh.f32 %v494_v48  ;;  %v9260_v48 = vld [vmem:[%s13850_s0 + $0x10] sm:$0xff] }
 0x16e   :  { %7029 = vmatmul.mubr.msk.f32.gmra.mxu0 %vm599_vm0, %v8315_v62  ;;  %7044 = vmatmul.mubr.msk.f32.gmra.mxu1 %vm599_vm0, %v8313_v60  ;;  %v8345_v44 = vpop.eup %8344  ;;  %v499_v50 = vadd.f32 %v9657_v35, %v498_v28  ;;  %v590_v35 = vshrl.u32 %v13856_v55, 7 }
 0x16f   :  { %1024 = vmatprep.mubr.f32.mxu0 %v13857_v13  ;;  %1114 = vmatprep.mubr.f32.mxu1 %v13857_v13 }
 0x170   :  { %8358 = vtanh.f32 %v499_v50  ;;  %v9943_v58 = vsub.s32 0, %v590_v35 }
 0x171   :  { %v8347_v46 = vpop.eup %8346  ;;  %8360 = vtanh.f32 %v504_v52 }
 0x172   :  { %7030 = vmatmul.mubr.msk.f32.gmra.mxu0 %vm599_vm0, %v8319_v2  ;;  %7045 = vmatmul.mubr.msk.f32.gmra.mxu1 %vm599_vm0, %v8317_v0  ;;  %v8349_v49 = vpop.eup %8348  ;;  %13956 = vst [vmem:[#allocation8_spill] sm:$0xff] %v9943_v58  ;;  %v9951_v61 = vrot.slane %v587_v59, %v9943_v58 }
 0x173   :  { %1030 = vmatprep.mubr.f32.mxu0 %v13857_v13  ;;  %1120 = vmatprep.mubr.f32.mxu1 %v13857_v13 }
 0x175   :  { %v8351_v51 = vpop.eup %8350 }
 0x176   :  { %7031 = vmatmul.mubr.msk.f32.gmra.mxu0 %vm599_vm0, %v8323_v6  ;;  %7046 = vmatmul.mubr.msk.f32.gmra.mxu1 %vm599_vm0, %v8321_v4  ;;  %v8353_v53 = vpop.eup %8352 }
 0x177   :  { %1126 = vmatprep.mubr.f32.mxu1 %v13857_v13 }
 0x179   :  { %v8355_v54 = vpop.eup %8354 }
 0x17a   :  { %7047 = vmatmul.mubr.msk.f32.gmra.mxu1 %vm599_vm0, %v8325_v8  ;;  %v8357_v37 = vpop.eup %8356 }
 0x17b   :  { %1132 = vmatprep.mubr.f32.mxu1 %v13857_v13 }
 0x17d   :  { %v8359_v57 = vpop.eup %8358 }
 0x17e   :  { %7048 = vmatmul.mubr.msk.f32.gmra.mxu1 %vm599_vm0, %v8327_v11  ;;  %v8361_v60 = vpop.eup %8360  ;;  %v9958_v11 = vsub.s32 1, %v590_v35  ;;  %v9261_v35 = vld [vmem:[%s13850_s0 + $0x18] sm:$0xff] }
 0x17f   :  { %1138 = vmatprep.mubr.f32.mxu1 %v13857_v13 }
 0x180   :  { %13957 = vst [vmem:[#allocation9_spill] sm:$0xff] %v9958_v11  ;;  %v9962_v17 = vrot.slane %v587_v59, %v9958_v11 }
 0x182   :  { %7049 = vmatmul.mubr.msk.f32.gmra.mxu1 %vm599_vm0, %v8329_v14 }
 0x183   :  { %1144 = vmatprep.mubr.f32.mxu1 %v13857_v13 }
 0x186   :  { %7050 = vmatmul.mubr.msk.f32.gmra.mxu1 %vm599_vm0, %v8331_v18 }
 0x187   :  { %1150 = vmatprep.mubr.f32.mxu1 %v13857_v13 }
 0x18a   :  { %7051 = vmatmul.mubr.msk.f32.gmra.mxu1 %vm599_vm0, %v8333_v22 }
 0x18b   :  { %1156 = vmatprep.mubr.f32.mxu1 %v13857_v13 }
 0x18e   :  { %7052 = vmatmul.mubr.msk.f32.gmra.mxu1 %vm599_vm0, %v8335_v26  ;;  %v9258_v26 = vld [vmem:[%s13850_s0] sm:$0xff] }
 0x18f   :  { %1162 = vmatprep.mubr.f32.mxu1 %v13857_v13 }
 0x192   :  { %7053 = vmatmul.mubr.msk.f32.gmra.mxu1 %vm599_vm0, %v8337_v30 }
 0x193   :  { %1168 = vmatprep.mubr.f32.mxu1 %v13857_v13 }
 0x196   :  { %7054 = vmatmul.mubr.msk.f32.gmra.mxu1 %vm599_vm0, %v8339_v36 }
 0x197   :  { %1174 = vmatprep.mubr.f32.mxu1 %v13857_v13 }
 0x19a   :  { %7055 = vmatmul.mubr.msk.f32.gmra.mxu1 %vm599_vm0, %v8341_v39  ;;  %v9259_v39 = vld [vmem:[%s13850_s0 + $0x8] sm:$0xff] }
 0x19b   :  { %1180 = vmatprep.mubr.f32.mxu1 %v13857_v13 }
 0x19e   :  { %7056 = vmatmul.mubr.msk.f32.gmra.mxu1 %vm599_vm0, %v8343_v41 }
 0x19f   :  { %1186 = vmatprep.mubr.f32.mxu1 %v13857_v13 }
 0x1a2   :  { %7057 = vmatmul.mubr.msk.f32.gmra.mxu1 %vm599_vm0, %v8345_v44  ;;  %v2175_v44 = vld [vmem:[#allocation2 + $0xd8] sm:$0xff] }
 0x1a3   :  { %1192 = vmatprep.mubr.f32.mxu1 %v13857_v13  ;;  %2405 = vmatprep.subr.mxu1 %v2175_v44 }
 0x1a4   :  { %2406 = vmatpush1.msra.mxu1 %v2174_v31 }
 0x1a6   :  { %7058 = vmatmul.mubr.msk.f32.gmra.mxu1 %vm599_vm0, %v8347_v46 }
 0x1a7   :  { %1198 = vmatprep.mubr.f32.mxu1 %v13857_v13 }
 0x1aa   :  { %7059 = vmatmul.mubr.msk.f32.gmra.mxu1 %vm599_vm0, %v8349_v49 }
 0x1ab   :  { %1204 = vmatprep.mubr.f32.mxu1 %v13857_v13 }
 0x1ae   :  { %7060 = vmatmul.mubr.msk.f32.gmra.mxu1 %vm599_vm0, %v8351_v51 }
 0x1af   :  { %1210 = vmatprep.mubr.f32.mxu1 %v13857_v13 }
 0x1b2   :  { %7061 = vmatmul.mubr.msk.f32.gmra.mxu1 %vm599_vm0, %v8353_v53 }
 0x1b3   :  { %1216 = vmatprep.mubr.f32.mxu1 %v13857_v13 }
 0x1b6   :  { %7062 = vmatmul.mubr.msk.f32.gmra.mxu1 %vm599_vm0, %v8355_v54 }
 0x1b7   :  { %1222 = vmatprep.mubr.f32.mxu1 %v13857_v13 }
 0x1ba   :  { %7063 = vmatmul.mubr.msk.f32.gmra.mxu1 %vm599_vm0, %v8357_v37 }
 0x1bb   :  { %1228 = vmatprep.mubr.f32.mxu1 %v13857_v13 }
 0x1be   :  { %7064 = vmatmul.mubr.msk.f32.gmra.mxu1 %vm599_vm0, %v8359_v57 }
 0x1bf   :  { %1234 = vmatprep.mubr.f32.mxu1 %v13857_v13 }
 0x1c2   :  { %v858_v62 = vpop.f32.mrf.mxu0  ;;  %7065 = vmatmul.mubr.msk.f32.gmra.mxu1 %vm599_vm0, %v8361_v60 }
 0x1c3   :  { %v859_v63 = vadd.f32 %v858_v62, %v9951_v61  ;;  %2449 = vmatprep.mubr.f32.mxu1 %v13857_v13 }
 0x1c4   :  { %v860_v0 = vpop.f32.mrf.mxu0 }
 0x1c5   :  { %v1241_v1 = vmul.f32 1.442695, %v859_v63  ;;  %1497 = vadd.xlane.f32.xlu0 %v859_v63  ;;  %v861_v25 = vadd.f32 %v860_v0, %v9962_v17 }
 0x1c6   :  { %v864_v2 = vpop.f32.mrf.mxu0 }
 0x1c7   :  { %8362 = vpow2.f32 %v1241_v1  ;;  %v865_v3 = vadd.f32 %v864_v2, %v9951_v61  ;;  %v9262_v1 = vld [vmem:[%s13850_s0 + $0x20] sm:$0xff] }
 0x1c8   :  { %v866_v4 = vpop.f32.mrf.mxu0 }
 0x1c9   :  { %v1243_v5 = vmul.f32 1.442695, %v865_v3  ;;  %1499 = vadd.xlane.f32.xlu0 %v865_v3  ;;  %v867_v38 = vadd.f32 %v866_v4, %v9962_v17 }
 0x1ca   :  { %v870_v6 = vpop.f32.mrf.mxu0 }
 0x1cb   :  { %8364 = vpow2.f32 %v1243_v5  ;;  %v871_v7 = vadd.f32 %v870_v6, %v9951_v61 }
 0x1cc   :  { %v872_v8 = vpop.f32.mrf.mxu0 }
 0x1cd   :  { %v1245_v12 = vmul.f32 1.442695, %v871_v7  ;;  %1501 = vadd.xlane.f32.xlu1 %v871_v7  ;;  %v873_v47 = vadd.f32 %v872_v8, %v9962_v17 }
 0x1ce   :  { %v876_v15 = vpop.f32.mrf.mxu0 }
 0x1cf   :  { %8366 = vpow2.f32 %v1245_v12  ;;  %v877_v14 = vadd.f32 %v876_v15, %v9951_v61 }
 0x1d0   :  { %v878_v16 = vpop.f32.mrf.mxu0 }
 0x1d1   :  { %v1247_v18 = vmul.f32 1.442695, %v877_v14  ;;  %1503 = vadd.xlane.f32.xlu1 %v877_v14  ;;  %v879_v37 = vadd.f32 %v878_v16, %v9962_v17 }
 0x1d2   :  { %v882_v20 = vpop.f32.mrf.mxu0 }
 0x1d3   :  { %8368 = vpow2.f32 %v1247_v18  ;;  %v883_v21 = vadd.f32 %v882_v20, %v9951_v61  ;;  %v2173_v20 = vld [vmem:[#allocation2 + $0xc8] sm:$0xff] }
 0x1d4   :  { %v8363_v22 = vpop.eup %8362  ;;  %v884_v23 = vpop.f32.mrf.mxu0  ;;  %2407 = vmatprep.subr.mxu1 %v2173_v20 }
 0x1d5   :  { %v1369_v19 = vmul.f32 %v9258_v26, %v8363_v22  ;;  %v1249_v29 = vmul.f32 1.442695, %v883_v21  ;;  %1505 = vadd.xlane.f32.xlu0 %v883_v21  ;;  %v885_v0 = vadd.f32 %v884_v23, %v9962_v17  ;;  %v2172_v21 = vld [vmem:[#allocation2 + $0xc0] sm:$0xff]  ;;  %v9264_v26 = vld [vmem:[%s13850_s0 + $0x30] sm:$0xff] }
 0x1d6   :  { %v888_v30 = vpop.f32.mrf.mxu0  ;;  %2408 = vmatpush1.msra.mxu1 %v2172_v21 }
 0x1d7   :  { %v9969_v32 = vadd.f32 %v1369_v19, %v861_v25  ;;  %8370 = vpow2.f32 %v1249_v29  ;;  %v889_v34 = vadd.f32 %v888_v30, %v9951_v61 }
 0x1d8   :  { %v8365_v36 = vpop.eup %8364  ;;  %v890_v27 = vpop.f32.mrf.mxu0 }
 0x1d9   :  { %v1370_v40 = vmul.f32 %v9259_v39, %v8365_v36  ;;  %v1251_v24 = vmul.f32 1.442695, %v889_v34  ;;  %1507 = vadd.xlane.f32.xlu1 %v889_v34  ;;  %7859 = vmatprep.mubr.f32.mxu0 %v9969_v32  ;;  %v891_v9 = vadd.f32 %v890_v27, %v9962_v17 }
 0x1da   :  { %v894_v41 = vpop.f32.mrf.mxu0 }
 0x1db   :  { %v9977_v42 = vadd.f32 %v1370_v40, %v867_v38  ;;  %8372 = vpow2.f32 %v1251_v24  ;;  %v895_v43 = vadd.f32 %v894_v41, %v9951_v61  ;;  %v9265_v40 = vld [vmem:[%s13850_s0 + $0x38] sm:$0xff] }
 0x1dc   :  { %v8367_v45 = vpop.eup %8366  ;;  %v896_v46 = vpop.f32.mrf.mxu0 }
 0x1dd   :  { %v1371_v49 = vmul.f32 %v9260_v48, %v8367_v45  ;;  %v1253_v28 = vmul.f32 1.442695, %v895_v43  ;;  %1509 = vadd.xlane.f32.xlu0 %v895_v43  ;;  %7860 = vmatmul.mubr.f32.vlgmr.msra.gmra.mxu0 %v9977_v42  ;;  %v897_v25 = vadd.f32 %v896_v46, %v9962_v17  ;;  %v9266_v48 = vld [vmem:[%s13850_s0 + $0x40] sm:$0xff] }
 0x1de   :  { %v900_v50 = vpop.f32.mrf.mxu0 }
 0x1df   :  { %v9985_v51 = vadd.f32 %v1371_v49, %v873_v47  ;;  %8374 = vpow2.f32 %v1253_v28  ;;  %v901_v52 = vadd.f32 %v900_v50, %v9951_v61 }
 0x1e0   :  { %v8369_v53 = vpop.eup %8368  ;;  %v902_v54 = vpop.f32.mrf.mxu0 }
 0x1e1   :  { %v1372_v56 = vmul.f32 %v9261_v35, %v8369_v53  ;;  %v1255_v57 = vmul.f32 1.442695, %v901_v52  ;;  %1511 = vadd.xlane.f32.xlu1 %v901_v52  ;;  %7862 = vmatprep.mubr.f32.mxu0 %v9985_v51  ;;  %v903_v39 = vadd.f32 %v902_v54, %v9962_v17 }
 0x1e2   :  { %v906_v59 = vpop.f32.mrf.mxu0 }
 0x1e3   :  { %v9993_v33 = vadd.f32 %v1372_v56, %v879_v37  ;;  %8376 = vpow2.f32 %v1255_v57  ;;  %v907_v60 = vadd.f32 %v906_v59, %v9951_v61  ;;  %v9267_v56 = vld [vmem:[%s13850_s0 + $0x48] sm:$0xff] }
 0x1e4   :  { %v8371_v62 = vpop.eup %8370  ;;  %v908_v63 = vpop.f32.mrf.mxu0 }
 0x1e5   :  { %v1373_v2 = vmul.f32 %v9262_v1, %v8371_v62  ;;  %v1257_v3 = vmul.f32 1.442695, %v907_v60  ;;  %1513 = vadd.xlane.f32.xlu0 %v907_v60  ;;  %7863 = vmatmul.mubr.f32.gmra.mxu0 %v9993_v33  ;;  %v909_v47 = vadd.f32 %v908_v63, %v9962_v17 }
 0x1e6   :  { %v912_v4 = vpop.f32.mrf.mxu0 }
 0x1e7   :  { %v10001_v5 = vadd.f32 %v1373_v2, %v885_v0  ;;  %8378 = vpow2.f32 %v1257_v3  ;;  %v913_v6 = vadd.f32 %v912_v4, %v9951_v61  ;;  %v2171_v0 = vld [vmem:[#allocation2 + $0xb8] sm:$0xff]  ;;  %v9268_v4 = vld [vmem:[%s13850_s0 + $0x50] sm:$0xff] }
 0x1e8   :  { %v8373_v7 = vpop.eup %8372  ;;  %v914_v8 = vpop.f32.mrf.mxu0  ;;  %2409 = vmatprep.subr.mxu1 %v2171_v0 }
 0x1e9   :  { %v1374_v12 = vmul.f32 %v9263_v10, %v8373_v7  ;;  %v1259_v15 = vmul.f32 1.442695, %v913_v6  ;;  %1515 = vadd.xlane.f32.xlu1 %v913_v6  ;;  %7865 = vmatprep.mubr.f32.mxu0 %v10001_v5  ;;  %v915_v35 = vadd.f32 %v914_v8, %v9962_v17 }
 0x1ea   :  { %v918_v14 = vpop.f32.mrf.mxu0 }
 0x1eb   :  { %v10009_v16 = vadd.f32 %v1374_v12, %v891_v9  ;;  %8380 = vpow2.f32 %v1259_v15  ;;  %v919_v18 = vadd.f32 %v918_v14, %v9951_v61  ;;  %v2170_v14 = vld [vmem:[#allocation2 + $0xb0] sm:$0xff] }
 0x1ec   :  { %v8375_v22 = vpop.eup %8374  ;;  %v920_v23 = vpop.f32.mrf.mxu0  ;;  %2410 = vmatpush1.msra.mxu1 %v2170_v14 }
 0x1ed   :  { %v1375_v19 = vmul.f32 %v9264_v26, %v8375_v22  ;;  %v1261_v29 = vmul.f32 1.442695, %v919_v18  ;;  %1517 = vadd.xlane.f32.xlu0 %v919_v18  ;;  %7866 = vmatmul.mubr.f32.gmra.mxu0 %v10009_v16  ;;  %v921_v3 = vadd.f32 %v920_v23, %v9962_v17  ;;  %v9269_v23 = vld [vmem:[%s13850_s0 + $0x58] sm:$0xff] }
 0x1ee   :  { %v924_v30 = vpop.f32.mrf.mxu0 }
 0x1ef   :  { %v10017_v34 = vadd.f32 %v1375_v19, %v897_v25  ;;  %8382 = vpow2.f32 %v1261_v29  ;;  %v925_v36 = vadd.f32 %v924_v30, %v9951_v61 }
 0x1f0   :  { %v8377_v27 = vpop.eup %8376  ;;  %v926_v38 = vpop.f32.mrf.mxu0 }
 0x1f1   :  { %v1376_v24 = vmul.f32 %v9265_v40, %v8377_v27  ;;  %v1263_v41 = vmul.f32 1.442695, %v925_v36  ;;  %1519 = vadd.xlane.f32.xlu1 %v925_v36  ;;  %7868 = vmatprep.mubr.f32.mxu0 %v10017_v34  ;;  %v927_v22 = vadd.f32 %v926_v38, %v9962_v17 }
 0x1f2   :  { %v930_v43 = vpop.f32.mrf.mxu0 }
 0x1f3   :  { %v10025_v44 = vadd.f32 %v1376_v24, %v903_v39  ;;  %8384 = vpow2.f32 %v1263_v41  ;;  %v931_v31 = vadd.f32 %v930_v43, %v9951_v61  ;;  %v9270_v41 = vld [vmem:[%s13850_s0 + $0x60] sm:$0xff] }
 0x1f4   :  { %v8379_v45 = vpop.eup %8378  ;;  %v932_v46 = vpop.f32.mrf.mxu0 }
 0x1f5   :  { %v1377_v49 = vmul.f32 %v9266_v48, %v8379_v45  ;;  %v1265_v28 = vmul.f32 1.442695, %v931_v31  ;;  %1521 = vadd.xlane.f32.xlu0 %v931_v31  ;;  %7869 = vmatmul.mubr.f32.gmra.mxu0 %v10025_v44  ;;  %v933_v24 = vadd.f32 %v932_v46, %v9962_v17 }
 0x1f6   :  { %v936_v50 = vpop.f32.mrf.mxu0 }
 0x1f7   :  { %v10033_v52 = vadd.f32 %v1377_v49, %v909_v47  ;;  %8386 = vpow2.f32 %v1265_v28  ;;  %v937_v53 = vadd.f32 %v936_v50, %v9951_v61 }
 0x1f8   :  { %v8381_v54 = vpop.eup %8380  ;;  %v10036_v37 = vpop.f32.mrf.mxu0 }
 0x1f9   :  { %v1378_v57 = vmul.f32 %v9267_v56, %v8381_v54  ;;  %v1267_v59 = vmul.f32 1.442695, %v937_v53  ;;  %1523 = vadd.xlane.f32.xlu1 %v937_v53  ;;  %7871 = vmatprep.mubr.f32.mxu0 %v10033_v52  ;;  %v939_v54 = vadd.f32 %v10036_v37, %v9962_v17 }
 0x1fa   :  { %v942_v60 = vpop.f32.mrf.mxu0 }
 0x1fb   :  { %v10043_v62 = vadd.f32 %v1378_v57, %v915_v35  ;;  %8388 = vpow2.f32 %v1267_v59  ;;  %v943_v63 = vadd.f32 %v942_v60, %v9951_v61  ;;  %v9271_v35 = vld [vmem:[%s13850_s0 + $0x68] sm:$0xff] }
 0x1fc   :  { %v8383_v1 = vpop.eup %8382  ;;  %v10046_v2 = vpop.f32.mrf.mxu0 }
 0x1fd   :  { %v1379_v6 = vmul.f32 %v9268_v4, %v8383_v1  ;;  %v1269_v7 = vmul.f32 1.442695, %v943_v63  ;;  %1525 = vadd.xlane.f32.xlu0 %v943_v63  ;;  %7872 = vmatmul.mubr.f32.gmra.mxu0 %v10043_v62 }
 0x1fe   :  { %v948_v8 = vpop.f32.mrf.mxu0  ;;  %v1038_v9 = vpop.f32.mrf.mxu1 }
 0x1ff   :  { %v10053_v10 = vadd.f32 %v1379_v6, %v921_v3  ;;  %8390 = vpow2.f32 %v1269_v7  ;;  %v949_v12 = vadd.f32 %v948_v8, %v9951_v61  ;;  %v10057_v15 = vadd.f32 %v1038_v9, %v9951_v61  ;;  %v9272_v7 = vld [vmem:[%s13850_s0 + $0x70] sm:$0xff] }
 0x200   :  { %v8385_v18 = vpop.eup %8384  ;;  %v10059_v20 = vpop.f32.mrf.mxu0  ;;  %v945_v6 = vadd.f32 %v10046_v2, %v9962_v17 }
 0x201   :  { %v10061_v21 = vpop.f32.mrf.mxu1  ;;  %v1380_v25 = vmul.f32 %v9269_v23, %v8385_v18  ;;  %v1271_v26 = vmul.f32 1.442695, %v949_v12  ;;  %1527 = vadd.xlane.f32.xlu1 %v949_v12  ;;  %1557 = vadd.xlane.f32.xlu0 %v10057_v15  ;;  %v2169_v23 = vld [vmem:[#allocation2 + $0xa8] sm:$0xff] }
 0x202   :  { %7874 = vmatprep.mubr.f32.mxu0 %v10053_v10  ;;  %v954_v19 = vpop.f32.mrf.mxu0  ;;  %2411 = vmatprep.subr.mxu1 %v2169_v23  ;;  %v9275_v23 = vld [vmem:[%s13850_s0 + $0x88] sm:$0xff] }
 0x203   :  { %v1044_v29 = vpop.f32.mrf.mxu1  ;;  %v10069_v30 = vadd.f32 %v1380_v25, %v927_v22  ;;  %8392 = vpow2.f32 %v1271_v26  ;;  %v955_v36 = vadd.f32 %v954_v19, %v9951_v61  ;;  %v2168_v25 = vld [vmem:[#allocation2 + $0xa0] sm:$0xff] }
 0x204   :  { %v10073_v27 = vadd.f32 %v1044_v29, %v9951_v61  ;;  %v8387_v38 = vpop.eup %8386  ;;  %v10075_v39 = vpop.f32.mrf.mxu0  ;;  %2412 = vmatpush1.msra.mxu1 %v2168_v25 }
 0x205   :  { %v10077_v40 = vpop.f32.mrf.mxu1  ;;  %v1381_v43 = vmul.f32 %v9270_v41, %v8387_v38  ;;  %v1273_v31 = vmul.f32 1.442695, %v955_v36  ;;  %1529 = vadd.xlane.f32.xlu0 %v955_v36  ;;  %7875 = vmatmul.mubr.f32.gmra.mxu0 %v10069_v30  ;;  %v951_v36 = vadd.f32 %v10059_v20, %v9962_v17  ;;  %v9273_v38 = vld [vmem:[%s13850_s0 + $0x78] sm:$0xff] }
 0x206   :  { %1559 = vadd.xlane.f32.xlu1 %v10073_v27  ;;  %v960_v45 = vpop.f32.mrf.mxu0 }
 0x207   :  { %v1050_v47 = vpop.f32.mrf.mxu1  ;;  %v10085_v48 = vadd.f32 %v1381_v43, %v933_v24  ;;  %8394 = vpow2.f32 %v1273_v31  ;;  %v961_v49 = vadd.f32 %v960_v45, %v9951_v61 }
 0x208   :  { %v10089_v46 = vadd.f32 %v1050_v47, %v9951_v61  ;;  %v8389_v28 = vpop.eup %8388  ;;  %v10091_v50 = vpop.f32.mrf.mxu0 }
 0x209   :  { %v10093_v53 = vpop.f32.mrf.mxu1  ;;  %v1382_v56 = vmul.f32 %v9271_v35, %v8389_v28  ;;  %v1275_v57 = vmul.f32 1.442695, %v961_v49  ;;  %7877 = vmatprep.mubr.f32.mxu0 %v10085_v48  ;;  %v2166_v28 = vld [vmem:[#allocation2 + $0x90] sm:$0xff] }
 0x20a   :  { %1531 = vadd.xlane.f32.xlu1 %v961_v49  ;;  %1561 = vadd.xlane.f32.xlu0 %v10089_v46  ;;  %v966_v59 = vpop.f32.mrf.mxu0  ;;  %v2167_v49 = vld [vmem:[#allocation2 + $0x98] sm:$0xff] }
 0x20b   :  { %v1056_v60 = vpop.f32.mrf.mxu1  ;;  %v10102_v63 = vadd.f32 %v1382_v56, %v939_v54  ;;  %8396 = vpow2.f32 %v1275_v57  ;;  %v967_v0 = vadd.f32 %v966_v59, %v9951_v61  ;;  %2413 = vmatprep.subr.mxu1 %v2167_v49  ;;  %v957_v57 = vadd.f32 %v10075_v39, %v9962_v17  ;;  %v9274_v59 = vld [vmem:[%s13850_s0 + $0x80] sm:$0xff] }
 0x20c   :  { %v10106_v37 = vadd.f32 %v1056_v60, %v9951_v61  ;;  %v8391_v1 = vpop.eup %8390  ;;  %v10108_v3 = vpop.f32.mrf.mxu0  ;;  %2414 = vmatpush1.msra.mxu1 %v2166_v28  ;;  %v9276_v28 = vld [vmem:[%s13850_s0 + $0x90] sm:$0xff] }
 0x20d   :  { %v10110_v4 = vpop.f32.mrf.mxu1  ;;  %v1383_v8 = vmul.f32 %v9272_v7, %v8391_v1  ;;  %v1277_v9 = vmul.f32 1.442695, %v967_v0  ;;  %7878 = vmatmul.mubr.f32.gmra.mxu0 %v10102_v63  ;;  %v969_v49 = vadd.f32 %v10108_v3, %v9962_v17 }
 0x20e   :  { %1563 = vadd.xlane.f32.xlu1 %v10106_v37  ;;  %1533 = vadd.xlane.f32.xlu0 %v967_v0  ;;  %v972_v12 = vpop.f32.mrf.mxu0 }
 0x20f   :  { %v1062_v14 = vpop.f32.mrf.mxu1  ;;  %v10119_v18 = vadd.f32 %v1383_v8, %v945_v6  ;;  %8398 = vpow2.f32 %v1277_v9  ;;  %v973_v22 = vadd.f32 %v972_v12, %v9951_v61 }
 0x210   :  { %v10123_v2 = vadd.f32 %v1062_v14, %v9951_v61  ;;  %v8393_v26 = vpop.eup %8392  ;;  %v10125_v19 = vpop.f32.mrf.mxu0 }
 0x211   :  { %13958 = vst [vmem:[#allocation10_spill] sm:$0xff] %v10119_v18  ;;  %v10127_v29 = vpop.f32.mrf.mxu1  ;;  %v1384_v24 = vmul.f32 %v9273_v38, %v8393_v26  ;;  %v1279_v41 = vmul.f32 1.442695, %v973_v22  ;;  %7880 = vmatprep.mubr.f32.mxu0 %v10119_v18  ;;  %v1305_v18 = vmul.f32 1.442695, %v10089_v46 }
 0x212   :  { %1535 = vadd.xlane.f32.xlu1 %v973_v22  ;;  %1565 = vadd.xlane.f32.xlu0 %v10123_v2  ;;  %v978_v43 = vpop.f32.mrf.mxu0  ;;  %v963_v22 = vadd.f32 %v10091_v50, %v9962_v17  ;;  %v1307_v46 = vmul.f32 1.442695, %v10106_v37 }
 0x213   :  { %v1068_v31 = vpop.f32.mrf.mxu1  ;;  %v10136_v45 = vadd.f32 %v1384_v24, %v951_v36  ;;  %8400 = vpow2.f32 %v1279_v41  ;;  %v979_v47 = vadd.f32 %v978_v43, %v9951_v61 }
 0x214   :  { %v10140_v20 = vadd.f32 %v1068_v31, %v9951_v61  ;;  %v8395_v54 = vpop.eup %8394  ;;  %v10142_v35 = vpop.f32.mrf.mxu0 }
 0x215   :  { %13959 = vst [vmem:[#allocation11_spill] sm:$0xff] %v10136_v45  ;;  %v10144_v56 = vpop.f32.mrf.mxu1  ;;  %v1385_v60 = vmul.f32 %v9274_v59, %v8395_v54  ;;  %v1281_v0 = vmul.f32 1.442695, %v979_v47  ;;  %7881 = vmatmul.mubr.f32.gmra.mxu0 %v10136_v45 }
 0x216   :  { %1567 = vadd.xlane.f32.xlu1 %v10140_v20  ;;  %1537 = vadd.xlane.f32.xlu0 %v979_v47  ;;  %v984_v1 = vpop.f32.mrf.mxu0 }
 0x217   :  { %v1074_v6 = vpop.f32.mrf.mxu1  ;;  %v10153_v7 = vadd.f32 %v1385_v60, %v957_v57  ;;  %8402 = vpow2.f32 %v1281_v0  ;;  %v985_v8 = vadd.f32 %v984_v1, %v9951_v61 }
 0x218   :  { %v10157_v39 = vadd.f32 %v1074_v6, %v9951_v61  ;;  %v8397_v9 = vpop.eup %8396  ;;  %v10159_v12 = vpop.f32.mrf.mxu0 }
 0x219   :  { %13960 = vst [vmem:[#allocation12_spill] sm:$0xff] %v10153_v7  ;;  %v10161_v14 = vpop.f32.mrf.mxu1  ;;  %v1386_v25 = vmul.f32 %v9275_v23, %v8397_v9  ;;  %v1283_v26 = vmul.f32 1.442695, %v985_v8  ;;  %7883 = vmatprep.mubr.f32.mxu0 %v10153_v7  ;;  %v975_v23 = vadd.f32 %v10125_v19, %v9962_v17  ;;  %v1301_v7 = vmul.f32 1.442695, %v10057_v15 }
 0x21a   :  { %1539 = vadd.xlane.f32.xlu1 %v985_v8  ;;  %1569 = vadd.xlane.f32.xlu0 %v10157_v39  ;;  %v990_v36 = vpop.f32.mrf.mxu0 }
 0x21b   :  { %v1080_v38 = vpop.f32.mrf.mxu1  ;;  %v10170_v24 = vadd.f32 %v1386_v25, %v963_v22  ;;  %8404 = vpow2.f32 %v1283_v26  ;;  %v991_v41 = vadd.f32 %v990_v36, %v9951_v61  ;;  %v2165_v22 = vld [vmem:[#allocation2 + $0x88] sm:$0xff]  ;;  %v9277_v25 = vld [vmem:[%s13850_s0 + $0x98] sm:$0xff] }
 0x21c   :  { %v10174_v50 = vadd.f32 %v1080_v38, %v9951_v61  ;;  %v8399_v43 = vpop.eup %8398  ;;  %v10176_v31 = vpop.f32.mrf.mxu0  ;;  %2415 = vmatprep.subr.mxu1 %v2165_v22 }
 0x21d   :  { %13961 = vst [vmem:[#allocation13_spill] sm:$0xff] %v10170_v24  ;;  %v10178_v47 = vpop.f32.mrf.mxu1  ;;  %v1387_v54 = vmul.f32 %v9276_v28, %v8399_v43  ;;  %v1285_v57 = vmul.f32 1.442695, %v991_v41  ;;  %7884 = vmatmul.mubr.f32.gmra.mxu0 %v10170_v24  ;;  %v2164_v43 = vld [vmem:[#allocation2 + $0x80] sm:$0xff] }
 0x21e   :  { %1571 = vadd.xlane.f32.xlu1 %v10174_v50  ;;  %1541 = vadd.xlane.f32.xlu0 %v991_v41  ;;  %v996_v59 = vpop.f32.mrf.mxu0 }
 0x21f   :  { %v1086_v60 = vpop.f32.mrf.mxu1  ;;  %v10187_v0 = vadd.f32 %v1387_v54, %v969_v49  ;;  %8406 = vpow2.f32 %v1285_v57  ;;  %v997_v1 = vadd.f32 %v996_v59, %v9951_v61  ;;  %2416 = vmatpush1.msra.mxu1 %v2164_v43 }
 0x220   :  { %v10191_v3 = vadd.f32 %v1086_v60, %v9951_v61  ;;  %v8401_v6 = vpop.eup %8400  ;;  %v10193_v8 = vpop.f32.mrf.mxu0  ;;  %v981_v60 = vadd.f32 %v10142_v35, %v9962_v17 }
 0x221   :  { %13962 = vst [vmem:[#allocation14_spill] sm:$0xff] %v10187_v0  ;;  %v10195_v9 = vpop.f32.mrf.mxu1  ;;  %v1388_v26 = vmul.f32 %v9277_v25, %v8401_v6  ;;  %v1287_v36 = vmul.f32 1.442695, %v997_v1  ;;  %7886 = vmatprep.mubr.f32.mxu0 %v10187_v0 }
 0x222   :  { %1543 = vadd.xlane.f32.xlu1 %v997_v1  ;;  %1573 = vadd.xlane.f32.xlu0 %v10191_v3  ;;  %v1002_v38 = vpop.f32.mrf.mxu0  ;;  %v9278_v1 = vld [vmem:[%s13850_s0 + $0xa0] sm:$0xff] }
 0x223   :  { %v1092_v41 = vpop.f32.mrf.mxu1  ;;  %v10204_v49 = vadd.f32 %v1388_v26, %v975_v23  ;;  %8408 = vpow2.f32 %v1287_v36  ;;  %v1003_v19 = vadd.f32 %v1002_v38, %v9951_v61 }
 0x224   :  { %v10208_v28 = vadd.f32 %v1092_v41, %v9951_v61  ;;  %v8403_v54 = vpop.eup %8402  ;;  %v10210_v57 = vpop.f32.mrf.mxu0 }
 0x225   :  { %13963 = vst [vmem:[#allocation15_spill] sm:$0xff] %v10204_v49  ;;  %v10212_v59 = vpop.f32.mrf.mxu1  ;;  %v1389_v6 = vmul.f32 %v9278_v1, %v8403_v54  ;;  %v1289_v22 = vmul.f32 1.442695, %v1003_v19  ;;  %7887 = vmatmul.mubr.f32.gmra.mxu0 %v10204_v49  ;;  %v9279_v54 = vld [vmem:[%s13850_s0 + $0xa8] sm:$0xff] }
 0x226   :  { %1575 = vadd.xlane.f32.xlu1 %v10208_v28  ;;  %1545 = vadd.xlane.f32.xlu0 %v1003_v19  ;;  %v1008_v23 = vpop.f32.mrf.mxu0  ;;  %v987_v19 = vadd.f32 %v10159_v12, %v9962_v17 }
 0x227   :  { %v1098_v25 = vpop.f32.mrf.mxu1  ;;  %v10221_v26 = vadd.f32 %v1389_v6, %v981_v60  ;;  %8410 = vpow2.f32 %v1289_v22  ;;  %v1009_v36 = vadd.f32 %v1008_v23, %v9951_v61 }
 0x228   :  { %v10225_v35 = vadd.f32 %v1098_v25, %v9951_v61  ;;  %v8405_v38 = vpop.eup %8404  ;;  %v10227_v41 = vpop.f32.mrf.mxu0 }
 0x229   :  { %13964 = vst [vmem:[#allocation16_spill] sm:$0xff] %v10221_v26  ;;  %v10229_v43 = vpop.f32.mrf.mxu1  ;;  %v1390_v60 = vmul.f32 %v9279_v54, %v8405_v38  ;;  %v1291_v1 = vmul.f32 1.442695, %v1009_v36  ;;  %7889 = vmatprep.mubr.f32.mxu0 %v10221_v26  ;;  %v9280_v54 = vld [vmem:[%s13850_s0 + $0xb0] sm:$0xff] }
 0x22a   :  { %1547 = vadd.xlane.f32.xlu1 %v1009_v36  ;;  %1577 = vadd.xlane.f32.xlu0 %v10225_v35  ;;  %v1014_v6 = vpop.f32.mrf.mxu0  ;;  %v993_v36 = vadd.f32 %v10176_v31, %v9962_v17 }
 0x22b   :  { %v1104_v22 = vpop.f32.mrf.mxu1  ;;  %v10238_v23 = vadd.f32 %v1390_v60, %v987_v19  ;;  %8412 = vpow2.f32 %v1291_v1  ;;  %v1015_v25 = vadd.f32 %v1014_v6, %v9951_v61 }
 0x22c   :  { %v10242_v12 = vadd.f32 %v1104_v22, %v9951_v61  ;;  %v8407_v55 = vpop.eup %8406  ;;  %v10244_v13 = vpop.f32.mrf.mxu0 }
 0x22d   :  { %13965 = vst [vmem:[#allocation17_spill] sm:$0xff] %v10238_v23  ;;  %v10246_v38 = vpop.f32.mrf.mxu1  ;;  %v1391_v19 = vmul.f32 %v9280_v54, %v8407_v55  ;;  %v1293_v60 = vmul.f32 1.442695, %v1015_v25  ;;  %7890 = vmatmul.mubr.f32.gmra.mxu0 %v10238_v23  ;;  %v9281_v54 = vld [vmem:[%s13850_s0 + $0xb8] sm:$0xff] }
 0x22e   :  { %1579 = vadd.xlane.f32.xlu1 %v10242_v12  ;;  %1549 = vadd.xlane.f32.xlu0 %v1015_v25  ;;  %v1020_v1 = vpop.f32.mrf.mxu0  ;;  %v999_v25 = vadd.f32 %v10193_v8, %v9962_v17 }
 0x22f   :  { %v1110_v6 = vpop.f32.mrf.mxu1  ;;  %v10255_v22 = vadd.f32 %v1391_v19, %v993_v36  ;;  %8414 = vpow2.f32 %v1293_v60  ;;  %v1021_v26 = vadd.f32 %v1020_v1, %v9951_v61 }
 0x230   :  { %v10259_v31 = vadd.f32 %v1110_v6, %v9951_v61  ;;  %v8409_v49 = vpop.eup %8408  ;;  %v10261_v0 = vpop.f32.mrf.mxu0 }
 0x231   :  { %13966 = vst [vmem:[#allocation18_spill] sm:$0xff] %v10255_v22  ;;  %v10263_v55 = vpop.f32.mrf.mxu1  ;;  %v1392_v36 = vmul.f32 %v9281_v54, %v8409_v49  ;;  %v1295_v19 = vmul.f32 1.442695, %v1021_v26  ;;  %7892 = vmatprep.mubr.f32.mxu0 %v10255_v22  ;;  %v1005_v54 = vadd.f32 %v10210_v57, %v9962_v17 }
 0x232   :  { %1551 = vadd.xlane.f32.xlu1 %v1021_v26  ;;  %1581 = vadd.xlane.f32.xlu0 %v10259_v31  ;;  %v1026_v60 = vpop.f32.mrf.mxu0 }
 0x233   :  { %v1116_v1 = vpop.f32.mrf.mxu1  ;;  %v10272_v6 = vadd.f32 %v1392_v36, %v999_v25  ;;  %8416 = vpow2.f32 %v1295_v19  ;;  %v1027_v23 = vadd.f32 %v1026_v60, %v9951_v61  ;;  %v9282_v25 = vld [vmem:[%s13850_s0 + $0xc0] sm:$0xff]  ;;  %v1303_v60 = vmul.f32 1.442695, %v10073_v27 }
 0x234   :  { %v10276_v8 = vadd.f32 %v1116_v1, %v9951_v61  ;;  %v8411_v24 = vpop.eup %8410  ;;  %v10279_v49 = vpop.f32.mrf.mxu0  ;;  %v1011_v27 = vadd.f32 %v10227_v41, %v9962_v17 }
 0x235   :  { %v10281_v26 = vpop.f32.mrf.mxu1  ;;  %v1393_v36 = vmul.f32 %v9282_v25, %v8411_v24  ;;  %v1297_v19 = vmul.f32 1.442695, %v1027_v23  ;;  %7893 = vmatmul.mubr.f32.gmra.mxu0 %v10272_v6 }
 0x236   :  { %1583 = vadd.xlane.f32.xlu1 %v10276_v8  ;;  %1553 = vadd.xlane.f32.xlu0 %v1027_v23  ;;  %v1032_v15 = vpop.f32.mrf.mxu0  ;;  %v9283_v23 = vld [vmem:[%s13850_s0 + $0xc8] sm:$0xff] }
 0x237   :  { %v1122_v1 = vpop.f32.mrf.mxu1  ;;  %v10291_v22 = vadd.f32 %v1393_v36, %v1005_v54  ;;  %8418 = vpow2.f32 %v1297_v19  ;;  %v1033_v57 = vadd.f32 %v1032_v15, %v9951_v61 }
 0x238   :  { %v8413_v45 = vpop.eup %8412  ;;  %8420 = vpow2.f32 %v1301_v7  ;;  %v10296_v24 = vadd.f32 %v1122_v1, %v9951_v61 }
 0x239   :  { %v10298_v25 = vpop.f32.mrf.mxu1  ;;  %v1394_v54 = vmul.f32 %v9283_v23, %v8413_v45  ;;  %v1299_v36 = vmul.f32 1.442695, %v1033_v57  ;;  %7895 = vmatprep.mubr.f32.mxu0 %v10291_v22  ;;  %8422 = vpow2.f32 %v1303_v60  ;;  %v1309_v45 = vmul.f32 1.442695, %v10123_v2 }
 0x23a   :  { %1555 = vadd.xlane.f32.xlu1 %v1033_v57  ;;  %1585 = vadd.xlane.f32.xlu0 %v10296_v24  ;;  %v1017_v60 = vadd.f32 %v10244_v13, %v9962_v17  ;;  %v9284_v57 = vld [vmem:[%s13850_s0 + $0xd0] sm:$0xff]  ;;  %v1313_v13 = vmul.f32 1.442695, %v10157_v39  ;;  %v1315_v39 = vmul.f32 1.442695, %v10174_v50 }
 0x23b   :  { %v1128_v7 = vpop.f32.mrf.mxu1  ;;  %v10308_v19 = vadd.f32 %v1394_v54, %v1011_v27  ;;  %8424 = vpow2.f32 %v1299_v36  ;;  %v1321_v50 = vmul.f32 1.442695, %v10225_v35 }
 0x23c   :  { %v10311_v41 = vadd.f32 %v1128_v7, %v9951_v61  ;;  %v8415_v15 = vpop.eup %8414  ;;  %8426 = vpow2.f32 %v1305_v18  ;;  %v1311_v18 = vmul.f32 1.442695, %v10140_v20  ;;  %v1023_v7 = vadd.f32 %v10261_v0, %v9962_v17 }
 0x23d   :  { %13967 = vst [vmem:[#allocation19_spill] sm:$0xff] %v10308_v19  ;;  %v10314_v1 = vpop.f32.mrf.mxu1  ;;  %v1395_v37 = vmul.f32 %v9284_v57, %v8415_v15  ;;  %7896 = vmatmul.mubr.f32.gmra.mxu0 %v10308_v19  ;;  %8428 = vpow2.f32 %v1307_v46  ;;  %v9285_v46 = vld [vmem:[%s13850_s0 + $0xd8] sm:$0xff]  ;;  %v1317_v20 = vmul.f32 1.442695, %v10191_v3  ;;  %v9286_v3 = vld [vmem:[%s13850_s0 + $0xe0] sm:$0xff] }
 0x23e   :  { %1587 = vadd.xlane.f32.xlu1 %v10311_v41  ;;  %8430 = vpow2.f32 %v1309_v45 }
 0x23f   :  { %v1134_v27 = vpop.f32.mrf.mxu1  ;;  %v10324_v23 = vadd.f32 %v1395_v37, %v1017_v60  ;;  %8432 = vpow2.f32 %v1311_v18 }
 0x240   :  { %v10327_v2 = vadd.f32 %v1134_v27, %v9951_v61  ;;  %v8417_v54 = vpop.eup %8416  ;;  %8434 = vpow2.f32 %v1313_v13 }
 0x241   :  { %13968 = vst [vmem:[#allocation20_spill] sm:$0xff] %v10324_v23  ;;  %v10330_v36 = vpop.f32.mrf.mxu1  ;;  %v1396_v15 = vmul.f32 %v9285_v46, %v8417_v54  ;;  %7898 = vmatprep.mubr.f32.mxu0 %v10324_v23  ;;  %v1029_v54 = vadd.f32 %v10279_v49, %v9962_v17  ;;  %8436 = vpow2.f32 %v1317_v20  ;;  %v9287_v20 = vld [vmem:[%s13850_s0 + $0xf0] sm:$0xff] }
 0x242   :  { %1589 = vadd.xlane.f32.xlu0 %v10327_v2  ;;  %8438 = vpow2.f32 %v1315_v39  ;;  %v1323_v39 = vmul.f32 1.442695, %v10242_v12  ;;  %v9289_v12 = vld [vmem:[%s13850_s0 + $0xf8] sm:$0xff] }
 0x243   :  { %v1140_v60 = vpop.f32.mrf.mxu1  ;;  %v10341_v45 = vadd.f32 %v1396_v15, %v1023_v7  ;;  %v1034_v7 = vpop.f32.mrf.mxu0  ;;  %v1319_v15 = vmul.f32 1.442695, %v10208_v28  ;;  %8440 = vpow2.f32 %v1321_v50 }
 0x244   :  { %v10344_v57 = vadd.f32 %v1140_v60, %v9951_v61  ;;  %v8419_v0 = vpop.eup %8418  ;;  %v1035_v28 = vadd.f32 %v1034_v7, %v9962_v17 }
 0x245   :  { %13969 = vst [vmem:[#allocation21_spill] sm:$0xff] %v10341_v45  ;;  %v10346_v37 = vpop.f32.mrf.mxu1  ;;  %v8421_v27 = vpop.eup %8420  ;;  %v1397_v18 = vmul.f32 %v9286_v3, %v8419_v0  ;;  %7899 = vmatmul.mubr.f32.gmra.mxu0 %v10341_v45  ;;  %v1041_v0 = vadd.f32 %v10061_v21, %v9962_v17  ;;  %v1047_v21 = vadd.f32 %v10077_v40, %v9962_v17  ;;  %8442 = vpow2.f32 %v1319_v15 }
 0x246   :  { %1591 = vadd.xlane.f32.xlu1 %v10344_v57  ;;  %v8423_v46 = vpop.eup %8422  ;;  %v1399_v35 = vmul.f32 %v9287_v20, %v8421_v27  ;;  %v1325_v27 = vmul.f32 1.442695, %v10259_v31  ;;  %v1053_v40 = vadd.f32 %v10093_v53, %v9962_v17  ;;  %v9290_v31 = vld [vmem:[%s13850_s0 + $0x100] sm:$0xff]  ;;  %8444 = vpow2.f32 %v1323_v39  ;;  %v9291_v39 = vld [vmem:[%s13850_s0 + $0x108] sm:$0xff] }
 0x247   :  { %v1146_v13 = vpop.f32.mrf.mxu1  ;;  %v10357_v60 = vadd.f32 %v1397_v18, %v1029_v54  ;;  %v9288_v54 = vld [vmem:[%s13850_s0 + $0xe8] sm:$0xff]  ;;  %v1400_v7 = vmul.f32 %v9289_v12, %v8423_v46  ;;  %v1327_v15 = vmul.f32 1.442695, %v10276_v8 }
 0x248   :  { %v10360_v49 = vadd.f32 %v1146_v13, %v9951_v61  ;;  %v8425_v23 = vpop.eup %8424  ;;  %8446 = vpow2.f32 %v1325_v27 }
 0x249   :  { %13970 = vst [vmem:[#allocation22_spill] sm:$0xff] %v10357_v60  ;;  %v10367_v3 = vpop.f32.mrf.mxu1  ;;  %v8427_v45 = vpop.eup %8426  ;;  %v1398_v18 = vmul.f32 %v9288_v54, %v8425_v23  ;;  %7901 = vmatprep.mubr.f32.mxu0 %v10357_v60  ;;  %v10387_v60 = vadd.f32 %v1399_v35, %v1041_v0  ;;  %v1329_v0 = vmul.f32 1.442695, %v10296_v24  ;;  %v10401_v53 = vadd.f32 %v1400_v7, %v1047_v21  ;;  %v9292_v21 = vld [vmem:[%s13850_s0 + $0x110] sm:$0xff] }
 0x24a   :  { %1593 = vadd.xlane.f32.xlu0 %v10360_v49  ;;  %v8429_v54 = vpop.eup %8428  ;;  %v1401_v50 = vmul.f32 %v9290_v31, %v8427_v45  ;;  %v1059_v45 = vadd.f32 %v10110_v4, %v9962_v17  ;;  %v1065_v24 = vadd.f32 %v10127_v29, %v9962_v17  ;;  %8448 = vpow2.f32 %v1327_v15 }
 0x24b   :  { %v1152_v13 = vpop.f32.mrf.mxu1  ;;  %v10382_v20 = vadd.f32 %v1398_v18, %v1035_v28  ;;  %v8431_v46 = vpop.eup %8430  ;;  %v1402_v8 = vmul.f32 %v9291_v39, %v8429_v54  ;;  %v1331_v7 = vmul.f32 1.442695, %v10311_v41  ;;  %8450 = vpow2.f32 %v1329_v0 }
 0x24c   :  { %v10385_v23 = vadd.f32 %v1152_v13, %v9951_v61  ;;  %v8433_v18 = vpop.eup %8432  ;;  %v10409_v13 = vadd.f32 %v1401_v50, %v1053_v40  ;;  %v1403_v27 = vmul.f32 %v9292_v21, %v8431_v46  ;;  %v1333_v54 = vmul.f32 1.442695, %v10327_v2  ;;  %v9293_v46 = vld [vmem:[%s13850_s0 + $0x118] sm:$0xff] }
 0x24d   :  { %v10394_v19 = vpop.f32.mrf.mxu1  ;;  %7902 = vmatmul.mubr.f32.gmra.mxu0 %v10382_v20  ;;  %v8435_v4 = vpop.eup %8434  ;;  %v10422_v31 = vadd.f32 %v1402_v8, %v1059_v45  ;;  %v1071_v50 = vadd.f32 %v10144_v56, %v9962_v17  ;;  %v1404_v41 = vmul.f32 %v9293_v46, %v8433_v18  ;;  %v1077_v2 = vadd.f32 %v10161_v14, %v9962_v17  ;;  %v9294_v45 = vld [vmem:[%s13850_s0 + $0x120] sm:$0xff]  ;;  %v9295_v14 = vld [vmem:[%s13850_s0 + $0x130] sm:$0xff] }
 0x24e   :  { %1595 = vadd.xlane.f32.xlu1 %v10385_v23  ;;  %7904 = vmatprep.mubr.f32.mxu0 %v10387_v60  ;;  %v8437_v29 = vpop.eup %8436  ;;  %v10430_v0 = vadd.f32 %v1403_v27, %v1065_v24  ;;  %v1405_v39 = vmul.f32 %v9294_v45, %v8435_v4  ;;  %8452 = vpow2.f32 %v1331_v7  ;;  %v1335_v56 = vmul.f32 1.442695, %v10344_v57 }
 0x24f   :  { %v1158_v35 = vpop.f32.mrf.mxu1  ;;  %v1089_v18 = vadd.f32 %v10195_v9, %v9962_v17  ;;  %v1407_v24 = vmul.f32 %v9295_v14, %v8437_v29  ;;  %8454 = vpow2.f32 %v1333_v54  ;;  %v1337_v21 = vmul.f32 1.442695, %v10360_v49  ;;  %v9296_v9 = vld [vmem:[%s13850_s0 + $0x128] sm:$0xff] }
 0x250   :  { %v1159_v28 = vadd.f32 %v1158_v35, %v9951_v61  ;;  %v8439_v35 = vpop.eup %8438  ;;  %v10448_v7 = vadd.f32 %v1404_v41, %v1071_v50  ;;  %v1083_v57 = vadd.f32 %v10178_v47, %v9962_v17  ;;  %v10456_v54 = vadd.f32 %v1405_v39, %v1077_v2 }
 0x251   :  { %v10416_v12 = vpop.f32.mrf.mxu1  ;;  %7905 = vmatmul.mubr.f32.gmra.mxu0 %v10401_v53  ;;  %v8441_v4 = vpop.eup %8440  ;;  %v1101_v45 = vadd.f32 %v10229_v43, %v9962_v17  ;;  %8456 = vpow2.f32 %v1335_v56  ;;  %v1339_v50 = vmul.f32 1.442695, %v10385_v23  ;;  %v10464_v41 = vadd.f32 %v1407_v24, %v1089_v18  ;;  %v9298_v18 = vld [vmem:[%s13850_s0 + $0x138] sm:$0xff] }
 0x252   :  { %1597 = vadd.xlane.f32.xlu0 %v1159_v28  ;;  %7907 = vmatprep.mubr.f32.mxu0 %v10409_v13  ;;  %v8443_v29 = vpop.eup %8442  ;;  %8458 = vpow2.f32 %v1337_v21  ;;  %v1341_v39 = vmul.f32 1.442695, %v1159_v28  ;;  %v1095_v23 = vadd.f32 %v10212_v59, %v9962_v17  ;;  %v1107_v21 = vadd.f32 %v10246_v38, %v9962_v17  ;;  %v9300_v38 = vld [vmem:[%s13850_s0 + $0x150] sm:$0xff] }
 0x253   :  { %v1164_v40 = vpop.f32.mrf.mxu1  ;;  %v8445_v47 = vpop.eup %8444  ;;  %v1408_v24 = vmul.f32 %v9298_v18, %v8443_v29  ;;  %v1113_v59 = vadd.f32 %v10263_v55, %v9962_v17  ;;  %8460 = vpow2.f32 %v1339_v50  ;;  %v1119_v50 = vadd.f32 %v10281_v26, %v9962_v17  ;;  %v9302_v26 = vld [vmem:[%s13850_s0 + $0x160] sm:$0xff] }
 0x254   :  { %v1165_v15 = vadd.f32 %v1164_v40, %v9951_v61  ;;  %v1406_v40 = vmul.f32 %v9296_v9, %v8439_v35  ;;  %v9297_v35 = vld [vmem:[%s13850_s0 + $0x140] sm:$0xff]  ;;  %8462 = vpow2.f32 %v1341_v39 }
 0x255   :  { %v10437_v8 = vpop.f32.mrf.mxu1  ;;  %7908 = vmatmul.mubr.f32.gmra.mxu0 %v10422_v31  ;;  %v1409_v2 = vmul.f32 %v9297_v35, %v8441_v4  ;;  %v8447_v43 = vpop.eup %8446  ;;  %v9299_v4 = vld [vmem:[%s13850_s0 + $0x148] sm:$0xff]  ;;  %v10494_v55 = vadd.f32 %v1408_v24, %v1095_v23 }
 0x256   :  { %1599 = vadd.xlane.f32.xlu1 %v1165_v15  ;;  %7910 = vmatprep.mubr.f32.mxu0 %v10430_v0  ;;  %v10470_v56 = vadd.f32 %v1406_v40, %v1083_v57  ;;  %v1410_v57 = vmul.f32 %v9299_v4, %v8445_v47  ;;  %v1343_v9 = vmul.f32 1.442695, %v1165_v15  ;;  %v1411_v35 = vmul.f32 %v9300_v38, %v8447_v43 }
 0x257   :  { %v1170_v27 = vpop.f32.mrf.mxu1  ;;  %v8449_v40 = vpop.eup %8448  ;;  %v10488_v29 = vadd.f32 %v1409_v2, %v1101_v45  ;;  %v1125_v45 = vadd.f32 %v10298_v25, %v9962_v17 }
 0x258   :  { %v1171_v46 = vadd.f32 %v1170_v27, %v9951_v61  ;;  %v8451_v47 = vpop.eup %8450  ;;  %v10503_v4 = vadd.f32 %v1410_v57, %v1107_v21  ;;  %8464 = vpow2.f32 %v1343_v9  ;;  %v10509_v24 = vadd.f32 %v1411_v35, %v1113_v59  ;;  %v9303_v35 = vld [vmem:[%s13850_s0 + $0x168] sm:$0xff] }
 0x259   :  { %v10458_v49 = vpop.f32.mrf.mxu1  ;;  %7911 = vmatmul.mubr.f32.gmra.mxu0 %v10448_v7  ;;  %v1413_v25 = vmul.f32 %v9302_v26, %v8451_v47  ;;  %v1143_v26 = vadd.f32 %v10346_v37, %v9962_v17  ;;  %v1149_v37 = vadd.f32 %v10367_v3, %v9962_v17  ;;  %v9307_v3 = vld [vmem:[%s13850_s0 + $0x188] sm:$0xff] }
 0x25a   :  { %1601 = vadd.xlane.f32.xlu0 %v1171_v46  ;;  %7913 = vmatprep.mubr.f32.mxu0 %v10456_v54 }
 0x25b   :  { %v1176_v14 = vpop.f32.mrf.mxu1  ;;  %v8453_v23 = vpop.eup %8452 }
 0x25c   :  { %v1177_v27 = vadd.f32 %v1176_v14, %v9951_v61  ;;  %v1345_v14 = vmul.f32 1.442695, %v1171_v46  ;;  %v9301_v46 = vld [vmem:[%s13850_s0 + $0x158] sm:$0xff]  ;;  %v8455_v38 = vpop.eup %8454 }
 0x25d   :  { %v10480_v28 = vpop.f32.mrf.mxu1  ;;  %7914 = vmatmul.mubr.f32.gmra.mxu0 %v10470_v56  ;;  %v1412_v39 = vmul.f32 %v9301_v46, %v8449_v40 }
 0x25e   :  { %1603 = vadd.xlane.f32.xlu1 %v1177_v27  ;;  %7916 = vmatprep.mubr.f32.mxu0 %v10464_v41  ;;  %v1347_v43 = vmul.f32 1.442695, %v1177_v27  ;;  %8466 = vpow2.f32 %v1345_v14  ;;  %v1131_v27 = vadd.f32 %v10314_v1, %v9962_v17  ;;  %v8457_v47 = vpop.eup %8456  ;;  %v1137_v1 = vadd.f32 %v10330_v36, %v9962_v17  ;;  %v9305_v36 = vld [vmem:[%s13850_s0 + $0x178] sm:$0xff] }
 0x25f   :  { %v1182_v18 = vpop.f32.mrf.mxu1  ;;  %v10520_v59 = vadd.f32 %v1412_v39, %v1119_v50  ;;  %v9304_v50 = vld [vmem:[%s13850_s0 + $0x170] sm:$0xff] }
 0x260   :  { %v1183_v15 = vadd.f32 %v1182_v18, %v9951_v61  ;;  %v1414_v18 = vmul.f32 %v9303_v35, %v8453_v23  ;;  %8468 = vpow2.f32 %v1347_v43  ;;  %v1415_v46 = vmul.f32 %v9304_v50, %v8455_v38  ;;  %v8459_v43 = vpop.eup %8458 }
 0x261   :  { %v10501_v2 = vpop.f32.mrf.mxu1  ;;  %7917 = vmatmul.mubr.f32.gmra.mxu0 %v10494_v55  ;;  %v8461_v38 = vpop.eup %8460 }
 0x262   :  { %1605 = vadd.xlane.f32.xlu0 %v1183_v15  ;;  %v1349_v21 = vmul.f32 1.442695, %v1183_v15  ;;  %7919 = vmatprep.mubr.f32.mxu0 %v10488_v29  ;;  %v10526_v15 = vadd.f32 %v1413_v25, %v1125_v45  ;;  %v10539_v25 = vadd.f32 %v1414_v18, %v1131_v27  ;;  %v9306_v27 = vld [vmem:[%s13850_s0 + $0x180] sm:$0xff] }
 0x263   :  { %v1188_v57 = vpop.f32.mrf.mxu1  ;;  %v1417_v35 = vmul.f32 %v9306_v27, %v8459_v43 }
 0x264   :  { %v1189_v9 = vadd.f32 %v1188_v57, %v9951_v61  ;;  %8470 = vpow2.f32 %v1349_v21  ;;  %v1416_v57 = vmul.f32 %v9305_v36, %v8457_v47  ;;  %v8463_v47 = vpop.eup %8462 }
 0x265   :  { %v10518_v40 = vpop.f32.mrf.mxu1  ;;  %7920 = vmatmul.mubr.f32.gmra.mxu0 %v10503_v4  ;;  %v10564_v36 = vadd.f32 %v1417_v35, %v1149_v37  ;;  %v1167_v37 = vadd.f32 %v10437_v8, %v9962_v17 }
 0x266   :  { %v1351_v14 = vmul.f32 1.442695, %v1189_v9  ;;  %1607 = vadd.xlane.f32.xlu1 %v1189_v9  ;;  %7922 = vmatprep.mubr.f32.mxu0 %v10509_v24  ;;  %v10545_v9 = vadd.f32 %v1415_v46, %v1137_v1  ;;  %v1155_v1 = vadd.f32 %v10394_v19, %v9962_v17  ;;  %v1418_v46 = vmul.f32 %v9307_v3, %v8461_v38 }
 0x267   :  { %v1194_v39 = vpop.f32.mrf.mxu1 }
 0x268   :  { %v1195_v23 = vadd.f32 %v1194_v39, %v9951_v61  ;;  %8472 = vpow2.f32 %v1351_v14  ;;  %v10556_v39 = vadd.f32 %v1416_v57, %v1143_v26  ;;  %v9308_v26 = vld [vmem:[%s13850_s0 + $0x190] sm:$0xff] }
 0x269   :  { %v10537_v45 = vpop.f32.mrf.mxu1  ;;  %7923 = vmatmul.mubr.f32.gmra.mxu0 %v10520_v59  ;;  %v1419_v19 = vmul.f32 %v9308_v26, %v8463_v47  ;;  %v1173_v26 = vadd.f32 %v10458_v49, %v9962_v17  ;;  %v9311_v49 = vld [vmem:[%s13850_s0 + $0x1a8] sm:$0xff] }
 0x26a   :  { %v1353_v21 = vmul.f32 1.442695, %v1195_v23  ;;  %1609 = vadd.xlane.f32.xlu0 %v1195_v23  ;;  %7925 = vmatprep.mubr.f32.mxu0 %v10526_v15  ;;  %13971 = vst [vmem:[#allocation23_spill] sm:$0xff] %v10556_v39  ;;  %v8465_v23 = vpop.eup %8464 }
 0x26b   :  { %v1200_v18 = vpop.f32.mrf.mxu1  ;;  %v8467_v27 = vpop.eup %8466 }
 0x26c   :  { %8474 = vpow2.f32 %v1353_v21  ;;  %v1201_v14 = vadd.f32 %v1200_v18, %v9951_v61  ;;  %v1161_v21 = vadd.f32 %v10416_v12, %v9962_v17  ;;  %v9309_v12 = vld [vmem:[%s13850_s0 + $0x198] sm:$0xff] }
 0x26d   :  { %v10554_v50 = vpop.f32.mrf.mxu1  ;;  %7926 = vmatmul.mubr.f32.gmra.mxu0 %v10539_v25  ;;  %v1420_v35 = vmul.f32 %v9309_v12, %v8465_v23  ;;  %v8469_v3 = vpop.eup %8468 }
 0x26e   :  { %v1355_v43 = vmul.f32 1.442695, %v1201_v14  ;;  %1611 = vadd.xlane.f32.xlu1 %v1201_v14  ;;  %7928 = vmatprep.mubr.f32.mxu0 %v10545_v9  ;;  %v10575_v14 = vadd.f32 %v1418_v46, %v1155_v1  ;;  %v9310_v1 = vld [vmem:[%s13850_s0 + $0x1a0] sm:$0xff] }
 0x26f   :  { %v1206_v57 = vpop.f32.mrf.mxu1  ;;  %v1421_v8 = vmul.f32 %v9310_v1, %v8467_v27 }
 0x270   :  { %8476 = vpow2.f32 %v1355_v43  ;;  %v1207_v38 = vadd.f32 %v1206_v57, %v9951_v61  ;;  %13972 = vst [vmem:[#allocation24_spill] sm:$0xff] %v10575_v14  ;;  %v10583_v43 = vadd.f32 %v1419_v19, %v1161_v21  ;;  %v1179_v21 = vadd.f32 %v10480_v28, %v9962_v17 }
 0x271   :  { %v10573_v18 = vpop.f32.mrf.mxu1  ;;  %7929 = vmatmul.mubr.f32.gmra.mxu0 %v10556_v39  ;;  %v8471_v57 = vpop.eup %8470  ;;  %v1422_v19 = vmul.f32 %v9311_v49, %v8469_v3  ;;  %v10600_v1 = vadd.f32 %v1421_v8, %v1173_v26  ;;  %v1191_v26 = vadd.f32 %v10518_v40, %v9962_v17 }
 0x272   :  { %v1357_v47 = vmul.f32 1.442695, %v1207_v38  ;;  %1613 = vadd.xlane.f32.xlu0 %v1207_v38  ;;  %7931 = vmatprep.mubr.f32.mxu0 %v10564_v36  ;;  %v10592_v38 = vadd.f32 %v1420_v35, %v1167_v37  ;;  %v9312_v37 = vld [vmem:[%s13850_s0 + $0x1b0] sm:$0xff] }
 0x273   :  { %v1212_v46 = vpop.f32.mrf.mxu1  ;;  %v1423_v28 = vmul.f32 %v9312_v37, %v8471_v57 }
 0x274   :  { %8478 = vpow2.f32 %v1357_v47  ;;  %v1213_v23 = vadd.f32 %v1212_v46, %v9951_v61  ;;  %v1185_v47 = vadd.f32 %v10501_v2, %v9962_v17  ;;  %v9313_v2 = vld [vmem:[%s13850_s0 + $0x1b8] sm:$0xff] }
 0x275   :  { %v1214_v12 = vpop.f32.mrf.mxu1  ;;  %7932 = vmatmul.mubr.f32.gmra.mxu0 %v10575_v14  ;;  %v8473_v27 = vpop.eup %8472 }
 0x276   :  { %v1359_v39 = vmul.f32 1.442695, %v1213_v23  ;;  %1615 = vadd.xlane.f32.xlu1 %v1213_v23  ;;  %7934 = vmatprep.mubr.f32.mxu0 %v10583_v43  ;;  %v10609_v23 = vadd.f32 %v1422_v19, %v1179_v21  ;;  %v1424_v8 = vmul.f32 %v9313_v2, %v8473_v27  ;;  %v10617_v57 = vadd.f32 %v1423_v28, %v1185_v47  ;;  %v9314_v21 = vld [vmem:[%s13850_s0 + $0x1c0] sm:$0xff] }
 0x277   :  { %v1218_v35 = vpop.f32.mrf.mxu1  ;;  %v1203_v47 = vadd.f32 %v10554_v50, %v9962_v17 }
 0x278   :  { %8480 = vpow2.f32 %v1359_v39  ;;  %v1219_v3 = vadd.f32 %v1218_v35, %v9951_v61  ;;  %v1197_v39 = vadd.f32 %v10537_v45, %v9962_v17  ;;  %v10626_v2 = vadd.f32 %v1424_v8, %v1191_v26  ;;  %v9315_v45 = vld [vmem:[%s13850_s0 + $0x1c8] sm:$0xff] }
 0x279   :  { %v8475_v46 = vpop.eup %8474  ;;  %v1220_v49 = vpop.f32.mrf.mxu1  ;;  %7935 = vmatmul.mubr.f32.gmra.mxu0 %v10592_v38  ;;  %v1209_v26 = vadd.f32 %v10573_v18, %v9962_v17 }
 0x27a   :  { %v1361_v14 = vmul.f32 1.442695, %v1219_v3  ;;  %1617 = vadd.xlane.f32.xlu0 %v1219_v3  ;;  %v1425_v19 = vmul.f32 %v9314_v21, %v8475_v46  ;;  %7937 = vmatprep.mubr.f32.mxu0 %v10600_v1  ;;  %13973 = vst [vmem:[#allocation25_spill] sm:$0xff] %v10626_v2 }
 0x27b   :  { %v1224_v40 = vpop.f32.mrf.mxu1 }
 0x27c   :  { %8482 = vpow2.f32 %v1361_v14  ;;  %v1225_v27 = vadd.f32 %v1224_v40, %v9951_v61  ;;  %v10634_v46 = vadd.f32 %v1425_v19, %v1197_v39 }
 0x27d   :  { %v8477_v37 = vpop.eup %8476  ;;  %v1226_v35 = vpop.f32.mrf.mxu1  ;;  %7938 = vmatmul.mubr.f32.gmra.mxu0 %v10609_v23 }
 0x27e   :  { %v1426_v28 = vmul.f32 %v9315_v45, %v8477_v37  ;;  %v1363_v3 = vmul.f32 1.442695, %v1225_v27  ;;  %1619 = vadd.xlane.f32.xlu1 %v1225_v27  ;;  %13974 = vst [vmem:[#allocation26_spill] sm:$0xff] %v10634_v46  ;;  %7940 = vmatprep.mubr.f32.mxu0 %v10617_v57  ;;  %v9316_v37 = vld [vmem:[%s13850_s0 + $0x1d0] sm:$0xff]  ;;  %v1215_v45 = vadd.f32 %v1214_v12, %v9962_v17 }
 0x27f   :  { %v1230_v14 = vpop.f32.mrf.mxu1 }
 0x280   :  { %8484 = vpow2.f32 %v1363_v3  ;;  %v1231_v50 = vadd.f32 %v1230_v14, %v9951_v61  ;;  %v10640_v40 = vadd.f32 %v1426_v28, %v1203_v47  ;;  %v9317_v3 = vld [vmem:[%s13850_s0 + $0x1d8] sm:$0xff] }
 0x281   :  { %v8479_v8 = vpop.eup %8478  ;;  %v1232_v21 = vpop.f32.mrf.mxu1  ;;  %7941 = vmatmul.mubr.f32.gmra.mxu0 %v10626_v2 }
 0x282   :  { %13975 = vst [vmem:[#allocation27_spill] sm:$0xff] %v10640_v40  ;;  %v1427_v27 = vmul.f32 %v9316_v37, %v8479_v8  ;;  %v1365_v39 = vmul.f32 1.442695, %v1231_v50  ;;  %1621 = vadd.xlane.f32.xlu0 %v1231_v50  ;;  %7943 = vmatprep.mubr.f32.mxu0 %v10634_v46 }
 0x283   :  { %v1236_v19 = vpop.f32.mrf.mxu1 }
 0x284   :  { %v10647_v18 = vadd.f32 %v1427_v27, %v1209_v26  ;;  %8486 = vpow2.f32 %v1365_v39  ;;  %v1237_v47 = vadd.f32 %v1236_v19, %v9951_v61  ;;  %v1221_v26 = vadd.f32 %v1220_v49, %v9962_v17  ;;  %v9318_v61 = vld [vmem:[%s13850_s0 + $0x1e0] sm:$0xff] }
 0x285   :  { %v8481_v28 = vpop.eup %8480  ;;  %7944 = vmatmul.mubr.f32.gmra.mxu0 %v10640_v40  ;;  %v1227_v39 = vadd.f32 %v1226_v35, %v9962_v17  ;;  %v1238_v35 = vpop.f32.mrf.mxu1 }
 0x286   :  { %13976 = vst [vmem:[#allocation28_spill] sm:$0xff] %v10647_v18  ;;  %v1428_v14 = vmul.f32 %v9317_v3, %v8481_v28  ;;  %v1367_v8 = vmul.f32 1.442695, %v1237_v47  ;;  %1623 = vadd.xlane.f32.xlu1 %v1237_v47  ;;  %7946 = vmatprep.mubr.f32.mxu0 %v10647_v18  ;;  %v1233_v28 = vadd.f32 %v1232_v21, %v9962_v17 }
 0x288   :  { %v10656_v50 = vadd.f32 %v1428_v14, %v1215_v45  ;;  %8488 = vpow2.f32 %v1367_v8  ;;  %v9319_v45 = vld [vmem:[%s13850_s0 + $0x1e8] sm:$0xff]  ;;  %v9320_v14 = vld [vmem:[%s13850_s0 + $0x1f0] sm:$0xff] }
 0x289   :  { %v8483_v12 = vpop.eup %8482 }
 0x28a   :  { %13977 = vst [vmem:[#allocation29_spill] sm:$0xff] %v10656_v50  ;;  %v1429_v37 = vmul.f32 %v9318_v61, %v8483_v12  ;;  %7947 = vmatmul.mubr.f32.gmra.mxu0 %v10656_v50  ;;  %v1239_v61 = vadd.f32 %v1238_v35, %v9962_v17 }
 0x28c   :  { %v10663_v27 = vadd.f32 %v1429_v37, %v1221_v26  ;;  %v9321_v37 = vld [vmem:[%s13850_s0 + $0x1f8] sm:$0xff] }
 0x28d   :  { %v8485_v19 = vpop.eup %8484 }
 0x28e   :  { %13978 = vst [vmem:[#allocation30_spill] sm:$0xff] %v10663_v27  ;;  %v1430_v47 = vmul.f32 %v9319_v45, %v8485_v19  ;;  %7949 = vmatprep.mubr.f32.mxu0 %v10663_v27  ;;  %v10690_v45 = vld [vmem:[%s13853_s3 + $0x1] ss:$0 sm:$0xff] }
 0x290   :  { %v10670_v49 = vadd.f32 %v1430_v47, %v1227_v39 }
 0x291   :  { %v8487_v3 = vpop.eup %8486 }
 0x292   :  { %13979 = vst [vmem:[#allocation31_spill] sm:$0xff] %v10670_v49  ;;  %v1431_v8 = vmul.f32 %v9320_v14, %v8487_v3  ;;  %7950 = vmatmul.mubr.f32.gmra.mxu0 %v10670_v49 }
 0x294   :  { %v10677_v26 = vadd.f32 %v1431_v8, %v1233_v28 }
 0x295   :  { %v8489_v12 = vpop.eup %8488 }
 0x296   :  { %13980 = vst [vmem:[#allocation32_spill] sm:$0xff] %v10677_v26  ;;  %v1432_v39 = vmul.f32 %v9321_v37, %v8489_v12  ;;  %7952 = vmatprep.mubr.f32.mxu0 %v10677_v26 }
 0x298   :  { %v10684_v21 = vadd.f32 %v1432_v39, %v1239_v61 }
 0x29a   :  { %13981 = vst [vmem:[#allocation33_spill] sm:$0xff] %v10684_v21  ;;  %7953 = vmatmul.mubr.f32.gmra.mxu0 %v10684_v21 }
 0x29d   :  { %v7861_v19 = vpop.f32.mrf.mxu0 }
 0x29e   :  { %v1786_v28 = vadd.f32 %v7861_v19, %v10690_v45 }
 0x29f   :  { %v1780_v47 = vpop.f32.mrf.mxu0 }
 0x2a0   :  { %v1781_v17 = vadd.f32 %v10690_v45, %v1780_v47  ;;  %v13982_v47 = vmov 0.0  }
 0x2a2   :  { %8490 = vtanh.f32 %v1781_v17 }
 0x2a3   :  { %8492 = vtanh.f32 %v1786_v28  ;;  %v7164_v28 = vld [vmem:[%s13851_s1 + $0x178] sm:$0xff] }
 0x2a4   :  { %7955 = vmatprep.subr.mxu0 %v7164_v28 }
 0x2a5   :  { %v7864_v3 = vpop.f32.mrf.mxu0  ;;  %7956 = vmatpush3.msra.mxu0 %v7164_v28 }
 0x2a6   :  { %v1796_v35 = vadd.f32 %v7864_v3, %v10690_v45 }
 0x2a7   :  { %v1790_v14 = vpop.f32.mrf.mxu0 }
 0x2a8   :  { %v1791_v8 = vadd.f32 %v10690_v45, %v1790_v14 }
 0x2aa   :  { %8494 = vtanh.f32 %v1791_v8 }
 0x2ab   :  { %8496 = vtanh.f32 %v1796_v35 }
 0x2ad   :  { %v7867_v12 = vpop.f32.mrf.mxu0 }
 0x2ae   :  { %v1806_v19 = vadd.f32 %v7867_v12, %v10690_v45 }
 0x2af   :  { %v8491_v61 = vpop.eup %8490  ;;  %v1800_v37 = vpop.f32.mrf.mxu0 }
 0x2b0   :  { %v1801_v39 = vadd.f32 %v10690_v45, %v1800_v37  ;;  %7085 = vmatmul.mubr.msk.f32.vlgmr.msra.gmra.mxu1 %vm599_vm0, %v8491_v61  ;;  %v8493_v17 = vpop.eup %8492  ;;  %v7163_v37 = vld [vmem:[%s13851_s1 + $0x170] sm:$0xff] }
 0x2b1   :  { %2455 = vmatprep.mubr.f32.mxu1 %v13982_v47  ;;  %7957 = vmatprep.subr.mxu0 %v7163_v37 }
 0x2b2   :  { %8498 = vtanh.f32 %v1801_v39  ;;  %7958 = vmatpush3.msra.mxu0 %v7163_v37 }
 0x2b3   :  { %8500 = vtanh.f32 %v1806_v19 }
 0x2b4   :  { %7086 = vmatmul.mubr.msk.f32.gmra.mxu1 %vm599_vm0, %v8493_v17 }
 0x2b5   :  { %v7870_v3 = vpop.f32.mrf.mxu0  ;;  %2461 = vmatprep.mubr.f32.mxu1 %v13982_v47 }
 0x2b6   :  { %v1816_v12 = vadd.f32 %v7870_v3, %v10690_v45 }
 0x2b7   :  { %v8495_v14 = vpop.eup %8494  ;;  %v1810_v8 = vpop.f32.mrf.mxu0 }
 0x2b8   :  { %v1811_v35 = vadd.f32 %v10690_v45, %v1810_v8  ;;  %7087 = vmatmul.mubr.msk.f32.gmra.mxu1 %vm599_vm0, %v8495_v14  ;;  %v8497_v61 = vpop.eup %8496  ;;  %v7162_v8 = vld [vmem:[%s13851_s1 + $0x168] sm:$0xff] }
 0x2b9   :  { %2467 = vmatprep.mubr.f32.mxu1 %v13982_v47  ;;  %7959 = vmatprep.subr.mxu0 %v7162_v8 }
 0x2ba   :  { %8502 = vtanh.f32 %v1811_v35  ;;  %7960 = vmatpush3.msra.mxu0 %v7162_v8 }
 0x2bb   :  { %8504 = vtanh.f32 %v1816_v12 }
 0x2bc   :  { %7088 = vmatmul.mubr.msk.f32.gmra.mxu1 %vm599_vm0, %v8497_v61 }
 0x2bd   :  { %v7873_v39 = vpop.f32.mrf.mxu0  ;;  %2473 = vmatprep.mubr.f32.mxu1 %v13982_v47 }
 0x2be   :  { %v1826_v3 = vadd.f32 %v7873_v39, %v10690_v45 }
 0x2bf   :  { %v8499_v19 = vpop.eup %8498  ;;  %v1820_v17 = vpop.f32.mrf.mxu0 }
 0x2c0   :  { %v1821_v28 = vadd.f32 %v10690_v45, %v1820_v17  ;;  %7089 = vmatmul.mubr.msk.f32.gmra.mxu1 %vm599_vm0, %v8499_v19  ;;  %v8501_v14 = vpop.eup %8500  ;;  %v7161_v17 = vld [vmem:[%s13851_s1 + $0x160] sm:$0xff] }
 0x2c1   :  { %2479 = vmatprep.mubr.f32.mxu1 %v13982_v47  ;;  %7961 = vmatprep.subr.mxu0 %v7161_v17 }
 0x2c2   :  { %8506 = vtanh.f32 %v1821_v28  ;;  %7962 = vmatpush3.msra.mxu0 %v7161_v17 }
 0x2c3   :  { %8508 = vtanh.f32 %v1826_v3 }
 0x2c4   :  { %7090 = vmatmul.mubr.msk.f32.gmra.mxu1 %vm599_vm0, %v8501_v14 }
 0x2c5   :  { %2485 = vmatprep.mubr.f32.mxu1 %v13982_v47  ;;  %v7876_v35 = vpop.f32.mrf.mxu0 }
 0x2c6   :  { %v1836_v19 = vadd.f32 %v7876_v35, %v10690_v45 }
 0x2c7   :  { %v8503_v12 = vpop.eup %8502  ;;  %v1830_v61 = vpop.f32.mrf.mxu0 }
 0x2c8   :  { %7091 = vmatmul.mubr.msk.f32.gmra.mxu1 %vm599_vm0, %v8503_v12  ;;  %v1831_v37 = vadd.f32 %v10690_v45, %v1830_v61  ;;  %v8505_v39 = vpop.eup %8504 }
 0x2c9   :  { %2491 = vmatprep.mubr.f32.mxu1 %v13982_v47 }
 0x2ca   :  { %8510 = vtanh.f32 %v1831_v37  ;;  %v7160_v37 = vld [vmem:[%s13851_s1 + $0x158] sm:$0xff] }
 0x2cb   :  { %8512 = vtanh.f32 %v1836_v19  ;;  %7963 = vmatprep.subr.mxu0 %v7160_v37 }
 0x2cc   :  { %7092 = vmatmul.mubr.msk.f32.gmra.mxu1 %vm599_vm0, %v8505_v39  ;;  %7964 = vmatpush3.msra.mxu0 %v7160_v37 }
 0x2cd   :  { %2497 = vmatprep.mubr.f32.mxu1 %v13982_v47  ;;  %v7879_v28 = vpop.f32.mrf.mxu0 }
 0x2ce   :  { %v1846_v12 = vadd.f32 %v7879_v28, %v10690_v45 }
 0x2cf   :  { %v8507_v3 = vpop.eup %8506  ;;  %v1840_v14 = vpop.f32.mrf.mxu0 }
 0x2d0   :  { %7093 = vmatmul.mubr.msk.f32.gmra.mxu1 %vm599_vm0, %v8507_v3  ;;  %v1841_v8 = vadd.f32 %v10690_v45, %v1840_v14  ;;  %v8509_v35 = vpop.eup %8508 }
 0x2d1   :  { %2503 = vmatprep.mubr.f32.mxu1 %v13982_v47 }
 0x2d2   :  { %8514 = vtanh.f32 %v1841_v8  ;;  %v7159_v8 = vld [vmem:[%s13851_s1 + $0x150] sm:$0xff] }
 0x2d3   :  { %8516 = vtanh.f32 %v1846_v12  ;;  %7965 = vmatprep.subr.mxu0 %v7159_v8 }
 0x2d4   :  { %7094 = vmatmul.mubr.msk.f32.gmra.mxu1 %vm599_vm0, %v8509_v35  ;;  %7966 = vmatpush3.msra.mxu0 %v7159_v8 }
 0x2d5   :  { %2509 = vmatprep.mubr.f32.mxu1 %v13982_v47  ;;  %v7882_v61 = vpop.f32.mrf.mxu0 }
 0x2d6   :  { %v1856_v28 = vadd.f32 %v7882_v61, %v10690_v45  ;;  %v7158_v61 = vld [vmem:[%s13851_s1 + $0x148] sm:$0xff] }
 0x2d7   :  { %v8511_v39 = vpop.eup %8510  ;;  %v1850_v19 = vpop.f32.mrf.mxu0  ;;  %7967 = vmatprep.subr.mxu0 %v7158_v61 }
 0x2d8   :  { %v1851_v17 = vadd.f32 %v10690_v45, %v1850_v19  ;;  %7095 = vmatmul.mubr.msk.f32.gmra.mxu1 %vm599_vm0, %v8511_v39  ;;  %v8513_v3 = vpop.eup %8512  ;;  %7968 = vmatpush3.msra.mxu0 %v7158_v61 }
 0x2d9   :  { %2515 = vmatprep.mubr.f32.mxu1 %v13982_v47 }
 0x2da   :  { %8518 = vtanh.f32 %v1851_v17 }
 0x2db   :  { %8520 = vtanh.f32 %v1856_v28 }
 0x2dc   :  { %7096 = vmatmul.mubr.msk.f32.gmra.mxu1 %vm599_vm0, %v8513_v3 }
 0x2dd   :  { %v7885_v14 = vpop.f32.mrf.mxu0  ;;  %2521 = vmatprep.mubr.f32.mxu1 %v13982_v47 }
 0x2de   :  { %v1866_v39 = vadd.f32 %v7885_v14, %v10690_v45  ;;  %v7157_v14 = vld [vmem:[%s13851_s1 + $0x140] sm:$0xff] }
 0x2df   :  { %v8515_v35 = vpop.eup %8514  ;;  %v1860_v12 = vpop.f32.mrf.mxu0  ;;  %7969 = vmatprep.subr.mxu0 %v7157_v14 }
 0x2e0   :  { %v1861_v37 = vadd.f32 %v10690_v45, %v1860_v12  ;;  %7097 = vmatmul.mubr.msk.f32.gmra.mxu1 %vm599_vm0, %v8515_v35  ;;  %v8517_v19 = vpop.eup %8516  ;;  %7970 = vmatpush3.msra.mxu0 %v7157_v14 }
 0x2e1   :  { %2527 = vmatprep.mubr.f32.mxu1 %v13982_v47 }
 0x2e2   :  { %8522 = vtanh.f32 %v1861_v37 }
 0x2e3   :  { %8524 = vtanh.f32 %v1866_v39 }
 0x2e4   :  { %7098 = vmatmul.mubr.msk.f32.gmra.mxu1 %vm599_vm0, %v8517_v19 }
 0x2e5   :  { %v7888_v17 = vpop.f32.mrf.mxu0  ;;  %2533 = vmatprep.mubr.f32.mxu1 %v13982_v47 }
 0x2e6   :  { %v1876_v35 = vadd.f32 %v7888_v17, %v10690_v45 }
 0x2e7   :  { %v8519_v28 = vpop.eup %8518  ;;  %v1870_v3 = vpop.f32.mrf.mxu0 }
 0x2e8   :  { %v1871_v8 = vadd.f32 %v10690_v45, %v1870_v3  ;;  %7099 = vmatmul.mubr.msk.f32.gmra.mxu1 %vm599_vm0, %v8519_v28  ;;  %v8521_v12 = vpop.eup %8520 }
 0x2e9   :  { %2539 = vmatprep.mubr.f32.mxu1 %v13982_v47 }
 0x2ea   :  { %8526 = vtanh.f32 %v1871_v8 }
 0x2eb   :  { %8528 = vtanh.f32 %v1876_v35 }
 0x2ec   :  { %7100 = vmatmul.mubr.msk.f32.gmra.mxu1 %vm599_vm0, %v8521_v12 }
 0x2ed   :  { %v7891_v37 = vpop.f32.mrf.mxu0  ;;  %2545 = vmatprep.mubr.f32.mxu1 %v13982_v47 }
 0x2ee   :  { %v1886_v17 = vadd.f32 %v7891_v37, %v10690_v45  ;;  %v7156_v37 = vld [vmem:[%s13851_s1 + $0x138] sm:$0xff] }
 0x2ef   :  { %v8523_v61 = vpop.eup %8522  ;;  %v1880_v39 = vpop.f32.mrf.mxu0  ;;  %7971 = vmatprep.subr.mxu0 %v7156_v37 }
 0x2f0   :  { %v1881_v19 = vadd.f32 %v10690_v45, %v1880_v39  ;;  %7101 = vmatmul.mubr.msk.f32.gmra.mxu1 %vm599_vm0, %v8523_v61  ;;  %v8525_v28 = vpop.eup %8524  ;;  %7972 = vmatpush3.msra.mxu0 %v7156_v37 }
 0x2f1   :  { %2551 = vmatprep.mubr.f32.mxu1 %v13982_v47 }
 0x2f2   :  { %8530 = vtanh.f32 %v1881_v19  ;;  %v7155_v19 = vld [vmem:[%s13851_s1 + $0x130] sm:$0xff] }
 0x2f3   :  { %8532 = vtanh.f32 %v1886_v17  ;;  %7973 = vmatprep.subr.mxu0 %v7155_v19 }
 0x2f4   :  { %7102 = vmatmul.mubr.msk.f32.gmra.mxu1 %vm599_vm0, %v8525_v28  ;;  %7974 = vmatpush3.msra.mxu0 %v7155_v19  ;;  %v7154_v28 = vld [vmem:[%s13851_s1 + $0x128] sm:$0xff]  ;;  %v7151_v19 = vld [vmem:[%s13851_s1 + $0x110] sm:$0xff] }
 0x2f5   :  { %v7894_v3 = vpop.f32.mrf.mxu0  ;;  %2557 = vmatprep.mubr.f32.mxu1 %v13982_v47  ;;  %7975 = vmatprep.subr.mxu0 %v7154_v28 }
 0x2f6   :  { %v1896_v12 = vadd.f32 %v7894_v3, %v10690_v45  ;;  %7976 = vmatpush3.msra.mxu0 %v7154_v28 }
 0x2f7   :  { %v8527_v8 = vpop.eup %8526  ;;  %v1890_v14 = vpop.f32.mrf.mxu0 }
 0x2f8   :  { %v1891_v35 = vadd.f32 %v10690_v45, %v1890_v14  ;;  %7103 = vmatmul.mubr.msk.f32.gmra.mxu1 %vm599_vm0, %v8527_v8  ;;  %v8529_v61 = vpop.eup %8528  ;;  %v7153_v14 = vld [vmem:[%s13851_s1 + $0x120] sm:$0xff] }
 0x2f9   :  { %2563 = vmatprep.mubr.f32.mxu1 %v13982_v47  ;;  %7977 = vmatprep.subr.mxu0 %v7153_v14 }
 0x2fa   :  { %8534 = vtanh.f32 %v1891_v35  ;;  %7978 = vmatpush3.msra.mxu0 %v7153_v14 }
 0x2fb   :  { %8536 = vtanh.f32 %v1896_v12  ;;  %v7152_v12 = vld [vmem:[%s13851_s1 + $0x118] sm:$0xff] }
 0x2fc   :  { %7104 = vmatmul.mubr.msk.f32.gmra.mxu1 %vm599_vm0, %v8529_v61  ;;  %7979 = vmatprep.subr.mxu0 %v7152_v12 }
 0x2fd   :  { %v7897_v39 = vpop.f32.mrf.mxu0  ;;  %2569 = vmatprep.mubr.f32.mxu1 %v13982_v47  ;;  %7980 = vmatpush3.msra.mxu0 %v7152_v12 }
 0x2fe   :  { %v1906_v35 = vadd.f32 %v7897_v39, %v10690_v45  ;;  %7981 = vmatprep.subr.mxu0 %v7151_v19 }
 0x2ff   :  { %v1900_v17 = vpop.f32.mrf.mxu0  ;;  %v8531_v3 = vpop.eup %8530  ;;  %7982 = vmatpush3.msra.mxu0 %v7151_v19 }
 0x300   :  { %v1901_v8 = vadd.f32 %v10690_v45, %v1900_v17  ;;  %7105 = vmatmul.mubr.msk.f32.gmra.mxu1 %vm599_vm0, %v8531_v3  ;;  %v8533_v37 = vpop.eup %8532  ;;  %v7150_v17 = vld [vmem:[%s13851_s1 + $0x108] sm:$0xff] }
 0x301   :  { %2575 = vmatprep.mubr.f32.mxu1 %v13982_v47  ;;  %7983 = vmatprep.subr.mxu0 %v7150_v17 }
 0x302   :  { %8538 = vtanh.f32 %v1901_v8  ;;  %7984 = vmatpush3.msra.mxu0 %v7150_v17  ;;  %v7149_v8 = vld [vmem:[%s13851_s1 + $0x100] sm:$0xff] }
 0x303   :  { %8540 = vtanh.f32 %v1906_v35  ;;  %7985 = vmatprep.subr.mxu0 %v7149_v8 }
 0x304   :  { %7106 = vmatmul.mubr.msk.f32.gmra.mxu1 %vm599_vm0, %v8533_v37  ;;  %7986 = vmatpush3.msra.mxu0 %v7149_v8 }
 0x305   :  { %v7900_v61 = vpop.f32.mrf.mxu0  ;;  %2581 = vmatprep.mubr.f32.mxu1 %v13982_v47 }
 0x306   :  { %v1916_v14 = vadd.f32 %v7900_v61, %v10690_v45 }
 0x307   :  { %v1910_v39 = vpop.f32.mrf.mxu0  ;;  %v8535_v28 = vpop.eup %8534 }
 0x308   :  { %v1911_v3 = vadd.f32 %v10690_v45, %v1910_v39  ;;  %7107 = vmatmul.mubr.msk.f32.gmra.mxu1 %vm599_vm0, %v8535_v28  ;;  %v8537_v35 = vpop.eup %8536 }
 0x309   :  { %2587 = vmatprep.mubr.f32.mxu1 %v13982_v47 }
 0x30a   :  { %8542 = vtanh.f32 %v1911_v3 }
 0x30b   :  { %8544 = vtanh.f32 %v1916_v14 }
 0x30c   :  { %7108 = vmatmul.mubr.msk.f32.gmra.mxu1 %vm599_vm0, %v8537_v35 }
 0x30d   :  { %v7903_v12 = vpop.f32.mrf.mxu0  ;;  %2593 = vmatprep.mubr.f32.mxu1 %v13982_v47 }
 0x30e   :  { %v1926_v61 = vadd.f32 %v7903_v12, %v10690_v45 }
 0x30f   :  { %v8539_v37 = vpop.eup %8538  ;;  %v1920_v19 = vpop.f32.mrf.mxu0 }
 0x310   :  { %v1921_v39 = vadd.f32 %v10690_v45, %v1920_v19  ;;  %7109 = vmatmul.mubr.msk.f32.gmra.mxu1 %vm599_vm0, %v8539_v37  ;;  %v8541_v28 = vpop.eup %8540 }
 0x311   :  { %v7906_v17 = vpop.f32.mrf.mxu0  ;;  %2599 = vmatprep.mubr.f32.mxu1 %v13982_v47 }
 0x312   :  { %8546 = vtanh.f32 %v1921_v39  ;;  %v1936_v37 = vadd.f32 %v7906_v17, %v10690_v45 }
 0x313   :  { %v1930_v3 = vpop.f32.mrf.mxu0  ;;  %8548 = vtanh.f32 %v1926_v61 }
 0x314   :  { %7110 = vmatmul.mubr.msk.f32.gmra.mxu1 %vm599_vm0, %v8541_v28  ;;  %v1931_v14 = vadd.f32 %v10690_v45, %v1930_v3 }
 0x315   :  { %2605 = vmatprep.mubr.f32.mxu1 %v13982_v47  ;;  %v7909_v35 = vpop.f32.mrf.mxu0 }
 0x316   :  { %8550 = vtanh.f32 %v1931_v14  ;;  %v1946_v3 = vadd.f32 %v7909_v35, %v10690_v45 }
 0x317   :  { %v8543_v8 = vpop.eup %8542  ;;  %v1940_v12 = vpop.f32.mrf.mxu0  ;;  %8552 = vtanh.f32 %v1936_v37 }
 0x318   :  { %7111 = vmatmul.mubr.msk.f32.gmra.mxu1 %vm599_vm0, %v8543_v8  ;;  %v8545_v19 = vpop.eup %8544  ;;  %v1941_v61 = vadd.f32 %v10690_v45, %v1940_v12 }
 0x319   :  { %2611 = vmatprep.mubr.f32.mxu1 %v13982_v47  ;;  %v7912_v28 = vpop.f32.mrf.mxu0 }
 0x31a   :  { %8554 = vtanh.f32 %v1941_v61  ;;  %v1956_v12 = vadd.f32 %v7912_v28, %v10690_v45 }
 0x31b   :  { %v1950_v8 = vpop.f32.mrf.mxu0  ;;  %8556 = vtanh.f32 %v1946_v3 }
 0x31c   :  { %7112 = vmatmul.mubr.msk.f32.gmra.mxu1 %vm599_vm0, %v8545_v19  ;;  %v1951_v14 = vadd.f32 %v10690_v45, %v1950_v8 }
 0x31d   :  { %2617 = vmatprep.mubr.f32.mxu1 %v13982_v47  ;;  %v7915_v19 = vpop.f32.mrf.mxu0 }
 0x31e   :  { %8558 = vtanh.f32 %v1951_v14  ;;  %v1966_v8 = vadd.f32 %v7915_v19, %v10690_v45 }
 0x31f   :  { %v8547_v39 = vpop.eup %8546  ;;  %8560 = vtanh.f32 %v1956_v12 }
 0x320   :  { %7113 = vmatmul.mubr.msk.f32.gmra.mxu1 %vm599_vm0, %v8547_v39  ;;  %v8549_v17 = vpop.eup %8548  ;;  %v1960_v39 = vpop.f32.mrf.mxu0 }
 0x321   :  { %2623 = vmatprep.mubr.f32.mxu1 %v13982_v47  ;;  %v1961_v61 = vadd.f32 %v10690_v45, %v1960_v39 }
 0x323   :  { %v8551_v37 = vpop.eup %8550  ;;  %8562 = vtanh.f32 %v1961_v61 }
 0x324   :  { %7114 = vmatmul.mubr.msk.f32.gmra.mxu1 %vm599_vm0, %v8549_v17  ;;  %v8553_v35 = vpop.eup %8552  ;;  %v7918_v17 = vpop.f32.mrf.mxu0  ;;  %8564 = vtanh.f32 %v1966_v8 }
 0x325   :  { %2629 = vmatprep.mubr.f32.mxu1 %v13982_v47  ;;  %v1976_v39 = vadd.f32 %v7918_v17, %v10690_v45 }
 0x326   :  { %v1970_v14 = vpop.f32.mrf.mxu0 }
 0x327   :  { %v8555_v3 = vpop.eup %8554 }
 0x328   :  { %7115 = vmatmul.mubr.msk.f32.gmra.mxu1 %vm599_vm0, %v8551_v37  ;;  %v8557_v28 = vpop.eup %8556  ;;  %v1971_v37 = vadd.f32 %v10690_v45, %v1970_v14 }
 0x329   :  { %2635 = vmatprep.mubr.f32.mxu1 %v13982_v47 }
 0x32a   :  { %8566 = vtanh.f32 %v1971_v37 }
 0x32b   :  { %v8559_v12 = vpop.eup %8558  ;;  %8568 = vtanh.f32 %v1976_v39 }
 0x32c   :  { %7116 = vmatmul.mubr.msk.f32.gmra.mxu1 %vm599_vm0, %v8553_v35  ;;  %v7921_v35 = vpop.f32.mrf.mxu0  ;;  %v8561_v19 = vpop.eup %8560 }
 0x32d   :  { %2641 = vmatprep.mubr.f32.mxu1 %v13982_v47  ;;  %v1986_v14 = vadd.f32 %v7921_v35, %v10690_v45 }
 0x32e   :  { %v1980_v61 = vpop.f32.mrf.mxu0 }
 0x330   :  { %7117 = vmatmul.mubr.msk.f32.gmra.mxu1 %vm599_vm0, %v8555_v3  ;;  %v1981_v3 = vadd.f32 %v10690_v45, %v1980_v61  ;;  %v8563_v8 = vpop.eup %8562 }
 0x331   :  { %2647 = vmatprep.mubr.f32.mxu1 %v13982_v47  ;;  %v8565_v17 = vpop.eup %8564 }
 0x332   :  { %8570 = vtanh.f32 %v1981_v3 }
 0x333   :  { %8572 = vtanh.f32 %v1986_v14 }
 0x334   :  { %7118 = vmatmul.mubr.msk.f32.gmra.mxu1 %vm599_vm0, %v8557_v28  ;;  %v7924_v28 = vpop.f32.mrf.mxu0 }
 0x335   :  { %2653 = vmatprep.mubr.f32.mxu1 %v13982_v47  ;;  %v1996_v61 = vadd.f32 %v7924_v28, %v10690_v45 }
 0x336   :  { %v1990_v37 = vpop.f32.mrf.mxu0 }
 0x337   :  { %v8567_v39 = vpop.eup %8566 }
 0x338   :  { %7119 = vmatmul.mubr.msk.f32.gmra.mxu1 %vm599_vm0, %v8559_v12  ;;  %v1991_v12 = vadd.f32 %v10690_v45, %v1990_v37  ;;  %v8569_v35 = vpop.eup %8568 }
 0x339   :  { %2659 = vmatprep.mubr.f32.mxu1 %v13982_v47 }
 0x33a   :  { %8574 = vtanh.f32 %v1991_v12 }
 0x33b   :  { %8576 = vtanh.f32 %v1996_v61 }
 0x33c   :  { %7120 = vmatmul.mubr.msk.f32.gmra.mxu1 %vm599_vm0, %v8561_v19  ;;  %v7927_v19 = vpop.f32.mrf.mxu0 }
 0x33d   :  { %2665 = vmatprep.mubr.f32.mxu1 %v13982_v47  ;;  %v2006_v37 = vadd.f32 %v7927_v19, %v10690_v45 }
 0x33e   :  { %v2000_v3 = vpop.f32.mrf.mxu0 }
 0x33f   :  { %v8571_v14 = vpop.eup %8570 }
 0x340   :  { %7121 = vmatmul.mubr.msk.f32.gmra.mxu1 %vm599_vm0, %v8563_v8  ;;  %v2001_v8 = vadd.f32 %v10690_v45, %v2000_v3  ;;  %v8573_v28 = vpop.eup %8572 }
 0x341   :  { %2671 = vmatprep.mubr.f32.mxu1 %v13982_v47 }
 0x342   :  { %8578 = vtanh.f32 %v2001_v8 }
 0x343   :  { %8580 = vtanh.f32 %v2006_v37 }
 0x344   :  { %7122 = vmatmul.mubr.msk.f32.gmra.mxu1 %vm599_vm0, %v8565_v17  ;;  %v7930_v17 = vpop.f32.mrf.mxu0 }
 0x345   :  { %2677 = vmatprep.mubr.f32.mxu1 %v13982_v47  ;;  %v2016_v3 = vadd.f32 %v7930_v17, %v10690_v45 }
 0x346   :  { %v2010_v12 = vpop.f32.mrf.mxu0 }
 0x347   :  { %v8575_v61 = vpop.eup %8574 }
 0x348   :  { %7123 = vmatmul.mubr.msk.f32.gmra.mxu1 %vm599_vm0, %v8567_v39  ;;  %v2011_v39 = vadd.f32 %v10690_v45, %v2010_v12  ;;  %v8577_v19 = vpop.eup %8576 }
 0x349   :  { %2683 = vmatprep.mubr.f32.mxu1 %v13982_v47 }
 0x34a   :  { %8582 = vtanh.f32 %v2011_v39 }
 0x34b   :  { %8584 = vtanh.f32 %v2016_v3 }
 0x34c   :  { %7124 = vmatmul.mubr.msk.f32.gmra.mxu1 %vm599_vm0, %v8569_v35  ;;  %v7933_v35 = vpop.f32.mrf.mxu0 }
 0x34d   :  { %2689 = vmatprep.mubr.f32.mxu1 %v13982_v47  ;;  %v2026_v12 = vadd.f32 %v7933_v35, %v10690_v45  ;;  %v7084_v35 = vld [vmem:[%s13854_s4 + $0x2] sm:$0x3] }
 0x34e   :  { %v2020_v8 = vpop.f32.mrf.mxu0 }
 0x34f   :  { %v8579_v37 = vpop.eup %8578 }
 0x350   :  { %7125 = vmatmul.mubr.msk.f32.gmra.mxu1 %vm599_vm0, %v8571_v14  ;;  %v2021_v14 = vadd.f32 %v10690_v45, %v2020_v8  ;;  %v8581_v17 = vpop.eup %8580 }
 0x351   :  { %2695 = vmatprep.mubr.f32.mxu1 %v13982_v47 }
 0x352   :  { %8586 = vtanh.f32 %v2021_v14 }
 0x353   :  { %8588 = vtanh.f32 %v2026_v12  ;;  %v10891_v12 = vrot.slane %v7084_v35, %v9943_v58 }
 0x354   :  { %7126 = vmatmul.mubr.msk.f32.gmra.mxu1 %vm599_vm0, %v8573_v28  ;;  %v7936_v28 = vpop.f32.mrf.mxu0 }
 0x355   :  { %2701 = vmatprep.mubr.f32.mxu1 %v13982_v47  ;;  %v2036_v8 = vadd.f32 %v7936_v28, %v10690_v45 }
 0x356   :  { %v2030_v39 = vpop.f32.mrf.mxu0 }
 0x357   :  { %v8583_v3 = vpop.eup %8582 }
 0x358   :  { %7127 = vmatmul.mubr.msk.f32.gmra.mxu1 %vm599_vm0, %v8575_v61  ;;  %v2031_v61 = vadd.f32 %v10690_v45, %v2030_v39  ;;  %v8585_v14 = vpop.eup %8584 }
 0x359   :  { %2707 = vmatprep.mubr.f32.mxu1 %v13982_v47 }
 0x35a   :  { %8590 = vtanh.f32 %v2031_v61 }
 0x35b   :  { %8592 = vtanh.f32 %v2036_v8 }
 0x35c   :  { %7128 = vmatmul.mubr.msk.f32.gmra.mxu1 %vm599_vm0, %v8577_v19  ;;  %v7939_v19 = vpop.f32.mrf.mxu0 }
 0x35d   :  { %2713 = vmatprep.mubr.f32.mxu1 %v13982_v47  ;;  %v2046_v61 = vadd.f32 %v7939_v19, %v10690_v45 }
 0x35f   :  { %v8587_v39 = vpop.eup %8586 }
 0x360   :  { %7129 = vmatmul.mubr.msk.f32.gmra.mxu1 %vm599_vm0, %v8579_v37  ;;  %v2040_v37 = vpop.f32.mrf.mxu0  ;;  %v8589_v58 = vpop.eup %8588 }
 0x361   :  { %2719 = vmatprep.mubr.f32.mxu1 %v13982_v47 }
 0x364   :  { %7130 = vmatmul.mubr.msk.f32.gmra.mxu1 %vm599_vm0, %v8581_v17  ;;  %v2041_v17 = vadd.f32 %v10690_v45, %v2040_v37 }
 0x365   :  { %2725 = vmatprep.mubr.f32.mxu1 %v13982_v47 }
 0x366   :  { %8594 = vtanh.f32 %v2041_v17 }
 0x367   :  { %v8591_v19 = vpop.eup %8590 }
 0x368   :  { %7131 = vmatmul.mubr.msk.f32.gmra.mxu1 %vm599_vm0, %v8583_v3  ;;  %v7942_v3 = vpop.f32.mrf.mxu0 }
 0x369   :  { %2731 = vmatprep.mubr.f32.mxu1 %v13982_v47 }
 0x36a   :  { %v2050_v49 = vpop.f32.mrf.mxu0 }
 0x36c   :  { %7132 = vmatmul.mubr.msk.f32.gmra.mxu1 %vm599_vm0, %v8585_v14  ;;  %v7945_v17 = vpop.f32.mrf.mxu0 }
 0x36d   :  { %2737 = vmatprep.mubr.f32.mxu1 %v13982_v47 }
 0x370   :  { %v2451_v21 = vpop.f32.mrf.mxu1  ;;  %7133 = vmatmul.mubr.msk.f32.gmra.mxu1 %vm599_vm0, %v8587_v39 }
 0x371   :  { %v2452_v26 = vadd.f32 %v2451_v21, %v10891_v12  ;;  %2743 = vmatprep.mubr.f32.mxu1 %v13982_v47  ;;  %v2051_v21 = vadd.f32 %v10690_v45, %v2050_v49  ;;  %v8593_v49 = vpop.eup %8592 }
 0x372   :  { %v2453_v28 = vpop.f32.mrf.mxu1 }
 0x373   :  { %v2834_v14 = vmul.f32 1.442695, %v2452_v26  ;;  %3090 = vadd.xlane.f32.xlu0 %v2452_v26 }
 0x374   :  { %v2457_v8 = vpop.f32.mrf.mxu1  ;;  %7134 = vmatmul.mubr.msk.f32.gmra.mxu1 %vm599_vm0, %v8589_v58  ;;  %v2056_v58 = vadd.f32 %v7942_v3, %v10690_v45  ;;  %v10916_v3 = vrot.slane %v7084_v35, %v9958_v11 }
 0x375   :  { %8596 = vpow2.f32 %v2834_v14  ;;  %v2458_v37 = vadd.f32 %v2457_v8, %v10891_v12  ;;  %2749 = vmatprep.mubr.f32.mxu1 %v13982_v47  ;;  %v2060_v8 = vpop.f32.mrf.mxu0 }
 0x376   :  { %v2459_v27 = vpop.f32.mrf.mxu1  ;;  %8598 = vtanh.f32 %v2046_v61  ;;  %v2454_v35 = vadd.f32 %v2453_v28, %v10916_v3 }
 0x377   :  { %v2836_v39 = vmul.f32 1.442695, %v2458_v37  ;;  %3092 = vadd.xlane.f32.xlu1 %v2458_v37  ;;  %v2460_v28 = vadd.f32 %v2459_v27, %v10916_v3 }
 0x378   :  { %v2463_v50 = vpop.f32.mrf.mxu1  ;;  %7135 = vmatmul.mubr.msk.f32.gmra.mxu1 %vm599_vm0, %v8591_v19  ;;  %v8595_v19 = vpop.eup %8594 }
 0x379   :  { %8600 = vpow2.f32 %v2836_v39  ;;  %v2464_v26 = vadd.f32 %v2463_v50, %v10891_v12  ;;  %2755 = vmatprep.mubr.f32.mxu1 %v13982_v47  ;;  %v2061_v39 = vadd.f32 %v10690_v45, %v2060_v8 }
 0x37a   :  { %v10905_v14 = vpop.f32.mrf.mxu1  ;;  %8602 = vtanh.f32 %v2051_v21 }
 0x37b   :  { %v2838_v61 = vmul.f32 1.442695, %v2464_v26  ;;  %3094 = vadd.xlane.f32.xlu0 %v2464_v26  ;;  %v7948_v26 = vpop.f32.mrf.mxu0 }
 0x37c   :  { %v2469_v37 = vpop.f32.mrf.mxu1  ;;  %7136 = vmatmul.mubr.msk.f32.gmra.mxu1 %vm599_vm0, %v8593_v49 }
 0x37d   :  { %8604 = vpow2.f32 %v2838_v61  ;;  %v2470_v18 = vadd.f32 %v2469_v37, %v10891_v12  ;;  %2761 = vmatprep.mubr.f32.mxu1 %v13982_v47  ;;  %v2066_v37 = vadd.f32 %v7945_v17, %v10690_v45 }
 0x37e   :  { %v10911_v50 = vpop.f32.mrf.mxu1  ;;  %8606 = vtanh.f32 %v2056_v58 }
 0x37f   :  { %v2840_v21 = vmul.f32 1.442695, %v2470_v18  ;;  %3096 = vadd.xlane.f32.xlu1 %v2470_v18 }
 0x380   :  { %v2475_v40 = vpop.f32.mrf.mxu1  ;;  %7137 = vmatmul.mubr.msk.f32.gmra.mxu1 %vm599_vm0, %v8595_v19 }
 0x381   :  { %8608 = vpow2.f32 %v2840_v21  ;;  %v2476_v61 = vadd.f32 %v2475_v40, %v10891_v12  ;;  %2767 = vmatprep.mubr.f32.mxu1 %v13982_v47  ;;  %v2070_v21 = vpop.f32.mrf.mxu0 }
 0x382   :  { %v8597_v49 = vpop.eup %8596  ;;  %v10921_v46 = vpop.f32.mrf.mxu1  ;;  %8610 = vtanh.f32 %v2061_v39 }
 0x383   :  { %v2962_v18 = vmul.f32 %v8597_v49, %v9969_v32  ;;  %v2842_v58 = vmul.f32 1.442695, %v2476_v61  ;;  %3098 = vadd.xlane.f32.xlu0 %v2476_v61  ;;  %v8599_v8 = vpop.eup %8598  ;;  %v2071_v32 = vadd.f32 %v10690_v45, %v2070_v21 }
 0x384   :  { %v2481_v11 = vpop.f32.mrf.mxu1  ;;  %7138 = vmatmul.mubr.msk.f32.gmra.mxu1 %vm599_vm0, %v8599_v8  ;;  %v2076_v8 = vadd.f32 %v7948_v26, %v10690_v45 }
 0x385   :  { %v10926_v40 = vadd.f32 %v2962_v18, %v2454_v35  ;;  %8612 = vpow2.f32 %v2842_v58  ;;  %v2482_v19 = vadd.f32 %v2481_v11, %v10891_v12  ;;  %2773 = vmatprep.mubr.f32.mxu1 %v13982_v47  ;;  %v7951_v11 = vpop.f32.mrf.mxu0 }
 0x386   :  { %v8601_v17 = vpop.eup %8600  ;;  %8614 = vtanh.f32 %v2066_v37  ;;  %v10930_v2 = vpop.f32.mrf.mxu1 }
 0x387   :  { %v2963_v39 = vmul.f32 %v8601_v17, %v9977_v42  ;;  %v2844_v61 = vmul.f32 1.442695, %v2482_v19  ;;  %3100 = vadd.xlane.f32.xlu1 %v2482_v19  ;;  %7987 = vmatprep.mubr.f32.mxu0 %v10926_v40  ;;  %v8603_v49 = vpop.eup %8602  ;;  %v2466_v42 = vadd.f32 %v10905_v14, %v10916_v3  ;;  %v2472_v14 = vadd.f32 %v10911_v50, %v10916_v3 }
 0x388   :  { %v2487_v35 = vpop.f32.mrf.mxu1  ;;  %7139 = vmatmul.mubr.msk.f32.gmra.mxu1 %vm599_vm0, %v8603_v49 }
 0x389   :  { %v10937_v18 = vadd.f32 %v2963_v39, %v2460_v28  ;;  %8616 = vpow2.f32 %v2844_v61  ;;  %v2488_v37 = vadd.f32 %v2487_v35, %v10891_v12  ;;  %2779 = vmatprep.mubr.f32.mxu1 %v13982_v47  ;;  %v2080_v28 = vpop.f32.mrf.mxu0 }
 0x38a   :  { %v8605_v58 = vpop.eup %8604  ;;  %v10942_v27 = vpop.f32.mrf.mxu1  ;;  %8618 = vtanh.f32 %v2071_v32 }
 0x38b   :  { %v2964_v21 = vmul.f32 %v8605_v58, %v9985_v51  ;;  %v2846_v19 = vmul.f32 1.442695, %v2488_v37  ;;  %3102 = vadd.xlane.f32.xlu0 %v2488_v37  ;;  %7988 = vmatmul.mubr.f32.vlgmr.msra.gmra.mxu0 %v10937_v18  ;;  %v8607_v17 = vpop.eup %8606  ;;  %v2081_v51 = vadd.f32 %v10690_v45, %v2080_v28  ;;  %v2086_v28 = vadd.f32 %v7951_v11, %v10690_v45 }
 0x38c   :  { %v2493_v39 = vpop.f32.mrf.mxu1  ;;  %7140 = vmatmul.mubr.msk.f32.gmra.mxu1 %vm599_vm0, %v8607_v17 }
 0x38d   :  { %v10949_v61 = vadd.f32 %v2964_v21, %v2466_v42  ;;  %8620 = vpow2.f32 %v2846_v19  ;;  %v2494_v26 = vadd.f32 %v2493_v39, %v10891_v12  ;;  %2785 = vmatprep.mubr.f32.mxu1 %v13982_v47  ;;  %v7954_v42 = vpop.f32.mrf.mxu0  ;;  %v2478_v39 = vadd.f32 %v10921_v46, %v10916_v3 }
 0x38e   :  { %v8609_v32 = vpop.eup %8608  ;;  %8622 = vtanh.f32 %v2076_v8  ;;  %v10953_v49 = vpop.f32.mrf.mxu1  ;;  %v2484_v46 = vadd.f32 %v10930_v2, %v10916_v3  ;;  %v3771_v2 = vld [vmem:[#allocation2 + $0x170] sm:$0xff] }
 0x38f   :  { %v2965_v35 = vmul.f32 %v8609_v32, %v9993_v33  ;;  %v2848_v37 = vmul.f32 1.442695, %v2494_v26  ;;  %3104 = vadd.xlane.f32.xlu1 %v2494_v26  ;;  %7990 = vmatprep.mubr.f32.mxu0 %v10949_v61  ;;  %v8611_v58 = vpop.eup %8610 }
 0x390   :  { %v2499_v21 = vpop.f32.mrf.mxu1  ;;  %7141 = vmatmul.mubr.msk.f32.gmra.mxu1 %vm599_vm0, %v8611_v58 }
 0x391   :  { %v10961_v19 = vadd.f32 %v2965_v35, %v2472_v14  ;;  %8624 = vpow2.f32 %v2848_v37  ;;  %v2500_v8 = vadd.f32 %v2499_v21, %v10891_v12  ;;  %2791 = vmatprep.mubr.f32.mxu1 %v13982_v47  ;;  %v2090_v14 = vpop.f32.mrf.mxu0 }
 0x392   :  { %v8613_v17 = vpop.eup %8612  ;;  %v10966_v50 = vpop.f32.mrf.mxu1  ;;  %8626 = vtanh.f32 %v2081_v51 }
 0x393   :  { %v8615_v33 = vpop.eup %8614  ;;  %v2966_v26 = vmul.f32 %v8613_v17, %v10001_v5  ;;  %v2850_v32 = vmul.f32 1.442695, %v2500_v8  ;;  %3106 = vadd.xlane.f32.xlu0 %v2500_v8  ;;  %7991 = vmatmul.mubr.f32.gmra.mxu0 %v10961_v19  ;;  %v2091_v5 = vadd.f32 %v10690_v45, %v2090_v14  ;;  %v3772_v45 = vld [vmem:[#allocation2 + $0x178] sm:$0xff] }
 0x394   :  { %v2505_v35 = vpop.f32.mrf.mxu1  ;;  %7142 = vmatmul.mubr.msk.f32.gmra.mxu1 %vm599_vm0, %v8615_v33  ;;  %3994 = vmatprep.subr.mxu0 %v3772_v45 }
 0x395   :  { %v10973_v37 = vadd.f32 %v2966_v26, %v2478_v39  ;;  %8628 = vpow2.f32 %v2850_v32  ;;  %v2506_v11 = vadd.f32 %v2505_v35, %v10891_v12  ;;  %2797 = vmatprep.mubr.f32.mxu1 %v13982_v47  ;;  %v2490_v35 = vadd.f32 %v10942_v27, %v10916_v3  ;;  %3995 = vmatpush1.msra.mxu0 %v3771_v2 }
 0x396   :  { %v8617_v58 = vpop.eup %8616  ;;  %8630 = vtanh.f32 %v2086_v28  ;;  %v10977_v51 = vpop.f32.mrf.mxu1 }
 0x397   :  { %v2967_v21 = vmul.f32 %v8617_v58, %v10009_v16  ;;  %v2852_v8 = vmul.f32 1.442695, %v2506_v11  ;;  %3108 = vadd.xlane.f32.xlu1 %v2506_v11  ;;  %7993 = vmatprep.mubr.f32.mxu0 %v10973_v37  ;;  %v8619_v17 = vpop.eup %8618  ;;  %v9322_v16 = vld [vmem:[%s13853_s3 + $0x1] ss:$0 sm:$0xff] }
 0x398   :  { %v2511_v28 = vpop.f32.mrf.mxu1  ;;  %7143 = vmatmul.mubr.msk.f32.gmra.mxu1 %vm599_vm0, %v8619_v17  ;;  %v2096_v14 = vadd.f32 %v9322_v16, %v7954_v42 }
 0x399   :  { %v10985_v39 = vadd.f32 %v2967_v21, %v2484_v46  ;;  %8632 = vpow2.f32 %v2852_v8  ;;  %v2512_v26 = vadd.f32 %v2511_v28, %v10891_v12  ;;  %2803 = vmatprep.mubr.f32.mxu1 %v13982_v47 }
 0x39a   :  { %v8621_v33 = vpop.eup %8620  ;;  %8634 = vtanh.f32 %v2091_v5  ;;  %v2513_v58 = vpop.f32.mrf.mxu1 }
 0x39b   :  { %v8623_v32 = vpop.eup %8622  ;;  %v2968_v11 = vmul.f32 %v8621_v33, %v10017_v34  ;;  %7994 = vmatmul.mubr.f32.gmra.mxu0 %v10985_v39  ;;  %v2854_v46 = vmul.f32 1.442695, %v2512_v26  ;;  %3110 = vadd.xlane.f32.xlu0 %v2512_v26  ;;  %v2496_v34 = vadd.f32 %v10953_v49, %v10916_v3 }
 0x39c   :  { %v2517_v8 = vpop.f32.mrf.mxu1  ;;  %7144 = vmatmul.mubr.msk.f32.gmra.mxu1 %vm599_vm0, %v8623_v32 }
 0x39d   :  { %v10997_v21 = vadd.f32 %v2968_v11, %v2490_v35  ;;  %8636 = vpow2.f32 %v2854_v46  ;;  %v2518_v42 = vadd.f32 %v2517_v8, %v10891_v12  ;;  %2809 = vmatprep.mubr.f32.mxu1 %v13982_v47 }
 0x39e   :  { %v8625_v17 = vpop.eup %8624  ;;  %8638 = vtanh.f32 %v2096_v14  ;;  %v2519_v5 = vpop.f32.mrf.mxu1 }
 0x39f   :  { %v2969_v27 = vmul.f32 %v8625_v17, %v10025_v44  ;;  %7996 = vmatprep.mubr.f32.mxu0 %v10997_v21  ;;  %v8627_v28 = vpop.eup %8626  ;;  %v2856_v33 = vmul.f32 1.442695, %v2518_v42  ;;  %3112 = vadd.xlane.f32.xlu1 %v2518_v42  ;;  %v2502_v44 = vadd.f32 %v10966_v50, %v10916_v3  ;;  %v2508_v50 = vadd.f32 %v10977_v51, %v10916_v3  ;;  %v3769_v51 = vld [vmem:[#allocation2 + $0x160] sm:$0xff] }
 0x3a0   :  { %v2523_v45 = vpop.f32.mrf.mxu1  ;;  %7145 = vmatmul.mubr.msk.f32.gmra.mxu1 %vm599_vm0, %v8627_v28 }
 0x3a1   :  { %v11006_v26 = vadd.f32 %v2969_v27, %v2496_v34  ;;  %8640 = vpow2.f32 %v2856_v33  ;;  %v2524_v32 = vadd.f32 %v2523_v45, %v10891_v12  ;;  %2815 = vmatprep.mubr.f32.mxu1 %v13982_v47 }
 0x3a2   :  { %v8629_v2 = vpop.eup %8628  ;;  %v2525_v14 = vpop.f32.mrf.mxu1 }
 0x3a3   :  { %v8631_v49 = vpop.eup %8630  ;;  %v2970_v16 = vmul.f32 %v8629_v2, %v10033_v52  ;;  %7997 = vmatmul.mubr.f32.gmra.mxu0 %v11006_v26  ;;  %v2858_v35 = vmul.f32 1.442695, %v2524_v32  ;;  %3114 = vadd.xlane.f32.xlu0 %v2524_v32  ;;  %v3770_v2 = vld [vmem:[#allocation2 + $0x168] sm:$0xff] }
 0x3a4   :  { %v2529_v46 = vpop.f32.mrf.mxu1  ;;  %7146 = vmatmul.mubr.msk.f32.gmra.mxu1 %vm599_vm0, %v8631_v49  ;;  %3996 = vmatprep.subr.mxu0 %v3770_v2 }
 0x3a5   :  { %v11015_v11 = vadd.f32 %v2970_v16, %v2502_v44  ;;  %8642 = vpow2.f32 %v2858_v35  ;;  %v2530_v17 = vadd.f32 %v2529_v46, %v10891_v12  ;;  %2821 = vmatprep.mubr.f32.mxu1 %v13982_v47  ;;  %v2514_v44 = vadd.f32 %v2513_v58, %v10916_v3  ;;  %3997 = vmatpush1.msra.mxu0 %v3769_v51 }
 0x3a6   :  { %v8633_v8 = vpop.eup %8632  ;;  %v2531_v42 = vpop.f32.mrf.mxu1 }
 0x3a7   :  { %v2971_v52 = vmul.f32 %v8633_v8, %v10043_v62  ;;  %7999 = vmatprep.mubr.f32.mxu0 %v11015_v11  ;;  %v8635_v34 = vpop.eup %8634  ;;  %v2860_v27 = vmul.f32 1.442695, %v2530_v17  ;;  %3116 = vadd.xlane.f32.xlu1 %v2530_v17 }
 0x3a8   :  { %v2535_v33 = vpop.f32.mrf.mxu1  ;;  %7147 = vmatmul.mubr.msk.f32.gmra.mxu1 %vm599_vm0, %v8635_v34  ;;  %v2520_v34 = vadd.f32 %v2519_v5, %v10916_v3 }
 0x3a9   :  { %v11024_v28 = vadd.f32 %v2971_v52, %v2508_v50  ;;  %8644 = vpow2.f32 %v2860_v27  ;;  %v2536_v45 = vadd.f32 %v2535_v33, %v10891_v12  ;;  %2827 = vmatprep.mubr.f32.mxu1 %v13982_v47 }
 0x3aa   :  { %v8637_v32 = vpop.eup %8636  ;;  %v2537_v62 = vpop.f32.mrf.mxu1 }
 0x3ab   :  { %8000 = vmatmul.mubr.f32.gmra.mxu0 %v11024_v28  ;;  %v8639_v49 = vpop.eup %8638  ;;  %v2972_v16 = vmul.f32 %v8637_v32, %v10053_v10  ;;  %v2862_v35 = vmul.f32 1.442695, %v2536_v45  ;;  %3118 = vadd.xlane.f32.xlu0 %v2536_v45  ;;  %v2526_v32 = vadd.f32 %v2525_v14, %v10916_v3 }
 0x3ac   :  { %v2541_v46 = vpop.f32.mrf.mxu1  ;;  %7148 = vmatmul.mubr.msk.f32.gmra.mxu1 %vm599_vm0, %v8639_v49 }
 0x3ad   :  { %v11033_v8 = vadd.f32 %v2972_v16, %v2514_v44  ;;  %8646 = vpow2.f32 %v2862_v35  ;;  %v2542_v17 = vadd.f32 %v2541_v46, %v10891_v12 }
 0x3ae   :  { %v8641_v50 = vpop.eup %8640  ;;  %v2543_v52 = vpop.f32.mrf.mxu1 }
 0x3af   :  { %v2973_v27 = vmul.f32 %v8641_v50, %v10069_v30  ;;  %v2864_v58 = vmul.f32 1.442695, %v2542_v17  ;;  %3120 = vadd.xlane.f32.xlu1 %v2542_v17  ;;  %8002 = vmatprep.mubr.f32.mxu0 %v11033_v8  ;;  %v2532_v17 = vadd.f32 %v2531_v42, %v10916_v3  ;;  %v13983_v42 = vld [vmem:[#allocation10_spill] sm:$0xff] }
 0x3b0   :  { %v2547_v10 = vpop.f32.mrf.mxu1 }
 0x3b1   :  { %v11039_v33 = vadd.f32 %v2973_v27, %v2520_v34  ;;  %8648 = vpow2.f32 %v2864_v58  ;;  %v2548_v45 = vadd.f32 %v2547_v10, %v10891_v12  ;;  %v3768_v58 = vld [vmem:[#allocation2 + $0x158] sm:$0xff]  ;;  %v3767_v10 = vld [vmem:[#allocation2 + $0x150] sm:$0xff] }
 0x3b2   :  { %v8643_v2 = vpop.eup %8642  ;;  %v2549_v51 = vpop.f32.mrf.mxu1  ;;  %3998 = vmatprep.subr.mxu0 %v3768_v58 }
 0x3b3   :  { %v2974_v49 = vmul.f32 %v8643_v2, %v10085_v48  ;;  %v2866_v44 = vmul.f32 1.442695, %v2548_v45  ;;  %3122 = vadd.xlane.f32.xlu0 %v2548_v45  ;;  %8003 = vmatmul.mubr.f32.gmra.mxu0 %v11039_v33 }
 0x3b4   :  { %v2553_v30 = vpop.f32.mrf.mxu1  ;;  %3999 = vmatpush1.msra.mxu0 %v3767_v10 }
 0x3b5   :  { %v11045_v5 = vadd.f32 %v2974_v49, %v2526_v32  ;;  %8650 = vpow2.f32 %v2866_v44  ;;  %v2554_v16 = vadd.f32 %v2553_v30, %v10891_v12  ;;  %v2538_v32 = vadd.f32 %v2537_v62, %v10916_v3 }
 0x3b6   :  { %v8645_v35 = vpop.eup %8644  ;;  %v2555_v46 = vpop.f32.mrf.mxu1 }
 0x3b7   :  { %v2975_v50 = vmul.f32 %v8645_v35, %v10102_v63  ;;  %v2868_v34 = vmul.f32 1.442695, %v2554_v16  ;;  %3124 = vadd.xlane.f32.xlu1 %v2554_v16  ;;  %8005 = vmatprep.mubr.f32.mxu0 %v11045_v5 }
 0x3b8   :  { %v2559_v48 = vpop.f32.mrf.mxu1 }
 0x3b9   :  { %v11051_v14 = vadd.f32 %v2975_v50, %v2532_v17  ;;  %8652 = vpow2.f32 %v2868_v34  ;;  %v2560_v27 = vadd.f32 %v2559_v48, %v10891_v12  ;;  %v2544_v50 = vadd.f32 %v2543_v52, %v10916_v3  ;;  %v13985_v34 = vld [vmem:[#allocation11_spill] sm:$0xff] }
 0x3ba   :  { %v8647_v45 = vpop.eup %8646  ;;  %v2561_v2 = vpop.f32.mrf.mxu1 }
 0x3bb   :  { %v2976_v49 = vmul.f32 %v8647_v45, %v13983_v42  ;;  %v2870_v63 = vmul.f32 1.442695, %v2560_v27  ;;  %3126 = vadd.xlane.f32.xlu0 %v2560_v27  ;;  %8006 = vmatmul.mubr.f32.gmra.mxu0 %v11051_v14  ;;  %v2550_v42 = vadd.f32 %v2549_v51, %v10916_v3 }
 0x3bc   :  { %v2565_v44 = vpop.f32.mrf.mxu1 }
 0x3bd   :  { %v11057_v30 = vadd.f32 %v2976_v49, %v2538_v32  ;;  %8654 = vpow2.f32 %v2870_v63  ;;  %v2566_v16 = vadd.f32 %v2565_v44, %v10891_v12  ;;  %v13987_v49 = vld [vmem:[#allocation12_spill] sm:$0xff] }
 0x3be   :  { %v8649_v35 = vpop.eup %8648  ;;  %v2567_v17 = vpop.f32.mrf.mxu1 }
 0x3bf   :  { %13984 = vst [vmem:[#allocation10_spill] sm:$0xff] %v11057_v30  ;;  %v2977_v48 = vmul.f32 %v8649_v35, %v13985_v34  ;;  %v2872_v62 = vmul.f32 1.442695, %v2566_v16  ;;  %3128 = vadd.xlane.f32.xlu1 %v2566_v16  ;;  %8008 = vmatprep.mubr.f32.mxu0 %v11057_v30 }
 0x3c0   :  { %v2571_v27 = vpop.f32.mrf.mxu1 }
 0x3c1   :  { %v11063_v58 = vadd.f32 %v2977_v48, %v2544_v50  ;;  %8656 = vpow2.f32 %v2872_v62  ;;  %v2572_v10 = vadd.f32 %v2571_v27, %v10891_v12  ;;  %v2556_v48 = vadd.f32 %v2555_v46, %v10916_v3  ;;  %v13989_v62 = vld [vmem:[#allocation13_spill] sm:$0xff]  ;;  %v13991_v46 = vld [vmem:[#allocation14_spill] sm:$0xff] }
 0x3c2   :  { %v8651_v45 = vpop.eup %8650  ;;  %v2573_v32 = vpop.f32.mrf.mxu1 }
 0x3c3   :  { %13986 = vst [vmem:[#allocation11_spill] sm:$0xff] %v11063_v58  ;;  %v2978_v63 = vmul.f32 %v8651_v45, %v13987_v49  ;;  %v2874_v44 = vmul.f32 1.442695, %v2572_v10  ;;  %3130 = vadd.xlane.f32.xlu0 %v2572_v10  ;;  %8009 = vmatmul.mubr.f32.gmra.mxu0 %v11063_v58  ;;  %v3765_v49 = vld [vmem:[#allocation2 + $0x140] sm:$0xff] }
 0x3c4   :  { %v2577_v52 = vpop.f32.mrf.mxu1 }
 0x3c5   :  { %v11069_v16 = vadd.f32 %v2978_v63, %v2550_v42  ;;  %8658 = vpow2.f32 %v2874_v44  ;;  %v2578_v35 = vadd.f32 %v2577_v52, %v10891_v12  ;;  %v3766_v42 = vld [vmem:[#allocation2 + $0x148] sm:$0xff]  ;;  %v2562_v52 = vadd.f32 %v2561_v2, %v10916_v3 }
 0x3c6   :  { %v8653_v50 = vpop.eup %8652  ;;  %v2579_v34 = vpop.f32.mrf.mxu1  ;;  %4000 = vmatprep.subr.mxu0 %v3766_v42  ;;  %v13993_v42 = vld [vmem:[#allocation15_spill] sm:$0xff] }
 0x3c7   :  { %13988 = vst [vmem:[#allocation12_spill] sm:$0xff] %v11069_v16  ;;  %v2979_v27 = vmul.f32 %v8653_v50, %v13989_v62  ;;  %v2876_v30 = vmul.f32 1.442695, %v2578_v35  ;;  %3132 = vadd.xlane.f32.xlu1 %v2578_v35  ;;  %8011 = vmatprep.mubr.f32.mxu0 %v11069_v16 }
 0x3c8   :  { %v2583_v51 = vpop.f32.mrf.mxu1  ;;  %4001 = vmatpush1.msra.mxu0 %v3765_v49 }
 0x3c9   :  { %v11075_v10 = vadd.f32 %v2979_v27, %v2556_v48  ;;  %8660 = vpow2.f32 %v2876_v30  ;;  %v2584_v45 = vadd.f32 %v2583_v51, %v10891_v12  ;;  %v2568_v51 = vadd.f32 %v2567_v17, %v10916_v3 }
 0x3ca   :  { %v8655_v63 = vpop.eup %8654  ;;  %v2585_v44 = vpop.f32.mrf.mxu1 }
 0x3cb   :  { %13990 = vst [vmem:[#allocation13_spill] sm:$0xff] %v11075_v10  ;;  %v2980_v58 = vmul.f32 %v8655_v63, %v13991_v46  ;;  %v2878_v50 = vmul.f32 1.442695, %v2584_v45  ;;  %3134 = vadd.xlane.f32.xlu0 %v2584_v45  ;;  %8012 = vmatmul.mubr.f32.gmra.mxu0 %v11075_v10  ;;  %v2574_v46 = vadd.f32 %v2573_v32, %v10916_v3 }
 0x3cc   :  { %v2589_v35 = vpop.f32.mrf.mxu1 }
 0x3cd   :  { %v11081_v48 = vadd.f32 %v2980_v58, %v2562_v52  ;;  %8662 = vpow2.f32 %v2878_v50  ;;  %v2590_v30 = vadd.f32 %v2589_v35, %v10891_v12  ;;  %v13995_v50 = vld [vmem:[#allocation16_spill] sm:$0xff] }
 0x3ce   :  { %v8657_v62 = vpop.eup %8656  ;;  %v2591_v27 = vpop.f32.mrf.mxu1 }
 0x3cf   :  { %13992 = vst [vmem:[#allocation14_spill] sm:$0xff] %v11081_v48  ;;  %v2981_v16 = vmul.f32 %v8657_v62, %v13993_v42  ;;  %v2880_v2 = vmul.f32 1.442695, %v2590_v30  ;;  %3136 = vadd.xlane.f32.xlu1 %v2590_v30  ;;  %8014 = vmatprep.mubr.f32.mxu0 %v11081_v48  ;;  %v2580_v42 = vadd.f32 %v2579_v34, %v10916_v3  ;;  %v13997_v34 = vld [vmem:[#allocation18_spill] sm:$0xff] }
 0x3d0   :  { %v2595_v45 = vpop.f32.mrf.mxu1 }
 0x3d1   :  { %v11087_v63 = vadd.f32 %v2981_v16, %v2568_v51  ;;  %8664 = vpow2.f32 %v2880_v2  ;;  %v2596_v58 = vadd.f32 %v2595_v45, %v10891_v12  ;;  %v13996_v2 = vld [vmem:[#allocation17_spill] sm:$0xff] }
 0x3d2   :  { %v8659_v49 = vpop.eup %8658  ;;  %v2597_v52 = vpop.f32.mrf.mxu1 }
 0x3d3   :  { %13994 = vst [vmem:[#allocation15_spill] sm:$0xff] %v11087_v63  ;;  %v2982_v35 = vmul.f32 %v8659_v49, %v13995_v50  ;;  %v2882_v10 = vmul.f32 1.442695, %v2596_v58  ;;  %3138 = vadd.xlane.f32.xlu0 %v2596_v58  ;;  %8015 = vmatmul.mubr.f32.gmra.mxu0 %v11087_v63 }
 0x3d4   :  { %v2601_v17 = vpop.f32.mrf.mxu1 }
 0x3d5   :  { %v11093_v30 = vadd.f32 %v2982_v35, %v2574_v46  ;;  %8666 = vpow2.f32 %v2882_v10  ;;  %v2602_v16 = vadd.f32 %v2601_v17, %v10891_v12  ;;  %v3764_v46 = vld [vmem:[#allocation2 + $0x138] sm:$0xff]  ;;  %v3763_v10 = vld [vmem:[#allocation2 + $0x130] sm:$0xff]  ;;  %v2586_v17 = vadd.f32 %v2585_v44, %v10916_v3 }
 0x3d6   :  { %v8661_v62 = vpop.eup %8660  ;;  %v2603_v51 = vpop.f32.mrf.mxu1  ;;  %4002 = vmatprep.subr.mxu0 %v3764_v46 }
 0x3d7   :  { %v2983_v45 = vmul.f32 %v8661_v62, %v13996_v2  ;;  %v2884_v48 = vmul.f32 1.442695, %v2602_v16  ;;  %3140 = vadd.xlane.f32.xlu1 %v2602_v16  ;;  %8017 = vmatprep.mubr.f32.mxu0 %v11093_v30 }
 0x3d8   :  { %v2607_v32 = vpop.f32.mrf.mxu1  ;;  %4003 = vmatpush1.msra.mxu0 %v3763_v10 }
 0x3d9   :  { %v11099_v58 = vadd.f32 %v2983_v45, %v2580_v42  ;;  %8668 = vpow2.f32 %v2884_v48  ;;  %v2608_v49 = vadd.f32 %v2607_v32, %v10891_v12  ;;  %v2592_v32 = vadd.f32 %v2591_v27, %v10916_v3 }
 0x3da   :  { %v8663_v50 = vpop.eup %8662  ;;  %v2609_v35 = vpop.f32.mrf.mxu1 }
 0x3db   :  { %v2984_v63 = vmul.f32 %v8663_v50, %v13997_v34  ;;  %v2886_v62 = vmul.f32 1.442695, %v2608_v49  ;;  %3142 = vadd.xlane.f32.xlu0 %v2608_v49  ;;  %8018 = vmatmul.mubr.f32.gmra.mxu0 %v11099_v58  ;;  %v2598_v34 = vadd.f32 %v2597_v52, %v10916_v3 }
 0x3dc   :  { %v2613_v16 = vpop.f32.mrf.mxu1 }
 0x3dd   :  { %v11105_v42 = vadd.f32 %v2984_v63, %v2586_v17  ;;  %8670 = vpow2.f32 %v2886_v62  ;;  %v2614_v48 = vadd.f32 %v2613_v16, %v10891_v12 }
 0x3de   :  { %v8665_v2 = vpop.eup %8664  ;;  %v2615_v45 = vpop.f32.mrf.mxu1 }
 0x3df   :  { %13998 = vst [vmem:[#allocation16_spill] sm:$0xff] %v11105_v42  ;;  %v2985_v46 = vmul.f32 %v8665_v2, %v10272_v6  ;;  %v2888_v44 = vmul.f32 1.442695, %v2614_v48  ;;  %3144 = vadd.xlane.f32.xlu1 %v2614_v48  ;;  %8020 = vmatprep.mubr.f32.mxu0 %v11105_v42 }
 0x3e0   :  { %v2619_v49 = vpop.f32.mrf.mxu1 }
 0x3e1   :  { %v11111_v50 = vadd.f32 %v2985_v46, %v2592_v32  ;;  %8672 = vpow2.f32 %v2888_v44  ;;  %v2620_v63 = vadd.f32 %v2619_v49, %v10891_v12  ;;  %v2604_v46 = vadd.f32 %v2603_v51, %v10916_v3  ;;  %v14001_v44 = vld [vmem:[#allocation19_spill] sm:$0xff]  ;;  %v14003_v51 = vld [vmem:[#allocation20_spill] sm:$0xff] }
 0x3e2   :  { %v8667_v10 = vpop.eup %8666  ;;  %v2621_v17 = vpop.f32.mrf.mxu1 }
 0x3e3   :  { %13999 = vst [vmem:[#allocation17_spill] sm:$0xff] %v11111_v50  ;;  %v2986_v62 = vmul.f32 %v8667_v10, %v10291_v22  ;;  %v2890_v16 = vmul.f32 1.442695, %v2620_v63  ;;  %3146 = vadd.xlane.f32.xlu0 %v2620_v63  ;;  %8021 = vmatmul.mubr.f32.gmra.mxu0 %v11111_v50  ;;  %v3762_v10 = vld [vmem:[#allocation2 + $0x128] sm:$0xff] }
 0x3e4   :  { %v2625_v6 = vpop.f32.mrf.mxu1  ;;  %4004 = vmatprep.subr.mxu0 %v3762_v10  ;;  %v14004_v10 = vld [vmem:[#allocation21_spill] sm:$0xff] }
 0x3e5   :  { %v11117_v27 = vadd.f32 %v2986_v62, %v2598_v34  ;;  %8674 = vpow2.f32 %v2890_v16  ;;  %v2626_v48 = vadd.f32 %v2625_v6, %v10891_v12  ;;  %v3761_v34 = vld [vmem:[#allocation2 + $0x120] sm:$0xff]  ;;  %v2610_v6 = vadd.f32 %v2609_v35, %v10916_v3 }
 0x3e6   :  { %v8669_v2 = vpop.eup %8668  ;;  %v2627_v32 = vpop.f32.mrf.mxu1  ;;  %4005 = vmatpush1.msra.mxu0 %v3761_v34 }
 0x3e7   :  { %14000 = vst [vmem:[#allocation18_spill] sm:$0xff] %v11117_v27  ;;  %v2987_v49 = vmul.f32 %v8669_v2, %v14001_v44  ;;  %v2892_v42 = vmul.f32 1.442695, %v2626_v48  ;;  %3148 = vadd.xlane.f32.xlu1 %v2626_v48  ;;  %8023 = vmatprep.mubr.f32.mxu0 %v11117_v27 }
 0x3e8   :  { %v2631_v22 = vpop.f32.mrf.mxu1 }
 0x3e9   :  { %v11123_v52 = vadd.f32 %v2987_v49, %v2604_v46  ;;  %8676 = vpow2.f32 %v2892_v42  ;;  %v2632_v63 = vadd.f32 %v2631_v22, %v10891_v12  ;;  %v2616_v22 = vadd.f32 %v2615_v45, %v10916_v3 }
 0x3ea   :  { %v8671_v62 = vpop.eup %8670  ;;  %v2633_v16 = vpop.f32.mrf.mxu1 }
 0x3eb   :  { %14002 = vst [vmem:[#allocation19_spill] sm:$0xff] %v11123_v52  ;;  %v2988_v50 = vmul.f32 %v8671_v62, %v14003_v51  ;;  %v2894_v2 = vmul.f32 1.442695, %v2632_v63  ;;  %3150 = vadd.xlane.f32.xlu0 %v2632_v63  ;;  %8024 = vmatmul.mubr.f32.gmra.mxu0 %v11123_v52  ;;  %v2622_v51 = vadd.f32 %v2621_v17, %v10916_v3 }
 0x3ec   :  { %v2637_v48 = vpop.f32.mrf.mxu1 }
 0x3ed   :  { %v11129_v46 = vadd.f32 %v2988_v50, %v2610_v6  ;;  %8678 = vpow2.f32 %v2894_v2  ;;  %v2638_v42 = vadd.f32 %v2637_v48, %v10891_v12  ;;  %v14005_v2 = vld [vmem:[#allocation22_spill] sm:$0xff] }
 0x3ee   :  { %v8673_v44 = vpop.eup %8672  ;;  %v2639_v49 = vpop.f32.mrf.mxu1 }
 0x3ef   :  { %v2989_v27 = vmul.f32 %v8673_v44, %v14004_v10  ;;  %v2896_v35 = vmul.f32 1.442695, %v2638_v42  ;;  %3152 = vadd.xlane.f32.xlu1 %v2638_v42  ;;  %8026 = vmatprep.mubr.f32.mxu0 %v11129_v46  ;;  %v2628_v10 = vadd.f32 %v2627_v32, %v10916_v3  ;;  %v2634_v32 = vadd.f32 %v2633_v16, %v10916_v3 }
 0x3f0   :  { %v2643_v63 = vpop.f32.mrf.mxu1 }
 0x3f1   :  { %v11135_v62 = vadd.f32 %v2989_v27, %v2616_v22  ;;  %8680 = vpow2.f32 %v2896_v35  ;;  %v2644_v50 = vadd.f32 %v2643_v63, %v10891_v12 }
 0x3f2   :  { %v8675_v34 = vpop.eup %8674  ;;  %v2645_v6 = vpop.f32.mrf.mxu1 }
 0x3f3   :  { %v2990_v48 = vmul.f32 %v8675_v34, %v14005_v2  ;;  %v2898_v52 = vmul.f32 1.442695, %v2644_v50  ;;  %3154 = vadd.xlane.f32.xlu0 %v2644_v50  ;;  %8027 = vmatmul.mubr.f32.gmra.mxu0 %v11135_v62 }
 0x3f4   :  { %v2649_v45 = vpop.f32.mrf.mxu1 }
 0x3f5   :  { %v11141_v42 = vadd.f32 %v2990_v48, %v2622_v51  ;;  %8682 = vpow2.f32 %v2898_v52  ;;  %v2650_v27 = vadd.f32 %v2649_v45, %v10891_v12  ;;  %v3760_v51 = vld [vmem:[#allocation2 + $0x118] sm:$0xff]  ;;  %v3759_v52 = vld [vmem:[#allocation2 + $0x110] sm:$0xff]  ;;  %v11150_v45 = vpop.xlane.xlu0 %1497 }
 0x3f6   :  { %v8677_v44 = vpop.eup %8676  ;;  %v2651_v22 = vpop.f32.mrf.mxu1  ;;  %4006 = vmatprep.subr.mxu0 %v3760_v51  ;;  %14006 = vst [vmem:[#allocation20_spill] sm:$0xff] %v11150_v45  ;;  %v2640_v45 = vadd.f32 %v2639_v49, %v10916_v3  ;;  %v2646_v49 = vadd.f32 %v2645_v6, %v10916_v3 }
 0x3f7   :  { %v2991_v35 = vmul.f32 %v8677_v44, %v10382_v20  ;;  %v2900_v63 = vmul.f32 1.442695, %v2650_v27  ;;  %3156 = vadd.xlane.f32.xlu1 %v2650_v27  ;;  %8029 = vmatprep.mubr.f32.mxu0 %v11141_v42  ;;  %v11158_v51 = vpop.xlane.xlu1 %1501 }
 0x3f8   :  { %v2655_v17 = vpop.f32.mrf.mxu1  ;;  %4007 = vmatpush1.msra.mxu0 %v3759_v52  ;;  %14007 = vst [vmem:[#allocation21_spill] sm:$0xff] %v11158_v51 }
 0x3f9   :  { %v11147_v50 = vadd.f32 %v2991_v35, %v2628_v10  ;;  %8684 = vpow2.f32 %v2900_v63  ;;  %v2656_v34 = vadd.f32 %v2655_v17, %v10891_v12  ;;  %v11166_v51 = vpop.xlane.xlu0 %1499 }
 0x3fa   :  { %v8679_v2 = vpop.eup %8678  ;;  %v2657_v48 = vpop.f32.mrf.mxu1  ;;  %14008 = vst [vmem:[#allocation22_spill] sm:$0xff] %v11166_v51  ;;  %v2652_v51 = vadd.f32 %v2651_v22, %v10916_v3 }
 0x3fb   :  { %v2992_v20 = vmul.f32 %v8679_v2, %v10387_v60  ;;  %v2902_v27 = vmul.f32 1.442695, %v2656_v34  ;;  %3158 = vadd.xlane.f32.xlu0 %v2656_v34  ;;  %8030 = vmatmul.mubr.f32.gmra.mxu0 %v11147_v50 }
 0x3fc   :  { %v2661_v44 = vpop.f32.mrf.mxu1 }
 0x3fd   :  { %v11155_v10 = vadd.f32 %v2992_v20, %v2634_v32  ;;  %8686 = vpow2.f32 %v2902_v27  ;;  %v2662_v35 = vadd.f32 %v2661_v44, %v10891_v12  ;;  %v3758_v32 = vld [vmem:[#allocation2 + $0x108] sm:$0xff]  ;;  %v3757_v20 = vld [vmem:[#allocation2 + $0x100] sm:$0xff]  ;;  %v11185_v22 = vpop.xlane.xlu0 %1505 }
 0x3fe   :  { %v8681_v63 = vpop.eup %8680  ;;  %v2663_v17 = vpop.f32.mrf.mxu1  ;;  %4008 = vmatprep.subr.mxu0 %v3758_v32  ;;  %14010 = vst [vmem:[#allocation35_spill] sm:$0xff] %v11185_v22 }
 0x3ff   :  { %v2993_v16 = vmul.f32 %v8681_v63, %v10401_v53  ;;  %v2904_v60 = vmul.f32 1.442695, %v2662_v35  ;;  %3160 = vadd.xlane.f32.xlu1 %v2662_v35  ;;  %8032 = vmatprep.mubr.f32.mxu0 %v11155_v10  ;;  %v11174_v32 = vpop.xlane.xlu1 %1503  ;;  %v2664_v22 = vadd.f32 %v2663_v17, %v10916_v3 }
 0x400   :  { %v2667_v34 = vpop.f32.mrf.mxu1  ;;  %4009 = vmatpush1.msra.mxu0 %v3757_v20  ;;  %14009 = vst [vmem:[#allocation34_spill] sm:$0xff] %v11174_v32 }
 0x401   :  { %v11163_v2 = vadd.f32 %v2993_v16, %v2640_v45  ;;  %8688 = vpow2.f32 %v2904_v60  ;;  %v2668_v52 = vadd.f32 %v2667_v34, %v10891_v12 }
 0x402   :  { %v8683_v27 = vpop.eup %8682  ;;  %v2669_v44 = vpop.f32.mrf.mxu1 }
 0x403   :  { %v2994_v53 = vmul.f32 %v8683_v27, %v10409_v13  ;;  %v2906_v35 = vmul.f32 1.442695, %v2668_v52  ;;  %3162 = vadd.xlane.f32.xlu0 %v2668_v52  ;;  %8033 = vmatmul.mubr.f32.gmra.mxu0 %v11163_v2  ;;  %v11193_v32 = vpop.xlane.xlu1 %1507 }
 0x404   :  { %v2673_v45 = vpop.f32.mrf.mxu1  ;;  %14011 = vst [vmem:[#allocation36_spill] sm:$0xff] %v11193_v32 }
 0x405   :  { %v11171_v63 = vadd.f32 %v2994_v53, %v2646_v49  ;;  %8690 = vpow2.f32 %v2906_v35  ;;  %v2674_v16 = vadd.f32 %v2673_v45, %v10891_v12  ;;  %v7247_v49 = vld [vmem:[%s13851_s1 + $0x1f8] sm:$0xff] }
 0x406   :  { %v8685_v60 = vpop.eup %8684  ;;  %v2675_v34 = vpop.f32.mrf.mxu1  ;;  %8083 = vmatprep.subr.mxu1 %v7247_v49 }
 0x407   :  { %v2995_v6 = vmul.f32 %v8685_v60, %v10422_v31  ;;  %v2908_v13 = vmul.f32 1.442695, %v2674_v16  ;;  %3164 = vadd.xlane.f32.xlu1 %v2674_v16  ;;  %8035 = vmatprep.mubr.f32.mxu0 %v11171_v63  ;;  %v2658_v31 = vadd.f32 %v2657_v48, %v10916_v3 }
 0x408   :  { %v2679_v52 = vpop.f32.mrf.mxu1  ;;  %8084 = vmatpush3.msra.mxu1 %v7247_v49 }
 0x409   :  { %v11179_v27 = vadd.f32 %v2995_v6, %v2652_v51  ;;  %8692 = vpow2.f32 %v2908_v13  ;;  %v2680_v20 = vadd.f32 %v2679_v52, %v10891_v12 }
 0x40a   :  { %v8687_v53 = vpop.eup %8686  ;;  %v2681_v35 = vpop.f32.mrf.mxu1 }
 0x40b   :  { %v2996_v45 = vmul.f32 %v8687_v53, %v10430_v0  ;;  %v2910_v16 = vmul.f32 1.442695, %v2680_v20  ;;  %3166 = vadd.xlane.f32.xlu0 %v2680_v20  ;;  %8036 = vmatmul.mubr.f32.gmra.mxu0 %v11179_v27 }
 0x40c   :  { %v2685_v51 = vpop.f32.mrf.mxu1 }
 0x40d   :  { %v11190_v60 = vadd.f32 %v2996_v45, %v2658_v31  ;;  %8694 = vpow2.f32 %v2910_v16  ;;  %v2686_v6 = vadd.f32 %v2685_v51, %v10891_v12  ;;  %v11201_v16 = vpop.xlane.xlu0 %1509  ;;  %v2670_v51 = vadd.f32 %v2669_v44, %v10916_v3 }
 0x40e   :  { %v8689_v13 = vpop.eup %8688  ;;  %v2687_v52 = vpop.f32.mrf.mxu1  ;;  %14012 = vst [vmem:[#allocation37_spill] sm:$0xff] %v11201_v16 }
 0x40f   :  { %v2997_v48 = vmul.f32 %v8689_v13, %v10448_v7  ;;  %v2912_v0 = vmul.f32 1.442695, %v2686_v6  ;;  %3168 = vadd.xlane.f32.xlu1 %v2686_v6  ;;  %8038 = vmatprep.mubr.f32.mxu0 %v11190_v60 }
 0x410   :  { %v2691_v20 = vpop.f32.mrf.mxu1 }
 0x411   :  { %v11198_v53 = vadd.f32 %v2997_v48, %v2664_v22  ;;  %8696 = vpow2.f32 %v2912_v0  ;;  %v2692_v49 = vadd.f32 %v2691_v20, %v10891_v12  ;;  %v11209_v0 = vpop.xlane.xlu1 %1511  ;;  %v2676_v20 = vadd.f32 %v2675_v34, %v10916_v3  ;;  %v11220_v34 = vpop.xlane.xlu0 %1513 }
 0x412   :  { %v8691_v31 = vpop.eup %8690  ;;  %v2693_v45 = vpop.f32.mrf.mxu1  ;;  %14013 = vst [vmem:[#allocation38_spill] sm:$0xff] %v11209_v0  ;;  %14014 = vst [vmem:[#allocation39_spill] sm:$0xff] %v11220_v34  ;;  %v2688_v34 = vadd.f32 %v2687_v52, %v10916_v3 }
 0x413   :  { %v2998_v17 = vmul.f32 %v8691_v31, %v10456_v54  ;;  %v2914_v32 = vmul.f32 1.442695, %v2692_v49  ;;  %3170 = vadd.xlane.f32.xlu0 %v2692_v49  ;;  %8039 = vmatmul.mubr.f32.gmra.mxu0 %v11198_v53  ;;  %v7246_v31 = vld [vmem:[%s13851_s1 + $0x1f0] sm:$0xff] }
 0x414   :  { %v2697_v7 = vpop.f32.mrf.mxu1  ;;  %8085 = vmatprep.subr.mxu1 %v7246_v31 }
 0x415   :  { %v11206_v6 = vadd.f32 %v2998_v17, %v2670_v51  ;;  %8698 = vpow2.f32 %v2914_v32  ;;  %v2698_v22 = vadd.f32 %v2697_v7, %v10891_v12  ;;  %8086 = vmatpush3.msra.mxu1 %v7246_v31  ;;  %v11228_v0 = vpop.xlane.xlu1 %1515 }
 0x416   :  { %v8693_v13 = vpop.eup %8692  ;;  %v2699_v48 = vpop.f32.mrf.mxu1  ;;  %14015 = vst [vmem:[#allocation40_spill] sm:$0xff] %v11228_v0 }
 0x417   :  { %v2999_v44 = vmul.f32 %v8693_v13, %v10470_v56  ;;  %v2916_v16 = vmul.f32 1.442695, %v2698_v22  ;;  %3172 = vadd.xlane.f32.xlu1 %v2698_v22  ;;  %8041 = vmatprep.mubr.f32.mxu0 %v11206_v6  ;;  %v2682_v56 = vadd.f32 %v2681_v35, %v10916_v3 }
 0x418   :  { %v2703_v54 = vpop.f32.mrf.mxu1 }
 0x419   :  { %v11214_v49 = vadd.f32 %v2999_v44, %v2676_v20  ;;  %8700 = vpow2.f32 %v2916_v16  ;;  %v2704_v32 = vadd.f32 %v2703_v54, %v10891_v12 }
 0x41a   :  { %v8695_v51 = vpop.eup %8694  ;;  %v2705_v17 = vpop.f32.mrf.mxu1 }
 0x41b   :  { %v3000_v7 = vmul.f32 %v8695_v51, %v10464_v41  ;;  %v2918_v22 = vmul.f32 1.442695, %v2704_v32  ;;  %3174 = vadd.xlane.f32.xlu0 %v2704_v32  ;;  %8042 = vmatmul.mubr.f32.gmra.mxu0 %v11214_v49 }
 0x41c   :  { %v2709_v16 = vpop.f32.mrf.mxu1 }
 0x41d   :  { %v11225_v13 = vadd.f32 %v3000_v7, %v2682_v56  ;;  %8702 = vpow2.f32 %v2918_v22  ;;  %v2710_v20 = vadd.f32 %v2709_v16, %v10891_v12  ;;  %v11236_v22 = vpop.xlane.xlu0 %1517  ;;  %v2694_v16 = vadd.f32 %v2693_v45, %v10916_v3 }
 0x41e   :  { %v8697_v44 = vpop.eup %8696  ;;  %v2711_v54 = vpop.f32.mrf.mxu1  ;;  %14016 = vst [vmem:[#allocation41_spill] sm:$0xff] %v11236_v22 }
 0x41f   :  { %v3001_v35 = vmul.f32 %v8697_v44, %v10494_v55  ;;  %v2920_v41 = vmul.f32 1.442695, %v2710_v20  ;;  %3176 = vadd.xlane.f32.xlu1 %v2710_v20  ;;  %8044 = vmatprep.mubr.f32.mxu0 %v11225_v13 }
 0x420   :  { %v2715_v32 = vpop.f32.mrf.mxu1 }
 0x421   :  { %v11233_v51 = vadd.f32 %v3001_v35, %v2688_v34  ;;  %8704 = vpow2.f32 %v2920_v41  ;;  %v2716_v31 = vadd.f32 %v2715_v32, %v10891_v12  ;;  %v11244_v41 = vpop.xlane.xlu1 %1519  ;;  %v2700_v32 = vadd.f32 %v2699_v48, %v10916_v3  ;;  %v11255_v48 = vpop.xlane.xlu0 %1521 }
 0x422   :  { %v8699_v56 = vpop.eup %8698  ;;  %v2717_v7 = vpop.f32.mrf.mxu1  ;;  %14017 = vst [vmem:[#allocation42_spill] sm:$0xff] %v11244_v41  ;;  %14018 = vst [vmem:[#allocation43_spill] sm:$0xff] %v11255_v48  ;;  %v2712_v48 = vadd.f32 %v2711_v54, %v10916_v3 }
 0x423   :  { %v3002_v52 = vmul.f32 %v8699_v56, %v10488_v29  ;;  %v2922_v0 = vmul.f32 1.442695, %v2716_v31  ;;  %3178 = vadd.xlane.f32.xlu0 %v2716_v31  ;;  %8045 = vmatmul.mubr.f32.gmra.mxu0 %v11233_v51  ;;  %v7245_v56 = vld [vmem:[%s13851_s1 + $0x1e8] sm:$0xff] }
 0x424   :  { %v2721_v55 = vpop.f32.mrf.mxu1  ;;  %8087 = vmatprep.subr.mxu1 %v7245_v56 }
 0x425   :  { %v11241_v20 = vadd.f32 %v3002_v52, %v2694_v16  ;;  %8706 = vpow2.f32 %v2922_v0  ;;  %v2722_v34 = vadd.f32 %v2721_v55, %v10891_v12  ;;  %8088 = vmatpush3.msra.mxu1 %v7245_v56  ;;  %v11263_v41 = vpop.xlane.xlu1 %1523 }
 0x426   :  { %v8701_v44 = vpop.eup %8700  ;;  %v2723_v35 = vpop.f32.mrf.mxu1  ;;  %14019 = vst [vmem:[#allocation44_spill] sm:$0xff] %v11263_v41 }
 0x427   :  { %v3003_v45 = vmul.f32 %v8701_v44, %v10503_v4  ;;  %v2924_v22 = vmul.f32 1.442695, %v2722_v34  ;;  %3180 = vadd.xlane.f32.xlu1 %v2722_v34  ;;  %8047 = vmatprep.mubr.f32.mxu0 %v11241_v20  ;;  %v2706_v4 = vadd.f32 %v2705_v17, %v10916_v3 }
 0x428   :  { %v2727_v29 = vpop.f32.mrf.mxu1 }
 0x429   :  { %v11249_v31 = vadd.f32 %v3003_v45, %v2700_v32  ;;  %8708 = vpow2.f32 %v2924_v22  ;;  %v2728_v0 = vadd.f32 %v2727_v29, %v10891_v12 }
 0x42a   :  { %v8703_v16 = vpop.eup %8702  ;;  %v2729_v52 = vpop.f32.mrf.mxu1 }
 0x42b   :  { %v3004_v55 = vmul.f32 %v8703_v16, %v10509_v24  ;;  %v2926_v34 = vmul.f32 1.442695, %v2728_v0  ;;  %3182 = vadd.xlane.f32.xlu0 %v2728_v0  ;;  %8048 = vmatmul.mubr.f32.gmra.mxu0 %v11249_v31 }
 0x42c   :  { %v2733_v22 = vpop.f32.mrf.mxu1 }
 0x42d   :  { %v11260_v44 = vadd.f32 %v3004_v55, %v2706_v4  ;;  %8710 = vpow2.f32 %v2926_v34  ;;  %v2734_v32 = vadd.f32 %v2733_v22, %v10891_v12  ;;  %v11271_v34 = vpop.xlane.xlu0 %1525  ;;  %v2718_v22 = vadd.f32 %v2717_v7, %v10916_v3 }
 0x42e   :  { %v8705_v45 = vpop.eup %8704  ;;  %v2735_v29 = vpop.f32.mrf.mxu1  ;;  %14020 = vst [vmem:[#allocation45_spill] sm:$0xff] %v11271_v34 }
 0x42f   :  { %v3005_v17 = vmul.f32 %v8705_v45, %v10520_v59  ;;  %v2928_v24 = vmul.f32 1.442695, %v2734_v32  ;;  %3184 = vadd.xlane.f32.xlu1 %v2734_v32  ;;  %8050 = vmatprep.mubr.f32.mxu0 %v11260_v44 }
 0x430   :  { %v2739_v0 = vpop.f32.mrf.mxu1 }
 0x431   :  { %v11268_v16 = vadd.f32 %v3005_v17, %v2712_v48  ;;  %8712 = vpow2.f32 %v2928_v24  ;;  %v2740_v56 = vadd.f32 %v2739_v0, %v10891_v12  ;;  %v11279_v24 = vpop.xlane.xlu1 %1527  ;;  %v2724_v0 = vadd.f32 %v2723_v35, %v10916_v3  ;;  %v11290_v35 = vpop.xlane.xlu0 %1557 }
 0x432   :  { %v8707_v4 = vpop.eup %8706  ;;  %v2741_v55 = vpop.f32.mrf.mxu1  ;;  %14022 = vst [vmem:[#allocation47_spill] sm:$0xff] %v11279_v24  ;;  %14023 = vst [vmem:[#allocation48_spill] sm:$0xff] %v11290_v35  ;;  %v2736_v35 = vadd.f32 %v2735_v29, %v10916_v3 }
 0x433   :  { %v3006_v54 = vmul.f32 %v8707_v4, %v10526_v15  ;;  %v2930_v41 = vmul.f32 1.442695, %v2740_v56  ;;  %3186 = vadd.xlane.f32.xlu0 %v2740_v56  ;;  %8051 = vmatmul.mubr.f32.gmra.mxu0 %v11268_v16  ;;  %v7244_v4 = vld [vmem:[%s13851_s1 + $0x1e0] sm:$0xff] }
 0x434   :  { %v2745_v59 = vpop.f32.mrf.mxu1  ;;  %8089 = vmatprep.subr.mxu1 %v7244_v4 }
 0x435   :  { %v11276_v32 = vadd.f32 %v3006_v54, %v2718_v22  ;;  %8714 = vpow2.f32 %v2930_v41  ;;  %v2746_v48 = vadd.f32 %v2745_v59, %v10891_v12  ;;  %8090 = vmatpush3.msra.mxu1 %v7244_v4  ;;  %v11298_v24 = vpop.xlane.xlu1 %1559 }
 0x436   :  { %v8709_v45 = vpop.eup %8708  ;;  %v2747_v17 = vpop.f32.mrf.mxu1  ;;  %14025 = vst [vmem:[#allocation50_spill] sm:$0xff] %v11298_v24 }
 0x437   :  { %14021 = vst [vmem:[#allocation46_spill] sm:$0xff] %v11276_v32  ;;  %v3007_v7 = vmul.f32 %v8709_v45, %v10539_v25  ;;  %v2932_v34 = vmul.f32 1.442695, %v2746_v48  ;;  %3188 = vadd.xlane.f32.xlu1 %v2746_v48  ;;  %8053 = vmatprep.mubr.f32.mxu0 %v11276_v32  ;;  %v2730_v25 = vadd.f32 %v2729_v52, %v10916_v3  ;;  %v14026_v52 = vld [vmem:[#allocation23_spill] sm:$0xff] }
 0x438   :  { %v2751_v15 = vpop.f32.mrf.mxu1 }
 0x439   :  { %v11284_v56 = vadd.f32 %v3007_v7, %v2724_v0  ;;  %8716 = vpow2.f32 %v2932_v34  ;;  %v2752_v41 = vadd.f32 %v2751_v15, %v10891_v12 }
 0x43a   :  { %v8711_v22 = vpop.eup %8710  ;;  %v2753_v54 = vpop.f32.mrf.mxu1 }
 0x43b   :  { %v3008_v59 = vmul.f32 %v8711_v22, %v10545_v9  ;;  %v2934_v48 = vmul.f32 1.442695, %v2752_v41  ;;  %3190 = vadd.xlane.f32.xlu0 %v2752_v41  ;;  %8054 = vmatmul.mubr.f32.gmra.mxu0 %v11284_v56 }
 0x43c   :  { %v2757_v34 = vpop.f32.mrf.mxu1 }
 0x43d   :  { %v11295_v45 = vadd.f32 %v3008_v59, %v2730_v25  ;;  %8718 = vpow2.f32 %v2934_v48  ;;  %v2758_v0 = vadd.f32 %v2757_v34, %v10891_v12  ;;  %v11306_v48 = vpop.xlane.xlu0 %1529  ;;  %v2742_v34 = vadd.f32 %v2741_v55, %v10916_v3 }
 0x43e   :  { %v8713_v7 = vpop.eup %8712  ;;  %v2759_v15 = vpop.f32.mrf.mxu1  ;;  %14027 = vst [vmem:[#allocation23_spill] sm:$0xff] %v11306_v48  ;;  %v14029_v48 = vld [vmem:[#allocation24_spill] sm:$0xff] }
 0x43f   :  { %14024 = vst [vmem:[#allocation49_spill] sm:$0xff] %v11295_v45  ;;  %v3009_v32 = vmul.f32 %v8713_v7, %v14026_v52  ;;  %v2936_v9 = vmul.f32 1.442695, %v2758_v0  ;;  %3192 = vadd.xlane.f32.xlu1 %v2758_v0  ;;  %8056 = vmatprep.mubr.f32.mxu0 %v11295_v45 }
 0x440   :  { %v2763_v41 = vpop.f32.mrf.mxu1 }
 0x441   :  { %v11303_v22 = vadd.f32 %v3009_v32, %v2736_v35  ;;  %8720 = vpow2.f32 %v2936_v9  ;;  %v2764_v4 = vadd.f32 %v2763_v41, %v10891_v12  ;;  %v11314_v9 = vpop.xlane.xlu1 %1531  ;;  %v2748_v41 = vadd.f32 %v2747_v17, %v10916_v3  ;;  %v11325_v17 = vpop.xlane.xlu0 %1561 }
 0x442   :  { %v8715_v25 = vpop.eup %8714  ;;  %v2765_v59 = vpop.f32.mrf.mxu1  ;;  %14028 = vst [vmem:[#allocation51_spill] sm:$0xff] %v11314_v9  ;;  %14031 = vst [vmem:[#allocation52_spill] sm:$0xff] %v11325_v17  ;;  %v2760_v17 = vadd.f32 %v2759_v15, %v10916_v3 }
 0x443   :  { %v3010_v29 = vmul.f32 %v8715_v25, %v10564_v36  ;;  %v2938_v24 = vmul.f32 1.442695, %v2764_v4  ;;  %3194 = vadd.xlane.f32.xlu0 %v2764_v4  ;;  %8057 = vmatmul.mubr.f32.gmra.mxu0 %v11303_v22  ;;  %v7243_v25 = vld [vmem:[%s13851_s1 + $0x1d8] sm:$0xff] }
 0x444   :  { %v2769_v0 = vpop.f32.mrf.mxu1  ;;  %8091 = vmatprep.subr.mxu1 %v7243_v25 }
 0x445   :  { %v11311_v7 = vadd.f32 %v3010_v29, %v2742_v34  ;;  %8722 = vpow2.f32 %v2938_v24  ;;  %v2770_v32 = vadd.f32 %v2769_v0, %v10891_v12  ;;  %8092 = vmatpush3.msra.mxu1 %v7243_v25  ;;  %v11333_v9 = vpop.xlane.xlu1 %1563 }
 0x446   :  { %v8717_v35 = vpop.eup %8716  ;;  %v2771_v52 = vpop.f32.mrf.mxu1  ;;  %14033 = vst [vmem:[#allocation54_spill] sm:$0xff] %v11333_v9 }
 0x447   :  { %v3011_v55 = vmul.f32 %v8717_v35, %v14029_v48  ;;  %v2940_v45 = vmul.f32 1.442695, %v2770_v32  ;;  %3196 = vadd.xlane.f32.xlu1 %v2770_v32  ;;  %8059 = vmatprep.mubr.f32.mxu0 %v11311_v7  ;;  %v2754_v48 = vadd.f32 %v2753_v54, %v10916_v3 }
 0x448   :  { %v2775_v36 = vpop.f32.mrf.mxu1 }
 0x449   :  { %v11319_v4 = vadd.f32 %v3011_v55, %v2748_v41  ;;  %8724 = vpow2.f32 %v2940_v45  ;;  %v2776_v24 = vadd.f32 %v2775_v36, %v10891_v12 }
 0x44a   :  { %v8719_v34 = vpop.eup %8718  ;;  %v2777_v29 = vpop.f32.mrf.mxu1 }
 0x44b   :  { %14030 = vst [vmem:[#allocation24_spill] sm:$0xff] %v11319_v4  ;;  %v3012_v0 = vmul.f32 %v8719_v34, %v10583_v43  ;;  %v2942_v32 = vmul.f32 1.442695, %v2776_v24  ;;  %3198 = vadd.xlane.f32.xlu0 %v2776_v24  ;;  %8060 = vmatmul.mubr.f32.gmra.mxu0 %v11319_v4 }
 0x44c   :  { %v2781_v45 = vpop.f32.mrf.mxu1 }
 0x44d   :  { %v11330_v35 = vadd.f32 %v3012_v0, %v2754_v48  ;;  %8726 = vpow2.f32 %v2942_v32  ;;  %v2782_v41 = vadd.f32 %v2781_v45, %v10891_v12  ;;  %v11341_v32 = vpop.xlane.xlu0 %1533  ;;  %v2766_v45 = vadd.f32 %v2765_v59, %v10916_v3 }
 0x44e   :  { %v8721_v55 = vpop.eup %8720  ;;  %v2783_v36 = vpop.f32.mrf.mxu1  ;;  %14035 = vst [vmem:[#allocation56_spill] sm:$0xff] %v11341_v32 }
 0x44f   :  { %14032 = vst [vmem:[#allocation53_spill] sm:$0xff] %v11330_v35  ;;  %v3013_v54 = vmul.f32 %v8721_v55, %v10592_v38  ;;  %v2944_v43 = vmul.f32 1.442695, %v2782_v41  ;;  %3200 = vadd.xlane.f32.xlu1 %v2782_v41  ;;  %8062 = vmatprep.mubr.f32.mxu0 %v11330_v35 }
 0x450   :  { %v2787_v24 = vpop.f32.mrf.mxu1 }
 0x451   :  { %v11338_v34 = vadd.f32 %v3013_v54, %v2760_v17  ;;  %8728 = vpow2.f32 %v2944_v43  ;;  %v2788_v25 = vadd.f32 %v2787_v24, %v10891_v12  ;;  %v11349_v43 = vpop.xlane.xlu1 %1535  ;;  %v2772_v24 = vadd.f32 %v2771_v52, %v10916_v3  ;;  %v11360_v52 = vpop.xlane.xlu0 %1565 }
 0x452   :  { %v8723_v48 = vpop.eup %8722  ;;  %v2789_v0 = vpop.f32.mrf.mxu1  ;;  %14037 = vst [vmem:[#allocation58_spill] sm:$0xff] %v11349_v43  ;;  %14039 = vst [vmem:[#allocation60_spill] sm:$0xff] %v11360_v52  ;;  %v2784_v52 = vadd.f32 %v2783_v36, %v10916_v3 }
 0x453   :  { %14034 = vst [vmem:[#allocation55_spill] sm:$0xff] %v11338_v34  ;;  %v3014_v15 = vmul.f32 %v8723_v48, %v10600_v1  ;;  %v2946_v9 = vmul.f32 1.442695, %v2788_v25  ;;  %3202 = vadd.xlane.f32.xlu0 %v2788_v25  ;;  %8063 = vmatmul.mubr.f32.gmra.mxu0 %v11338_v34  ;;  %v7242_v48 = vld [vmem:[%s13851_s1 + $0x1d0] sm:$0xff] }
 0x454   :  { %v2793_v38 = vpop.f32.mrf.mxu1  ;;  %8093 = vmatprep.subr.mxu1 %v7242_v48 }
 0x455   :  { %v11346_v41 = vadd.f32 %v3014_v15, %v2766_v45  ;;  %8730 = vpow2.f32 %v2946_v9  ;;  %v2794_v17 = vadd.f32 %v2793_v38, %v10891_v12  ;;  %8094 = vmatpush3.msra.mxu1 %v7242_v48  ;;  %v11368_v43 = vpop.xlane.xlu1 %1567 }
 0x456   :  { %v8725_v55 = vpop.eup %8724  ;;  %v2795_v54 = vpop.f32.mrf.mxu1  ;;  %14041 = vst [vmem:[#allocation62_spill] sm:$0xff] %v11368_v43  ;;  %v14045_v43 = vld [vmem:[#allocation26_spill] sm:$0xff] }
 0x457   :  { %14036 = vst [vmem:[#allocation57_spill] sm:$0xff] %v11346_v41  ;;  %v3015_v59 = vmul.f32 %v8725_v55, %v10609_v23  ;;  %v2948_v32 = vmul.f32 1.442695, %v2794_v17  ;;  %3204 = vadd.xlane.f32.xlu1 %v2794_v17  ;;  %8065 = vmatprep.mubr.f32.mxu0 %v11346_v41  ;;  %v2778_v23 = vadd.f32 %v2777_v29, %v10916_v3  ;;  %v14042_v29 = vld [vmem:[#allocation25_spill] sm:$0xff] }
 0x458   :  { %v2799_v1 = vpop.f32.mrf.mxu1 }
 0x459   :  { %v11354_v25 = vadd.f32 %v3015_v59, %v2772_v24  ;;  %8732 = vpow2.f32 %v2948_v32  ;;  %v2800_v9 = vadd.f32 %v2799_v1, %v10891_v12 }
 0x45a   :  { %v8727_v45 = vpop.eup %8726  ;;  %v2801_v15 = vpop.f32.mrf.mxu1 }
 0x45b   :  { %14038 = vst [vmem:[#allocation59_spill] sm:$0xff] %v11354_v25  ;;  %v3016_v38 = vmul.f32 %v8727_v45, %v10617_v57  ;;  %v2950_v17 = vmul.f32 1.442695, %v2800_v9  ;;  %3206 = vadd.xlane.f32.xlu0 %v2800_v9  ;;  %8066 = vmatmul.mubr.f32.gmra.mxu0 %v11354_v25 }
 0x45c   :  { %v2805_v32 = vpop.f32.mrf.mxu1 }
 0x45d   :  { %v11365_v55 = vadd.f32 %v3016_v38, %v2778_v23  ;;  %8734 = vpow2.f32 %v2950_v17  ;;  %v2806_v24 = vadd.f32 %v2805_v32, %v10891_v12  ;;  %v11376_v17 = vpop.xlane.xlu0 %1537  ;;  %v2790_v32 = vadd.f32 %v2789_v0, %v10916_v3 }
 0x45e   :  { %v8729_v59 = vpop.eup %8728  ;;  %v2807_v1 = vpop.f32.mrf.mxu1  ;;  %14044 = vst [vmem:[#allocation63_spill] sm:$0xff] %v11376_v17  ;;  %v14048_v17 = vld [vmem:[#allocation27_spill] sm:$0xff] }
 0x45f   :  { %14040 = vst [vmem:[#allocation61_spill] sm:$0xff] %v11365_v55  ;;  %v3017_v41 = vmul.f32 %v8729_v59, %v14042_v29  ;;  %v2952_v57 = vmul.f32 1.442695, %v2806_v24  ;;  %3208 = vadd.xlane.f32.xlu1 %v2806_v24  ;;  %8068 = vmatprep.mubr.f32.mxu0 %v11365_v55 }
 0x460   :  { %v2811_v9 = vpop.f32.mrf.mxu1 }
 0x461   :  { %v11373_v45 = vadd.f32 %v3017_v41, %v2784_v52  ;;  %8736 = vpow2.f32 %v2952_v57  ;;  %v2812_v48 = vadd.f32 %v2811_v9, %v10891_v12  ;;  %v11384_v57 = vpop.xlane.xlu1 %1539  ;;  %v2796_v9 = vadd.f32 %v2795_v54, %v10916_v3  ;;  %v11395_v54 = vpop.xlane.xlu0 %1569 }
 0x462   :  { %v8731_v23 = vpop.eup %8730  ;;  %v2813_v38 = vpop.f32.mrf.mxu1  ;;  %14047 = vst [vmem:[#allocation64_spill] sm:$0xff] %v11384_v57  ;;  %14050 = vst [vmem:[#allocation65_spill] sm:$0xff] %v11395_v54  ;;  %v2808_v54 = vadd.f32 %v2807_v1, %v10916_v3  ;;  %v11416_v1 = vld [vmem:[%s13853_s3 + $0x2] ss:$0 sm:$0xff] }
 0x463   :  { %14043 = vst [vmem:[#allocation25_spill] sm:$0xff] %v11373_v45  ;;  %v3018_v36 = vmul.f32 %v8731_v23, %v14045_v43  ;;  %v2954_v25 = vmul.f32 1.442695, %v2812_v48  ;;  %3210 = vadd.xlane.f32.xlu0 %v2812_v48  ;;  %8069 = vmatmul.mubr.f32.gmra.mxu0 %v11373_v45  ;;  %v7241_v23 = vld [vmem:[%s13851_s1 + $0x1c8] sm:$0xff]  ;;  %v7989_v57 = vpop.f32.mrf.mxu0 }
 0x464   :  { %v2817_v24 = vpop.f32.mrf.mxu1  ;;  %8095 = vmatprep.subr.mxu1 %v7241_v23 }
 0x465   :  { %v11381_v59 = vadd.f32 %v3018_v36, %v2790_v32  ;;  %8738 = vpow2.f32 %v2954_v25  ;;  %v2818_v41 = vadd.f32 %v2817_v24, %v10891_v12  ;;  %v14051_v24 = vld [vmem:[#allocation28_spill] sm:$0xff]  ;;  %8096 = vmatpush3.msra.mxu1 %v7241_v23 }
 0x466   :  { %v8733_v52 = vpop.eup %8732  ;;  %v2819_v29 = vpop.f32.mrf.mxu1 }
 0x467   :  { %14046 = vst [vmem:[#allocation26_spill] sm:$0xff] %v11381_v59  ;;  %v3019_v0 = vmul.f32 %v8733_v52, %v14048_v17  ;;  %v2956_v55 = vmul.f32 1.442695, %v2818_v41  ;;  %3212 = vadd.xlane.f32.xlu1 %v2818_v41  ;;  %8071 = vmatprep.mubr.f32.mxu0 %v11381_v59  ;;  %v2802_v17 = vadd.f32 %v2801_v15, %v10916_v3  ;;  %v11403_v59 = vpop.xlane.xlu1 %1571  ;;  %v14054_v15 = vld [vmem:[#allocation29_spill] sm:$0xff] }
 0x468   :  { %v2823_v43 = vpop.f32.mrf.mxu1  ;;  %14053 = vst [vmem:[#allocation66_spill] sm:$0xff] %v11403_v59  ;;  %v14062_v59 = vld [vmem:[#allocation33_spill] sm:$0xff] }
 0x469   :  { %v11389_v48 = vadd.f32 %v3019_v0, %v2796_v9  ;;  %8740 = vpow2.f32 %v2956_v55  ;;  %v2824_v25 = vadd.f32 %v2823_v43, %v10891_v12 }
 0x46a   :  { %v8735_v32 = vpop.eup %8734  ;;  %v2825_v36 = vpop.f32.mrf.mxu1 }
 0x46b   :  { %14049 = vst [vmem:[#allocation27_spill] sm:$0xff] %v11389_v48  ;;  %v3020_v41 = vmul.f32 %v8735_v32, %v14051_v24  ;;  %v2958_v52 = vmul.f32 1.442695, %v2824_v25  ;;  %3214 = vadd.xlane.f32.xlu0 %v2824_v25  ;;  %8072 = vmatmul.mubr.f32.gmra.mxu0 %v11389_v48  ;;  %v2814_v24 = vadd.f32 %v2813_v38, %v10916_v3 }
 0x46c   :  { %v2829_v55 = vpop.f32.mrf.mxu1  ;;  %v3379_v38 = vadd.f32 %v7989_v57, %v11416_v1 }
 0x46d   :  { %v11400_v9 = vadd.f32 %v3020_v41, %v2802_v17  ;;  %8742 = vpow2.f32 %v2958_v52  ;;  %v2830_v0 = vadd.f32 %v2829_v55, %v10891_v12  ;;  %v3373_v17 = vpop.f32.mrf.mxu0  ;;  %v14056_v12 = vld [vmem:[#allocation30_spill] sm:$0xff] }
 0x46e   :  { %v8737_v43 = vpop.eup %8736  ;;  %v3374_v52 = vadd.f32 %v11416_v1, %v3373_v17 }
 0x46f   :  { %14052 = vst [vmem:[#allocation28_spill] sm:$0xff] %v11400_v9  ;;  %v3021_v45 = vmul.f32 %v8737_v43, %v14054_v15  ;;  %v2960_v32 = vmul.f32 1.442695, %v2830_v0  ;;  %3216 = vadd.xlane.f32.xlu1 %v2830_v0  ;;  %8074 = vmatprep.mubr.f32.mxu0 %v11400_v9  ;;  %v2820_v0 = vadd.f32 %v2819_v29, %v10916_v3  ;;  %v14058_v43 = vld [vmem:[#allocation31_spill] sm:$0xff] }
 0x471   :  { %v11408_v25 = vadd.f32 %v3021_v45, %v2808_v54  ;;  %8744 = vpow2.f32 %v2960_v32  ;;  %v7992_v54 = vpop.f32.mrf.mxu0 }
 0x472   :  { %v8739_v23 = vpop.eup %8738  ;;  %8746 = vtanh.f32 %v3374_v52 }
 0x473   :  { %14055 = vst [vmem:[#allocation29_spill] sm:$0xff] %v11408_v25  ;;  %v3022_v41 = vmul.f32 %v8739_v23, %v14056_v12  ;;  %8075 = vmatmul.mubr.f32.gmra.mxu0 %v11408_v25  ;;  %v7240_v23 = vld [vmem:[%s13851_s1 + $0x1c0] sm:$0xff]  ;;  %v2826_v12 = vadd.f32 %v2825_v36, %v10916_v3  ;;  %8748 = vtanh.f32 %v3379_v38  ;;  %v3389_v36 = vadd.f32 %v7992_v54, %v11416_v1 }
 0x474   :  { %8097 = vmatprep.subr.mxu1 %v7240_v23 }
 0x475   :  { %v11419_v55 = vadd.f32 %v3022_v41, %v2814_v24  ;;  %v3383_v24 = vpop.f32.mrf.mxu0  ;;  %v14060_v41 = vld [vmem:[#allocation32_spill] sm:$0xff]  ;;  %8098 = vmatpush3.msra.mxu1 %v7240_v23 }
 0x476   :  { %v8741_v45 = vpop.eup %8740  ;;  %v3384_v57 = vadd.f32 %v11416_v1, %v3383_v24 }
 0x477   :  { %14057 = vst [vmem:[#allocation30_spill] sm:$0xff] %v11419_v55  ;;  %v3023_v15 = vmul.f32 %v8741_v45, %v14058_v43  ;;  %8077 = vmatprep.mubr.f32.mxu0 %v11419_v55  ;;  %v2831_v45 = vpop.f32.mrf.mxu1  ;;  %v7995_v43 = vpop.f32.mrf.mxu0 }
 0x478   :  { %8750 = vtanh.f32 %v3384_v57 }
 0x479   :  { %v11425_v32 = vadd.f32 %v3023_v15, %v2820_v0  ;;  %v2832_v15 = vadd.f32 %v2831_v45, %v10916_v3  ;;  %v3393_v23 = vpop.f32.mrf.mxu0  ;;  %8752 = vtanh.f32 %v3389_v36  ;;  %v7239_v3 = vld [vmem:[%s13851_s1 + $0x1b8] sm:$0xff] }
 0x47a   :  { %v8743_v17 = vpop.eup %8742  ;;  %v3394_v38 = vadd.f32 %v11416_v1, %v3393_v23  ;;  %8099 = vmatprep.subr.mxu1 %v7239_v3 }
 0x47b   :  { %14059 = vst [vmem:[#allocation31_spill] sm:$0xff] %v11425_v32  ;;  %v3024_v29 = vmul.f32 %v8743_v17, %v14060_v41  ;;  %8078 = vmatmul.mubr.f32.gmra.mxu0 %v11425_v32  ;;  %8100 = vmatpush3.msra.mxu1 %v7239_v3 }
 0x47c   :  { %8754 = vtanh.f32 %v3394_v38  ;;  %v7238_v38 = vld [vmem:[%s13851_s1 + $0x1b0] sm:$0xff] }
 0x47d   :  { %v11434_v52 = vadd.f32 %v3024_v29, %v2826_v12  ;;  %v7998_v12 = vpop.f32.mrf.mxu0  ;;  %8101 = vmatprep.subr.mxu1 %v7238_v38 }
 0x47e   :  { %v8745_v0 = vpop.eup %8744  ;;  %v3409_v57 = vadd.f32 %v7998_v12, %v11416_v1  ;;  %8102 = vmatpush3.msra.mxu1 %v7238_v38 }
 0x47f   :  { %14061 = vst [vmem:[#allocation32_spill] sm:$0xff] %v11434_v52  ;;  %v3025_v55 = vmul.f32 %v8745_v0, %v14062_v59  ;;  %8080 = vmatprep.mubr.f32.mxu0 %v11434_v52  ;;  %v8747_v24 = vpop.eup %8746  ;;  %v3399_v59 = vadd.f32 %v7995_v43, %v11416_v1  ;;  %v3403_v54 = vpop.f32.mrf.mxu0 }
 0x480   :  { %v3404_v41 = vadd.f32 %v11416_v1, %v3403_v54 }
 0x481   :  { %v11440_v17 = vadd.f32 %v3025_v55, %v2832_v15  ;;  %v8749_v55 = vpop.eup %8748  ;;  %8756 = vtanh.f32 %v3399_v59  ;;  %v8001_v45 = vpop.f32.mrf.mxu0 }
 0x482   :  { %8758 = vtanh.f32 %v3404_v41 }
 0x483   :  { %14063 = vst [vmem:[#allocation33_spill] sm:$0xff] %v11440_v17  ;;  %8081 = vmatmul.mubr.f32.gmra.mxu0 %v11440_v17  ;;  %v3413_v43 = vpop.f32.mrf.mxu0  ;;  %8760 = vtanh.f32 %v3409_v57 }
 0x484   :  { %4042 = vmatprep.mubr.f32.mxu0 %v13982_v47  ;;  %v3414_v15 = vadd.f32 %v11416_v1, %v3413_v43 }
 0x485   :  { %v8751_v29 = vpop.eup %8750  ;;  %v8004_v23 = vpop.f32.mrf.mxu0 }
 0x486   :  { %v8753_v0 = vpop.eup %8752  ;;  %8762 = vtanh.f32 %v3414_v15  ;;  %v3429_v41 = vadd.f32 %v8004_v23, %v11416_v1  ;;  %v7237_v15 = vld [vmem:[%s13851_s1 + $0x1a8] sm:$0xff] }
 0x487   :  { %7168 = vmatmul.mubr.msk.f32.vlgmr.msra.gmra.mxu0 %vm599_vm0, %v8747_v24  ;;  %v3419_v24 = vadd.f32 %v8001_v45, %v11416_v1  ;;  %v3423_v3 = vpop.f32.mrf.mxu0  ;;  %8103 = vmatprep.subr.mxu1 %v7237_v15 }
 0x488   :  { %4048 = vmatprep.mubr.f32.mxu0 %v13982_v47  ;;  %v3424_v59 = vadd.f32 %v11416_v1, %v3423_v3  ;;  %8104 = vmatpush3.msra.mxu1 %v7237_v15 }
 0x489   :  { %v8755_v36 = vpop.eup %8754  ;;  %8764 = vtanh.f32 %v3419_v24  ;;  %v8007_v54 = vpop.f32.mrf.mxu0 }
 0x48a   :  { %8766 = vtanh.f32 %v3424_v59 }
 0x48b   :  { %7169 = vmatmul.mubr.msk.f32.gmra.mxu0 %vm599_vm0, %v8749_v55  ;;  %v3433_v45 = vpop.f32.mrf.mxu0  ;;  %8768 = vtanh.f32 %v3429_v41 }
 0x48c   :  { %4054 = vmatprep.mubr.f32.mxu0 %v13982_v47  ;;  %v3434_v57 = vadd.f32 %v11416_v1, %v3433_v45 }
 0x48d   :  { %v8010_v43 = vpop.f32.mrf.mxu0 }
 0x48e   :  { %v8757_v12 = vpop.eup %8756  ;;  %8770 = vtanh.f32 %v3434_v57  ;;  %v3449_v59 = vadd.f32 %v8010_v43, %v11416_v1  ;;  %v7236_v57 = vld [vmem:[%s13851_s1 + $0x1a0] sm:$0xff] }
 0x48f   :  { %7170 = vmatmul.mubr.msk.f32.gmra.mxu0 %vm599_vm0, %v8751_v29  ;;  %v8759_v55 = vpop.eup %8758  ;;  %v3443_v38 = vpop.f32.mrf.mxu0  ;;  %8105 = vmatprep.subr.mxu1 %v7236_v57 }
 0x490   :  { %4060 = vmatprep.mubr.f32.mxu0 %v13982_v47  ;;  %v8761_v29 = vpop.eup %8760  ;;  %v3444_v24 = vadd.f32 %v11416_v1, %v3443_v38  ;;  %8106 = vmatpush3.msra.mxu1 %v7236_v57 }
 0x491   :  { %v8013_v3 = vpop.f32.mrf.mxu0 }
 0x493   :  { %7171 = vmatmul.mubr.msk.f32.gmra.mxu0 %vm599_vm0, %v8753_v0  ;;  %v8763_v0 = vpop.eup %8762 }
 0x494   :  { %4066 = vmatprep.mubr.f32.mxu0 %v13982_v47 }
 0x496   :  { %v8765_v23 = vpop.eup %8764 }
 0x497   :  { %7172 = vmatmul.mubr.msk.f32.gmra.mxu0 %vm599_vm0, %v8755_v36  ;;  %v3439_v36 = vadd.f32 %v8007_v54, %v11416_v1  ;;  %v3453_v54 = vpop.f32.mrf.mxu0 }
 0x498   :  { %4072 = vmatprep.mubr.f32.mxu0 %v13982_v47  ;;  %v3454_v41 = vadd.f32 %v11416_v1, %v3453_v54 }
 0x499   :  { %8772 = vtanh.f32 %v3439_v36  ;;  %v8016_v45 = vpop.f32.mrf.mxu0 }
 0x49a   :  { %8774 = vtanh.f32 %v3444_v24  ;;  %v3469_v24 = vadd.f32 %v8016_v45, %v11416_v1 }
 0x49b   :  { %7173 = vmatmul.mubr.msk.f32.gmra.mxu0 %vm599_vm0, %v8757_v12  ;;  %v8767_v12 = vpop.eup %8766  ;;  %8776 = vtanh.f32 %v3449_v59  ;;  %v3463_v15 = vpop.f32.mrf.mxu0 }
 0x49c   :  { %4078 = vmatprep.mubr.f32.mxu0 %v13982_v47  ;;  %8778 = vtanh.f32 %v3454_v41  ;;  %v3464_v36 = vadd.f32 %v11416_v1, %v3463_v15 }
 0x49d   :  { %v8019_v38 = vpop.f32.mrf.mxu0 }
 0x49e   :  { %v3479_v41 = vadd.f32 %v8019_v38, %v11416_v1 }
 0x49f   :  { %7174 = vmatmul.mubr.msk.f32.gmra.mxu0 %vm599_vm0, %v8759_v55  ;;  %v8769_v55 = vpop.eup %8768 }
 0x4a0   :  { %4084 = vmatprep.mubr.f32.mxu0 %v13982_v47 }
 0x4a3   :  { %7175 = vmatmul.mubr.msk.f32.gmra.mxu0 %vm599_vm0, %v8761_v29  ;;  %v8771_v29 = vpop.eup %8770 }
 0x4a4   :  { %4090 = vmatprep.mubr.f32.mxu0 %v13982_v47 }
 0x4a6   :  { %v8773_v43 = vpop.eup %8772 }
 0x4a7   :  { %7176 = vmatmul.mubr.msk.f32.gmra.mxu0 %vm599_vm0, %v8763_v0  ;;  %v3459_v0 = vadd.f32 %v8013_v3, %v11416_v1  ;;  %v3473_v3 = vpop.f32.mrf.mxu0 }
 0x4a8   :  { %4096 = vmatprep.mubr.f32.mxu0 %v13982_v47  ;;  %v3474_v59 = vadd.f32 %v11416_v1, %v3473_v3 }
 0x4a9   :  { %8780 = vtanh.f32 %v3459_v0  ;;  %v8022_v54 = vpop.f32.mrf.mxu0 }
 0x4aa   :  { %8782 = vtanh.f32 %v3464_v36  ;;  %v3489_v15 = vadd.f32 %v8022_v54, %v11416_v1 }
 0x4ab   :  { %7177 = vmatmul.mubr.msk.f32.gmra.mxu0 %vm599_vm0, %v8765_v23  ;;  %v8775_v23 = vpop.eup %8774  ;;  %8784 = vtanh.f32 %v3469_v24  ;;  %v3483_v45 = vpop.f32.mrf.mxu0 }
 0x4ac   :  { %4102 = vmatprep.mubr.f32.mxu0 %v13982_v47  ;;  %8786 = vtanh.f32 %v3474_v59  ;;  %v3484_v57 = vadd.f32 %v11416_v1, %v3483_v45  ;;  %v7235_v59 = vld [vmem:[%s13851_s1 + $0x198] sm:$0xff] }
 0x4ad   :  { %8788 = vtanh.f32 %v3479_v41  ;;  %8107 = vmatprep.subr.mxu1 %v7235_v59  ;;  %v7234_v41 = vld [vmem:[%s13851_s1 + $0x190] sm:$0xff] }
 0x4ae   :  { %8790 = vtanh.f32 %v3484_v57  ;;  %8108 = vmatpush3.msra.mxu1 %v7235_v59  ;;  %v7233_v57 = vld [vmem:[%s13851_s1 + $0x188] sm:$0xff] }
 0x4af   :  { %7178 = vmatmul.mubr.msk.f32.gmra.mxu0 %vm599_vm0, %v8767_v12  ;;  %v8777_v12 = vpop.eup %8776  ;;  %8792 = vtanh.f32 %v3489_v15  ;;  %8109 = vmatprep.subr.mxu1 %v7234_v41 }
 0x4b0   :  { %4108 = vmatprep.mubr.f32.mxu0 %v13982_v47  ;;  %8110 = vmatpush3.msra.mxu1 %v7234_v41 }
 0x4b1   :  { %8111 = vmatprep.subr.mxu1 %v7233_v57 }
 0x4b2   :  { %8112 = vmatpush3.msra.mxu1 %v7233_v57 }
 0x4b3   :  { %7179 = vmatmul.mubr.msk.f32.gmra.mxu0 %vm599_vm0, %v8769_v55  ;;  %v8779_v55 = vpop.eup %8778 }
 0x4b4   :  { %4114 = vmatprep.mubr.f32.mxu0 %v13982_v47 }
 0x4b7   :  { %7180 = vmatmul.mubr.msk.f32.gmra.mxu0 %vm599_vm0, %v8771_v29  ;;  %v8781_v29 = vpop.eup %8780 }
 0x4b8   :  { %4120 = vmatprep.mubr.f32.mxu0 %v13982_v47  ;;  %v8783_v0 = vpop.eup %8782 }
 0x4b9   :  { %v8785_v36 = vpop.eup %8784 }
 0x4ba   :  { %v8787_v24 = vpop.eup %8786 }
 0x4bb   :  { %7181 = vmatmul.mubr.msk.f32.gmra.mxu0 %vm599_vm0, %v8773_v43  ;;  %v8025_v43 = vpop.f32.mrf.mxu0 }
 0x4bc   :  { %4126 = vmatprep.mubr.f32.mxu0 %v13982_v47  ;;  %v3499_v3 = vadd.f32 %v8025_v43, %v11416_v1  ;;  %v7232_v43 = vld [vmem:[%s13851_s1 + $0x180] sm:$0xff] }
 0x4bd   :  { %8113 = vmatprep.subr.mxu1 %v7232_v43 }
 0x4be   :  { %8114 = vmatpush3.msra.mxu1 %v7232_v43 }
 0x4bf   :  { %7182 = vmatmul.mubr.msk.f32.gmra.mxu0 %vm599_vm0, %v8775_v23  ;;  %v3493_v23 = vpop.f32.mrf.mxu0 }
 0x4c0   :  { %4132 = vmatprep.mubr.f32.mxu0 %v13982_v47  ;;  %v3494_v38 = vadd.f32 %v11416_v1, %v3493_v23 }
 0x4c2   :  { %8794 = vtanh.f32 %v3494_v38 }
 0x4c3   :  { %7183 = vmatmul.mubr.msk.f32.gmra.mxu0 %vm599_vm0, %v8777_v12  ;;  %v8028_v12 = vpop.f32.mrf.mxu0  ;;  %8796 = vtanh.f32 %v3499_v3 }
 0x4c4   :  { %4138 = vmatprep.mubr.f32.mxu0 %v13982_v47  ;;  %v3509_v15 = vadd.f32 %v8028_v12, %v11416_v1 }
 0x4c5   :  { %v3503_v54 = vpop.f32.mrf.mxu0 }
 0x4c7   :  { %7184 = vmatmul.mubr.msk.f32.gmra.mxu0 %vm599_vm0, %v8779_v55  ;;  %v8789_v55 = vpop.eup %8788  ;;  %v8031_v45 = vpop.f32.mrf.mxu0 }
 0x4c8   :  { %4144 = vmatprep.mubr.f32.mxu0 %v13982_v47  ;;  %v3519_v12 = vadd.f32 %v8031_v45, %v11416_v1 }
 0x4cb   :  { %7185 = vmatmul.mubr.msk.f32.gmra.mxu0 %vm599_vm0, %v8781_v29  ;;  %v3504_v29 = vadd.f32 %v11416_v1, %v3503_v54 }
 0x4cc   :  { %4150 = vmatprep.mubr.f32.mxu0 %v13982_v47 }
 0x4cd   :  { %8798 = vtanh.f32 %v3504_v29 }
 0x4ce   :  { %8800 = vtanh.f32 %v3509_v15 }
 0x4cf   :  { %7186 = vmatmul.mubr.msk.f32.gmra.mxu0 %vm599_vm0, %v8783_v0  ;;  %v8791_v0 = vpop.eup %8790 }
 0x4d0   :  { %4156 = vmatprep.mubr.f32.mxu0 %v13982_v47  ;;  %v8793_v23 = vpop.eup %8792 }
 0x4d1   :  { %v8795_v3 = vpop.eup %8794 }
 0x4d2   :  { %v8797_v54 = vpop.eup %8796 }
 0x4d3   :  { %7187 = vmatmul.mubr.msk.f32.gmra.mxu0 %vm599_vm0, %v8785_v36  ;;  %v3513_v36 = vpop.f32.mrf.mxu0 }
 0x4d4   :  { %4162 = vmatprep.mubr.f32.mxu0 %v13982_v47 }
 0x4d5   :  { %v8034_v38 = vpop.f32.mrf.mxu0 }
 0x4d6   :  { %v3529_v43 = vadd.f32 %v8034_v38, %v11416_v1 }
 0x4d7   :  { %7188 = vmatmul.mubr.msk.f32.gmra.mxu0 %vm599_vm0, %v8787_v24  ;;  %v3514_v24 = vadd.f32 %v11416_v1, %v3513_v36  ;;  %v3523_v59 = vpop.f32.mrf.mxu0 }
 0x4d8   :  { %4168 = vmatprep.mubr.f32.mxu0 %v13982_v47  ;;  %v3524_v41 = vadd.f32 %v11416_v1, %v3523_v59 }
 0x4d9   :  { %8802 = vtanh.f32 %v3514_v24 }
 0x4da   :  { %8804 = vtanh.f32 %v3519_v12  ;;  %v8799_v57 = vpop.eup %8798 }
 0x4db   :  { %7189 = vmatmul.mubr.msk.f32.gmra.mxu0 %vm599_vm0, %v8789_v55  ;;  %v8037_v55 = vpop.f32.mrf.mxu0  ;;  %8806 = vtanh.f32 %v3524_v41  ;;  %v8801_v45 = vpop.eup %8800 }
 0x4dc   :  { %4174 = vmatprep.mubr.f32.mxu0 %v13982_v47  ;;  %8808 = vtanh.f32 %v3529_v43 }
 0x4dd   :  { %v3533_v29 = vpop.f32.mrf.mxu0 }
 0x4de   :  { %v3534_v36 = vadd.f32 %v11416_v1, %v3533_v29 }
 0x4df   :  { %7190 = vmatmul.mubr.msk.f32.gmra.mxu0 %vm599_vm0, %v8791_v0  ;;  %v8040_v0 = vpop.f32.mrf.mxu0 }
 0x4e0   :  { %4180 = vmatprep.mubr.f32.mxu0 %v13982_v47  ;;  %8810 = vtanh.f32 %v3534_v36 }
 0x4e1   :  { %v3543_v15 = vpop.f32.mrf.mxu0 }
 0x4e3   :  { %7191 = vmatmul.mubr.msk.f32.gmra.mxu0 %vm599_vm0, %v8793_v23  ;;  %v8043_v23 = vpop.f32.mrf.mxu0 }
 0x4e4   :  { %4186 = vmatprep.mubr.f32.mxu0 %v13982_v47 }
 0x4e5   :  { %v3553_v38 = vpop.f32.mrf.mxu0 }
 0x4e6   :  { %v8803_v24 = vpop.eup %8802 }
 0x4e7   :  { %7192 = vmatmul.mubr.msk.f32.gmra.mxu0 %vm599_vm0, %v8795_v3  ;;  %v3539_v3 = vadd.f32 %v8037_v55, %v11416_v1  ;;  %v8805_v59 = vpop.eup %8804  ;;  %v8046_v12 = vpop.f32.mrf.mxu0 }
 0x4e8   :  { %4192 = vmatprep.mubr.f32.mxu0 %v13982_v47  ;;  %v8807_v41 = vpop.eup %8806 }
 0x4e9   :  { %8812 = vtanh.f32 %v3539_v3  ;;  %v3563_v29 = vpop.f32.mrf.mxu0  ;;  %v8809_v43 = vpop.eup %8808  ;;  %v3559_v3 = vadd.f32 %v8043_v23, %v11416_v1 }
 0x4eb   :  { %7193 = vmatmul.mubr.msk.f32.gmra.mxu0 %vm599_vm0, %v8797_v54  ;;  %v3544_v54 = vadd.f32 %v11416_v1, %v3543_v15  ;;  %v8049_v55 = vpop.f32.mrf.mxu0 }
 0x4ec   :  { %4198 = vmatprep.mubr.f32.mxu0 %v13982_v47 }
 0x4ed   :  { %8814 = vtanh.f32 %v3544_v54  ;;  %v3573_v36 = vpop.f32.mrf.mxu0  ;;  %v8811_v15 = vpop.eup %8810  ;;  %v3564_v54 = vadd.f32 %v11416_v1, %v3563_v29 }
 0x4ef   :  { %7194 = vmatmul.mubr.msk.f32.gmra.mxu0 %vm599_vm0, %v8799_v57  ;;  %v3549_v57 = vadd.f32 %v8040_v0, %v11416_v1 }
 0x4f0   :  { %4204 = vmatprep.mubr.f32.mxu0 %v13982_v47 }
 0x4f1   :  { %8816 = vtanh.f32 %v3549_v57  ;;  %v3569_v57 = vadd.f32 %v8046_v12, %v11416_v1 }
 0x4f3   :  { %7195 = vmatmul.mubr.msk.f32.gmra.mxu0 %vm599_vm0, %v8801_v45  ;;  %v3554_v45 = vadd.f32 %v11416_v1, %v3553_v38 }
 0x4f4   :  { %4210 = vmatprep.mubr.f32.mxu0 %v13982_v47 }
 0x4f5   :  { %8818 = vtanh.f32 %v3554_v45 }
 0x4f6   :  { %v8813_v0 = vpop.eup %8812  ;;  %8820 = vtanh.f32 %v3559_v3 }
 0x4f7   :  { %7196 = vmatmul.mubr.msk.f32.gmra.mxu0 %vm599_vm0, %v8803_v24  ;;  %v8052_v24 = vpop.f32.mrf.mxu0  ;;  %8822 = vtanh.f32 %v3564_v54 }
 0x4f8   :  { %4216 = vmatprep.mubr.f32.mxu0 %v13982_v47  ;;  %8824 = vtanh.f32 %v3569_v57 }
 0x4fb   :  { %7197 = vmatmul.mubr.msk.f32.gmra.mxu0 %vm599_vm0, %v8805_v59  ;;  %v3583_v59 = vpop.f32.mrf.mxu0 }
 0x4fc   :  { %4222 = vmatprep.mubr.f32.mxu0 %v13982_v47 }
 0x4fd   :  { %v8055_v38 = vpop.f32.mrf.mxu0 }
 0x4ff   :  { %7198 = vmatmul.mubr.msk.f32.gmra.mxu0 %vm599_vm0, %v8807_v41  ;;  %v8815_v41 = vpop.eup %8814  ;;  %v3593_v23 = vpop.f32.mrf.mxu0 }
 0x500   :  { %4228 = vmatprep.mubr.f32.mxu0 %v13982_v47 }
 0x503   :  { %7199 = vmatmul.mubr.msk.f32.gmra.mxu0 %vm599_vm0, %v8809_v43  ;;  %v8817_v43 = vpop.eup %8816  ;;  %v8058_v45 = vpop.f32.mrf.mxu0 }
 0x504   :  { %4234 = vmatprep.mubr.f32.mxu0 %v13982_v47  ;;  %v8819_v29 = vpop.eup %8818 }
 0x505   :  { %v3603_v3 = vpop.f32.mrf.mxu0  ;;  %v8821_v54 = vpop.eup %8820 }
 0x507   :  { %7200 = vmatmul.mubr.msk.f32.gmra.mxu0 %vm599_vm0, %v8811_v15  ;;  %v3574_v15 = vadd.f32 %v11416_v1, %v3573_v36  ;;  %v8823_v36 = vpop.eup %8822 }
 0x508   :  { %4240 = vmatprep.mubr.f32.mxu0 %v13982_v47 }
 0x509   :  { %8826 = vtanh.f32 %v3574_v15 }
 0x50b   :  { %7201 = vmatmul.mubr.msk.f32.gmra.mxu0 %vm599_vm0, %v8813_v0  ;;  %v3579_v0 = vadd.f32 %v8049_v55, %v11416_v1  ;;  %v8061_v12 = vpop.f32.mrf.mxu0  ;;  %v8825_v55 = vpop.eup %8824 }
 0x50c   :  { %4246 = vmatprep.mubr.f32.mxu0 %v13982_v47 }
 0x50d   :  { %8828 = vtanh.f32 %v3579_v0  ;;  %v3613_v57 = vpop.f32.mrf.mxu0  ;;  %v3594_v0 = vadd.f32 %v11416_v1, %v3593_v23  ;;  %v3604_v23 = vadd.f32 %v11416_v1, %v3603_v3 }
 0x50f   :  { %7202 = vmatmul.mubr.msk.f32.gmra.mxu0 %vm599_vm0, %v8815_v41  ;;  %v3584_v41 = vadd.f32 %v11416_v1, %v3583_v59 }
 0x510   :  { %4252 = vmatprep.mubr.f32.mxu0 %v13982_v47 }
 0x511   :  { %8830 = vtanh.f32 %v3584_v41 }
 0x513   :  { %7203 = vmatmul.mubr.msk.f32.gmra.mxu0 %vm599_vm0, %v8817_v43  ;;  %v8064_v43 = vpop.f32.mrf.mxu0 }
 0x514   :  { %4258 = vmatprep.mubr.f32.mxu0 %v13982_v47 }
 0x515   :  { %v3623_v15 = vpop.f32.mrf.mxu0 }
 0x517   :  { %7204 = vmatmul.mubr.msk.f32.gmra.mxu0 %vm599_vm0, %v8819_v29  ;;  %v3589_v29 = vadd.f32 %v8052_v24, %v11416_v1 }
 0x518   :  { %4264 = vmatprep.mubr.f32.mxu0 %v13982_v47 }
 0x519   :  { %8832 = vtanh.f32 %v3589_v29 }
 0x51a   :  { %8834 = vtanh.f32 %v3594_v0 }
 0x51b   :  { %7205 = vmatmul.mubr.msk.f32.gmra.mxu0 %vm599_vm0, %v8821_v54  ;;  %v8067_v59 = vpop.f32.mrf.mxu0  ;;  %v8827_v54 = vpop.eup %8826 }
 0x51c   :  { %4270 = vmatprep.mubr.f32.mxu0 %v13982_v47  ;;  %v8829_v41 = vpop.eup %8828 }
 0x51d   :  { %v3633_v24 = vpop.f32.mrf.mxu0 }
 0x51e   :  { %v8831_v29 = vpop.eup %8830 }
 0x51f   :  { %7206 = vmatmul.mubr.msk.f32.gmra.mxu0 %vm599_vm0, %v8823_v36  ;;  %v3599_v36 = vadd.f32 %v8055_v38, %v11416_v1  ;;  %v3609_v38 = vadd.f32 %v8058_v45, %v11416_v1  ;;  %v3619_v45 = vadd.f32 %v8061_v12, %v11416_v1  ;;  %v3629_v12 = vadd.f32 %v8064_v43, %v11416_v1 }
 0x520   :  { %4276 = vmatprep.mubr.f32.mxu0 %v13982_v47  ;;  %v3634_v43 = vadd.f32 %v11416_v1, %v3633_v24 }
 0x521   :  { %8836 = vtanh.f32 %v3599_v36  ;;  %v3614_v36 = vadd.f32 %v11416_v1, %v3613_v57  ;;  %v3624_v57 = vadd.f32 %v11416_v1, %v3623_v15  ;;  %v14064_v15 = vld [vmem:[#allocation8_spill] sm:$0xff] }
 0x522   :  { %8838 = vtanh.f32 %v3604_v23 }
 0x523   :  { %7207 = vmatmul.mubr.msk.f32.gmra.mxu0 %vm599_vm0, %v8825_v55  ;;  %v11592_v17 = vpop.f32.mrf.mxu0  ;;  %8840 = vtanh.f32 %v3609_v38 }
 0x524   :  { %4282 = vmatprep.mubr.f32.mxu0 %v13982_v47  ;;  %8842 = vtanh.f32 %v3614_v36 }
 0x525   :  { %v3643_v55 = vpop.f32.mrf.mxu0  ;;  %8844 = vtanh.f32 %v3619_v45 }
 0x526   :  { %8846 = vtanh.f32 %v3624_v57 }
 0x527   :  { %7208 = vmatmul.mubr.msk.f32.gmra.mxu0 %vm599_vm0, %v8827_v54  ;;  %v8833_v54 = vpop.eup %8832  ;;  %8848 = vtanh.f32 %v3629_v12 }
 0x528   :  { %4288 = vmatprep.mubr.f32.mxu0 %v13982_v47  ;;  %8850 = vtanh.f32 %v3634_v43  ;;  %v11647_v43 = vpop.xlane.xlu1 %1543 }
 0x529   :  { %14066 = vst [vmem:[#allocation68_spill] sm:$0xff] %v11647_v43 }
 0x52b   :  { %7209 = vmatmul.mubr.msk.f32.gmra.mxu0 %vm599_vm0, %v8829_v41  ;;  %v11600_v0 = vpop.f32.mrf.mxu0  ;;  %v8835_v41 = vpop.eup %8834 }
 0x52c   :  { %4294 = vmatprep.mubr.f32.mxu0 %v13982_v47 }
 0x52d   :  { %v11605_v3 = vpop.f32.mrf.mxu0 }
 0x52e   :  { %v8837_v23 = vpop.eup %8836 }
 0x52f   :  { %7210 = vmatmul.mubr.msk.f32.gmra.mxu0 %vm599_vm0, %v8831_v29 }
 0x530   :  { %4300 = vmatprep.mubr.f32.mxu0 %v13982_v47 }
 0x533   :  { %7211 = vmatmul.mubr.msk.f32.gmra.mxu0 %vm599_vm0, %v8833_v54  ;;  %v11607_v52 = vpop.f32.mrf.mxu0  ;;  %v8839_v54 = vpop.eup %8838 }
 0x534   :  { %4306 = vmatprep.mubr.f32.mxu0 %v13982_v47 }
 0x535   :  { %v11612_v29 = vpop.f32.mrf.mxu0 }
 0x537   :  { %7212 = vmatmul.mubr.msk.f32.gmra.mxu0 %vm599_vm0, %v8835_v41  ;;  %v7167_v41 = vld [vmem:[%s13854_s4 + $0x4] sm:$0x3] }
 0x538   :  { %4312 = vmatprep.mubr.f32.mxu0 %v13982_v47 }
 0x53b   :  { %7213 = vmatmul.mubr.msk.f32.gmra.mxu0 %vm599_vm0, %v8837_v23  ;;  %v11617_v38 = vpop.f32.mrf.mxu0  ;;  %v8841_v23 = vpop.eup %8840 }
 0x53c   :  { %4318 = vmatprep.mubr.f32.mxu0 %v13982_v47  ;;  %v8843_v32 = vpop.eup %8842 }
 0x53d   :  { %v11622_v36 = vpop.f32.mrf.mxu0  ;;  %v8845_v34 = vpop.eup %8844 }
 0x53f   :  { %7214 = vmatmul.mubr.msk.f32.gmra.mxu0 %vm599_vm0, %v8839_v54  ;;  %v11632_v54 = vrot.slane %v7167_v41, %v14064_v15  ;;  %v11641_v15 = vpop.xlane.xlu0 %1541 }
 0x540   :  { %4324 = vmatprep.mubr.f32.mxu0 %v13982_v47  ;;  %14065 = vst [vmem:[#allocation67_spill] sm:$0xff] %v11641_v15 }
 0x543   :  { %v11627_v45 = vpop.f32.mrf.mxu0  ;;  %7215 = vmatmul.mubr.msk.f32.gmra.mxu0 %vm599_vm0, %v8841_v23  ;;  %v3639_v23 = vadd.f32 %v8067_v59, %v11416_v1  ;;  %v8847_v59 = vpop.eup %8846 }
 0x544   :  { %4330 = vmatprep.mubr.f32.mxu0 %v13982_v47 }
 0x545   :  { %v11635_v57 = vpop.f32.mrf.mxu0 }
 0x547   :  { %v4044_v25 = vpop.f32.mrf.mxu0  ;;  %7216 = vmatmul.mubr.msk.f32.gmra.mxu0 %vm599_vm0, %v8843_v32 }
 0x548   :  { %v4045_v9 = vadd.f32 %v4044_v25, %v11632_v54  ;;  %4336 = vmatprep.mubr.f32.mxu0 %v13982_v47  ;;  %v3644_v25 = vadd.f32 %v11416_v1, %v3643_v55  ;;  %v8849_v55 = vpop.eup %8848 }
 0x549   :  { %v4046_v48 = vpop.f32.mrf.mxu0 }
 0x54a   :  { %v4427_v12 = vmul.f32 1.442695, %v4045_v9  ;;  %4683 = vadd.xlane.f32.xlu0 %v4045_v9  ;;  %v3649_v9 = vadd.f32 %v11592_v17, %v11416_v1 }
 0x54b   :  { %v4050_v24 = vpop.f32.mrf.mxu0  ;;  %7217 = vmatmul.mubr.msk.f32.gmra.mxu0 %vm599_vm0, %v8845_v34 }
 0x54c   :  { %8852 = vpow2.f32 %v4427_v12  ;;  %v4051_v35 = vadd.f32 %v4050_v24, %v11632_v54  ;;  %4342 = vmatprep.mubr.f32.mxu0 %v13982_v47  ;;  %v11654_v12 = vpop.xlane.xlu0 %1573 }
 0x54d   :  { %8854 = vtanh.f32 %v3639_v23  ;;  %v4052_v32 = vpop.f32.mrf.mxu0  ;;  %14067 = vst [vmem:[#allocation69_spill] sm:$0xff] %v11654_v12 }
 0x54e   :  { %v4429_v4 = vmul.f32 1.442695, %v4051_v35  ;;  %4685 = vadd.xlane.f32.xlu1 %v4051_v35  ;;  %v3654_v35 = vadd.f32 %v11416_v1, %v11605_v3  ;;  %v3659_v3 = vadd.f32 %v11600_v0, %v11416_v1 }
 0x54f   :  { %v4056_v15 = vpop.f32.mrf.mxu0  ;;  %7218 = vmatmul.mubr.msk.f32.gmra.mxu0 %vm599_vm0, %v8847_v59  ;;  %v14069_v59 = vld [vmem:[#allocation9_spill] sm:$0xff] }
 0x550   :  { %8856 = vpow2.f32 %v4429_v4  ;;  %v4057_v34 = vadd.f32 %v4056_v15, %v11632_v54  ;;  %4348 = vmatprep.mubr.f32.mxu0 %v13982_v47  ;;  %v8851_v15 = vpop.eup %8850  ;;  %v11666_v12 = vrot.slane %v7167_v41, %v14069_v59  ;;  %v11675_v41 = vpop.xlane.xlu0 %1545 }
 0x551   :  { %8858 = vtanh.f32 %v3644_v25  ;;  %v4058_v23 = vpop.f32.mrf.mxu0  ;;  %v11663_v25 = vpop.xlane.xlu1 %1575  ;;  %14070 = vst [vmem:[#allocation71_spill] sm:$0xff] %v11675_v41  ;;  %v3664_v41 = vadd.f32 %v11416_v1, %v11612_v29 }
 0x552   :  { %v4431_v24 = vmul.f32 1.442695, %v4057_v34  ;;  %4687 = vadd.xlane.f32.xlu0 %v4057_v34  ;;  %14068 = vst [vmem:[#allocation70_spill] sm:$0xff] %v11663_v25 }
 0x553   :  { %v4062_v43 = vpop.f32.mrf.mxu0  ;;  %7219 = vmatmul.mubr.msk.f32.gmra.mxu0 %vm599_vm0, %v8849_v55 }
 0x554   :  { %8860 = vpow2.f32 %v4431_v24  ;;  %v4063_v4 = vadd.f32 %v4062_v43, %v11632_v54  ;;  %4354 = vmatprep.mubr.f32.mxu0 %v13982_v47 }
 0x555   :  { %8862 = vtanh.f32 %v3649_v9  ;;  %v11661_v17 = vpop.f32.mrf.mxu0 }
 0x556   :  { %v4433_v34 = vmul.f32 1.442695, %v4063_v4  ;;  %4689 = vadd.xlane.f32.xlu1 %v4063_v4  ;;  %v4047_v4 = vadd.f32 %v4046_v48, %v11666_v12 }
 0x557   :  { %v4068_v55 = vpop.f32.mrf.mxu0  ;;  %7220 = vmatmul.mubr.msk.f32.gmra.mxu0 %vm599_vm0, %v8851_v15 }
 0x558   :  { %8864 = vpow2.f32 %v4433_v34  ;;  %v4069_v43 = vadd.f32 %v4068_v55, %v11632_v54  ;;  %4360 = vmatprep.mubr.f32.mxu0 %v13982_v47 }
 0x559   :  { %v8853_v9 = vpop.eup %8852  ;;  %8866 = vtanh.f32 %v3654_v35  ;;  %v11673_v24 = vpop.f32.mrf.mxu0 }
 0x55a   :  { %v8855_v25 = vpop.eup %8854  ;;  %v4555_v59 = vmul.f32 %v8853_v9, %v10926_v40  ;;  %v4435_v15 = vmul.f32 1.442695, %v4069_v43  ;;  %4691 = vadd.xlane.f32.xlu0 %v4069_v43  ;;  %v11688_v9 = vpop.xlane.xlu1 %1547  ;;  %v4053_v43 = vadd.f32 %v4052_v32, %v11666_v12  ;;  %v3669_v32 = vadd.f32 %v11607_v52, %v11416_v1 }
 0x55b   :  { %v4074_v34 = vpop.f32.mrf.mxu0  ;;  %7221 = vmatmul.mubr.msk.f32.gmra.mxu0 %vm599_vm0, %v8855_v25  ;;  %14071 = vst [vmem:[#allocation72_spill] sm:$0xff] %v11688_v9 }
 0x55c   :  { %v11680_v55 = vadd.f32 %v4555_v59, %v4047_v4  ;;  %8868 = vpow2.f32 %v4435_v15  ;;  %v4075_v0 = vadd.f32 %v4074_v34, %v11632_v54  ;;  %4366 = vmatprep.mubr.f32.mxu0 %v13982_v47 }
 0x55d   :  { %v8857_v35 = vpop.eup %8856  ;;  %8870 = vtanh.f32 %v3659_v3  ;;  %v11686_v48 = vpop.f32.mrf.mxu0 }
 0x55e   :  { %v8859_v40 = vpop.eup %8858  ;;  %v4556_v25 = vmul.f32 %v8857_v35, %v10937_v18  ;;  %v4437_v59 = vmul.f32 1.442695, %v4075_v0  ;;  %4693 = vadd.xlane.f32.xlu1 %v4075_v0  ;;  %8115 = vmatprep.mubr.f32.mxu1 %v11680_v55  ;;  %v11702_v0 = vpop.xlane.xlu0 %1577  ;;  %v4059_v35 = vadd.f32 %v4058_v23, %v11666_v12  ;;  %v3674_v23 = vadd.f32 %v11416_v1, %v11622_v36 }
 0x55f   :  { %v4080_v4 = vpop.f32.mrf.mxu0  ;;  %7222 = vmatmul.mubr.msk.f32.gmra.mxu0 %vm599_vm0, %v8859_v40  ;;  %14072 = vst [vmem:[#allocation73_spill] sm:$0xff] %v11702_v0 }
 0x560   :  { %v11694_v3 = vadd.f32 %v4556_v25, %v4053_v43  ;;  %8872 = vpow2.f32 %v4437_v59  ;;  %v4081_v29 = vadd.f32 %v4080_v4, %v11632_v54  ;;  %4372 = vmatprep.mubr.f32.mxu0 %v13982_v47 }
 0x561   :  { %v8861_v15 = vpop.eup %8860  ;;  %8874 = vtanh.f32 %v3664_v41  ;;  %v11700_v18 = vpop.f32.mrf.mxu0 }
 0x562   :  { %v8863_v34 = vpop.eup %8862  ;;  %v4557_v40 = vmul.f32 %v8861_v15, %v10949_v61  ;;  %v4439_v43 = vmul.f32 1.442695, %v4081_v29  ;;  %4695 = vadd.xlane.f32.xlu0 %v4081_v29  ;;  %8116 = vmatmul.mubr.f32.vlgmr.msra.gmra.mxu1 %v11694_v3  ;;  %v11716_v29 = vpop.xlane.xlu1 %1579  ;;  %v4065_v15 = vadd.f32 %v11661_v17, %v11666_v12  ;;  %v3679_v17 = vadd.f32 %v11617_v38, %v11416_v1 }
 0x563   :  { %v4086_v25 = vpop.f32.mrf.mxu0  ;;  %7223 = vmatmul.mubr.msk.f32.gmra.mxu0 %vm599_vm0, %v8863_v34  ;;  %14073 = vst [vmem:[#allocation74_spill] sm:$0xff] %v11716_v29 }
 0x564   :  { %v11708_v59 = vadd.f32 %v4557_v40, %v4059_v35  ;;  %8876 = vpow2.f32 %v4439_v43  ;;  %v4087_v52 = vadd.f32 %v4086_v25, %v11632_v54  ;;  %4378 = vmatprep.mubr.f32.mxu0 %v13982_v47 }
 0x565   :  { %v8865_v41 = vpop.eup %8864  ;;  %8878 = vtanh.f32 %v3669_v32  ;;  %v11714_v61 = vpop.f32.mrf.mxu0 }
 0x566   :  { %v8867_v4 = vpop.eup %8866  ;;  %v4558_v34 = vmul.f32 %v8865_v41, %v10961_v19  ;;  %v4441_v35 = vmul.f32 1.442695, %v4087_v52  ;;  %4697 = vadd.xlane.f32.xlu1 %v4087_v52  ;;  %8118 = vmatprep.mubr.f32.mxu1 %v11708_v59  ;;  %v11731_v52 = vpop.xlane.xlu0 %1549  ;;  %v4071_v41 = vadd.f32 %v11673_v24, %v11666_v12  ;;  %v3684_v24 = vadd.f32 %v11416_v1, %v11635_v57  ;;  %v5365_v57 = vld [vmem:[#allocation2 + $0x1f8] sm:$0xff] }
 0x567   :  { %v4092_v40 = vpop.f32.mrf.mxu0  ;;  %7224 = vmatmul.mubr.msk.f32.gmra.mxu0 %vm599_vm0, %v8867_v4  ;;  %14074 = vst [vmem:[#allocation75_spill] sm:$0xff] %v11731_v52  ;;  %5587 = vmatprep.subr.mxu1 %v5365_v57 }
 0x568   :  { %v11723_v32 = vadd.f32 %v4558_v34, %v4065_v15  ;;  %8880 = vpow2.f32 %v4441_v35  ;;  %v4093_v36 = vadd.f32 %v4092_v40, %v11632_v54  ;;  %4384 = vmatprep.mubr.f32.mxu0 %v13982_v47 }
 0x569   :  { %v8869_v43 = vpop.eup %8868  ;;  %8882 = vtanh.f32 %v3674_v23  ;;  %v11729_v19 = vpop.f32.mrf.mxu0 }
 0x56a   :  { %v8871_v25 = vpop.eup %8870  ;;  %v4559_v4 = vmul.f32 %v8869_v43, %v10973_v37  ;;  %v4443_v15 = vmul.f32 1.442695, %v4093_v36  ;;  %4699 = vadd.xlane.f32.xlu0 %v4093_v36  ;;  %8119 = vmatmul.mubr.f32.gmra.mxu1 %v11723_v32  ;;  %v11746_v36 = vpop.xlane.xlu1 %1551  ;;  %v4077_v43 = vadd.f32 %v11686_v48, %v11666_v12 }
 0x56b   :  { %v4098_v34 = vpop.f32.mrf.mxu0  ;;  %7225 = vmatmul.mubr.msk.f32.gmra.mxu0 %vm599_vm0, %v8871_v25  ;;  %14075 = vst [vmem:[#allocation76_spill] sm:$0xff] %v11746_v36 }
 0x56c   :  { %v11738_v35 = vadd.f32 %v4559_v4, %v4071_v41  ;;  %8884 = vpow2.f32 %v4443_v15  ;;  %v4099_v38 = vadd.f32 %v4098_v34, %v11632_v54  ;;  %4390 = vmatprep.mubr.f32.mxu0 %v13982_v47  ;;  %v5364_v15 = vld [vmem:[#allocation2 + $0x1f0] sm:$0xff] }
 0x56d   :  { %v8873_v23 = vpop.eup %8872  ;;  %8886 = vtanh.f32 %v3679_v17  ;;  %v11744_v37 = vpop.f32.mrf.mxu0  ;;  %5588 = vmatpush1.msra.mxu1 %v5364_v15 }
 0x56e   :  { %v8875_v40 = vpop.eup %8874  ;;  %v4560_v25 = vmul.f32 %v8873_v23, %v10985_v39  ;;  %v4445_v41 = vmul.f32 1.442695, %v4099_v38  ;;  %4701 = vadd.xlane.f32.xlu1 %v4099_v38  ;;  %8121 = vmatprep.mubr.f32.mxu1 %v11738_v35  ;;  %v9323_v39 = vld [vmem:[%s13853_s3 + $0x2] ss:$0 sm:$0xff] }
 0x56f   :  { %v4104_v4 = vpop.f32.mrf.mxu0  ;;  %7226 = vmatmul.mubr.msk.f32.gmra.mxu0 %vm599_vm0, %v8875_v40  ;;  %v3689_v48 = vadd.f32 %v9323_v39, %v11627_v45  ;;  %v11763_v40 = vpop.xlane.xlu0 %1581 }
 0x570   :  { %v11753_v17 = vadd.f32 %v4560_v25, %v4077_v43  ;;  %8888 = vpow2.f32 %v4445_v41  ;;  %v4105_v1 = vadd.f32 %v4104_v4, %v11632_v54  ;;  %4396 = vmatprep.mubr.f32.mxu0 %v13982_v47  ;;  %14076 = vst [vmem:[#allocation77_spill] sm:$0xff] %v11763_v40  ;;  %v4083_v43 = vadd.f32 %v11700_v18, %v11666_v12 }
 0x571   :  { %v8877_v34 = vpop.eup %8876  ;;  %8890 = vtanh.f32 %v3684_v24  ;;  %v11761_v38 = vpop.f32.mrf.mxu0 }
 0x572   :  { %v8879_v23 = vpop.eup %8878  ;;  %v4561_v25 = vmul.f32 %v8877_v34, %v10997_v21  ;;  %v4447_v41 = vmul.f32 1.442695, %v4105_v1  ;;  %4703 = vadd.xlane.f32.xlu0 %v4105_v1  ;;  %8122 = vmatmul.mubr.f32.gmra.mxu1 %v11753_v17  ;;  %v11776_v34 = vpop.xlane.xlu1 %1583  ;;  %v4089_v1 = vadd.f32 %v11714_v61, %v11666_v12 }
 0x573   :  { %v4110_v4 = vpop.f32.mrf.mxu0  ;;  %7227 = vmatmul.mubr.msk.f32.gmra.mxu0 %vm599_vm0, %v8879_v23  ;;  %14077 = vst [vmem:[#allocation78_spill] sm:$0xff] %v11776_v34  ;;  %v11787_v61 = vpop.xlane.xlu0 %1553 }
 0x574   :  { %v11770_v45 = vadd.f32 %v4561_v25, %v4083_v43  ;;  %8892 = vpow2.f32 %v4447_v41  ;;  %v4111_v24 = vadd.f32 %v4110_v4, %v11632_v54  ;;  %4402 = vmatprep.mubr.f32.mxu0 %v13982_v47  ;;  %14078 = vst [vmem:[#allocation79_spill] sm:$0xff] %v11787_v61 }
 0x575   :  { %v8881_v57 = vpop.eup %8880  ;;  %8894 = vtanh.f32 %v3689_v48  ;;  %v11774_v18 = vpop.f32.mrf.mxu0 }
 0x576   :  { %v8883_v21 = vpop.eup %8882  ;;  %v4562_v39 = vmul.f32 %v8881_v57, %v11006_v26  ;;  %v4449_v15 = vmul.f32 1.442695, %v4111_v24  ;;  %4705 = vadd.xlane.f32.xlu1 %v4111_v24  ;;  %8124 = vmatprep.mubr.f32.mxu1 %v11770_v45  ;;  %v4095_v26 = vadd.f32 %v11729_v19, %v11666_v12  ;;  %v11798_v19 = vpop.xlane.xlu1 %1555 }
 0x577   :  { %v4116_v23 = vpop.f32.mrf.mxu0  ;;  %7228 = vmatmul.mubr.msk.f32.gmra.mxu0 %vm599_vm0, %v8883_v21  ;;  %14079 = vst [vmem:[#allocation80_spill] sm:$0xff] %v11798_v19 }
 0x578   :  { %v11783_v43 = vadd.f32 %v4562_v39, %v4089_v1  ;;  %8896 = vpow2.f32 %v4449_v15  ;;  %v4117_v48 = vadd.f32 %v4116_v23, %v11632_v54  ;;  %4408 = vmatprep.mubr.f32.mxu0 %v13982_v47 }
 0x579   :  { %v8885_v25 = vpop.eup %8884  ;;  %v4118_v41 = vpop.f32.mrf.mxu0 }
 0x57a   :  { %v8887_v4 = vpop.eup %8886  ;;  %v4563_v24 = vmul.f32 %v8885_v25, %v11015_v11  ;;  %v4451_v57 = vmul.f32 1.442695, %v4117_v48  ;;  %4707 = vadd.xlane.f32.xlu0 %v4117_v48  ;;  %8125 = vmatmul.mubr.f32.gmra.mxu1 %v11783_v43  ;;  %v4101_v11 = vadd.f32 %v11744_v37, %v11666_v12  ;;  %v11819_v29 = vpop.xlane.xlu1 %1587 }
 0x57b   :  { %v4122_v21 = vpop.f32.mrf.mxu0  ;;  %7229 = vmatmul.mubr.msk.f32.gmra.mxu0 %vm599_vm0, %v8887_v4  ;;  %14081 = vst [vmem:[#allocation82_spill] sm:$0xff] %v11819_v29 }
 0x57c   :  { %v11794_v1 = vadd.f32 %v4563_v24, %v4095_v26  ;;  %8898 = vpow2.f32 %v4451_v57  ;;  %v4123_v39 = vadd.f32 %v4122_v21, %v11632_v54  ;;  %4414 = vmatprep.mubr.f32.mxu0 %v13982_v47  ;;  %v5363_v57 = vld [vmem:[#allocation2 + $0x1e8] sm:$0xff]  ;;  %v5362_v21 = vld [vmem:[#allocation2 + $0x1e0] sm:$0xff] }
 0x57d   :  { %v8889_v15 = vpop.eup %8888  ;;  %v4124_v23 = vpop.f32.mrf.mxu0  ;;  %5589 = vmatprep.subr.mxu1 %v5363_v57 }
 0x57e   :  { %v8891_v34 = vpop.eup %8890  ;;  %v4564_v48 = vmul.f32 %v8889_v15, %v11024_v28  ;;  %v4453_v25 = vmul.f32 1.442695, %v4123_v39  ;;  %4709 = vadd.xlane.f32.xlu1 %v4123_v39  ;;  %8127 = vmatprep.mubr.f32.mxu1 %v11794_v1  ;;  %v11809_v15 = vpop.xlane.xlu0 %1585  ;;  %v4107_v39 = vadd.f32 %v11761_v38, %v11666_v12 }
 0x57f   :  { %v4128_v4 = vpop.f32.mrf.mxu0  ;;  %7230 = vmatmul.mubr.msk.f32.gmra.mxu0 %vm599_vm0, %v8891_v34  ;;  %14080 = vst [vmem:[#allocation81_spill] sm:$0xff] %v11809_v15  ;;  %5590 = vmatpush1.msra.mxu1 %v5362_v21 }
 0x580   :  { %v11805_v26 = vadd.f32 %v4564_v48, %v4101_v11  ;;  %8900 = vpow2.f32 %v4453_v25  ;;  %v4129_v24 = vadd.f32 %v4128_v4, %v11632_v54  ;;  %4420 = vmatprep.mubr.f32.mxu0 %v13982_v47 }
 0x581   :  { %v8893_v40 = vpop.eup %8892  ;;  %v4130_v37 = vpop.f32.mrf.mxu0 }
 0x582   :  { %v8895_v28 = vpop.eup %8894  ;;  %v4565_v34 = vmul.f32 %v8893_v40, %v11033_v8  ;;  %v4455_v11 = vmul.f32 1.442695, %v4129_v24  ;;  %4711 = vadd.xlane.f32.xlu0 %v4129_v24  ;;  %8128 = vmatmul.mubr.f32.gmra.mxu1 %v11805_v26  ;;  %v4113_v8 = vadd.f32 %v11774_v18, %v11666_v12 }
 0x583   :  { %v4134_v48 = vpop.f32.mrf.mxu0  ;;  %7231 = vmatmul.mubr.msk.f32.gmra.mxu0 %vm599_vm0, %v8895_v28 }
 0x584   :  { %v11816_v25 = vadd.f32 %v4565_v34, %v4107_v39  ;;  %8902 = vpow2.f32 %v4455_v11  ;;  %v4135_v4 = vadd.f32 %v4134_v48, %v11632_v54  ;;  %v11828_v11 = vpop.xlane.xlu0 %1589  ;;  %v4119_v48 = vadd.f32 %v4118_v41, %v11666_v12 }
 0x585   :  { %v8897_v57 = vpop.eup %8896  ;;  %v4136_v15 = vpop.f32.mrf.mxu0  ;;  %14082 = vst [vmem:[#allocation83_spill] sm:$0xff] %v11828_v11 }
 0x586   :  { %v4566_v38 = vmul.f32 %v8897_v57, %v11039_v33  ;;  %v4457_v40 = vmul.f32 1.442695, %v4135_v4  ;;  %4713 = vadd.xlane.f32.xlu1 %v4135_v4  ;;  %8130 = vmatprep.mubr.f32.mxu1 %v11816_v25 }
 0x587   :  { %v4140_v24 = vpop.f32.mrf.mxu0 }
 0x588   :  { %v11825_v21 = vadd.f32 %v4566_v38, %v4113_v8  ;;  %8904 = vpow2.f32 %v4457_v40  ;;  %v4141_v28 = vadd.f32 %v4140_v24, %v11632_v54  ;;  %v11836_v40 = vpop.xlane.xlu1 %1591  ;;  %v4125_v24 = vadd.f32 %v4124_v23, %v11666_v12 }
 0x589   :  { %v8899_v39 = vpop.eup %8898  ;;  %v4142_v34 = vpop.f32.mrf.mxu0  ;;  %14083 = vst [vmem:[#allocation84_spill] sm:$0xff] %v11836_v40  ;;  %v4131_v23 = vadd.f32 %v4130_v37, %v11666_v12  ;;  %v14087_v37 = vld [vmem:[#allocation11_spill] sm:$0xff] }
 0x58a   :  { %v4567_v18 = vmul.f32 %v8899_v39, %v11045_v5  ;;  %v4459_v29 = vmul.f32 1.442695, %v4141_v28  ;;  %4715 = vadd.xlane.f32.xlu0 %v4141_v28  ;;  %8131 = vmatmul.mubr.f32.gmra.mxu1 %v11825_v21  ;;  %v5361_v39 = vld [vmem:[#allocation2 + $0x1d8] sm:$0xff]  ;;  %v11844_v40 = vpop.xlane.xlu0 %1593 }
 0x58b   :  { %v4146_v33 = vpop.f32.mrf.mxu0  ;;  %5591 = vmatprep.subr.mxu1 %v5361_v39  ;;  %14084 = vst [vmem:[#allocation85_spill] sm:$0xff] %v11844_v40  ;;  %v4137_v40 = vadd.f32 %v4136_v15, %v11666_v12 }
 0x58c   :  { %v11833_v4 = vadd.f32 %v4567_v18, %v4119_v48  ;;  %8906 = vpow2.f32 %v4459_v29  ;;  %v4147_v57 = vadd.f32 %v4146_v33, %v11632_v54  ;;  %v5360_v48 = vld [vmem:[#allocation2 + $0x1d0] sm:$0xff]  ;;  %v11852_v39 = vpop.xlane.xlu1 %1595 }
 0x58d   :  { %v8901_v8 = vpop.eup %8900  ;;  %v4148_v38 = vpop.f32.mrf.mxu0  ;;  %5592 = vmatpush1.msra.mxu1 %v5360_v48 }
 0x58e   :  { %v4568_v41 = vmul.f32 %v8901_v8, %v11051_v14  ;;  %v4461_v11 = vmul.f32 1.442695, %v4147_v57  ;;  %4717 = vadd.xlane.f32.xlu1 %v4147_v57  ;;  %8133 = vmatprep.mubr.f32.mxu1 %v11833_v4  ;;  %v14085_v14 = vld [vmem:[#allocation10_spill] sm:$0xff] }
 0x58f   :  { %v4152_v5 = vpop.f32.mrf.mxu0  ;;  %14086 = vst [vmem:[#allocation10_spill] sm:$0xff] %v11852_v39  ;;  %v14089_v39 = vld [vmem:[#allocation12_spill] sm:$0xff] }
 0x590   :  { %v11841_v28 = vadd.f32 %v4568_v41, %v4125_v24  ;;  %8908 = vpow2.f32 %v4461_v11  ;;  %v4153_v29 = vadd.f32 %v4152_v5, %v11632_v54 }
 0x591   :  { %v8903_v18 = vpop.eup %8902  ;;  %v4154_v33 = vpop.f32.mrf.mxu0 }
 0x592   :  { %v4569_v8 = vmul.f32 %v8903_v18, %v14085_v14  ;;  %v4463_v57 = vmul.f32 1.442695, %v4153_v29  ;;  %4719 = vadd.xlane.f32.xlu0 %v4153_v29  ;;  %8134 = vmatmul.mubr.f32.gmra.mxu1 %v11841_v28 }
 0x593   :  { %v4158_v24 = vpop.f32.mrf.mxu0 }
 0x594   :  { %v11849_v11 = vadd.f32 %v4569_v8, %v4131_v23  ;;  %8910 = vpow2.f32 %v4463_v57  ;;  %v4159_v41 = vadd.f32 %v4158_v24, %v11632_v54  ;;  %v11860_v57 = vpop.xlane.xlu0 %1597  ;;  %v4143_v24 = vadd.f32 %v4142_v34, %v11666_v12 }
 0x595   :  { %v8905_v5 = vpop.eup %8904  ;;  %v4160_v0 = vpop.f32.mrf.mxu0  ;;  %14088 = vst [vmem:[#allocation11_spill] sm:$0xff] %v11860_v57  ;;  %v14091_v57 = vld [vmem:[#allocation13_spill] sm:$0xff] }
 0x596   :  { %v4570_v19 = vmul.f32 %v8905_v5, %v14087_v37  ;;  %v4465_v18 = vmul.f32 1.442695, %v4159_v41  ;;  %4721 = vadd.xlane.f32.xlu1 %v4159_v41  ;;  %8136 = vmatprep.mubr.f32.mxu1 %v11849_v11 }
 0x597   :  { %v4164_v29 = vpop.f32.mrf.mxu0 }
 0x598   :  { %v11857_v14 = vadd.f32 %v4570_v19, %v4137_v40  ;;  %8912 = vpow2.f32 %v4465_v18  ;;  %v4165_v48 = vadd.f32 %v4164_v29, %v11632_v54  ;;  %v11868_v18 = vpop.xlane.xlu1 %1599  ;;  %v4149_v29 = vadd.f32 %v4148_v38, %v11666_v12 }
 0x599   :  { %v8907_v23 = vpop.eup %8906  ;;  %v4166_v8 = vpop.f32.mrf.mxu0  ;;  %14090 = vst [vmem:[#allocation12_spill] sm:$0xff] %v11868_v18  ;;  %v4155_v38 = vadd.f32 %v4154_v33, %v11666_v12  ;;  %v14095_v33 = vld [vmem:[#allocation15_spill] sm:$0xff] }
 0x59a   :  { %v4571_v15 = vmul.f32 %v8907_v23, %v14089_v39  ;;  %v4467_v61 = vmul.f32 1.442695, %v4165_v48  ;;  %4723 = vadd.xlane.f32.xlu0 %v4165_v48  ;;  %8137 = vmatmul.mubr.f32.gmra.mxu1 %v11857_v14  ;;  %v5359_v23 = vld [vmem:[#allocation2 + $0x1c8] sm:$0xff]  ;;  %v11876_v18 = vpop.xlane.xlu0 %1601 }
 0x59b   :  { %v4170_v41 = vpop.f32.mrf.mxu0  ;;  %5593 = vmatprep.subr.mxu1 %v5359_v23  ;;  %14092 = vst [vmem:[#allocation13_spill] sm:$0xff] %v11876_v18  ;;  %v4161_v18 = vadd.f32 %v4160_v0, %v11666_v12 }
 0x59c   :  { %v11865_v5 = vadd.f32 %v4571_v15, %v4143_v24  ;;  %8914 = vpow2.f32 %v4467_v61  ;;  %v4171_v19 = vadd.f32 %v4170_v41, %v11632_v54  ;;  %v5358_v24 = vld [vmem:[#allocation2 + $0x1c0] sm:$0xff]  ;;  %v11884_v23 = vpop.xlane.xlu1 %1603 }
 0x59d   :  { %v8909_v40 = vpop.eup %8908  ;;  %v4172_v37 = vpop.f32.mrf.mxu0  ;;  %5594 = vmatpush1.msra.mxu1 %v5358_v24 }
 0x59e   :  { %v4572_v34 = vmul.f32 %v8909_v40, %v14091_v57  ;;  %v4469_v36 = vmul.f32 1.442695, %v4171_v19  ;;  %4725 = vadd.xlane.f32.xlu1 %v4171_v19  ;;  %8139 = vmatprep.mubr.f32.mxu1 %v11865_v5  ;;  %v14093_v57 = vld [vmem:[#allocation14_spill] sm:$0xff] }
 0x59f   :  { %v4176_v39 = vpop.f32.mrf.mxu0  ;;  %14094 = vst [vmem:[#allocation14_spill] sm:$0xff] %v11884_v23 }
 0x5a0   :  { %v11873_v48 = vadd.f32 %v4572_v34, %v4149_v29  ;;  %8916 = vpow2.f32 %v4469_v36  ;;  %v4177_v61 = vadd.f32 %v4176_v39, %v11632_v54 }
 0x5a1   :  { %v8911_v15 = vpop.eup %8910  ;;  %v4178_v41 = vpop.f32.mrf.mxu0 }
 0x5a2   :  { %v4573_v40 = vmul.f32 %v8911_v15, %v14093_v57  ;;  %v4471_v19 = vmul.f32 1.442695, %v4177_v61  ;;  %4727 = vadd.xlane.f32.xlu0 %v4177_v61  ;;  %8140 = vmatmul.mubr.f32.gmra.mxu1 %v11873_v48 }
 0x5a3   :  { %v4182_v29 = vpop.f32.mrf.mxu0 }
 0x5a4   :  { %v11881_v36 = vadd.f32 %v4573_v40, %v4155_v38  ;;  %8918 = vpow2.f32 %v4471_v19  ;;  %v4183_v34 = vadd.f32 %v4182_v29, %v11632_v54  ;;  %v11892_v19 = vpop.xlane.xlu0 %1605  ;;  %v4167_v29 = vadd.f32 %v4166_v8, %v11666_v12 }
 0x5a5   :  { %v8913_v39 = vpop.eup %8912  ;;  %v4184_v52 = vpop.f32.mrf.mxu0  ;;  %14097 = vst [vmem:[#allocation86_spill] sm:$0xff] %v11892_v19 }
 0x5a6   :  { %v4574_v9 = vmul.f32 %v8913_v39, %v14095_v33  ;;  %v4473_v15 = vmul.f32 1.442695, %v4183_v34  ;;  %4729 = vadd.xlane.f32.xlu1 %v4183_v34  ;;  %8142 = vmatprep.mubr.f32.mxu1 %v11881_v36 }
 0x5a7   :  { %v4188_v61 = vpop.f32.mrf.mxu0 }
 0x5a8   :  { %v11889_v57 = vadd.f32 %v4574_v9, %v4161_v18  ;;  %8920 = vpow2.f32 %v4473_v15  ;;  %v4189_v24 = vadd.f32 %v4188_v61, %v11632_v54  ;;  %v11900_v15 = vpop.xlane.xlu1 %1607  ;;  %v4173_v61 = vadd.f32 %v4172_v37, %v11666_v12 }
 0x5a9   :  { %v8915_v38 = vpop.eup %8914  ;;  %v4190_v40 = vpop.f32.mrf.mxu0  ;;  %14099 = vst [vmem:[#allocation88_spill] sm:$0xff] %v11900_v15  ;;  %v4179_v37 = vadd.f32 %v4178_v41, %v11666_v12  ;;  %v14105_v41 = vld [vmem:[#allocation17_spill] sm:$0xff] }
 0x5aa   :  { %14096 = vst [vmem:[#allocation15_spill] sm:$0xff] %v11889_v57  ;;  %v4575_v0 = vmul.f32 %v8915_v38, %v11093_v30  ;;  %v4475_v23 = vmul.f32 1.442695, %v4189_v24  ;;  %4731 = vadd.xlane.f32.xlu0 %v4189_v24  ;;  %8143 = vmatmul.mubr.f32.gmra.mxu1 %v11889_v57  ;;  %v5357_v38 = vld [vmem:[#allocation2 + $0x1b8] sm:$0xff]  ;;  %v11908_v15 = vpop.xlane.xlu0 %1609 }
 0x5ab   :  { %v4194_v34 = vpop.f32.mrf.mxu0  ;;  %5595 = vmatprep.subr.mxu1 %v5357_v38  ;;  %14101 = vst [vmem:[#allocation90_spill] sm:$0xff] %v11908_v15  ;;  %v4185_v15 = vadd.f32 %v4184_v52, %v11666_v12 }
 0x5ac   :  { %v11897_v39 = vadd.f32 %v4575_v0, %v4167_v29  ;;  %8922 = vpow2.f32 %v4475_v23  ;;  %v4195_v9 = vadd.f32 %v4194_v34, %v11632_v54  ;;  %v5356_v29 = vld [vmem:[#allocation2 + $0x1b0] sm:$0xff]  ;;  %v11916_v38 = vpop.xlane.xlu1 %1611 }
 0x5ad   :  { %v8917_v18 = vpop.eup %8916  ;;  %v4196_v33 = vpop.f32.mrf.mxu0  ;;  %5596 = vmatpush1.msra.mxu1 %v5356_v29  ;;  %14104 = vst [vmem:[#allocation91_spill] sm:$0xff] %v11916_v38  ;;  %v14107_v38 = vld [vmem:[#allocation18_spill] sm:$0xff] }
 0x5ae   :  { %14098 = vst [vmem:[#allocation87_spill] sm:$0xff] %v11897_v39  ;;  %v4576_v8 = vmul.f32 %v8917_v18, %v11099_v58  ;;  %v4477_v19 = vmul.f32 1.442695, %v4195_v9  ;;  %4733 = vadd.xlane.f32.xlu1 %v4195_v9  ;;  %8145 = vmatprep.mubr.f32.mxu1 %v11897_v39  ;;  %v14102_v58 = vld [vmem:[#allocation16_spill] sm:$0xff] }
 0x5af   :  { %v4200_v30 = vpop.f32.mrf.mxu0 }
 0x5b0   :  { %v11905_v24 = vadd.f32 %v4576_v8, %v4173_v61  ;;  %8924 = vpow2.f32 %v4477_v19  ;;  %v4201_v23 = vadd.f32 %v4200_v30, %v11632_v54 }
 0x5b1   :  { %v8919_v0 = vpop.eup %8918  ;;  %v4202_v34 = vpop.f32.mrf.mxu0 }
 0x5b2   :  { %14100 = vst [vmem:[#allocation89_spill] sm:$0xff] %v11905_v24  ;;  %v4577_v18 = vmul.f32 %v8919_v0, %v14102_v58  ;;  %v4479_v9 = vmul.f32 1.442695, %v4201_v23  ;;  %4735 = vadd.xlane.f32.xlu0 %v4201_v23  ;;  %8146 = vmatmul.mubr.f32.gmra.mxu1 %v11905_v24 }
 0x5b3   :  { %v4206_v61 = vpop.f32.mrf.mxu0 }
 0x5b4   :  { %v11913_v19 = vadd.f32 %v4577_v18, %v4179_v37  ;;  %8926 = vpow2.f32 %v4479_v9  ;;  %v4207_v8 = vadd.f32 %v4206_v61, %v11632_v54  ;;  %v11924_v9 = vpop.xlane.xlu0 %1613  ;;  %v4191_v61 = vadd.f32 %v4190_v40, %v11666_v12 }
 0x5b5   :  { %v8921_v30 = vpop.eup %8920  ;;  %v4208_v39 = vpop.f32.mrf.mxu0  ;;  %14106 = vst [vmem:[#allocation17_spill] sm:$0xff] %v11924_v9  ;;  %v14109_v9 = vld [vmem:[#allocation19_spill] sm:$0xff] }
 0x5b6   :  { %14103 = vst [vmem:[#allocation16_spill] sm:$0xff] %v11913_v19  ;;  %v4578_v57 = vmul.f32 %v8921_v30, %v14105_v41  ;;  %v4481_v0 = vmul.f32 1.442695, %v4207_v8  ;;  %4737 = vadd.xlane.f32.xlu1 %v4207_v8  ;;  %8148 = vmatprep.mubr.f32.mxu1 %v11913_v19 }
 0x5b7   :  { %v4212_v23 = vpop.f32.mrf.mxu0 }
 0x5b8   :  { %v11921_v58 = vadd.f32 %v4578_v57, %v4185_v15  ;;  %8928 = vpow2.f32 %v4481_v0  ;;  %v4213_v29 = vadd.f32 %v4212_v23, %v11632_v54  ;;  %v11932_v0 = vpop.xlane.xlu1 %1615  ;;  %v4197_v23 = vadd.f32 %v4196_v33, %v11666_v12 }
 0x5b9   :  { %v8923_v37 = vpop.eup %8922  ;;  %v4214_v18 = vpop.f32.mrf.mxu0  ;;  %14108 = vst [vmem:[#allocation18_spill] sm:$0xff] %v11932_v0  ;;  %v4203_v33 = vadd.f32 %v4202_v34, %v11666_v12 }
 0x5ba   :  { %v4579_v52 = vmul.f32 %v8923_v37, %v14107_v38  ;;  %v4483_v24 = vmul.f32 1.442695, %v4213_v29  ;;  %4739 = vadd.xlane.f32.xlu0 %v4213_v29  ;;  %8149 = vmatmul.mubr.f32.gmra.mxu1 %v11921_v58  ;;  %v5355_v37 = vld [vmem:[#allocation2 + $0x1a8] sm:$0xff]  ;;  %v11940_v0 = vpop.xlane.xlu0 %1617 }
 0x5bb   :  { %v4218_v8 = vpop.f32.mrf.mxu0  ;;  %5597 = vmatprep.subr.mxu1 %v5355_v37  ;;  %14110 = vst [vmem:[#allocation19_spill] sm:$0xff] %v11940_v0  ;;  %v4209_v0 = vadd.f32 %v4208_v39, %v11666_v12 }
 0x5bc   :  { %v11929_v30 = vadd.f32 %v4579_v52, %v4191_v61  ;;  %8930 = vpow2.f32 %v4483_v24  ;;  %v4219_v57 = vadd.f32 %v4218_v8, %v11632_v54  ;;  %v5354_v61 = vld [vmem:[#allocation2 + $0x1a0] sm:$0xff]  ;;  %v11948_v37 = vpop.xlane.xlu1 %1619 }
 0x5bd   :  { %v8925_v15 = vpop.eup %8924  ;;  %v4220_v41 = vpop.f32.mrf.mxu0  ;;  %5598 = vmatpush1.msra.mxu1 %v5354_v61  ;;  %14111 = vst [vmem:[#allocation92_spill] sm:$0xff] %v11948_v37 }
 0x5be   :  { %v4580_v40 = vmul.f32 %v8925_v15, %v14109_v9  ;;  %v4485_v19 = vmul.f32 1.442695, %v4219_v57  ;;  %4741 = vadd.xlane.f32.xlu1 %v4219_v57  ;;  %8151 = vmatprep.mubr.f32.mxu1 %v11929_v30 }
 0x5bf   :  { %v4224_v38 = vpop.f32.mrf.mxu0 }
 0x5c0   :  { %v11937_v29 = vadd.f32 %v4580_v40, %v4197_v23  ;;  %8932 = vpow2.f32 %v4485_v19  ;;  %v4225_v24 = vadd.f32 %v4224_v38, %v11632_v54 }
 0x5c1   :  { %v8927_v52 = vpop.eup %8926  ;;  %v4226_v8 = vpop.f32.mrf.mxu0 }
 0x5c2   :  { %v4581_v9 = vmul.f32 %v8927_v52, %v11129_v46  ;;  %v4487_v57 = vmul.f32 1.442695, %v4225_v24  ;;  %4743 = vadd.xlane.f32.xlu0 %v4225_v24  ;;  %8152 = vmatmul.mubr.f32.gmra.mxu1 %v11937_v29 }
 0x5c3   :  { %v4230_v15 = vpop.f32.mrf.mxu0 }
 0x5c4   :  { %v11945_v19 = vadd.f32 %v4581_v9, %v4203_v33  ;;  %8934 = vpow2.f32 %v4487_v57  ;;  %v4231_v23 = vadd.f32 %v4230_v15, %v11632_v54  ;;  %v11956_v57 = vpop.xlane.xlu0 %1621  ;;  %v4215_v15 = vadd.f32 %v4214_v18, %v11666_v12 }
 0x5c5   :  { %v8929_v40 = vpop.eup %8928  ;;  %v4232_v38 = vpop.f32.mrf.mxu0  ;;  %14112 = vst [vmem:[#allocation93_spill] sm:$0xff] %v11956_v57 }
 0x5c6   :  { %v4582_v34 = vmul.f32 %v8929_v40, %v11135_v62  ;;  %v4489_v46 = vmul.f32 1.442695, %v4231_v23  ;;  %4745 = vadd.xlane.f32.xlu1 %v4231_v23  ;;  %8154 = vmatprep.mubr.f32.mxu1 %v11945_v19 }
 0x5c7   :  { %v4236_v24 = vpop.f32.mrf.mxu0 }
 0x5c8   :  { %v11953_v52 = vadd.f32 %v4582_v34, %v4209_v0  ;;  %8936 = vpow2.f32 %v4489_v46  ;;  %v4237_v61 = vadd.f32 %v4236_v24, %v11632_v54  ;;  %v11964_v46 = vpop.xlane.xlu1 %1623  ;;  %v4221_v24 = vadd.f32 %v4220_v41, %v11666_v12 }
 0x5c9   :  { %v8931_v33 = vpop.eup %8930  ;;  %v4238_v9 = vpop.f32.mrf.mxu0  ;;  %14113 = vst [vmem:[#allocation94_spill] sm:$0xff] %v11964_v46  ;;  %v4227_v41 = vadd.f32 %v4226_v8, %v11666_v12 }
 0x5ca   :  { %v4583_v39 = vmul.f32 %v8931_v33, %v11141_v42  ;;  %v4491_v37 = vmul.f32 1.442695, %v4237_v61  ;;  %4747 = vadd.xlane.f32.xlu0 %v4237_v61  ;;  %8155 = vmatmul.mubr.f32.gmra.mxu1 %v11953_v52  ;;  %v5353_v33 = vld [vmem:[#allocation2 + $0x198] sm:$0xff]  ;;  %v11972_v46 = vpop.xlane.xlu0 %3090 }
 0x5cb   :  { %v4242_v62 = vpop.f32.mrf.mxu0  ;;  %5599 = vmatprep.subr.mxu1 %v5353_v33  ;;  %14114 = vst [vmem:[#allocation95_spill] sm:$0xff] %v11972_v46  ;;  %v4233_v46 = vadd.f32 %v4232_v38, %v11666_v12  ;;  %v4239_v38 = vadd.f32 %v4238_v9, %v11666_v12 }
 0x5cc   :  { %v11961_v23 = vadd.f32 %v4583_v39, %v4215_v15  ;;  %8938 = vpow2.f32 %v4491_v37  ;;  %v4243_v0 = vadd.f32 %v4242_v62, %v11632_v54  ;;  %v5352_v15 = vld [vmem:[#allocation2 + $0x190] sm:$0xff]  ;;  %v11980_v33 = vpop.xlane.xlu1 %3092 }
 0x5cd   :  { %v8933_v40 = vpop.eup %8932  ;;  %v4244_v34 = vpop.f32.mrf.mxu0  ;;  %5600 = vmatpush1.msra.mxu1 %v5352_v15  ;;  %14115 = vst [vmem:[#allocation96_spill] sm:$0xff] %v11980_v33 }
 0x5ce   :  { %v4584_v18 = vmul.f32 %v8933_v40, %v11147_v50  ;;  %v4493_v57 = vmul.f32 1.442695, %v4243_v0  ;;  %4749 = vadd.xlane.f32.xlu1 %v4243_v0  ;;  %8157 = vmatprep.mubr.f32.mxu1 %v11961_v23  ;;  %v11988_v33 = vpop.xlane.xlu0 %3094 }
 0x5cf   :  { %v4248_v42 = vpop.f32.mrf.mxu0  ;;  %14116 = vst [vmem:[#allocation97_spill] sm:$0xff] %v11988_v33  ;;  %v4245_v33 = vadd.f32 %v4244_v34, %v11666_v12 }
 0x5d0   :  { %v11969_v61 = vadd.f32 %v4584_v18, %v4221_v24  ;;  %8940 = vpow2.f32 %v4493_v57  ;;  %v4249_v37 = vadd.f32 %v4248_v42, %v11632_v54 }
 0x5d1   :  { %v8935_v39 = vpop.eup %8934  ;;  %v4250_v62 = vpop.f32.mrf.mxu0 }
 0x5d2   :  { %v4585_v50 = vmul.f32 %v8935_v39, %v11155_v10  ;;  %v4495_v0 = vmul.f32 1.442695, %v4249_v37  ;;  %4751 = vadd.xlane.f32.xlu0 %v4249_v37  ;;  %8158 = vmatmul.mubr.f32.gmra.mxu1 %v11969_v61 }
 0x5d3   :  { %v4254_v40 = vpop.f32.mrf.mxu0 }
 0x5d4   :  { %v11977_v57 = vadd.f32 %v4585_v50, %v4227_v41  ;;  %8942 = vpow2.f32 %v4495_v0  ;;  %v4255_v24 = vadd.f32 %v4254_v40, %v11632_v54  ;;  %v5351_v41 = vld [vmem:[#allocation2 + $0x188] sm:$0xff]  ;;  %v5350_v50 = vld [vmem:[#allocation2 + $0x180] sm:$0xff] }
 0x5d5   :  { %v8937_v18 = vpop.eup %8936  ;;  %v4256_v42 = vpop.f32.mrf.mxu0  ;;  %5601 = vmatprep.subr.mxu1 %v5351_v41 }
 0x5d6   :  { %v4586_v8 = vmul.f32 %v8937_v18, %v11163_v2  ;;  %v4497_v10 = vmul.f32 1.442695, %v4255_v24  ;;  %4753 = vadd.xlane.f32.xlu1 %v4255_v24  ;;  %8160 = vmatprep.mubr.f32.mxu1 %v11977_v57  ;;  %v11996_v41 = vpop.xlane.xlu1 %3096 }
 0x5d7   :  { %v4260_v37 = vpop.f32.mrf.mxu0  ;;  %5602 = vmatpush1.msra.mxu1 %v5350_v50  ;;  %14117 = vst [vmem:[#allocation98_spill] sm:$0xff] %v11996_v41 }
 0x5d8   :  { %v11985_v39 = vadd.f32 %v4586_v8, %v4233_v46  ;;  %8944 = vpow2.f32 %v4497_v10  ;;  %v4261_v15 = vadd.f32 %v4260_v37, %v11632_v54 }
 0x5d9   :  { %v8939_v0 = vpop.eup %8938  ;;  %v4262_v40 = vpop.f32.mrf.mxu0 }
 0x5da   :  { %v4587_v2 = vmul.f32 %v8939_v0, %v11171_v63  ;;  %v4499_v24 = vmul.f32 1.442695, %v4261_v15  ;;  %4755 = vadd.xlane.f32.xlu0 %v4261_v15  ;;  %8161 = vmatmul.mubr.f32.gmra.mxu1 %v11985_v39 }
 0x5db   :  { %v4266_v46 = vpop.f32.mrf.mxu0 }
 0x5dc   :  { %v11993_v18 = vadd.f32 %v4587_v2, %v4239_v38  ;;  %8946 = vpow2.f32 %v4499_v24  ;;  %v4267_v8 = vadd.f32 %v4266_v46, %v11632_v54  ;;  %v12004_v24 = vpop.xlane.xlu0 %3098  ;;  %v4251_v46 = vadd.f32 %v4250_v62, %v11666_v12 }
 0x5dd   :  { %v8941_v10 = vpop.eup %8940  ;;  %v4268_v37 = vpop.f32.mrf.mxu0  ;;  %14118 = vst [vmem:[#allocation99_spill] sm:$0xff] %v12004_v24 }
 0x5de   :  { %v4588_v9 = vmul.f32 %v8941_v10, %v11179_v27  ;;  %v4501_v63 = vmul.f32 1.442695, %v4267_v8  ;;  %4757 = vadd.xlane.f32.xlu1 %v4267_v8  ;;  %8163 = vmatprep.mubr.f32.mxu1 %v11993_v18 }
 0x5df   :  { %v4272_v15 = vpop.f32.mrf.mxu0 }
 0x5e0   :  { %v12001_v0 = vadd.f32 %v4588_v9, %v4245_v33  ;;  %8948 = vpow2.f32 %v4501_v63  ;;  %v4273_v50 = vadd.f32 %v4272_v15, %v11632_v54  ;;  %v12012_v63 = vpop.xlane.xlu1 %3100  ;;  %v4257_v15 = vadd.f32 %v4256_v42, %v11666_v12 }
 0x5e1   :  { %v8943_v38 = vpop.eup %8942  ;;  %v4274_v2 = vpop.f32.mrf.mxu0  ;;  %14119 = vst [vmem:[#allocation100_spill] sm:$0xff] %v12012_v63 }
 0x5e2   :  { %v4589_v34 = vmul.f32 %v8943_v38, %v11190_v60  ;;  %v4503_v41 = vmul.f32 1.442695, %v4273_v50  ;;  %4759 = vadd.xlane.f32.xlu0 %v4273_v50  ;;  %8164 = vmatmul.mubr.f32.gmra.mxu1 %v12001_v0 }
 0x5e3   :  { %v4278_v27 = vpop.f32.mrf.mxu0 }
 0x5e4   :  { %v12009_v8 = vadd.f32 %v4589_v34, %v4251_v46  ;;  %8950 = vpow2.f32 %v4503_v41  ;;  %v4279_v33 = vadd.f32 %v4278_v27, %v11632_v54  ;;  %v12020_v34 = vpop.xlane.xlu0 %3102  ;;  %v4263_v27 = vadd.f32 %v4262_v40, %v11666_v12 }
 0x5e5   :  { %v8945_v10 = vpop.eup %8944  ;;  %v4280_v9 = vpop.f32.mrf.mxu0  ;;  %14120 = vst [vmem:[#allocation101_spill] sm:$0xff] %v12020_v34 }
 0x5e6   :  { %v4590_v62 = vmul.f32 %v8945_v10, %v11198_v53  ;;  %v4505_v24 = vmul.f32 1.442695, %v4279_v33  ;;  %4761 = vadd.xlane.f32.xlu1 %v4279_v33  ;;  %8166 = vmatprep.mubr.f32.mxu1 %v12009_v8 }
 0x5e7   :  { %v4284_v60 = vpop.f32.mrf.mxu0 }
 0x5e8   :  { %v12017_v50 = vadd.f32 %v4590_v62, %v4257_v15  ;;  %8952 = vpow2.f32 %v4505_v24  ;;  %v4285_v41 = vadd.f32 %v4284_v60, %v11632_v54  ;;  %v12028_v62 = vpop.xlane.xlu1 %3104  ;;  %v4269_v60 = vadd.f32 %v4268_v37, %v11666_v12 }
 0x5e9   :  { %v8947_v38 = vpop.eup %8946  ;;  %v4286_v46 = vpop.f32.mrf.mxu0  ;;  %14121 = vst [vmem:[#allocation102_spill] sm:$0xff] %v12028_v62 }
 0x5ea   :  { %v4591_v42 = vmul.f32 %v8947_v38, %v11206_v6  ;;  %v4507_v63 = vmul.f32 1.442695, %v4285_v41  ;;  %4763 = vadd.xlane.f32.xlu0 %v4285_v41  ;;  %8167 = vmatmul.mubr.f32.gmra.mxu1 %v12017_v50 }
 0x5eb   :  { %v4290_v53 = vpop.f32.mrf.mxu0 }
 0x5ec   :  { %v12025_v33 = vadd.f32 %v4591_v42, %v4263_v27  ;;  %8954 = vpow2.f32 %v4507_v63  ;;  %v4291_v24 = vadd.f32 %v4290_v53, %v11632_v54  ;;  %v12036_v42 = vpop.xlane.xlu0 %3106  ;;  %v4275_v53 = vadd.f32 %v4274_v2, %v11666_v12 }
 0x5ed   :  { %v8949_v10 = vpop.eup %8948  ;;  %v4292_v15 = vpop.f32.mrf.mxu0  ;;  %14122 = vst [vmem:[#allocation103_spill] sm:$0xff] %v12036_v42 }
 0x5ee   :  { %v4592_v40 = vmul.f32 %v8949_v10, %v11214_v49  ;;  %v4509_v34 = vmul.f32 1.442695, %v4291_v24  ;;  %4765 = vadd.xlane.f32.xlu1 %v4291_v24  ;;  %8169 = vmatprep.mubr.f32.mxu1 %v12025_v33 }
 0x5ef   :  { %v4296_v6 = vpop.f32.mrf.mxu0 }
 0x5f0   :  { %v12033_v41 = vadd.f32 %v4592_v40, %v4269_v60  ;;  %8956 = vpow2.f32 %v4509_v34  ;;  %v4297_v63 = vadd.f32 %v4296_v6, %v11632_v54  ;;  %v12044_v40 = vpop.xlane.xlu1 %3108  ;;  %v4281_v6 = vadd.f32 %v4280_v9, %v11666_v12 }
 0x5f1   :  { %v8951_v38 = vpop.eup %8950  ;;  %v4298_v27 = vpop.f32.mrf.mxu0  ;;  %14123 = vst [vmem:[#allocation104_spill] sm:$0xff] %v12044_v40 }
 0x5f2   :  { %v4593_v37 = vmul.f32 %v8951_v38, %v11225_v13  ;;  %v4511_v62 = vmul.f32 1.442695, %v4297_v63  ;;  %4767 = vadd.xlane.f32.xlu0 %v4297_v63  ;;  %8170 = vmatmul.mubr.f32.gmra.mxu1 %v12033_v41 }
 0x5f3   :  { %v4302_v49 = vpop.f32.mrf.mxu0 }
 0x5f4   :  { %v12041_v24 = vadd.f32 %v4593_v37, %v4275_v53  ;;  %8958 = vpow2.f32 %v4511_v62  ;;  %v4303_v34 = vadd.f32 %v4302_v49, %v11632_v54  ;;  %v12052_v37 = vpop.xlane.xlu0 %3110  ;;  %v4287_v49 = vadd.f32 %v4286_v46, %v11666_v12 }
 0x5f5   :  { %v8953_v10 = vpop.eup %8952  ;;  %v4304_v60 = vpop.f32.mrf.mxu0  ;;  %14125 = vst [vmem:[#allocation106_spill] sm:$0xff] %v12052_v37 }
 0x5f6   :  { %v4594_v2 = vmul.f32 %v8953_v10, %v11233_v51  ;;  %v4513_v42 = vmul.f32 1.442695, %v4303_v34  ;;  %4769 = vadd.xlane.f32.xlu1 %v4303_v34  ;;  %8172 = vmatprep.mubr.f32.mxu1 %v12041_v24 }
 0x5f7   :  { %v4308_v13 = vpop.f32.mrf.mxu0 }
 0x5f8   :  { %v12049_v63 = vadd.f32 %v4594_v2, %v4281_v6  ;;  %8960 = vpow2.f32 %v4513_v42  ;;  %v4309_v62 = vadd.f32 %v4308_v13, %v11632_v54  ;;  %v12060_v2 = vpop.xlane.xlu1 %3112  ;;  %v4293_v13 = vadd.f32 %v4292_v15, %v11666_v12 }
 0x5f9   :  { %v8955_v38 = vpop.eup %8954  ;;  %v4310_v53 = vpop.f32.mrf.mxu0  ;;  %14127 = vst [vmem:[#allocation108_spill] sm:$0xff] %v12060_v2 }
 0x5fa   :  { %14124 = vst [vmem:[#allocation105_spill] sm:$0xff] %v12049_v63  ;;  %v4595_v9 = vmul.f32 %v8955_v38, %v11241_v20  ;;  %v4515_v40 = vmul.f32 1.442695, %v4309_v62  ;;  %4771 = vadd.xlane.f32.xlu0 %v4309_v62  ;;  %8173 = vmatmul.mubr.f32.gmra.mxu1 %v12049_v63 }
 0x5fb   :  { %v4314_v51 = vpop.f32.mrf.mxu0 }
 0x5fc   :  { %v12057_v34 = vadd.f32 %v4595_v9, %v4287_v49  ;;  %8962 = vpow2.f32 %v4515_v40  ;;  %v4315_v42 = vadd.f32 %v4314_v51, %v11632_v54  ;;  %v12068_v9 = vpop.xlane.xlu0 %3114  ;;  %v4299_v51 = vadd.f32 %v4298_v27, %v11666_v12 }
 0x5fd   :  { %v8957_v10 = vpop.eup %8956  ;;  %v4316_v6 = vpop.f32.mrf.mxu0  ;;  %14129 = vst [vmem:[#allocation110_spill] sm:$0xff] %v12068_v9 }
 0x5fe   :  { %14126 = vst [vmem:[#allocation107_spill] sm:$0xff] %v12057_v34  ;;  %v4596_v46 = vmul.f32 %v8957_v10, %v11249_v31  ;;  %v4517_v37 = vmul.f32 1.442695, %v4315_v42  ;;  %4773 = vadd.xlane.f32.xlu1 %v4315_v42  ;;  %8175 = vmatprep.mubr.f32.mxu1 %v12057_v34 }
 0x5ff   :  { %v4320_v20 = vpop.f32.mrf.mxu0 }
 0x600   :  { %v12065_v62 = vadd.f32 %v4596_v46, %v4293_v13  ;;  %8964 = vpow2.f32 %v4517_v37  ;;  %v4321_v40 = vadd.f32 %v4320_v20, %v11632_v54  ;;  %v12076_v46 = vpop.xlane.xlu1 %3116  ;;  %v4305_v20 = vadd.f32 %v4304_v60, %v11666_v12 }
 0x601   :  { %v8959_v38 = vpop.eup %8958  ;;  %v4322_v49 = vpop.f32.mrf.mxu0  ;;  %14131 = vst [vmem:[#allocation112_spill] sm:$0xff] %v12076_v46  ;;  %v14134_v46 = vld [vmem:[#allocation46_spill] sm:$0xff] }
 0x602   :  { %14128 = vst [vmem:[#allocation109_spill] sm:$0xff] %v12065_v62  ;;  %v4597_v15 = vmul.f32 %v8959_v38, %v11260_v44  ;;  %v4519_v2 = vmul.f32 1.442695, %v4321_v40  ;;  %4775 = vadd.xlane.f32.xlu0 %v4321_v40  ;;  %8176 = vmatmul.mubr.f32.gmra.mxu1 %v12065_v62 }
 0x603   :  { %v4326_v31 = vpop.f32.mrf.mxu0 }
 0x604   :  { %v12073_v42 = vadd.f32 %v4597_v15, %v4299_v51  ;;  %8966 = vpow2.f32 %v4519_v2  ;;  %v4327_v37 = vadd.f32 %v4326_v31, %v11632_v54  ;;  %v12084_v15 = vpop.xlane.xlu0 %3118  ;;  %v4311_v31 = vadd.f32 %v4310_v53, %v11666_v12 }
 0x605   :  { %v8961_v10 = vpop.eup %8960  ;;  %v4328_v13 = vpop.f32.mrf.mxu0  ;;  %14133 = vst [vmem:[#allocation114_spill] sm:$0xff] %v12084_v15 }
 0x606   :  { %14130 = vst [vmem:[#allocation111_spill] sm:$0xff] %v12073_v42  ;;  %v4598_v27 = vmul.f32 %v8961_v10, %v11268_v16  ;;  %v4521_v9 = vmul.f32 1.442695, %v4327_v37  ;;  %4777 = vadd.xlane.f32.xlu1 %v4327_v37  ;;  %8178 = vmatprep.mubr.f32.mxu1 %v12073_v42 }
 0x607   :  { %v4332_v44 = vpop.f32.mrf.mxu0 }
 0x608   :  { %v12081_v40 = vadd.f32 %v4598_v27, %v4305_v20  ;;  %8968 = vpow2.f32 %v4521_v9  ;;  %v4333_v2 = vadd.f32 %v4332_v44, %v11632_v54  ;;  %v12092_v27 = vpop.xlane.xlu1 %3120  ;;  %v4317_v44 = vadd.f32 %v4316_v6, %v11666_v12 }
 0x609   :  { %v8963_v38 = vpop.eup %8962  ;;  %v4334_v51 = vpop.f32.mrf.mxu0  ;;  %14136 = vst [vmem:[#allocation115_spill] sm:$0xff] %v12092_v27  ;;  %v14139_v27 = vld [vmem:[#allocation49_spill] sm:$0xff] }
 0x60a   :  { %14132 = vst [vmem:[#allocation113_spill] sm:$0xff] %v12081_v40  ;;  %v4599_v60 = vmul.f32 %v8963_v38, %v14134_v46  ;;  %v4523_v62 = vmul.f32 1.442695, %v4333_v2  ;;  %4779 = vadd.xlane.f32.xlu0 %v4333_v2  ;;  %8179 = vmatmul.mubr.f32.gmra.mxu1 %v12081_v40 }
 0x60b   :  { %v4338_v16 = vpop.f32.mrf.mxu0 }
 0x60c   :  { %v12089_v37 = vadd.f32 %v4599_v60, %v4311_v31  ;;  %8970 = vpow2.f32 %v4523_v62  ;;  %v4339_v9 = vadd.f32 %v4338_v16, %v11632_v54  ;;  %v12100_v60 = vpop.xlane.xlu0 %3122  ;;  %v4323_v16 = vadd.f32 %v4322_v49, %v11666_v12 }
 0x60d   :  { %v8965_v10 = vpop.eup %8964  ;;  %v4340_v20 = vpop.f32.mrf.mxu0  ;;  %14138 = vst [vmem:[#allocation117_spill] sm:$0xff] %v12100_v60 }
 0x60e   :  { %14135 = vst [vmem:[#allocation46_spill] sm:$0xff] %v12089_v37  ;;  %v4600_v53 = vmul.f32 %v8965_v10, %v11284_v56  ;;  %v4525_v15 = vmul.f32 1.442695, %v4339_v9  ;;  %4781 = vadd.xlane.f32.xlu1 %v4339_v9  ;;  %8181 = vmatprep.mubr.f32.mxu1 %v12089_v37 }
 0x60f   :  { %v4344_v46 = vpop.f32.mrf.mxu0 }
 0x610   :  { %v12097_v2 = vadd.f32 %v4600_v53, %v4317_v44  ;;  %8972 = vpow2.f32 %v4525_v15  ;;  %v4345_v62 = vadd.f32 %v4344_v46, %v11632_v54  ;;  %v12108_v53 = vpop.xlane.xlu1 %3124  ;;  %v4329_v46 = vadd.f32 %v4328_v13, %v11666_v12 }
 0x611   :  { %v8967_v38 = vpop.eup %8966  ;;  %v4346_v31 = vpop.f32.mrf.mxu0  ;;  %14141 = vst [vmem:[#allocation118_spill] sm:$0xff] %v12108_v53 }
 0x612   :  { %14137 = vst [vmem:[#allocation116_spill] sm:$0xff] %v12097_v2  ;;  %v4601_v6 = vmul.f32 %v8967_v38, %v14139_v27  ;;  %v4527_v40 = vmul.f32 1.442695, %v4345_v62  ;;  %4783 = vadd.xlane.f32.xlu0 %v4345_v62  ;;  %8182 = vmatmul.mubr.f32.gmra.mxu1 %v12097_v2 }
 0x613   :  { %v4350_v56 = vpop.f32.mrf.mxu0 }
 0x614   :  { %v12105_v9 = vadd.f32 %v4601_v6, %v4323_v16  ;;  %8974 = vpow2.f32 %v4527_v40  ;;  %v4351_v15 = vadd.f32 %v4350_v56, %v11632_v54  ;;  %v12116_v6 = vpop.xlane.xlu0 %3126  ;;  %v4335_v56 = vadd.f32 %v4334_v51, %v11666_v12 }
 0x615   :  { %v8969_v10 = vpop.eup %8968  ;;  %v4352_v44 = vpop.f32.mrf.mxu0  ;;  %14143 = vst [vmem:[#allocation120_spill] sm:$0xff] %v12116_v6  ;;  %v14146_v6 = vld [vmem:[#allocation24_spill] sm:$0xff] }
 0x616   :  { %14140 = vst [vmem:[#allocation49_spill] sm:$0xff] %v12105_v9  ;;  %v4602_v49 = vmul.f32 %v8969_v10, %v11303_v22  ;;  %v4529_v60 = vmul.f32 1.442695, %v4351_v15  ;;  %4785 = vadd.xlane.f32.xlu1 %v4351_v15  ;;  %8184 = vmatprep.mubr.f32.mxu1 %v12105_v9 }
 0x617   :  { %v4356_v27 = vpop.f32.mrf.mxu0 }
 0x618   :  { %v12113_v62 = vadd.f32 %v4602_v49, %v4329_v46  ;;  %8976 = vpow2.f32 %v4529_v60  ;;  %v4357_v40 = vadd.f32 %v4356_v27, %v11632_v54  ;;  %v12124_v49 = vpop.xlane.xlu1 %3128  ;;  %v4341_v27 = vadd.f32 %v4340_v20, %v11666_v12 }
 0x619   :  { %v8971_v38 = vpop.eup %8970  ;;  %v4358_v16 = vpop.f32.mrf.mxu0  ;;  %14145 = vst [vmem:[#allocation122_spill] sm:$0xff] %v12124_v49  ;;  %v14149_v49 = vld [vmem:[#allocation53_spill] sm:$0xff] }
 0x61a   :  { %14142 = vst [vmem:[#allocation119_spill] sm:$0xff] %v12113_v62  ;;  %v4603_v13 = vmul.f32 %v8971_v38, %v11311_v7  ;;  %v4531_v53 = vmul.f32 1.442695, %v4357_v40  ;;  %4787 = vadd.xlane.f32.xlu0 %v4357_v40  ;;  %8185 = vmatmul.mubr.f32.gmra.mxu1 %v12113_v62 }
 0x61b   :  { %v4362_v22 = vpop.f32.mrf.mxu0 }
 0x61c   :  { %v12121_v15 = vadd.f32 %v4603_v13, %v4335_v56  ;;  %8978 = vpow2.f32 %v4531_v53  ;;  %v4363_v60 = vadd.f32 %v4362_v22, %v11632_v54  ;;  %v12132_v13 = vpop.xlane.xlu0 %3130  ;;  %v4347_v22 = vadd.f32 %v4346_v31, %v11666_v12 }
 0x61d   :  { %v8973_v10 = vpop.eup %8972  ;;  %v4364_v46 = vpop.f32.mrf.mxu0  ;;  %14148 = vst [vmem:[#allocation123_spill] sm:$0xff] %v12132_v13  ;;  %v14152_v13 = vld [vmem:[#allocation55_spill] sm:$0xff] }
 0x61e   :  { %14144 = vst [vmem:[#allocation121_spill] sm:$0xff] %v12121_v15  ;;  %v4604_v51 = vmul.f32 %v8973_v10, %v14146_v6  ;;  %v4533_v9 = vmul.f32 1.442695, %v4363_v60  ;;  %4789 = vadd.xlane.f32.xlu1 %v4363_v60  ;;  %8187 = vmatprep.mubr.f32.mxu1 %v12121_v15 }
 0x61f   :  { %v4368_v7 = vpop.f32.mrf.mxu0 }
 0x620   :  { %v12129_v40 = vadd.f32 %v4604_v51, %v4341_v27  ;;  %8980 = vpow2.f32 %v4533_v9  ;;  %v4369_v53 = vadd.f32 %v4368_v7, %v11632_v54  ;;  %v12140_v51 = vpop.xlane.xlu1 %3132  ;;  %v4353_v7 = vadd.f32 %v4352_v44, %v11666_v12 }
 0x621   :  { %v8975_v38 = vpop.eup %8974  ;;  %v4370_v56 = vpop.f32.mrf.mxu0  ;;  %14151 = vst [vmem:[#allocation124_spill] sm:$0xff] %v12140_v51  ;;  %v14155_v51 = vld [vmem:[#allocation57_spill] sm:$0xff] }
 0x622   :  { %14147 = vst [vmem:[#allocation24_spill] sm:$0xff] %v12129_v40  ;;  %v4605_v20 = vmul.f32 %v8975_v38, %v14149_v49  ;;  %v4535_v62 = vmul.f32 1.442695, %v4369_v53  ;;  %4791 = vadd.xlane.f32.xlu0 %v4369_v53  ;;  %8188 = vmatmul.mubr.f32.gmra.mxu1 %v12129_v40 }
 0x623   :  { %v4374_v6 = vpop.f32.mrf.mxu0 }
 0x624   :  { %v12137_v60 = vadd.f32 %v4605_v20, %v4347_v22  ;;  %8982 = vpow2.f32 %v4535_v62  ;;  %v4375_v9 = vadd.f32 %v4374_v6, %v11632_v54  ;;  %v12148_v20 = vpop.xlane.xlu0 %3134  ;;  %v4359_v6 = vadd.f32 %v4358_v16, %v11666_v12 }
 0x625   :  { %v8977_v10 = vpop.eup %8976  ;;  %v4376_v27 = vpop.f32.mrf.mxu0  ;;  %14154 = vst [vmem:[#allocation125_spill] sm:$0xff] %v12148_v20  ;;  %v14158_v20 = vld [vmem:[#allocation59_spill] sm:$0xff] }
 0x626   :  { %14150 = vst [vmem:[#allocation53_spill] sm:$0xff] %v12137_v60  ;;  %v4606_v31 = vmul.f32 %v8977_v10, %v14152_v13  ;;  %v4537_v15 = vmul.f32 1.442695, %v4375_v9  ;;  %4793 = vadd.xlane.f32.xlu1 %v4375_v9  ;;  %8190 = vmatprep.mubr.f32.mxu1 %v12137_v60 }
 0x627   :  { %v4380_v49 = vpop.f32.mrf.mxu0 }
 0x628   :  { %v12145_v53 = vadd.f32 %v4606_v31, %v4353_v7  ;;  %8984 = vpow2.f32 %v4537_v15  ;;  %v4381_v62 = vadd.f32 %v4380_v49, %v11632_v54  ;;  %v12156_v31 = vpop.xlane.xlu1 %3136  ;;  %v4365_v49 = vadd.f32 %v4364_v46, %v11666_v12 }
 0x629   :  { %v8979_v38 = vpop.eup %8978  ;;  %v4382_v22 = vpop.f32.mrf.mxu0  ;;  %14157 = vst [vmem:[#allocation126_spill] sm:$0xff] %v12156_v31  ;;  %v14161_v31 = vld [vmem:[#allocation61_spill] sm:$0xff] }
 0x62a   :  { %14153 = vst [vmem:[#allocation55_spill] sm:$0xff] %v12145_v53  ;;  %v4607_v44 = vmul.f32 %v8979_v38, %v14155_v51  ;;  %v4539_v40 = vmul.f32 1.442695, %v4381_v62  ;;  %4795 = vadd.xlane.f32.xlu0 %v4381_v62  ;;  %8191 = vmatmul.mubr.f32.gmra.mxu1 %v12145_v53 }
 0x62b   :  { %v4386_v13 = vpop.f32.mrf.mxu0 }
 0x62c   :  { %v12153_v9 = vadd.f32 %v4607_v44, %v4359_v6  ;;  %8986 = vpow2.f32 %v4539_v40  ;;  %v4387_v15 = vadd.f32 %v4386_v13, %v11632_v54  ;;  %v12164_v44 = vpop.xlane.xlu0 %3138  ;;  %v4371_v13 = vadd.f32 %v4370_v56, %v11666_v12 }
 0x62d   :  { %v8981_v10 = vpop.eup %8980  ;;  %v4388_v7 = vpop.f32.mrf.mxu0  ;;  %14160 = vst [vmem:[#allocation127_spill] sm:$0xff] %v12164_v44  ;;  %v14164_v44 = vld [vmem:[#allocation25_spill] sm:$0xff] }
 0x62e   :  { %14156 = vst [vmem:[#allocation57_spill] sm:$0xff] %v12153_v9  ;;  %v4608_v16 = vmul.f32 %v8981_v10, %v14158_v20  ;;  %v4541_v60 = vmul.f32 1.442695, %v4387_v15  ;;  %4797 = vadd.xlane.f32.xlu1 %v4387_v15  ;;  %8193 = vmatprep.mubr.f32.mxu1 %v12153_v9 }
 0x62f   :  { %v4392_v51 = vpop.f32.mrf.mxu0 }
 0x630   :  { %v12161_v62 = vadd.f32 %v4608_v16, %v4365_v49  ;;  %8988 = vpow2.f32 %v4541_v60  ;;  %v4393_v40 = vadd.f32 %v4392_v51, %v11632_v54  ;;  %v12172_v16 = vpop.xlane.xlu1 %3140  ;;  %v4377_v51 = vadd.f32 %v4376_v27, %v11666_v12 }
 0x631   :  { %v8983_v38 = vpop.eup %8982  ;;  %v4394_v6 = vpop.f32.mrf.mxu0  ;;  %14163 = vst [vmem:[#allocation128_spill] sm:$0xff] %v12172_v16  ;;  %v14167_v16 = vld [vmem:[#allocation26_spill] sm:$0xff] }
 0x632   :  { %14159 = vst [vmem:[#allocation59_spill] sm:$0xff] %v12161_v62  ;;  %v4609_v46 = vmul.f32 %v8983_v38, %v14161_v31  ;;  %v4543_v53 = vmul.f32 1.442695, %v4393_v40  ;;  %4799 = vadd.xlane.f32.xlu0 %v4393_v40  ;;  %8194 = vmatmul.mubr.f32.gmra.mxu1 %v12161_v62 }
 0x633   :  { %v4398_v20 = vpop.f32.mrf.mxu0 }
 0x634   :  { %v12169_v15 = vadd.f32 %v4609_v46, %v4371_v13  ;;  %8990 = vpow2.f32 %v4543_v53  ;;  %v4399_v60 = vadd.f32 %v4398_v20, %v11632_v54  ;;  %v12180_v46 = vpop.xlane.xlu0 %3142  ;;  %v4383_v20 = vadd.f32 %v4382_v22, %v11666_v12 }
 0x635   :  { %v8985_v10 = vpop.eup %8984  ;;  %v4400_v49 = vpop.f32.mrf.mxu0  ;;  %14166 = vst [vmem:[#allocation129_spill] sm:$0xff] %v12180_v46  ;;  %v14170_v46 = vld [vmem:[#allocation27_spill] sm:$0xff] }
 0x636   :  { %14162 = vst [vmem:[#allocation61_spill] sm:$0xff] %v12169_v15  ;;  %v4610_v56 = vmul.f32 %v8985_v10, %v14164_v44  ;;  %v4545_v9 = vmul.f32 1.442695, %v4399_v60  ;;  %4801 = vadd.xlane.f32.xlu1 %v4399_v60  ;;  %8196 = vmatprep.mubr.f32.mxu1 %v12169_v15 }
 0x637   :  { %v4404_v31 = vpop.f32.mrf.mxu0 }
 0x638   :  { %v12177_v40 = vadd.f32 %v4610_v56, %v4377_v51  ;;  %8992 = vpow2.f32 %v4545_v9  ;;  %v4405_v53 = vadd.f32 %v4404_v31, %v11632_v54  ;;  %v12188_v56 = vpop.xlane.xlu1 %3144  ;;  %v4389_v31 = vadd.f32 %v4388_v7, %v11666_v12 }
 0x639   :  { %v8987_v38 = vpop.eup %8986  ;;  %v4406_v13 = vpop.f32.mrf.mxu0  ;;  %14169 = vst [vmem:[#allocation130_spill] sm:$0xff] %v12188_v56  ;;  %v14173_v56 = vld [vmem:[#allocation28_spill] sm:$0xff] }
 0x63a   :  { %14165 = vst [vmem:[#allocation25_spill] sm:$0xff] %v12177_v40  ;;  %v4611_v27 = vmul.f32 %v8987_v38, %v14167_v16  ;;  %v4547_v62 = vmul.f32 1.442695, %v4405_v53  ;;  %4803 = vadd.xlane.f32.xlu0 %v4405_v53  ;;  %8197 = vmatmul.mubr.f32.gmra.mxu1 %v12177_v40 }
 0x63b   :  { %v4410_v44 = vpop.f32.mrf.mxu0 }
 0x63c   :  { %v12185_v60 = vadd.f32 %v4611_v27, %v4383_v20  ;;  %8994 = vpow2.f32 %v4547_v62  ;;  %v4411_v9 = vadd.f32 %v4410_v44, %v11632_v54  ;;  %v12196_v27 = vpop.xlane.xlu0 %3146  ;;  %v4395_v44 = vadd.f32 %v4394_v6, %v11666_v12 }
 0x63d   :  { %v8989_v10 = vpop.eup %8988  ;;  %v4412_v51 = vpop.f32.mrf.mxu0  ;;  %14172 = vst [vmem:[#allocation131_spill] sm:$0xff] %v12196_v27  ;;  %v14176_v27 = vld [vmem:[#allocation29_spill] sm:$0xff] }
 0x63e   :  { %14168 = vst [vmem:[#allocation26_spill] sm:$0xff] %v12185_v60  ;;  %v4612_v22 = vmul.f32 %v8989_v10, %v14170_v46  ;;  %v4549_v15 = vmul.f32 1.442695, %v4411_v9  ;;  %4805 = vadd.xlane.f32.xlu1 %v4411_v9  ;;  %8199 = vmatprep.mubr.f32.mxu1 %v12185_v60 }
 0x63f   :  { %v4416_v16 = vpop.f32.mrf.mxu0 }
 0x640   :  { %v12193_v53 = vadd.f32 %v4612_v22, %v4389_v31  ;;  %8996 = vpow2.f32 %v4549_v15  ;;  %v4417_v62 = vadd.f32 %v4416_v16, %v11632_v54  ;;  %v8117_v31 = vpop.f32.mrf.mxu1  ;;  %v12204_v22 = vpop.xlane.xlu1 %3148  ;;  %v4401_v16 = vadd.f32 %v4400_v49, %v11666_v12  ;;  %v12217_v49 = vld [vmem:[%s13853_s3 + $0x3] ss:$0 sm:$0xff] }
 0x641   :  { %v8991_v38 = vpop.eup %8990  ;;  %v4418_v20 = vpop.f32.mrf.mxu0  ;;  %14175 = vst [vmem:[#allocation132_spill] sm:$0xff] %v12204_v22 }
 0x642   :  { %14171 = vst [vmem:[#allocation27_spill] sm:$0xff] %v12193_v53  ;;  %v4613_v7 = vmul.f32 %v8991_v38, %v14173_v56  ;;  %v4551_v40 = vmul.f32 1.442695, %v4417_v62  ;;  %4807 = vadd.xlane.f32.xlu0 %v4417_v62  ;;  %8200 = vmatmul.mubr.f32.gmra.mxu1 %v12193_v53  ;;  %v4966_v38 = vpop.f32.mrf.mxu1  ;;  %v4419_v22 = vadd.f32 %v4418_v20, %v11666_v12 }
 0x643   :  { %v4422_v46 = vpop.f32.mrf.mxu0 }
 0x644   :  { %v12201_v9 = vadd.f32 %v4613_v7, %v4395_v44  ;;  %8998 = vpow2.f32 %v4551_v40  ;;  %v4423_v15 = vadd.f32 %v4422_v46, %v11632_v54  ;;  %v4407_v40 = vadd.f32 %v4406_v13, %v11666_v12  ;;  %v14178_v54 = vld [vmem:[#allocation30_spill] sm:$0xff] }
 0x645   :  { %v8993_v10 = vpop.eup %8992  ;;  %v4972_v13 = vadd.f32 %v8117_v31, %v12217_v49 }
 0x646   :  { %14174 = vst [vmem:[#allocation28_spill] sm:$0xff] %v12201_v9  ;;  %v4614_v6 = vmul.f32 %v8993_v10, %v14176_v27  ;;  %v4553_v60 = vmul.f32 1.442695, %v4423_v15  ;;  %4809 = vadd.xlane.f32.xlu1 %v4423_v15  ;;  %8202 = vmatprep.mubr.f32.mxu1 %v12201_v9  ;;  %v4967_v27 = vadd.f32 %v12217_v49, %v4966_v38  ;;  %v8120_v15 = vpop.f32.mrf.mxu1  ;;  %v14180_v10 = vld [vmem:[#allocation31_spill] sm:$0xff]  ;;  %v14182_v38 = vld [vmem:[#allocation32_spill] sm:$0xff] }
 0x647   :  { %v4982_v20 = vadd.f32 %v8120_v15, %v12217_v49 }
 0x648   :  { %v12209_v56 = vadd.f32 %v4614_v6, %v4401_v16  ;;  %9000 = vpow2.f32 %v4553_v60  ;;  %v4413_v60 = vadd.f32 %v4412_v51, %v11666_v12 }
 0x649   :  { %v8995_v62 = vpop.eup %8994  ;;  %9002 = vtanh.f32 %v4967_v27  ;;  %v14184_v27 = vld [vmem:[#allocation33_spill] sm:$0xff] }
 0x64a   :  { %14177 = vst [vmem:[#allocation29_spill] sm:$0xff] %v12209_v56  ;;  %v4615_v44 = vmul.f32 %v8995_v62, %v14178_v54  ;;  %8203 = vmatmul.mubr.f32.gmra.mxu1 %v12209_v56  ;;  %v4976_v54 = vpop.f32.mrf.mxu1  ;;  %9004 = vtanh.f32 %v4972_v13 }
 0x64b   :  { %v4977_v51 = vadd.f32 %v12217_v49, %v4976_v54 }
 0x64c   :  { %v12220_v7 = vadd.f32 %v4615_v44, %v4407_v40  ;;  %v4424_v44 = vpop.f32.mrf.mxu0 }
 0x64d   :  { %v8997_v46 = vpop.eup %8996  ;;  %v4425_v31 = vadd.f32 %v4424_v44, %v11666_v12  ;;  %9006 = vtanh.f32 %v4977_v51 }
 0x64e   :  { %14179 = vst [vmem:[#allocation30_spill] sm:$0xff] %v12220_v7  ;;  %v4616_v16 = vmul.f32 %v8997_v46, %v14180_v10  ;;  %8205 = vmatprep.mubr.f32.mxu1 %v12220_v7  ;;  %v8123_v7 = vpop.f32.mrf.mxu1  ;;  %9008 = vtanh.f32 %v4982_v20 }
 0x64f   :  { %v4992_v12 = vadd.f32 %v8123_v7, %v12217_v49 }
 0x650   :  { %v12226_v6 = vadd.f32 %v4616_v16, %v4413_v60 }
 0x651   :  { %v8999_v62 = vpop.eup %8998 }
 0x652   :  { %14181 = vst [vmem:[#allocation31_spill] sm:$0xff] %v12226_v6  ;;  %v4617_v40 = vmul.f32 %v8999_v62, %v14182_v38  ;;  %8206 = vmatmul.mubr.f32.gmra.mxu1 %v12226_v6  ;;  %v4986_v62 = vpop.f32.mrf.mxu1 }
 0x654   :  { %v12232_v46 = vadd.f32 %v4617_v40, %v4419_v22  ;;  %v4987_v22 = vadd.f32 %v12217_v49, %v4986_v62  ;;  %v8126_v54 = vpop.f32.mrf.mxu1 }
 0x655   :  { %v9001_v10 = vpop.eup %9000 }
 0x656   :  { %14183 = vst [vmem:[#allocation32_spill] sm:$0xff] %v12232_v46  ;;  %v4618_v60 = vmul.f32 %v9001_v10, %v14184_v27  ;;  %8208 = vmatprep.mubr.f32.mxu1 %v12232_v46  ;;  %v9003_v13 = vpop.eup %9002  ;;  %9010 = vtanh.f32 %v4987_v22  ;;  %v4996_v38 = vpop.f32.mrf.mxu1  ;;  %v5002_v10 = vadd.f32 %v8126_v54, %v12217_v49 }
 0x657   :  { %v9005_v15 = vpop.eup %9004  ;;  %9012 = vtanh.f32 %v4992_v12  ;;  %v4997_v40 = vadd.f32 %v12217_v49, %v4996_v38 }
 0x658   :  { %v12238_v16 = vadd.f32 %v4618_v60, %v4425_v31  ;;  %v8129_v51 = vpop.f32.mrf.mxu1 }
 0x659   :  { %9014 = vtanh.f32 %v4997_v40  ;;  %v5012_v62 = vadd.f32 %v8129_v51, %v12217_v49 }
 0x65a   :  { %14185 = vst [vmem:[#allocation33_spill] sm:$0xff] %v12238_v16  ;;  %8209 = vmatmul.mubr.f32.gmra.mxu1 %v12238_v16  ;;  %v9007_v44 = vpop.eup %9006  ;;  %v5006_v31 = vpop.f32.mrf.mxu1  ;;  %9016 = vtanh.f32 %v5002_v10 }
 0x65b   :  { %5635 = vmatprep.mubr.f32.mxu1 %v13982_v47  ;;  %v9009_v7 = vpop.eup %9008  ;;  %v5007_v27 = vadd.f32 %v12217_v49, %v5006_v31 }
 0x65c   :  { %v8132_v20 = vpop.f32.mrf.mxu1 }
 0x65d   :  { %9018 = vtanh.f32 %v5007_v27  ;;  %v5022_v38 = vadd.f32 %v8132_v20, %v12217_v49 }
 0x65e   :  { %7251 = vmatmul.mubr.msk.f32.vlgmr.msra.gmra.mxu1 %vm599_vm0, %v9003_v13  ;;  %v5016_v13 = vpop.f32.mrf.mxu1  ;;  %9020 = vtanh.f32 %v5012_v62 }
 0x65f   :  { %5641 = vmatprep.mubr.f32.mxu1 %v13982_v47  ;;  %v5017_v54 = vadd.f32 %v12217_v49, %v5016_v13 }
 0x661   :  { %9022 = vtanh.f32 %v5017_v54 }
 0x662   :  { %7252 = vmatmul.mubr.msk.f32.gmra.mxu1 %vm599_vm0, %v9005_v15  ;;  %v8135_v15 = vpop.f32.mrf.mxu1  ;;  %9024 = vtanh.f32 %v5022_v38 }
 0x663   :  { %5647 = vmatprep.mubr.f32.mxu1 %v13982_v47  ;;  %v9011_v60 = vpop.eup %9010  ;;  %v5032_v31 = vadd.f32 %v8135_v15, %v12217_v49 }
 0x664   :  { %v9013_v22 = vpop.eup %9012 }
 0x666   :  { %7253 = vmatmul.mubr.msk.f32.gmra.mxu1 %vm599_vm0, %v9007_v44  ;;  %v9015_v12 = vpop.eup %9014  ;;  %v5026_v44 = vpop.f32.mrf.mxu1 }
 0x667   :  { %5653 = vmatprep.mubr.f32.mxu1 %v13982_v47  ;;  %v9017_v40 = vpop.eup %9016  ;;  %v5027_v51 = vadd.f32 %v12217_v49, %v5026_v44 }
 0x669   :  { %9026 = vtanh.f32 %v5027_v51 }
 0x66a   :  { %7254 = vmatmul.mubr.msk.f32.gmra.mxu1 %vm599_vm0, %v9009_v7  ;;  %v9019_v10 = vpop.eup %9018  ;;  %v8138_v7 = vpop.f32.mrf.mxu1  ;;  %9028 = vtanh.f32 %v5032_v31 }
 0x66b   :  { %5659 = vmatprep.mubr.f32.mxu1 %v13982_v47  ;;  %v9021_v27 = vpop.eup %9020  ;;  %v5042_v13 = vadd.f32 %v8138_v7, %v12217_v49 }
 0x66e   :  { %7255 = vmatmul.mubr.msk.f32.gmra.mxu1 %vm599_vm0, %v9011_v60  ;;  %v5036_v60 = vpop.f32.mrf.mxu1  ;;  %v9023_v62 = vpop.eup %9022 }
 0x66f   :  { %5665 = vmatprep.mubr.f32.mxu1 %v13982_v47  ;;  %v5037_v20 = vadd.f32 %v12217_v49, %v5036_v60  ;;  %v9025_v54 = vpop.eup %9024 }
 0x671   :  { %9030 = vtanh.f32 %v5037_v20 }
 0x672   :  { %7256 = vmatmul.mubr.msk.f32.gmra.mxu1 %vm599_vm0, %v9013_v22  ;;  %v8141_v22 = vpop.f32.mrf.mxu1  ;;  %9032 = vtanh.f32 %v5042_v13 }
 0x673   :  { %5671 = vmatprep.mubr.f32.mxu1 %v13982_v47  ;;  %v5052_v44 = vadd.f32 %v8141_v22, %v12217_v49 }
 0x676   :  { %7257 = vmatmul.mubr.msk.f32.gmra.mxu1 %vm599_vm0, %v9015_v12  ;;  %v5046_v12 = vpop.f32.mrf.mxu1  ;;  %v9027_v38 = vpop.eup %9026 }
 0x677   :  { %5677 = vmatprep.mubr.f32.mxu1 %v13982_v47  ;;  %v5047_v15 = vadd.f32 %v12217_v49, %v5046_v12  ;;  %v9029_v51 = vpop.eup %9028 }
 0x679   :  { %9034 = vtanh.f32 %v5047_v15 }
 0x67a   :  { %7258 = vmatmul.mubr.msk.f32.gmra.mxu1 %vm599_vm0, %v9017_v40  ;;  %v8144_v40 = vpop.f32.mrf.mxu1  ;;  %9036 = vtanh.f32 %v5052_v44 }
 0x67b   :  { %5683 = vmatprep.mubr.f32.mxu1 %v13982_v47  ;;  %v5062_v60 = vadd.f32 %v8144_v40, %v12217_v49 }
 0x67e   :  { %7259 = vmatmul.mubr.msk.f32.gmra.mxu1 %vm599_vm0, %v9019_v10  ;;  %v5056_v10 = vpop.f32.mrf.mxu1  ;;  %v9031_v31 = vpop.eup %9030 }
 0x67f   :  { %5689 = vmatprep.mubr.f32.mxu1 %v13982_v47  ;;  %v5057_v7 = vadd.f32 %v12217_v49, %v5056_v10  ;;  %v9033_v20 = vpop.eup %9032 }
 0x681   :  { %9038 = vtanh.f32 %v5057_v7 }
 0x682   :  { %7260 = vmatmul.mubr.msk.f32.gmra.mxu1 %vm599_vm0, %v9021_v27  ;;  %v8147_v27 = vpop.f32.mrf.mxu1  ;;  %9040 = vtanh.f32 %v5062_v60 }
 0x683   :  { %5695 = vmatprep.mubr.f32.mxu1 %v13982_v47  ;;  %v5072_v12 = vadd.f32 %v8147_v27, %v12217_v49 }
 0x686   :  { %7261 = vmatmul.mubr.msk.f32.gmra.mxu1 %vm599_vm0, %v9023_v62  ;;  %v5066_v62 = vpop.f32.mrf.mxu1  ;;  %v9035_v13 = vpop.eup %9034 }
 0x687   :  { %5701 = vmatprep.mubr.f32.mxu1 %v13982_v47  ;;  %v5067_v22 = vadd.f32 %v12217_v49, %v5066_v62  ;;  %v9037_v15 = vpop.eup %9036 }
 0x689   :  { %9042 = vtanh.f32 %v5067_v22 }
 0x68a   :  { %7262 = vmatmul.mubr.msk.f32.gmra.mxu1 %vm599_vm0, %v9025_v54  ;;  %v8150_v54 = vpop.f32.mrf.mxu1  ;;  %9044 = vtanh.f32 %v5072_v12 }
 0x68b   :  { %5707 = vmatprep.mubr.f32.mxu1 %v13982_v47  ;;  %v5082_v10 = vadd.f32 %v8150_v54, %v12217_v49 }
 0x68e   :  { %7263 = vmatmul.mubr.msk.f32.gmra.mxu1 %vm599_vm0, %v9027_v38  ;;  %v5076_v38 = vpop.f32.mrf.mxu1  ;;  %v9039_v44 = vpop.eup %9038 }
 0x68f   :  { %5713 = vmatprep.mubr.f32.mxu1 %v13982_v47  ;;  %v5077_v40 = vadd.f32 %v12217_v49, %v5076_v38  ;;  %v9041_v7 = vpop.eup %9040 }
 0x691   :  { %9046 = vtanh.f32 %v5077_v40 }
 0x692   :  { %7264 = vmatmul.mubr.msk.f32.gmra.mxu1 %vm599_vm0, %v9029_v51  ;;  %v8153_v51 = vpop.f32.mrf.mxu1  ;;  %9048 = vtanh.f32 %v5082_v10 }
 0x693   :  { %5719 = vmatprep.mubr.f32.mxu1 %v13982_v47  ;;  %v5092_v62 = vadd.f32 %v8153_v51, %v12217_v49 }
 0x696   :  { %7265 = vmatmul.mubr.msk.f32.gmra.mxu1 %vm599_vm0, %v9031_v31  ;;  %v5086_v31 = vpop.f32.mrf.mxu1  ;;  %v9043_v60 = vpop.eup %9042 }
 0x697   :  { %5725 = vmatprep.mubr.f32.mxu1 %v13982_v47  ;;  %v5087_v27 = vadd.f32 %v12217_v49, %v5086_v31  ;;  %v9045_v22 = vpop.eup %9044 }
 0x699   :  { %9050 = vtanh.f32 %v5087_v27 }
 0x69a   :  { %7266 = vmatmul.mubr.msk.f32.gmra.mxu1 %vm599_vm0, %v9033_v20  ;;  %v8156_v20 = vpop.f32.mrf.mxu1  ;;  %9052 = vtanh.f32 %v5092_v62 }
 0x69b   :  { %5731 = vmatprep.mubr.f32.mxu1 %v13982_v47  ;;  %v5102_v38 = vadd.f32 %v8156_v20, %v12217_v49 }
 0x69e   :  { %7267 = vmatmul.mubr.msk.f32.gmra.mxu1 %vm599_vm0, %v9035_v13  ;;  %v5096_v13 = vpop.f32.mrf.mxu1 }
 0x69f   :  { %5737 = vmatprep.mubr.f32.mxu1 %v13982_v47  ;;  %v5097_v54 = vadd.f32 %v12217_v49, %v5096_v13 }
 0x6a0   :  { %v8159_v12 = vpop.f32.mrf.mxu1 }
 0x6a1   :  { %9054 = vtanh.f32 %v5097_v54  ;;  %v5112_v27 = vadd.f32 %v8159_v12, %v12217_v49 }
 0x6a2   :  { %7268 = vmatmul.mubr.msk.f32.gmra.mxu1 %vm599_vm0, %v9037_v15  ;;  %v9047_v15 = vpop.eup %9046  ;;  %v5106_v40 = vpop.f32.mrf.mxu1  ;;  %9056 = vtanh.f32 %v5102_v38 }
 0x6a3   :  { %5743 = vmatprep.mubr.f32.mxu1 %v13982_v47  ;;  %v5107_v10 = vadd.f32 %v12217_v49, %v5106_v40 }
 0x6a4   :  { %v8162_v51 = vpop.f32.mrf.mxu1 }
 0x6a5   :  { %9058 = vtanh.f32 %v5107_v10 }
 0x6a6   :  { %7269 = vmatmul.mubr.msk.f32.gmra.mxu1 %vm599_vm0, %v9039_v44  ;;  %v9049_v44 = vpop.eup %9048  ;;  %v5116_v31 = vpop.f32.mrf.mxu1  ;;  %9060 = vtanh.f32 %v5112_v27 }
 0x6a7   :  { %5749 = vmatprep.mubr.f32.mxu1 %v13982_v47  ;;  %v5117_v62 = vadd.f32 %v12217_v49, %v5116_v31 }
 0x6a9   :  { %9062 = vtanh.f32 %v5117_v62 }
 0x6aa   :  { %7270 = vmatmul.mubr.msk.f32.gmra.mxu1 %vm599_vm0, %v9041_v7  ;;  %v9051_v7 = vpop.eup %9050 }
 0x6ab   :  { %5755 = vmatprep.mubr.f32.mxu1 %v13982_v47  ;;  %v9053_v20 = vpop.eup %9052 }
 0x6ae   :  { %7271 = vmatmul.mubr.msk.f32.gmra.mxu1 %vm599_vm0, %v9043_v60  ;;  %v8165_v60 = vpop.f32.mrf.mxu1  ;;  %v9055_v13 = vpop.eup %9054 }
 0x6af   :  { %5761 = vmatprep.mubr.f32.mxu1 %v13982_v47  ;;  %v9057_v12 = vpop.eup %9056 }
 0x6b2   :  { %7272 = vmatmul.mubr.msk.f32.gmra.mxu1 %vm599_vm0, %v9045_v22  ;;  %v5126_v22 = vpop.f32.mrf.mxu1  ;;  %v9059_v10 = vpop.eup %9058 }
 0x6b3   :  { %5767 = vmatprep.mubr.f32.mxu1 %v13982_v47  ;;  %v5127_v40 = vadd.f32 %v12217_v49, %v5126_v22  ;;  %v9061_v31 = vpop.eup %9060 }
 0x6b4   :  { %v8168_v54 = vpop.f32.mrf.mxu1 }
 0x6b6   :  { %7273 = vmatmul.mubr.msk.f32.gmra.mxu1 %vm599_vm0, %v9047_v15  ;;  %v5122_v15 = vadd.f32 %v8162_v51, %v12217_v49  ;;  %v5136_v38 = vpop.f32.mrf.mxu1  ;;  %v9063_v62 = vpop.eup %9062 }
 0x6b7   :  { %5773 = vmatprep.mubr.f32.mxu1 %v13982_v47 }
 0x6b8   :  { %9064 = vtanh.f32 %v5122_v15 }
 0x6b9   :  { %9066 = vtanh.f32 %v5127_v40 }
 0x6ba   :  { %7274 = vmatmul.mubr.msk.f32.gmra.mxu1 %vm599_vm0, %v9049_v44  ;;  %v8171_v44 = vpop.f32.mrf.mxu1 }
 0x6bb   :  { %5779 = vmatprep.mubr.f32.mxu1 %v13982_v47 }
 0x6bc   :  { %v5146_v51 = vpop.f32.mrf.mxu1 }
 0x6be   :  { %7275 = vmatmul.mubr.msk.f32.gmra.mxu1 %vm599_vm0, %v9051_v7  ;;  %v5132_v7 = vadd.f32 %v8165_v60, %v12217_v49  ;;  %v8174_v27 = vpop.f32.mrf.mxu1 }
 0x6bf   :  { %5785 = vmatprep.mubr.f32.mxu1 %v13982_v47 }
 0x6c0   :  { %9068 = vtanh.f32 %v5132_v7  ;;  %v5156_v22 = vpop.f32.mrf.mxu1  ;;  %v5152_v7 = vadd.f32 %v8171_v44, %v12217_v49 }
 0x6c2   :  { %7276 = vmatmul.mubr.msk.f32.gmra.mxu1 %vm599_vm0, %v9053_v20  ;;  %v5137_v20 = vadd.f32 %v12217_v49, %v5136_v38  ;;  %v8177_v60 = vpop.f32.mrf.mxu1 }
 0x6c3   :  { %5791 = vmatprep.mubr.f32.mxu1 %v13982_v47 }
 0x6c4   :  { %9070 = vtanh.f32 %v5137_v20  ;;  %v5166_v40 = vpop.f32.mrf.mxu1  ;;  %v5157_v20 = vadd.f32 %v12217_v49, %v5156_v22 }
 0x6c5   :  { %v9065_v15 = vpop.eup %9064 }
 0x6c6   :  { %7277 = vmatmul.mubr.msk.f32.gmra.mxu1 %vm599_vm0, %v9055_v13  ;;  %v5142_v13 = vadd.f32 %v8168_v54, %v12217_v49  ;;  %v9067_v38 = vpop.eup %9066 }
 0x6c7   :  { %5797 = vmatprep.mubr.f32.mxu1 %v13982_v47 }
 0x6c8   :  { %9072 = vtanh.f32 %v5142_v13  ;;  %v5162_v13 = vadd.f32 %v8174_v27, %v12217_v49  ;;  %v5172_v27 = vadd.f32 %v8177_v60, %v12217_v49 }
 0x6ca   :  { %7278 = vmatmul.mubr.msk.f32.gmra.mxu1 %vm599_vm0, %v9057_v12  ;;  %v5147_v12 = vadd.f32 %v12217_v49, %v5146_v51 }
 0x6cb   :  { %5803 = vmatprep.mubr.f32.mxu1 %v13982_v47 }
 0x6cc   :  { %9074 = vtanh.f32 %v5147_v12 }
 0x6cd   :  { %v9069_v54 = vpop.eup %9068  ;;  %9076 = vtanh.f32 %v5152_v7 }
 0x6ce   :  { %7279 = vmatmul.mubr.msk.f32.gmra.mxu1 %vm599_vm0, %v9059_v10  ;;  %v8180_v10 = vpop.f32.mrf.mxu1  ;;  %9078 = vtanh.f32 %v5157_v20 }
 0x6cf   :  { %5809 = vmatprep.mubr.f32.mxu1 %v13982_v47  ;;  %9080 = vtanh.f32 %v5162_v13 }
 0x6d2   :  { %7280 = vmatmul.mubr.msk.f32.gmra.mxu1 %vm599_vm0, %v9061_v31  ;;  %v5176_v31 = vpop.f32.mrf.mxu1 }
 0x6d3   :  { %5815 = vmatprep.mubr.f32.mxu1 %v13982_v47  ;;  %v5177_v13 = vadd.f32 %v12217_v49, %v5176_v31 }
 0x6d4   :  { %v8183_v51 = vpop.f32.mrf.mxu1 }
 0x6d6   :  { %7281 = vmatmul.mubr.msk.f32.gmra.mxu1 %vm599_vm0, %v9063_v62  ;;  %v9071_v62 = vpop.eup %9070  ;;  %v5186_v44 = vpop.f32.mrf.mxu1 }
 0x6d7   :  { %5821 = vmatprep.mubr.f32.mxu1 %v13982_v47 }
 0x6da   :  { %7282 = vmatmul.mubr.msk.f32.gmra.mxu1 %vm599_vm0, %v9065_v15  ;;  %v9073_v15 = vpop.eup %9072  ;;  %v8186_v12 = vpop.f32.mrf.mxu1 }
 0x6db   :  { %5827 = vmatprep.mubr.f32.mxu1 %v13982_v47  ;;  %v9075_v22 = vpop.eup %9074 }
 0x6dc   :  { %v5196_v7 = vpop.f32.mrf.mxu1 }
 0x6de   :  { %7283 = vmatmul.mubr.msk.f32.gmra.mxu1 %vm599_vm0, %v9067_v38  ;;  %v5167_v38 = vadd.f32 %v12217_v49, %v5166_v40 }
 0x6df   :  { %5833 = vmatprep.mubr.f32.mxu1 %v13982_v47 }
 0x6e0   :  { %9082 = vtanh.f32 %v5167_v38 }
 0x6e1   :  { %9084 = vtanh.f32 %v5172_v27 }
 0x6e2   :  { %7284 = vmatmul.mubr.msk.f32.gmra.mxu1 %vm599_vm0, %v9069_v54  ;;  %v12353_v54 = vpop.xlane.xlu0 %3150  ;;  %v12356_v20 = vpop.f32.mrf.mxu1  ;;  %9086 = vtanh.f32 %v5177_v13 }
 0x6e3   :  { %5839 = vmatprep.mubr.f32.mxu1 %v13982_v47  ;;  %14186 = vst [vmem:[#allocation133_spill] sm:$0xff] %v12353_v54 }
 0x6e6   :  { %7285 = vmatmul.mubr.msk.f32.gmra.mxu1 %vm599_vm0, %v9071_v62  ;;  %v9077_v62 = vpop.eup %9076  ;;  %v12362_v40 = vpop.xlane.xlu0 %3154 }
 0x6e7   :  { %5845 = vmatprep.mubr.f32.mxu1 %v13982_v47  ;;  %14188 = vst [vmem:[#allocation135_spill] sm:$0xff] %v12362_v40  ;;  %v9079_v16 = vpop.eup %9078 }
 0x6ea   :  { %7286 = vmatmul.mubr.msk.f32.gmra.mxu1 %vm599_vm0, %v9073_v15  ;;  %v12359_v15 = vpop.xlane.xlu1 %3152  ;;  %v12371_v38 = vpop.xlane.xlu0 %3158 }
 0x6eb   :  { %5851 = vmatprep.mubr.f32.mxu1 %v13982_v47  ;;  %14187 = vst [vmem:[#allocation134_spill] sm:$0xff] %v12359_v15  ;;  %14190 = vst [vmem:[#allocation137_spill] sm:$0xff] %v12371_v38  ;;  %v9081_v15 = vpop.eup %9080 }
 0x6ed   :  { %v9083_v46 = vpop.eup %9082 }
 0x6ee   :  { %7287 = vmatmul.mubr.msk.f32.gmra.mxu1 %vm599_vm0, %v9075_v22  ;;  %v5206_v22 = vpop.f32.mrf.mxu1  ;;  %v12368_v60 = vpop.xlane.xlu1 %3156 }
 0x6ef   :  { %5857 = vmatprep.mubr.f32.mxu1 %v13982_v47  ;;  %14189 = vst [vmem:[#allocation136_spill] sm:$0xff] %v12368_v60  ;;  %v12378_v27 = vpop.xlane.xlu0 %3162  ;;  %v9085_v38 = vpop.eup %9084 }
 0x6f0   :  { %v12365_v54 = vpop.f32.mrf.mxu1  ;;  %14192 = vst [vmem:[#allocation139_spill] sm:$0xff] %v12378_v27 }
 0x6f2   :  { %7288 = vmatmul.mubr.msk.f32.gmra.mxu1 %vm599_vm0, %v9077_v62  ;;  %v5182_v62 = vadd.f32 %v8180_v10, %v12217_v49  ;;  %v5216_v40 = vpop.f32.mrf.mxu1  ;;  %v12375_v31 = vpop.xlane.xlu1 %3160 }
 0x6f3   :  { %5863 = vmatprep.mubr.f32.mxu1 %v13982_v47  ;;  %14191 = vst [vmem:[#allocation138_spill] sm:$0xff] %v12375_v31  ;;  %v12387_v13 = vpop.xlane.xlu0 %3166 }
 0x6f4   :  { %9088 = vtanh.f32 %v5182_v62  ;;  %v12381_v60 = vpop.f32.mrf.mxu1  ;;  %14194 = vst [vmem:[#allocation141_spill] sm:$0xff] %v12387_v13  ;;  %v5197_v62 = vadd.f32 %v12217_v49, %v5196_v7 }
 0x6f6   :  { %7289 = vmatmul.mubr.msk.f32.gmra.mxu1 %vm599_vm0, %v9079_v16  ;;  %v5187_v16 = vadd.f32 %v12217_v49, %v5186_v44  ;;  %v12384_v10 = vpop.xlane.xlu1 %3164  ;;  %v5226_v31 = vpop.f32.mrf.mxu1 }
 0x6f7   :  { %5869 = vmatprep.mubr.f32.mxu1 %v13982_v47  ;;  %14193 = vst [vmem:[#allocation140_spill] sm:$0xff] %v12384_v10  ;;  %v9087_v10 = vpop.eup %9086 }
 0x6f8   :  { %9090 = vtanh.f32 %v5187_v16 }
 0x6fa   :  { %7290 = vmatmul.mubr.msk.f32.gmra.mxu1 %vm599_vm0, %v9081_v15  ;;  %v5192_v15 = vadd.f32 %v8183_v51, %v12217_v49  ;;  %v12390_v27 = vpop.f32.mrf.mxu1  ;;  %v12393_v44 = vpop.xlane.xlu1 %3168 }
 0x6fb   :  { %5875 = vmatprep.mubr.f32.mxu1 %v13982_v47  ;;  %14195 = vst [vmem:[#allocation142_spill] sm:$0xff] %v12393_v44 }
 0x6fc   :  { %9092 = vtanh.f32 %v5192_v15  ;;  %v12399_v13 = vpop.f32.mrf.mxu1 }
 0x6fd   :  { %9094 = vtanh.f32 %v5197_v62  ;;  %v5212_v62 = vadd.f32 %v12356_v20, %v12217_v49 }
 0x6fe   :  { %7291 = vmatmul.mubr.msk.f32.gmra.mxu1 %vm599_vm0, %v9083_v46  ;;  %v12396_v46 = vpop.xlane.xlu0 %3170  ;;  %v12402_v51 = vpop.xlane.xlu1 %3172 }
 0x6ff   :  { %5881 = vmatprep.mubr.f32.mxu1 %v13982_v47  ;;  %14196 = vst [vmem:[#allocation143_spill] sm:$0xff] %v12396_v46  ;;  %14197 = vst [vmem:[#allocation144_spill] sm:$0xff] %v12402_v51 }
 0x701   :  { %v9089_v46 = vpop.eup %9088 }
 0x702   :  { %7292 = vmatmul.mubr.msk.f32.gmra.mxu1 %vm599_vm0, %v9085_v38  ;;  %v12405_v16 = vpop.xlane.xlu0 %3174  ;;  %v5202_v38 = vadd.f32 %v8186_v12, %v12217_v49  ;;  %v12408_v44 = vpop.f32.mrf.mxu1 }
 0x703   :  { %5887 = vmatprep.mubr.f32.mxu1 %v13982_v47  ;;  %14198 = vst [vmem:[#allocation145_spill] sm:$0xff] %v12405_v16  ;;  %v12411_v7 = vpop.xlane.xlu1 %3176 }
 0x704   :  { %14199 = vst [vmem:[#allocation146_spill] sm:$0xff] %v12411_v7  ;;  %9096 = vtanh.f32 %v5202_v38  ;;  %v12417_v51 = vpop.f32.mrf.mxu1 }
 0x705   :  { %v9091_v16 = vpop.eup %9090 }
 0x706   :  { %7293 = vmatmul.mubr.msk.f32.gmra.mxu1 %vm599_vm0, %v9087_v10  ;;  %v12414_v15 = vpop.xlane.xlu0 %3178  ;;  %v5207_v10 = vadd.f32 %v12217_v49, %v5206_v22 }
 0x707   :  { %5893 = vmatprep.mubr.f32.mxu1 %v13982_v47  ;;  %14200 = vst [vmem:[#allocation147_spill] sm:$0xff] %v12414_v15  ;;  %v12422_v12 = vpop.xlane.xlu1 %3180 }
 0x708   :  { %14201 = vst [vmem:[#allocation148_spill] sm:$0xff] %v12422_v12  ;;  %9098 = vtanh.f32 %v5207_v10  ;;  %v5217_v12 = vadd.f32 %v12217_v49, %v5216_v40  ;;  %v7250_v40 = vld [vmem:[%s13854_s4 + $0x6] sm:$0x3] }
 0x709   :  { %v9093_v38 = vpop.eup %9092  ;;  %9100 = vtanh.f32 %v5212_v62 }
 0x70a   :  { %7294 = vmatmul.mubr.msk.f32.gmra.mxu1 %vm599_vm0, %v9089_v46  ;;  %v12419_v6 = vpop.f32.mrf.mxu1  ;;  %v12425_v46 = vpop.xlane.xlu0 %3182  ;;  %9102 = vtanh.f32 %v5217_v12  ;;  %v5227_v12 = vadd.f32 %v12217_v49, %v5226_v31 }
 0x70b   :  { %5899 = vmatprep.mubr.f32.mxu1 %v13982_v47  ;;  %14202 = vst [vmem:[#allocation149_spill] sm:$0xff] %v12425_v46  ;;  %v12432_v22 = vpop.xlane.xlu1 %3184  ;;  %v9095_v46 = vpop.eup %9094 }
 0x70c   :  { %v12429_v15 = vpop.f32.mrf.mxu1  ;;  %14203 = vst [vmem:[#allocation150_spill] sm:$0xff] %v12432_v22 }
 0x70e   :  { %7295 = vmatmul.mubr.msk.f32.gmra.mxu1 %vm599_vm0, %v9091_v16  ;;  %v12435_v16 = vpop.xlane.xlu0 %3186 }
 0x70f   :  { %5905 = vmatprep.mubr.f32.mxu1 %v13982_v47  ;;  %14204 = vst [vmem:[#allocation151_spill] sm:$0xff] %v12435_v16  ;;  %v12441_v20 = vpop.xlane.xlu1 %3188 }
 0x710   :  { %14205 = vst [vmem:[#allocation152_spill] sm:$0xff] %v12441_v20 }
 0x711   :  { %v9097_v62 = vpop.eup %9096 }
 0x712   :  { %7296 = vmatmul.mubr.msk.f32.gmra.mxu1 %vm599_vm0, %v9093_v38  ;;  %v12438_v7 = vpop.f32.mrf.mxu1  ;;  %v12444_v10 = vpop.xlane.xlu0 %3190  ;;  %v5222_v38 = vadd.f32 %v12365_v54, %v12217_v49 }
 0x713   :  { %5911 = vmatprep.mubr.f32.mxu1 %v13982_v47  ;;  %14206 = vst [vmem:[#allocation153_spill] sm:$0xff] %v12444_v10  ;;  %v14208_v10 = vld [vmem:[#allocation8_spill] sm:$0xff] }
 0x714   :  { %v12448_v22 = vpop.f32.mrf.mxu1  ;;  %v12460_v20 = vrot.slane %v7250_v40, %v14208_v10  ;;  %9104 = vtanh.f32 %v5222_v38  ;;  %v5232_v10 = vadd.f32 %v12381_v60, %v12217_v49  ;;  %v5237_v60 = vadd.f32 %v12217_v49, %v12399_v13 }
 0x715   :  { %v9099_v9 = vpop.eup %9098  ;;  %9106 = vtanh.f32 %v5227_v12 }
 0x716   :  { %7297 = vmatmul.mubr.msk.f32.gmra.mxu1 %vm599_vm0, %v9095_v46  ;;  %v12456_v46 = vpop.xlane.xlu1 %3192  ;;  %v12462_v54 = vpop.xlane.xlu0 %3194 }
 0x717   :  { %5917 = vmatprep.mubr.f32.mxu1 %v13982_v47  ;;  %14207 = vst [vmem:[#allocation154_spill] sm:$0xff] %v12456_v46  ;;  %14209 = vst [vmem:[#allocation8_spill] sm:$0xff] %v12462_v54  ;;  %v9101_v31 = vpop.eup %9100 }
 0x71a   :  { %v12453_v16 = vpop.f32.mrf.mxu1  ;;  %7298 = vmatmul.mubr.msk.f32.gmra.mxu1 %vm599_vm0, %v9097_v62  ;;  %v12468_v2 = vpop.xlane.xlu1 %3196 }
 0x71b   :  { %5923 = vmatprep.mubr.f32.mxu1 %v13982_v47  ;;  %14210 = vst [vmem:[#allocation155_spill] sm:$0xff] %v12468_v2  ;;  %v12472_v46 = vpop.xlane.xlu0 %3198 }
 0x71c   :  { %v12465_v56 = vpop.f32.mrf.mxu1  ;;  %14211 = vst [vmem:[#allocation156_spill] sm:$0xff] %v12472_v46  ;;  %v9103_v46 = vpop.eup %9102 }
 0x71e   :  { %v5637_v53 = vpop.f32.mrf.mxu1  ;;  %7299 = vmatmul.mubr.msk.f32.gmra.mxu1 %vm599_vm0, %v9099_v9  ;;  %v12477_v9 = vpop.xlane.xlu1 %3200 }
 0x71f   :  { %v5638_v62 = vadd.f32 %v5637_v53, %v12460_v20  ;;  %5929 = vmatprep.mubr.f32.mxu1 %v13982_v47  ;;  %14212 = vst [vmem:[#allocation157_spill] sm:$0xff] %v12477_v9  ;;  %v12481_v2 = vpop.xlane.xlu0 %3202 }
 0x720   :  { %v5639_v38 = vpop.f32.mrf.mxu1  ;;  %14213 = vst [vmem:[#allocation158_spill] sm:$0xff] %v12481_v2 }
 0x721   :  { %v6020_v54 = vmul.f32 1.442695, %v5638_v62  ;;  %6276 = vadd.xlane.f32.xlu0 %v5638_v62  ;;  %v9105_v2 = vpop.eup %9104 }
 0x722   :  { %v5643_v37 = vpop.f32.mrf.mxu1  ;;  %7300 = vmatmul.mubr.msk.f32.gmra.mxu1 %vm599_vm0, %v9101_v31  ;;  %v12486_v31 = vpop.xlane.xlu1 %3204 }
 0x723   :  { %9108 = vpow2.f32 %v6020_v54  ;;  %v5644_v53 = vadd.f32 %v5643_v37, %v12460_v20  ;;  %5935 = vmatprep.mubr.f32.mxu1 %v13982_v47  ;;  %14214 = vst [vmem:[#allocation159_spill] sm:$0xff] %v12486_v31  ;;  %v12490_v54 = vpop.xlane.xlu0 %3206 }
 0x724   :  { %9110 = vtanh.f32 %v5232_v10  ;;  %v5645_v12 = vpop.f32.mrf.mxu1  ;;  %14215 = vst [vmem:[#allocation160_spill] sm:$0xff] %v12490_v54  ;;  %v5242_v10 = vadd.f32 %v12390_v27, %v12217_v49  ;;  %v5247_v27 = vadd.f32 %v12217_v49, %v12417_v51  ;;  %v9107_v54 = vpop.eup %9106 }
 0x725   :  { %v6022_v42 = vmul.f32 1.442695, %v5644_v53  ;;  %6278 = vadd.xlane.f32.xlu1 %v5644_v53 }
 0x726   :  { %v5649_v62 = vpop.f32.mrf.mxu1  ;;  %7301 = vmatmul.mubr.msk.f32.gmra.mxu1 %vm599_vm0, %v9103_v46  ;;  %v12497_v46 = vpop.xlane.xlu1 %3208 }
 0x727   :  { %9112 = vpow2.f32 %v6022_v42  ;;  %v5650_v37 = vadd.f32 %v5649_v62, %v12460_v20  ;;  %5941 = vmatprep.mubr.f32.mxu1 %v13982_v47  ;;  %14216 = vst [vmem:[#allocation161_spill] sm:$0xff] %v12497_v46  ;;  %v12501_v62 = vpop.xlane.xlu0 %3210 }
 0x728   :  { %9114 = vtanh.f32 %v5237_v60  ;;  %v12494_v13 = vpop.f32.mrf.mxu1  ;;  %14217 = vst [vmem:[#allocation162_spill] sm:$0xff] %v12501_v62  ;;  %v5252_v62 = vadd.f32 %v12408_v44, %v12217_v49 }
 0x729   :  { %v6024_v53 = vmul.f32 1.442695, %v5650_v37  ;;  %6280 = vadd.xlane.f32.xlu0 %v5650_v37  ;;  %v14218_v37 = vld [vmem:[#allocation9_spill] sm:$0xff] }
 0x72a   :  { %v5655_v9 = vpop.f32.mrf.mxu1  ;;  %7302 = vmatmul.mubr.msk.f32.gmra.mxu1 %vm599_vm0, %v9105_v2  ;;  %v12508_v31 = vrot.slane %v7250_v40, %v14218_v37 }
 0x72b   :  { %9116 = vpow2.f32 %v6024_v53  ;;  %v5656_v42 = vadd.f32 %v5655_v9, %v12460_v20  ;;  %5947 = vmatprep.mubr.f32.mxu1 %v13982_v47  ;;  %v12511_v9 = vpop.xlane.xlu1 %3212  ;;  %v12515_v51 = vpop.xlane.xlu0 %3214 }
 0x72c   :  { %9118 = vtanh.f32 %v5242_v10  ;;  %v12505_v60 = vpop.f32.mrf.mxu1  ;;  %14219 = vst [vmem:[#allocation9_spill] sm:$0xff] %v12511_v9  ;;  %14220 = vst [vmem:[#allocation163_spill] sm:$0xff] %v12515_v51  ;;  %v5640_v37 = vadd.f32 %v5639_v38, %v12508_v31 }
 0x72d   :  { %v6026_v2 = vmul.f32 1.442695, %v5656_v42  ;;  %6282 = vadd.xlane.f32.xlu1 %v5656_v42 }
 0x72e   :  { %v5661_v46 = vpop.f32.mrf.mxu1  ;;  %7303 = vmatmul.mubr.msk.f32.gmra.mxu1 %vm599_vm0, %v9107_v54 }
 0x72f   :  { %9120 = vpow2.f32 %v6026_v2  ;;  %v5662_v53 = vadd.f32 %v5661_v46, %v12460_v20  ;;  %5953 = vmatprep.mubr.f32.mxu1 %v13982_v47  ;;  %v12524_v46 = vpop.xlane.xlu1 %3216  ;;  %v12530_v51 = vpop.xlane.xlu0 %4683 }
 0x730   :  { %v9109_v10 = vpop.eup %9108  ;;  %9122 = vtanh.f32 %v5247_v27  ;;  %v12519_v40 = vpop.f32.mrf.mxu1  ;;  %14221 = vst [vmem:[#allocation164_spill] sm:$0xff] %v12524_v46 }
 0x731   :  { %v9111_v42 = vpop.eup %9110  ;;  %v6148_v54 = vmul.f32 %v9109_v10, %v11680_v55  ;;  %v6028_v9 = vmul.f32 1.442695, %v5662_v53  ;;  %6284 = vadd.xlane.f32.xlu0 %v5662_v53  ;;  %v5257_v55 = vadd.f32 %v12217_v49, %v12429_v15  ;;  %v5646_v10 = vadd.f32 %v5645_v12, %v12508_v31 }
 0x732   :  { %v5667_v2 = vpop.f32.mrf.mxu1  ;;  %7304 = vmatmul.mubr.msk.f32.gmra.mxu1 %vm599_vm0, %v9111_v42 }
 0x733   :  { %v12526_v34 = vadd.f32 %v6148_v54, %v5640_v37  ;;  %9124 = vpow2.f32 %v6028_v9  ;;  %v5668_v44 = vadd.f32 %v5667_v2, %v12460_v20  ;;  %5959 = vmatprep.mubr.f32.mxu1 %v13982_v47  ;;  %v12541_v2 = vpop.xlane.xlu1 %4685 }
 0x734   :  { %v9113_v27 = vpop.eup %9112  ;;  %9126 = vtanh.f32 %v5252_v62  ;;  %v12534_v38 = vpop.f32.mrf.mxu1 }
 0x735   :  { %v9115_v53 = vpop.eup %9114  ;;  %v6149_v42 = vmul.f32 %v9113_v27, %v11694_v3  ;;  %v6030_v37 = vmul.f32 1.442695, %v5668_v44  ;;  %6286 = vadd.xlane.f32.xlu1 %v5668_v44  ;;  %v6468_v9 = vmul.f32 %v12526_v34, %v12526_v34  ;;  %v12547_v3 = vpop.xlane.xlu0 %4687  ;;  %v5262_v44 = vadd.f32 %v12419_v6, %v12217_v49 }
 0x736   :  { %v5673_v54 = vpop.f32.mrf.mxu1  ;;  %7305 = vmatmul.mubr.msk.f32.gmra.mxu1 %vm599_vm0, %v9115_v53 }
 0x737   :  { %v12543_v62 = vadd.f32 %v6149_v42, %v5646_v10  ;;  %9128 = vpow2.f32 %v6030_v37  ;;  %v5674_v15 = vadd.f32 %v5673_v54, %v12460_v20  ;;  %6532 = vadd.xlane.f32.xlu0 %v6468_v9  ;;  %5965 = vmatprep.mubr.f32.mxu1 %v13982_v47  ;;  %v5652_v10 = vadd.f32 %v12494_v13, %v12508_v31  ;;  %v12559_v46 = vpop.xlane.xlu1 %4689 }
 0x738   :  { %v9117_v12 = vpop.eup %9116  ;;  %9130 = vtanh.f32 %v5257_v55  ;;  %v12551_v27 = vpop.f32.mrf.mxu1 }
 0x739   :  { %v9119_v53 = vpop.eup %9118  ;;  %v6150_v42 = vmul.f32 %v9117_v12, %v11708_v59  ;;  %v6032_v37 = vmul.f32 1.442695, %v5674_v15  ;;  %v6469_v9 = vmul.f32 %v12543_v62, %v12543_v62  ;;  %v12564_v13 = vpop.xlane.xlu0 %4691  ;;  %v5267_v59 = vadd.f32 %v12217_v49, %v12448_v22 }
 0x73a   :  { %v5679_v54 = vpop.f32.mrf.mxu1  ;;  %7306 = vmatmul.mubr.msk.f32.gmra.mxu1 %vm599_vm0, %v9119_v53  ;;  %14222 = vst [vmem:[#allocation165_spill] sm:$0xff] %v12564_v13 }
 0x73b   :  { %v12561_v63 = vadd.f32 %v6150_v42, %v5652_v10  ;;  %9132 = vpow2.f32 %v6032_v37  ;;  %v5680_v6 = vadd.f32 %v5679_v54, %v12460_v20  ;;  %6534 = vadd.xlane.f32.xlu1 %v6469_v9  ;;  %6288 = vadd.xlane.f32.xlu0 %v5674_v15  ;;  %v5658_v10 = vadd.f32 %v12505_v60, %v12508_v31 }
 0x73c   :  { %v9121_v55 = vpop.eup %9120  ;;  %9134 = vtanh.f32 %v5262_v44  ;;  %v12568_v12 = vpop.f32.mrf.mxu1  ;;  %5971 = vmatprep.mubr.f32.mxu1 %v13982_v47 }
 0x73d   :  { %v9123_v53 = vpop.eup %9122  ;;  %v6151_v42 = vmul.f32 %v9121_v55, %v11723_v32  ;;  %v6034_v37 = vmul.f32 1.442695, %v5680_v6  ;;  %v6470_v15 = vmul.f32 %v12561_v63, %v12561_v63  ;;  %v12577_v44 = vpop.xlane.xlu1 %4693  ;;  %v5272_v32 = vadd.f32 %v12438_v7, %v12217_v49 }
 0x73e   :  { %v5685_v9 = vpop.f32.mrf.mxu1  ;;  %7307 = vmatmul.mubr.msk.f32.gmra.mxu1 %vm599_vm0, %v9123_v53  ;;  %v12582_v60 = vpop.xlane.xlu0 %4695 }
 0x73f   :  { %v12579_v22 = vadd.f32 %v6151_v42, %v5658_v10  ;;  %9136 = vpow2.f32 %v6034_v37  ;;  %v5686_v54 = vadd.f32 %v5685_v9, %v12460_v20  ;;  %6290 = vadd.xlane.f32.xlu1 %v5680_v6  ;;  %6536 = vadd.xlane.f32.xlu0 %v6470_v15  ;;  %14223 = vst [vmem:[#allocation166_spill] sm:$0xff] %v12582_v60 }
 0x740   :  { %v9125_v13 = vpop.eup %9124  ;;  %9138 = vtanh.f32 %v5267_v59  ;;  %v12586_v55 = vpop.f32.mrf.mxu1  ;;  %5977 = vmatprep.mubr.f32.mxu1 %v13982_v47  ;;  %v5664_v10 = vadd.f32 %v12519_v40, %v12508_v31 }
 0x741   :  { %v9127_v53 = vpop.eup %9126  ;;  %v6152_v42 = vmul.f32 %v9125_v13, %v11738_v35  ;;  %v6036_v37 = vmul.f32 1.442695, %v5686_v54  ;;  %v6471_v6 = vmul.f32 %v12579_v22, %v12579_v22  ;;  %v12595_v9 = vpop.xlane.xlu1 %4697  ;;  %v5277_v35 = vadd.f32 %v12217_v49, %v12465_v56 }
 0x742   :  { %v5691_v15 = vpop.f32.mrf.mxu1  ;;  %7308 = vmatmul.mubr.msk.f32.gmra.mxu1 %vm599_vm0, %v9127_v53  ;;  %v12600_v40 = vpop.xlane.xlu0 %4699 }
 0x743   :  { %v12597_v7 = vadd.f32 %v6152_v42, %v5664_v10  ;;  %9140 = vpow2.f32 %v6036_v37  ;;  %v5692_v59 = vadd.f32 %v5691_v15, %v12460_v20  ;;  %6538 = vadd.xlane.f32.xlu1 %v6471_v6  ;;  %6292 = vadd.xlane.f32.xlu0 %v5686_v54  ;;  %v5670_v10 = vadd.f32 %v12534_v38, %v12508_v31 }
 0x744   :  { %v9129_v60 = vpop.eup %9128  ;;  %9142 = vtanh.f32 %v5272_v32  ;;  %v12604_v13 = vpop.f32.mrf.mxu1  ;;  %5983 = vmatprep.mubr.f32.mxu1 %v13982_v47 }
 0x745   :  { %v9131_v53 = vpop.eup %9130  ;;  %v6153_v42 = vmul.f32 %v9129_v60, %v11753_v17  ;;  %v6038_v37 = vmul.f32 1.442695, %v5692_v59  ;;  %v6472_v54 = vmul.f32 %v12597_v7, %v12597_v7  ;;  %v12613_v32 = vpop.xlane.xlu1 %4701  ;;  %v9324_v17 = vld [vmem:[%s13853_s3 + $0x3] ss:$0 sm:$0xff]  ;;  %s9373_s3 = smov [#allocation5]  }
 0x746   :  { %v5697_v6 = vpop.f32.mrf.mxu1  ;;  %7309 = vmatmul.mubr.msk.f32.gmra.mxu1 %vm599_vm0, %v9131_v53  ;;  %v12618_v38 = vpop.xlane.xlu0 %4703  ;;  %v5282_v60 = vadd.f32 %v9324_v17, %v12453_v16  ;;  %s6989_s10 = sshll.u32 %s9373_s3, 4  ;;  %s6990_s10 = int_to_ptr.vmem [resolvable:$true] %s6989_s10 }
 0x747   :  { %v12615_v56 = vadd.f32 %v6153_v42, %v5670_v10  ;;  %9144 = vpow2.f32 %v6038_v37  ;;  %v5698_v49 = vadd.f32 %v5697_v6, %v12460_v20  ;;  %6294 = vadd.xlane.f32.xlu1 %v5692_v59  ;;  %6540 = vadd.xlane.f32.xlu0 %v6472_v54  ;;  %14224 = vst [vmem:[#allocation167_spill] sm:$0xff] %v12618_v38  ;;  %s9345_s11 = scalar_lea.vmem %s6990_s10, 8192  ;;  %p9350_p6 = scmp.lt.s32.totalorder %s6990_s10, %s6990_s10 }
 0x748   :  { %v9133_v15 = vpop.eup %9132  ;;  %9146 = vtanh.f32 %v5277_v35  ;;  %v12624_v53 = vpop.f32.mrf.mxu1  ;;  %5989 = vmatprep.mubr.f32.mxu1 %v13982_v47  ;;  %v5676_v42 = vadd.f32 %v12551_v27, %v12508_v31  ;;  %p9346_p5 = scmp.ne.s32.totalorder %s6990_s10, %s9345_s11  ;;  %p9351_p7 = scmp.lt.s32.totalorder %s9345_s11, %s9345_s11 }
 0x749   :  { %v9135_v10 = vpop.eup %9134  ;;  %v6154_v59 = vmul.f32 %v9133_v15, %v11770_v45  ;;  %v6040_v37 = vmul.f32 1.442695, %v5698_v49  ;;  %v6473_v54 = vmul.f32 %v12615_v56, %v12615_v56  ;;  %v12633_v38 = vpop.xlane.xlu1 %4705 }
 0x74a   :  { %v5703_v6 = vpop.f32.mrf.mxu1  ;;  %7310 = vmatmul.mubr.msk.f32.gmra.mxu1 %vm599_vm0, %v9135_v10  ;;  %14225 = vst [vmem:[#allocation168_spill] sm:$0xff] %v12633_v38  ;;  %v12638_v27 = vpop.xlane.xlu0 %4707  ;;  %v5682_v10 = vadd.f32 %v12568_v12, %v12508_v31  ;;  %v5700_v38 = vadd.f32 %v12624_v53, %v12508_v31  ;;  %p9352_p8 = por %p9351_p7, %p9350_p6 }
 0x74b   :  { %v12635_v16 = vadd.f32 %v6154_v59, %v5676_v42  ;;  %9148 = vpow2.f32 %v6040_v37  ;;  %v5704_v35 = vadd.f32 %v5703_v6, %v12460_v20  ;;  %6542 = vadd.xlane.f32.xlu1 %v6473_v54  ;;  %6296 = vadd.xlane.f32.xlu0 %v5698_v49  ;;  %14226 = vst [vmem:[#allocation169_spill] sm:$0xff] %v12638_v27 }
 0x74c   :  { %v9137_v17 = vpop.eup %9136  ;;  %9150 = vtanh.f32 %v5282_v60  ;;  %v12640_v45 = vpop.f32.mrf.mxu1  ;;  %5995 = vmatprep.mubr.f32.mxu1 %v13982_v47  ;;  %p9353_p9 = pnand %p9352_p8, %p9346_p5 }
 0x74d   :  { %v9139_v15 = vpop.eup %9138  ;;  %v6155_v42 = vmul.f32 %v9137_v17, %v11783_v43  ;;  %v6042_v59 = vmul.f32 1.442695, %v5704_v35  ;;  %v6474_v37 = vmul.f32 %v12635_v16, %v12635_v16  ;;  %v12649_v49 = vpop.xlane.xlu1 %4709 }
 0x74e   :  { %v5709_v54 = vpop.f32.mrf.mxu1  ;;  %7311 = vmatmul.mubr.msk.f32.gmra.mxu1 %vm599_vm0, %v9139_v15  ;;  %14227 = vst [vmem:[#allocation170_spill] sm:$0xff] %v12649_v49  ;;  %v12654_v12 = vpop.xlane.xlu0 %4711  ;;  %v5688_v15 = vadd.f32 %v12586_v55, %v12508_v31 }
 0x74f   :  { %v12651_v60 = vadd.f32 %v6155_v42, %v5682_v10  ;;  %9152 = vpow2.f32 %v6042_v59  ;;  %v5710_v6 = vadd.f32 %v5709_v54, %v12460_v20  ;;  %6298 = vadd.xlane.f32.xlu1 %v5704_v35  ;;  %6544 = vadd.xlane.f32.xlu0 %v6474_v37  ;;  %14228 = vst [vmem:[#allocation171_spill] sm:$0xff] %v12654_v12 }
 0x750   :  { %v9141_v27 = vpop.eup %9140  ;;  %v12656_v43 = vpop.f32.mrf.mxu1  ;;  %6001 = vmatprep.mubr.f32.mxu1 %v13982_v47 }
 0x751   :  { %v9143_v17 = vpop.eup %9142  ;;  %v6156_v49 = vmul.f32 %v9141_v27, %v11794_v1  ;;  %v6044_v10 = vmul.f32 1.442695, %v5710_v6  ;;  %v6475_v42 = vmul.f32 %v12651_v60, %v12651_v60  ;;  %v12665_v35 = vpop.xlane.xlu1 %4713 }
 0x752   :  { %v5715_v59 = vpop.f32.mrf.mxu1  ;;  %7312 = vmatmul.mubr.msk.f32.gmra.mxu1 %vm599_vm0, %v9143_v17  ;;  %14229 = vst [vmem:[#allocation172_spill] sm:$0xff] %v12665_v35  ;;  %v12670_v55 = vpop.xlane.xlu0 %4715  ;;  %v5694_v17 = vadd.f32 %v12604_v13, %v12508_v31 }
 0x753   :  { %v12667_v37 = vadd.f32 %v6156_v49, %v5688_v15  ;;  %9154 = vpow2.f32 %v6044_v10  ;;  %v5716_v54 = vadd.f32 %v5715_v59, %v12460_v20  ;;  %6546 = vadd.xlane.f32.xlu1 %v6475_v42  ;;  %6300 = vadd.xlane.f32.xlu0 %v5710_v6  ;;  %14230 = vst [vmem:[#allocation173_spill] sm:$0xff] %v12670_v55 }
 0x754   :  { %v9145_v12 = vpop.eup %9144  ;;  %v12672_v1 = vpop.f32.mrf.mxu1  ;;  %6007 = vmatprep.mubr.f32.mxu1 %v13982_v47 }
 0x755   :  { %v9147_v27 = vpop.eup %9146  ;;  %v6157_v35 = vmul.f32 %v9145_v12, %v11805_v26  ;;  %v6046_v49 = vmul.f32 1.442695, %v5716_v54  ;;  %v6476_v15 = vmul.f32 %v12667_v37, %v12667_v37  ;;  %v12681_v6 = vpop.xlane.xlu1 %4717 }
 0x756   :  { %v5721_v10 = vpop.f32.mrf.mxu1  ;;  %7313 = vmatmul.mubr.msk.f32.gmra.mxu1 %vm599_vm0, %v9147_v27  ;;  %14231 = vst [vmem:[#allocation174_spill] sm:$0xff] %v12681_v6  ;;  %v12686_v13 = vpop.xlane.xlu0 %4719 }
 0x757   :  { %v12683_v42 = vadd.f32 %v6157_v35, %v5694_v17  ;;  %9156 = vpow2.f32 %v6046_v49  ;;  %v5722_v59 = vadd.f32 %v5721_v10, %v12460_v20  ;;  %6302 = vadd.xlane.f32.xlu1 %v5716_v54  ;;  %6548 = vadd.xlane.f32.xlu0 %v6476_v15  ;;  %14232 = vst [vmem:[#allocation175_spill] sm:$0xff] %v12686_v13 }
 0x758   :  { %v9149_v55 = vpop.eup %9148  ;;  %v5723_v26 = vpop.f32.mrf.mxu1  ;;  %6013 = vmatprep.mubr.f32.mxu1 %v13982_v47 }
 0x759   :  { %v9151_v12 = vpop.eup %9150  ;;  %v6158_v27 = vmul.f32 %v9149_v55, %v11816_v25  ;;  %v6048_v6 = vmul.f32 1.442695, %v5722_v59  ;;  %v6477_v35 = vmul.f32 %v12683_v42, %v12683_v42  ;;  %v12695_v54 = vpop.xlane.xlu1 %4721  ;;  %v5706_v55 = vadd.f32 %v12640_v45, %v12508_v31 }
 0x75a   :  { %v5727_v17 = vpop.f32.mrf.mxu1  ;;  %7314 = vmatmul.mubr.msk.f32.gmra.mxu1 %vm599_vm0, %v9151_v12  ;;  %14233 = vst [vmem:[#allocation176_spill] sm:$0xff] %v12695_v54  ;;  %v12700_v53 = vpop.xlane.xlu0 %4723 }
 0x75b   :  { %v12697_v49 = vadd.f32 %v6158_v27, %v5700_v38  ;;  %9158 = vpow2.f32 %v6048_v6  ;;  %v5728_v47 = vadd.f32 %v5727_v17, %v12460_v20  ;;  %6550 = vadd.xlane.f32.xlu1 %v6477_v35  ;;  %6304 = vadd.xlane.f32.xlu0 %v5722_v59  ;;  %14234 = vst [vmem:[#allocation177_spill] sm:$0xff] %v12700_v53 }
 0x75c   :  { %v9153_v15 = vpop.eup %9152  ;;  %v5729_v25 = vpop.f32.mrf.mxu1 }
 0x75d   :  { %v6159_v10 = vmul.f32 %v9153_v15, %v11825_v21  ;;  %v6050_v13 = vmul.f32 1.442695, %v5728_v47  ;;  %v6478_v12 = vmul.f32 %v12697_v49, %v12697_v49  ;;  %v12707_v27 = vpop.xlane.xlu1 %4725  ;;  %v5712_v21 = vadd.f32 %v12656_v43, %v12508_v31 }
 0x75e   :  { %v5733_v38 = vpop.f32.mrf.mxu1  ;;  %14235 = vst [vmem:[#allocation178_spill] sm:$0xff] %v12707_v27  ;;  %v12712_v17 = vpop.xlane.xlu0 %4727 }
 0x75f   :  { %v12709_v6 = vadd.f32 %v6159_v10, %v5706_v55  ;;  %9160 = vpow2.f32 %v6050_v13  ;;  %v5734_v59 = vadd.f32 %v5733_v38, %v12460_v20  ;;  %6306 = vadd.xlane.f32.xlu1 %v5728_v47  ;;  %6552 = vadd.xlane.f32.xlu0 %v6478_v12  ;;  %14236 = vst [vmem:[#allocation179_spill] sm:$0xff] %v12712_v17 }
 0x760   :  { %v9155_v35 = vpop.eup %9154  ;;  %v5735_v45 = vpop.f32.mrf.mxu1 }
 0x761   :  { %v6160_v15 = vmul.f32 %v9155_v35, %v11833_v4  ;;  %v6052_v53 = vmul.f32 1.442695, %v5734_v59  ;;  %v6479_v27 = vmul.f32 %v12709_v6, %v12709_v6  ;;  %v12719_v10 = vpop.xlane.xlu1 %4729  ;;  %v5718_v4 = vadd.f32 %v12672_v1, %v12508_v31 }
 0x762   :  { %v5739_v55 = vpop.f32.mrf.mxu1  ;;  %14237 = vst [vmem:[#allocation180_spill] sm:$0xff] %v12719_v10  ;;  %v12724_v38 = vpop.xlane.xlu0 %4731 }
 0x763   :  { %v12721_v13 = vadd.f32 %v6160_v15, %v5712_v21  ;;  %9162 = vpow2.f32 %v6052_v53  ;;  %v5740_v47 = vadd.f32 %v5739_v55, %v12460_v20  ;;  %6554 = vadd.xlane.f32.xlu1 %v6479_v27  ;;  %6308 = vadd.xlane.f32.xlu0 %v5734_v59  ;;  %14238 = vst [vmem:[#allocation181_spill] sm:$0xff] %v12724_v38 }
 0x764   :  { %v9157_v12 = vpop.eup %9156  ;;  %v5741_v43 = vpop.f32.mrf.mxu1 }
 0x765   :  { %v6161_v35 = vmul.f32 %v9157_v12, %v11841_v28  ;;  %v6054_v17 = vmul.f32 1.442695, %v5740_v47  ;;  %v6480_v10 = vmul.f32 %v12721_v13, %v12721_v13  ;;  %v12731_v15 = vpop.xlane.xlu1 %4733  ;;  %v5724_v28 = vadd.f32 %v5723_v26, %v12508_v31 }
 0x766   :  { %v5745_v21 = vpop.f32.mrf.mxu1  ;;  %14239 = vst [vmem:[#allocation182_spill] sm:$0xff] %v12731_v15  ;;  %v12736_v55 = vpop.xlane.xlu0 %4735 }
 0x767   :  { %v12733_v53 = vadd.f32 %v6161_v35, %v5718_v4  ;;  %9164 = vpow2.f32 %v6054_v17  ;;  %v5746_v27 = vadd.f32 %v5745_v21, %v12460_v20  ;;  %6310 = vadd.xlane.f32.xlu1 %v5740_v47  ;;  %6556 = vadd.xlane.f32.xlu0 %v6480_v10  ;;  %14240 = vst [vmem:[#allocation183_spill] sm:$0xff] %v12736_v55 }
 0x768   :  { %v9159_v59 = vpop.eup %9158  ;;  %v5747_v1 = vpop.f32.mrf.mxu1 }
 0x769   :  { %v6162_v12 = vmul.f32 %v9159_v59, %v11849_v11  ;;  %v6056_v38 = vmul.f32 1.442695, %v5746_v27  ;;  %v6481_v54 = vmul.f32 %v12733_v53, %v12733_v53  ;;  %v12742_v4 = vpop.xlane.xlu1 %4737  ;;  %v5730_v11 = vadd.f32 %v5729_v25, %v12508_v31 }
 0x76a   :  { %v5751_v15 = vpop.f32.mrf.mxu1  ;;  %14241 = vst [vmem:[#allocation184_spill] sm:$0xff] %v12742_v4  ;;  %v12747_v35 = vpop.xlane.xlu0 %4739 }
 0x76b   :  { %v12744_v17 = vadd.f32 %v6162_v12, %v5724_v28  ;;  %9166 = vpow2.f32 %v6056_v38  ;;  %v5752_v10 = vadd.f32 %v5751_v15, %v12460_v20  ;;  %6558 = vadd.xlane.f32.xlu1 %v6481_v54  ;;  %6312 = vadd.xlane.f32.xlu0 %v5746_v27  ;;  %14242 = vst [vmem:[#allocation185_spill] sm:$0xff] %v12747_v35 }
 0x76c   :  { %v9161_v47 = vpop.eup %9160  ;;  %v5753_v26 = vpop.f32.mrf.mxu1 }
 0x76d   :  { %v6163_v21 = vmul.f32 %v9161_v47, %v11857_v14  ;;  %v6058_v59 = vmul.f32 1.442695, %v5752_v10  ;;  %v6482_v55 = vmul.f32 %v12744_v17, %v12744_v17  ;;  %v12753_v28 = vpop.xlane.xlu1 %4741  ;;  %v5736_v14 = vadd.f32 %v5735_v45, %v12508_v31 }
 0x76e   :  { %v5757_v4 = vpop.f32.mrf.mxu1  ;;  %14243 = vst [vmem:[#allocation186_spill] sm:$0xff] %v12753_v28  ;;  %v12758_v27 = vpop.xlane.xlu0 %4743 }
 0x76f   :  { %v12755_v38 = vadd.f32 %v6163_v21, %v5730_v11  ;;  %9168 = vpow2.f32 %v6058_v59  ;;  %v5758_v54 = vadd.f32 %v5757_v4, %v12460_v20  ;;  %6314 = vadd.xlane.f32.xlu1 %v5752_v10  ;;  %6560 = vadd.xlane.f32.xlu0 %v6482_v55  ;;  %14244 = vst [vmem:[#allocation187_spill] sm:$0xff] %v12758_v27 }
 0x770   :  { %v9163_v15 = vpop.eup %9162  ;;  %v5759_v25 = vpop.f32.mrf.mxu1 }
 0x771   :  { %v6164_v12 = vmul.f32 %v9163_v15, %v11865_v5  ;;  %v6060_v47 = vmul.f32 1.442695, %v5758_v54  ;;  %v6483_v35 = vmul.f32 %v12755_v38, %v12755_v38  ;;  %v12764_v11 = vpop.xlane.xlu1 %4745  ;;  %v5742_v5 = vadd.f32 %v5741_v43, %v12508_v31 }
 0x772   :  { %v5763_v28 = vpop.f32.mrf.mxu1  ;;  %14245 = vst [vmem:[#allocation188_spill] sm:$0xff] %v12764_v11  ;;  %v12769_v10 = vpop.xlane.xlu0 %4747 }
 0x773   :  { %v12766_v21 = vadd.f32 %v6164_v12, %v5736_v14  ;;  %9170 = vpow2.f32 %v6060_v47  ;;  %v5764_v55 = vadd.f32 %v5763_v28, %v12460_v20  ;;  %6562 = vadd.xlane.f32.xlu1 %v6483_v35  ;;  %6316 = vadd.xlane.f32.xlu0 %v5758_v54  ;;  %14246 = vst [vmem:[#allocation189_spill] sm:$0xff] %v12769_v10 }
 0x774   :  { %v9165_v4 = vpop.eup %9164  ;;  %v5765_v45 = vpop.f32.mrf.mxu1 }
 0x775   :  { %v6165_v59 = vmul.f32 %v9165_v4, %v11873_v48  ;;  %v6062_v15 = vmul.f32 1.442695, %v5764_v55  ;;  %v6484_v27 = vmul.f32 %v12766_v21, %v12766_v21  ;;  %v12775_v14 = vpop.xlane.xlu1 %4749  ;;  %v5748_v48 = vadd.f32 %v5747_v1, %v12508_v31 }
 0x776   :  { %v5769_v11 = vpop.f32.mrf.mxu1  ;;  %14247 = vst [vmem:[#allocation190_spill] sm:$0xff] %v12775_v14  ;;  %v12780_v54 = vpop.xlane.xlu0 %4751 }
 0x777   :  { %v12777_v12 = vadd.f32 %v6165_v59, %v5742_v5  ;;  %9172 = vpow2.f32 %v6062_v15  ;;  %v5770_v35 = vadd.f32 %v5769_v11, %v12460_v20  ;;  %6318 = vadd.xlane.f32.xlu1 %v5764_v55  ;;  %6564 = vadd.xlane.f32.xlu0 %v6484_v27  ;;  %14249 = vst [vmem:[#allocation192_spill] sm:$0xff] %v12780_v54  ;;  %v14253_v15 = vld [vmem:[#allocation15_spill] sm:$0xff] }
 0x778   :  { %v9167_v28 = vpop.eup %9166  ;;  %v5771_v43 = vpop.f32.mrf.mxu1 }
 0x779   :  { %14248 = vst [vmem:[#allocation191_spill] sm:$0xff] %v12777_v12  ;;  %v6166_v47 = vmul.f32 %v9167_v28, %v11881_v36  ;;  %v6064_v4 = vmul.f32 1.442695, %v5770_v35  ;;  %v6485_v10 = vmul.f32 %v12777_v12, %v12777_v12  ;;  %v12786_v5 = vpop.xlane.xlu1 %4753  ;;  %v5754_v36 = vadd.f32 %v5753_v26, %v12508_v31 }
 0x77a   :  { %v5775_v14 = vpop.f32.mrf.mxu1  ;;  %14250 = vst [vmem:[#allocation193_spill] sm:$0xff] %v12786_v5  ;;  %v12791_v55 = vpop.xlane.xlu0 %4755 }
 0x77b   :  { %v12788_v59 = vadd.f32 %v6166_v47, %v5748_v48  ;;  %9174 = vpow2.f32 %v6064_v4  ;;  %v5776_v27 = vadd.f32 %v5775_v14, %v12460_v20  ;;  %6566 = vadd.xlane.f32.xlu1 %v6485_v10  ;;  %6320 = vadd.xlane.f32.xlu0 %v5770_v35  ;;  %14252 = vst [vmem:[#allocation195_spill] sm:$0xff] %v12791_v55 }
 0x77c   :  { %v9169_v11 = vpop.eup %9168  ;;  %v5777_v1 = vpop.f32.mrf.mxu1  ;;  %v5760_v4 = vadd.f32 %v5759_v25, %v12508_v31 }
 0x77d   :  { %14251 = vst [vmem:[#allocation194_spill] sm:$0xff] %v12788_v59  ;;  %v6167_v28 = vmul.f32 %v9169_v11, %v14253_v15  ;;  %v6066_v54 = vmul.f32 1.442695, %v5776_v27  ;;  %v6486_v12 = vmul.f32 %v12788_v59, %v12788_v59  ;;  %v12797_v48 = vpop.xlane.xlu1 %4757  ;;  %v14257_v11 = vld [vmem:[#allocation87_spill] sm:$0xff] }
 0x77e   :  { %v5781_v5 = vpop.f32.mrf.mxu1  ;;  %14254 = vst [vmem:[#allocation15_spill] sm:$0xff] %v12797_v48  ;;  %v12802_v35 = vpop.xlane.xlu0 %4759 }
 0x77f   :  { %v12799_v47 = vadd.f32 %v6167_v28, %v5754_v36  ;;  %9176 = vpow2.f32 %v6066_v54  ;;  %v5782_v10 = vadd.f32 %v5781_v5, %v12460_v20  ;;  %6322 = vadd.xlane.f32.xlu1 %v5776_v27  ;;  %6568 = vadd.xlane.f32.xlu0 %v6486_v12  ;;  %14256 = vst [vmem:[#allocation197_spill] sm:$0xff] %v12802_v35 }
 0x780   :  { %v9171_v14 = vpop.eup %9170  ;;  %v5783_v26 = vpop.f32.mrf.mxu1  ;;  %v5766_v28 = vadd.f32 %v5765_v45, %v12508_v31 }
 0x781   :  { %14255 = vst [vmem:[#allocation196_spill] sm:$0xff] %v12799_v47  ;;  %v6168_v15 = vmul.f32 %v9171_v14, %v14257_v11  ;;  %v6068_v55 = vmul.f32 1.442695, %v5782_v10  ;;  %v6487_v59 = vmul.f32 %v12799_v47, %v12799_v47  ;;  %v12808_v36 = vpop.xlane.xlu1 %4761  ;;  %v14261_v14 = vld [vmem:[#allocation89_spill] sm:$0xff] }
 0x782   :  { %v5787_v48 = vpop.f32.mrf.mxu1  ;;  %14258 = vst [vmem:[#allocation87_spill] sm:$0xff] %v12808_v36  ;;  %v12813_v27 = vpop.xlane.xlu0 %4763 }
 0x783   :  { %v12810_v54 = vadd.f32 %v6168_v15, %v5760_v4  ;;  %9178 = vpow2.f32 %v6068_v55  ;;  %v5788_v12 = vadd.f32 %v5787_v48, %v12460_v20  ;;  %6570 = vadd.xlane.f32.xlu1 %v6487_v59  ;;  %6324 = vadd.xlane.f32.xlu0 %v5782_v10  ;;  %14260 = vst [vmem:[#allocation199_spill] sm:$0xff] %v12813_v27 }
 0x784   :  { %v9173_v5 = vpop.eup %9172  ;;  %v5789_v25 = vpop.f32.mrf.mxu1  ;;  %v5772_v15 = vadd.f32 %v5771_v43, %v12508_v31 }
 0x785   :  { %14259 = vst [vmem:[#allocation198_spill] sm:$0xff] %v12810_v54  ;;  %v6169_v11 = vmul.f32 %v9173_v5, %v14261_v14  ;;  %v6070_v35 = vmul.f32 1.442695, %v5788_v12  ;;  %v6488_v47 = vmul.f32 %v12810_v54, %v12810_v54  ;;  %v12819_v4 = vpop.xlane.xlu1 %4765  ;;  %v14264_v5 = vld [vmem:[#allocation16_spill] sm:$0xff] }
 0x786   :  { %v5793_v36 = vpop.f32.mrf.mxu1  ;;  %14262 = vst [vmem:[#allocation89_spill] sm:$0xff] %v12819_v4  ;;  %v12824_v10 = vpop.xlane.xlu0 %4767 }
 0x787   :  { %v12821_v55 = vadd.f32 %v6169_v11, %v5766_v28  ;;  %9180 = vpow2.f32 %v6070_v35  ;;  %v5794_v59 = vadd.f32 %v5793_v36, %v12460_v20  ;;  %6326 = vadd.xlane.f32.xlu1 %v5788_v12  ;;  %6572 = vadd.xlane.f32.xlu0 %v6488_v47  ;;  %14263 = vst [vmem:[#allocation200_spill] sm:$0xff] %v12824_v10 }
 0x788   :  { %v9175_v48 = vpop.eup %9174  ;;  %v5795_v45 = vpop.f32.mrf.mxu1  ;;  %v5778_v11 = vadd.f32 %v5777_v1, %v12508_v31 }
 0x789   :  { %v6170_v14 = vmul.f32 %v9175_v48, %v14264_v5  ;;  %v6072_v27 = vmul.f32 1.442695, %v5794_v59  ;;  %v6489_v54 = vmul.f32 %v12821_v55, %v12821_v55  ;;  %v12830_v28 = vpop.xlane.xlu1 %4769 }
 0x78a   :  { %v5799_v4 = vpop.f32.mrf.mxu1  ;;  %14265 = vst [vmem:[#allocation16_spill] sm:$0xff] %v12830_v28  ;;  %v12835_v12 = vpop.xlane.xlu0 %4771 }
 0x78b   :  { %v12832_v35 = vadd.f32 %v6170_v14, %v5772_v15  ;;  %9182 = vpow2.f32 %v6072_v27  ;;  %v5800_v47 = vadd.f32 %v5799_v4, %v12460_v20  ;;  %6574 = vadd.xlane.f32.xlu1 %v6489_v54  ;;  %6328 = vadd.xlane.f32.xlu0 %v5794_v59  ;;  %14266 = vst [vmem:[#allocation201_spill] sm:$0xff] %v12835_v12 }
 0x78c   :  { %v9177_v36 = vpop.eup %9176  ;;  %v5801_v43 = vpop.f32.mrf.mxu1 }
 0x78d   :  { %v6171_v48 = vmul.f32 %v9177_v36, %v11921_v58  ;;  %v6074_v5 = vmul.f32 1.442695, %v5800_v47  ;;  %v6490_v10 = vmul.f32 %v12832_v35, %v12832_v35  ;;  %v12841_v15 = vpop.xlane.xlu1 %4773  ;;  %v5784_v58 = vadd.f32 %v5783_v26, %v12508_v31 }
 0x78e   :  { %v5805_v28 = vpop.f32.mrf.mxu1  ;;  %14267 = vst [vmem:[#allocation202_spill] sm:$0xff] %v12841_v15  ;;  %v12846_v59 = vpop.xlane.xlu0 %4775 }
 0x78f   :  { %v12843_v27 = vadd.f32 %v6171_v48, %v5778_v11  ;;  %9184 = vpow2.f32 %v6074_v5  ;;  %v5806_v54 = vadd.f32 %v5805_v28, %v12460_v20  ;;  %6330 = vadd.xlane.f32.xlu1 %v5800_v47  ;;  %6576 = vadd.xlane.f32.xlu0 %v6490_v10  ;;  %14268 = vst [vmem:[#allocation203_spill] sm:$0xff] %v12846_v59 }
 0x790   :  { %v9179_v4 = vpop.eup %9178  ;;  %v5807_v1 = vpop.f32.mrf.mxu1 }
 0x791   :  { %v6172_v14 = vmul.f32 %v9179_v4, %v11929_v30  ;;  %v6076_v36 = vmul.f32 1.442695, %v5806_v54  ;;  %v6491_v12 = vmul.f32 %v12843_v27, %v12843_v27  ;;  %v12852_v11 = vpop.xlane.xlu1 %4777  ;;  %v5790_v30 = vadd.f32 %v5789_v25, %v12508_v31 }
 0x792   :  { %v5811_v15 = vpop.f32.mrf.mxu1  ;;  %14269 = vst [vmem:[#allocation204_spill] sm:$0xff] %v12852_v11  ;;  %v12857_v47 = vpop.xlane.xlu0 %4779 }
 0x793   :  { %v12854_v48 = vadd.f32 %v6172_v14, %v5784_v58  ;;  %9186 = vpow2.f32 %v6076_v36  ;;  %v5812_v10 = vadd.f32 %v5811_v15, %v12460_v20  ;;  %6578 = vadd.xlane.f32.xlu1 %v6491_v12  ;;  %6332 = vadd.xlane.f32.xlu0 %v5806_v54  ;;  %14270 = vst [vmem:[#allocation205_spill] sm:$0xff] %v12857_v47 }
 0x794   :  { %v9181_v28 = vpop.eup %9180  ;;  %v5813_v26 = vpop.f32.mrf.mxu1 }
 0x795   :  { %v6173_v5 = vmul.f32 %v9181_v28, %v11937_v29  ;;  %v6078_v4 = vmul.f32 1.442695, %v5812_v10  ;;  %v6492_v59 = vmul.f32 %v12854_v48, %v12854_v48  ;;  %v12863_v58 = vpop.xlane.xlu1 %4781  ;;  %v5796_v29 = vadd.f32 %v5795_v45, %v12508_v31 }
 0x796   :  { %v5817_v11 = vpop.f32.mrf.mxu1  ;;  %14271 = vst [vmem:[#allocation206_spill] sm:$0xff] %v12863_v58  ;;  %v12868_v54 = vpop.xlane.xlu0 %4783 }
 0x797   :  { %v12865_v14 = vadd.f32 %v6173_v5, %v5790_v30  ;;  %9188 = vpow2.f32 %v6078_v4  ;;  %v5818_v12 = vadd.f32 %v5817_v11, %v12460_v20  ;;  %6334 = vadd.xlane.f32.xlu1 %v5812_v10  ;;  %6580 = vadd.xlane.f32.xlu0 %v6492_v59  ;;  %14272 = vst [vmem:[#allocation207_spill] sm:$0xff] %v12868_v54 }
 0x798   :  { %v9183_v15 = vpop.eup %9182  ;;  %v5819_v25 = vpop.f32.mrf.mxu1 }
 0x799   :  { %v6174_v36 = vmul.f32 %v9183_v15, %v11945_v19  ;;  %v6080_v28 = vmul.f32 1.442695, %v5818_v12  ;;  %v6493_v47 = vmul.f32 %v12865_v14, %v12865_v14  ;;  %v12874_v30 = vpop.xlane.xlu1 %4785  ;;  %v5802_v19 = vadd.f32 %v5801_v43, %v12508_v31 }
 0x79a   :  { %v5823_v58 = vpop.f32.mrf.mxu1  ;;  %14273 = vst [vmem:[#allocation208_spill] sm:$0xff] %v12874_v30  ;;  %v12879_v10 = vpop.xlane.xlu0 %4787 }
 0x79b   :  { %v12876_v5 = vadd.f32 %v6174_v36, %v5796_v29  ;;  %9190 = vpow2.f32 %v6080_v28  ;;  %v5824_v59 = vadd.f32 %v5823_v58, %v12460_v20  ;;  %6582 = vadd.xlane.f32.xlu1 %v6493_v47  ;;  %6336 = vadd.xlane.f32.xlu0 %v5818_v12  ;;  %14275 = vst [vmem:[#allocation210_spill] sm:$0xff] %v12879_v10 }
 0x79c   :  { %v9185_v11 = vpop.eup %9184  ;;  %v5825_v45 = vpop.f32.mrf.mxu1 }
 0x79d   :  { %14274 = vst [vmem:[#allocation209_spill] sm:$0xff] %v12876_v5  ;;  %v6175_v4 = vmul.f32 %v9185_v11, %v11953_v52  ;;  %v6082_v15 = vmul.f32 1.442695, %v5824_v59  ;;  %v6494_v54 = vmul.f32 %v12876_v5, %v12876_v5  ;;  %v12885_v29 = vpop.xlane.xlu1 %4789  ;;  %v5808_v52 = vadd.f32 %v5807_v1, %v12508_v31 }
 0x79e   :  { %v5829_v30 = vpop.f32.mrf.mxu1  ;;  %14276 = vst [vmem:[#allocation211_spill] sm:$0xff] %v12885_v29  ;;  %v12890_v12 = vpop.xlane.xlu0 %4791 }
 0x79f   :  { %v12887_v36 = vadd.f32 %v6175_v4, %v5802_v19  ;;  %9192 = vpow2.f32 %v6082_v15  ;;  %v5830_v47 = vadd.f32 %v5829_v30, %v12460_v20  ;;  %6338 = vadd.xlane.f32.xlu1 %v5824_v59  ;;  %6584 = vadd.xlane.f32.xlu0 %v6494_v54  ;;  %14278 = vst [vmem:[#allocation213_spill] sm:$0xff] %v12890_v12 }
 0x7a0   :  { %v9187_v58 = vpop.eup %9186  ;;  %v5831_v43 = vpop.f32.mrf.mxu1 }
 0x7a1   :  { %14277 = vst [vmem:[#allocation212_spill] sm:$0xff] %v12887_v36  ;;  %v6176_v28 = vmul.f32 %v9187_v58, %v11961_v23  ;;  %v6084_v11 = vmul.f32 1.442695, %v5830_v47  ;;  %v6495_v10 = vmul.f32 %v12887_v36, %v12887_v36  ;;  %v12896_v19 = vpop.xlane.xlu1 %4793  ;;  %v5814_v23 = vadd.f32 %v5813_v26, %v12508_v31  ;;  %v14299_v36 = vld [vmem:[#allocation96_spill] sm:$0xff] }
 0x7a2   :  { %v5835_v29 = vpop.f32.mrf.mxu1  ;;  %14279 = vst [vmem:[#allocation214_spill] sm:$0xff] %v12896_v19  ;;  %v12901_v59 = vpop.xlane.xlu0 %4795 }
 0x7a3   :  { %v12898_v4 = vadd.f32 %v6176_v28, %v5808_v52  ;;  %9194 = vpow2.f32 %v6084_v11  ;;  %v5836_v54 = vadd.f32 %v5835_v29, %v12460_v20  ;;  %6586 = vadd.xlane.f32.xlu1 %v6495_v10  ;;  %6340 = vadd.xlane.f32.xlu0 %v5830_v47  ;;  %14281 = vst [vmem:[#allocation216_spill] sm:$0xff] %v12901_v59 }
 0x7a4   :  { %v9189_v30 = vpop.eup %9188  ;;  %v5837_v1 = vpop.f32.mrf.mxu1 }
 0x7a5   :  { %14280 = vst [vmem:[#allocation215_spill] sm:$0xff] %v12898_v4  ;;  %v6177_v15 = vmul.f32 %v9189_v30, %v11969_v61  ;;  %v6086_v58 = vmul.f32 1.442695, %v5836_v54  ;;  %v6496_v12 = vmul.f32 %v12898_v4, %v12898_v4  ;;  %v12907_v52 = vpop.xlane.xlu1 %4797  ;;  %v5820_v61 = vadd.f32 %v5819_v25, %v12508_v31  ;;  %v14298_v4 = vld [vmem:[#allocation22_spill] sm:$0xff] }
 0x7a6   :  { %v5841_v19 = vpop.f32.mrf.mxu1  ;;  %14282 = vst [vmem:[#allocation217_spill] sm:$0xff] %v12907_v52  ;;  %v12912_v47 = vpop.xlane.xlu0 %4799 }
 0x7a7   :  { %v12909_v28 = vadd.f32 %v6177_v15, %v5814_v23  ;;  %9196 = vpow2.f32 %v6086_v58  ;;  %v5842_v10 = vadd.f32 %v5841_v19, %v12460_v20  ;;  %6342 = vadd.xlane.f32.xlu1 %v5836_v54  ;;  %6588 = vadd.xlane.f32.xlu0 %v6496_v12  ;;  %14284 = vst [vmem:[#allocation219_spill] sm:$0xff] %v12912_v47 }
 0x7a8   :  { %v9191_v29 = vpop.eup %9190  ;;  %v5843_v26 = vpop.f32.mrf.mxu1 }
 0x7a9   :  { %14283 = vst [vmem:[#allocation218_spill] sm:$0xff] %v12909_v28  ;;  %v6178_v11 = vmul.f32 %v9191_v29, %v11977_v57  ;;  %v6088_v30 = vmul.f32 1.442695, %v5842_v10  ;;  %v6497_v59 = vmul.f32 %v12909_v28, %v12909_v28  ;;  %v12918_v23 = vpop.xlane.xlu1 %4801  ;;  %v5826_v57 = vadd.f32 %v5825_v45, %v12508_v31 }
 0x7aa   :  { %v5847_v52 = vpop.f32.mrf.mxu1  ;;  %14285 = vst [vmem:[#allocation220_spill] sm:$0xff] %v12918_v23  ;;  %v12923_v54 = vpop.xlane.xlu0 %4803 }
 0x7ab   :  { %v12920_v15 = vadd.f32 %v6178_v11, %v5820_v61  ;;  %9198 = vpow2.f32 %v6088_v30  ;;  %v5848_v12 = vadd.f32 %v5847_v52, %v12460_v20  ;;  %6590 = vadd.xlane.f32.xlu1 %v6497_v59  ;;  %6344 = vadd.xlane.f32.xlu0 %v5842_v10  ;;  %14287 = vst [vmem:[#allocation222_spill] sm:$0xff] %v12923_v54 }
 0x7ac   :  { %v9193_v19 = vpop.eup %9192  ;;  %v5849_v25 = vpop.f32.mrf.mxu1 }
 0x7ad   :  { %14286 = vst [vmem:[#allocation221_spill] sm:$0xff] %v12920_v15  ;;  %v6179_v58 = vmul.f32 %v9193_v19, %v11985_v39  ;;  %v6090_v29 = vmul.f32 1.442695, %v5848_v12  ;;  %v6498_v23 = vmul.f32 %v12920_v15, %v12920_v15  ;;  %v12929_v61 = vpop.xlane.xlu1 %4805  ;;  %v5832_v39 = vadd.f32 %v5831_v43, %v12508_v31 }
 0x7ae   :  { %v5853_v47 = vpop.f32.mrf.mxu1  ;;  %14288 = vst [vmem:[#allocation223_spill] sm:$0xff] %v12929_v61  ;;  %v12934_v10 = vpop.xlane.xlu0 %4807 }
 0x7af   :  { %v12931_v11 = vadd.f32 %v6179_v58, %v5826_v57  ;;  %9200 = vpow2.f32 %v6090_v29  ;;  %v5854_v59 = vadd.f32 %v5853_v47, %v12460_v20  ;;  %6346 = vadd.xlane.f32.xlu1 %v5848_v12  ;;  %14290 = vst [vmem:[#allocation225_spill] sm:$0xff] %v12934_v10  ;;  %6592 = vadd.xlane.f32.xlu0 %v6498_v23 }
 0x7b0   :  { %v9195_v52 = vpop.eup %9194  ;;  %v12936_v45 = vpop.f32.mrf.mxu1 }
 0x7b1   :  { %14289 = vst [vmem:[#allocation224_spill] sm:$0xff] %v12931_v11  ;;  %v6180_v30 = vmul.f32 %v9195_v52, %v11993_v18  ;;  %v6092_v19 = vmul.f32 1.442695, %v5854_v59  ;;  %v6499_v57 = vmul.f32 %v12931_v11, %v12931_v11  ;;  %v12942_v58 = vpop.xlane.xlu1 %4809  ;;  %v5838_v18 = vadd.f32 %v5837_v1, %v12508_v31 }
 0x7b2   :  { %v5859_v54 = vpop.f32.mrf.mxu1  ;;  %14291 = vst [vmem:[#allocation226_spill] sm:$0xff] %v12942_v58  ;;  %v6277_v23 = vpop.xlane.xlu0 %6276 }
 0x7b3   :  { %v12944_v29 = vadd.f32 %v6180_v30, %v5832_v39  ;;  %9202 = vpow2.f32 %v6092_v19  ;;  %v5860_v47 = vadd.f32 %v5859_v54, %v12460_v20  ;;  %6594 = vadd.xlane.f32.xlu1 %v6499_v57  ;;  %6348 = vadd.xlane.f32.xlu0 %v5854_v59 }
 0x7b4   :  { %v9197_v12 = vpop.eup %9196  ;;  %v12947_v10 = vpop.f32.mrf.mxu1 }
 0x7b5   :  { %14292 = vst [vmem:[#allocation227_spill] sm:$0xff] %v12944_v29  ;;  %v6181_v43 = vmul.f32 %v9197_v12, %v12001_v0  ;;  %v6094_v52 = vmul.f32 1.442695, %v5860_v47  ;;  %v6500_v58 = vmul.f32 %v12944_v29, %v12944_v29  ;;  %v6279_v30 = vpop.xlane.xlu1 %6278  ;;  %v5844_v0 = vadd.f32 %v5843_v26, %v12508_v31  ;;  %v14295_v29 = vld [vmem:[#allocation95_spill] sm:$0xff] }
 0x7b6   :  { %v5865_v61 = vpop.f32.mrf.mxu1  ;;  %v12956_v57 = vpop.xlane.xlu0 %6280  ;;  %v14296_v26 = vlaneseq }
 0x7b7   :  { %v12953_v39 = vadd.f32 %v6181_v43, %v5838_v18  ;;  %9204 = vpow2.f32 %v6094_v52  ;;  %v5866_v54 = vadd.f32 %v5865_v61, %v12460_v20  ;;  %6350 = vadd.xlane.f32.xlu1 %v5860_v47  ;;  %6596 = vadd.xlane.f32.xlu0 %v6500_v58  ;;  %v14294_v58 = vld [vmem:[#allocation20_spill] sm:$0xff] }
 0x7b8   :  { %v9199_v19 = vpop.eup %9198  ;;  %v12958_v59 = vpop.f32.mrf.mxu1  ;;  %v3218_v15 = vadd.f32 %v14295_v29, %v14294_v58 }
 0x7b9   :  { %14293 = vst [vmem:[#allocation228_spill] sm:$0xff] %v12953_v39  ;;  %v6182_v1 = vmul.f32 %v9199_v19, %v12009_v8  ;;  %v6096_v12 = vmul.f32 1.442695, %v5866_v54  ;;  %v6501_v18 = vmul.f32 %v12953_v39, %v12953_v39  ;;  %v12966_v61 = vpop.xlane.xlu1 %6282  ;;  %v12976_v19 = vand.u32 127, %v14296_v26 }
 0x7ba   :  { %v5871_v11 = vpop.f32.mrf.mxu1  ;;  %v12971_v28 = vpop.xlane.xlu0 %6284 }
 0x7bb   :  { %v12964_v43 = vadd.f32 %v6182_v1, %v5844_v0  ;;  %9206 = vpow2.f32 %v6096_v12  ;;  %v5872_v52 = vadd.f32 %v5871_v11, %v12460_v20  ;;  %6598 = vadd.xlane.f32.xlu1 %v6501_v18  ;;  %6352 = vadd.xlane.f32.xlu0 %v5866_v54  ;;  %v5850_v0 = vadd.f32 %v5849_v25, %v12508_v31 }
 0x7bc   :  { %v9201_v47 = vpop.eup %9200  ;;  %v12973_v8 = vpop.f32.mrf.mxu1  ;;  %v4811_v11 = vadd.f32 %v12530_v51, %v3218_v15  ;;  %v3219_v25 = vadd.f32 %v14299_v36, %v14298_v4  ;;  %vm6791_vm1 = vcmp.eq.s32.totalorder %v12976_v19, 17  ;;  %v5856_v15 = vadd.f32 %v12936_v45, %v12508_v31  ;;  %v14301_v45 = vld [vmem:[#allocation97_spill] sm:$0xff] }
 0x7bd   :  { %v6183_v1 = vmul.f32 %v9201_v47, %v12017_v50  ;;  %v6098_v12 = vmul.f32 1.442695, %v5872_v52  ;;  %v6502_v29 = vmul.f32 %v12964_v43, %v12964_v43  ;;  %vm6790_vm2 = vcmp.eq.s32.totalorder %v12976_v19, 16 }
 0x7be   :  { %v5877_v39 = vpop.f32.mrf.mxu1  ;;  %v12986_v18 = vpop.xlane.xlu1 %6286  ;;  %v6404_v5 = vadd.f32 %v6277_v23, %v4811_v11  ;;  %v14300_v11 = vld [vmem:[#allocation21_spill] sm:$0xff] }
 0x7bf   :  { %v12983_v58 = vadd.f32 %v6183_v1, %v5850_v0  ;;  %9208 = vpow2.f32 %v6098_v12  ;;  %v5878_v54 = vadd.f32 %v5877_v39, %v12460_v20  ;;  %6354 = vadd.xlane.f32.xlu1 %v5872_v52  ;;  %6600 = vadd.xlane.f32.xlu0 %v6502_v29  ;;  %v4812_v0 = vadd.f32 %v12541_v2, %v3219_v25 }
 0x7c0   :  { %v9203_v26 = vpop.eup %9202  ;;  %v12990_v50 = vpop.f32.mrf.mxu1  ;;  %v3220_v29 = vadd.f32 %v14301_v45, %v14300_v11 }
 0x7c1   :  { %14297 = vst [vmem:[#allocation20_spill] sm:$0xff] %v12983_v58  ;;  %v6533_v51 = vpop.xlane.xlu0 %6532  ;;  %v6184_v47 = vmul.f32 %v9203_v26, %v12025_v33  ;;  %v6100_v39 = vmul.f32 1.442695, %v5878_v54  ;;  %v6503_v36 = vmul.f32 %v12983_v58, %v12983_v58  ;;  %v6792_v33 = vsel %vm6791_vm1, %v6404_v5, %v12526_v34 }
 0x7c2   :  { %v6660_v1 = vmul.f32 -0.5, %v6533_v51  ;;  %v5883_v12 = vpop.f32.mrf.mxu1  ;;  %v6405_v2 = vadd.f32 %v6279_v30, %v4812_v0  ;;  %v4813_v11 = vadd.f32 %v12547_v3, %v3220_v29 }
 0x7c3   :  { %v12999_v4 = vadd.f32 %v6184_v47, %v5856_v15  ;;  %9210 = vpow2.f32 %v6100_v39  ;;  %v5884_v23 = vadd.f32 %v5883_v12, %v12460_v20  ;;  %6602 = vadd.xlane.f32.xlu1 %v6503_v36  ;;  %6356 = vadd.xlane.f32.xlu0 %v5878_v54  ;;  %v5862_v15 = vadd.f32 %v12947_v10, %v12508_v31  ;;  %v14303_v36 = vld [vmem:[#allocation98_spill] sm:$0xff] }
 0x7c4   :  { %v9205_v52 = vpop.eup %9204  ;;  %v7315_v26 = vadd.f32 -14.703016, %v6660_v1  ;;  %v13008_v25 = vpop.f32.mrf.mxu1  ;;  %v14302_v1 = vld [vmem:[#allocation34_spill] sm:$0xff]  ;;  %v6793_v3 = vsel %vm6791_vm1, %v6405_v2, %v12543_v62  ;;  %v6406_v45 = vadd.f32 %v12956_v57, %v4813_v11 }
 0x7c5   :  { %v6535_v51 = vpop.xlane.xlu1 %6534  ;;  %v6185_v47 = vmul.f32 %v9205_v52, %v12033_v41  ;;  %v6102_v39 = vmul.f32 1.442695, %v5884_v23  ;;  %v13013_v58 = vpop.xlane.xlu0 %6288  ;;  %v6504_v30 = vmul.f32 %v12999_v4, %v12999_v4  ;;  %v3221_v52 = vadd.f32 %v14303_v36, %v14302_v1 }
 0x7c6   :  { %v6661_v12 = vmul.f32 -0.5, %v6535_v51  ;;  %v6856_v34 = vsel %vm6790_vm2, %v7315_v26, %v6792_v33  ;;  %v5889_v5 = vpop.f32.mrf.mxu1  ;;  %v5868_v26 = vadd.f32 %v12958_v59, %v12508_v31  ;;  %v5874_v36 = vadd.f32 %v12973_v8, %v12508_v31 }
 0x7c7   :  { %v13020_v54 = vadd.f32 %v6185_v47, %v5862_v15  ;;  %6920 = vst [vmem:[#allocation5] sm:$0xff] %v6856_v34  ;;  %9212 = vpow2.f32 %v6102_v39  ;;  %v5890_v41 = vadd.f32 %v5889_v5, %v12460_v20  ;;  %6358 = vadd.xlane.f32.xlu1 %v5884_v23  ;;  %6604 = vadd.xlane.f32.xlu0 %v6504_v30  ;;  %v14305_v34 = vld [vmem:[#allocation99_spill] sm:$0xff] }
 0x7c8   :  { %v7316_v10 = vadd.f32 -14.703016, %v6661_v12  ;;  %v9207_v0 = vpop.eup %9206  ;;  %v13029_v29 = vpop.f32.mrf.mxu1  ;;  %v4814_v62 = vadd.f32 %v12559_v46, %v3221_v52  ;;  %v6794_v30 = vsel %vm6791_vm1, %v6406_v45, %v12561_v63  ;;  %v14306_v52 = vld [vmem:[#allocation105_spill] sm:$0xff] }
 0x7c9   :  { %v13031_v33 = vpop.xlane.xlu1 %6290  ;;  %v6186_v51 = vmul.f32 %v9207_v0, %v12041_v24  ;;  %v6104_v47 = vmul.f32 1.442695, %v5890_v41  ;;  %v6537_v39 = vpop.xlane.xlu0 %6536  ;;  %v6505_v2 = vmul.f32 %v13020_v54, %v13020_v54  ;;  %v14304_v24 = vld [vmem:[#allocation35_spill] sm:$0xff] }
 0x7ca   :  { %v6857_v15 = vsel %vm6790_vm2, %v7316_v10, %v6793_v3  ;;  %v6662_v57 = vmul.f32 -0.5, %v6537_v39  ;;  %v5895_v23 = vpop.f32.mrf.mxu1  ;;  %v3222_v5 = vadd.f32 %v14305_v34, %v14304_v24  ;;  %v6407_v46 = vadd.f32 %v12966_v61, %v4814_v62 }
 0x7cb   :  { %6921 = vst [vmem:[#allocation5 + $0x8] sm:$0xff] %v6857_v15  ;;  %v13041_v12 = vadd.f32 %v6186_v51, %v5868_v26  ;;  %9214 = vpow2.f32 %v6104_v47  ;;  %v5896_v59 = vadd.f32 %v5895_v23, %v12460_v20  ;;  %6606 = vadd.xlane.f32.xlu1 %v6505_v2  ;;  %6360 = vadd.xlane.f32.xlu0 %v5890_v41  ;;  %v14307_v47 = vld [vmem:[#allocation165_spill] sm:$0xff]  ;;  %v14308_v23 = vld [vmem:[#allocation36_spill] sm:$0xff] }
 0x7cc   :  { %v9209_v11 = vpop.eup %9208  ;;  %v7317_v10 = vadd.f32 -14.703016, %v6662_v57  ;;  %v13050_v0 = vpop.f32.mrf.mxu1  ;;  %v4815_v39 = vadd.f32 %v14307_v47, %v3222_v5  ;;  %v14309_v2 = vld [vmem:[#allocation100_spill] sm:$0xff]  ;;  %v6795_v24 = vsel %vm6791_vm1, %v6407_v46, %v12579_v22 }
 0x7cd   :  { %v6539_v1 = vpop.xlane.xlu1 %6538  ;;  %v6187_v3 = vmul.f32 %v9209_v11, %v14306_v52  ;;  %v6106_v26 = vmul.f32 1.442695, %v5896_v59  ;;  %v13055_v15 = vpop.xlane.xlu0 %6292  ;;  %v6506_v41 = vmul.f32 %v13041_v12, %v13041_v12  ;;  %v3223_v11 = vadd.f32 %v14309_v2, %v14308_v23 }
 0x7ce   :  { %v6663_v51 = vmul.f32 -0.5, %v6539_v1  ;;  %v6858_v63 = vsel %vm6790_vm2, %v7317_v10, %v6794_v30  ;;  %v5901_v61 = vpop.f32.mrf.mxu1  ;;  %v6408_v34 = vadd.f32 %v12971_v28, %v4815_v39  ;;  %v5880_v10 = vadd.f32 %v12990_v50, %v12508_v31  ;;  %v14310_v1 = vld [vmem:[#allocation107_spill] sm:$0xff]  ;;  %v14311_v39 = vld [vmem:[#allocation37_spill] sm:$0xff] }
 0x7cf   :  { %v13062_v45 = vadd.f32 %v6187_v3, %v5874_v36  ;;  %6922 = vst [vmem:[#allocation5 + $0x10] sm:$0xff] %v6858_v63  ;;  %9216 = vpow2.f32 %v6106_v26  ;;  %v5902_v62 = vadd.f32 %v5901_v61, %v12460_v20  ;;  %6362 = vadd.xlane.f32.xlu1 %v5896_v59  ;;  %6608 = vadd.xlane.f32.xlu0 %v6506_v41  ;;  %v14312_v63 = vld [vmem:[#allocation101_spill] sm:$0xff] }
 0x7d0   :  { %v7318_v8 = vadd.f32 -14.703016, %v6663_v51  ;;  %v9211_v57 = vpop.eup %9210  ;;  %v13071_v5 = vpop.f32.mrf.mxu1  ;;  %v4816_v22 = vadd.f32 %v12577_v44, %v3223_v11  ;;  %v3224_v61 = vadd.f32 %v14312_v63, %v14311_v39  ;;  %v6796_v41 = vsel %vm6791_vm1, %v6408_v34, %v12597_v7  ;;  %v14313_v11 = vld [vmem:[#allocation109_spill] sm:$0xff] }
 0x7d1   :  { %v13073_v30 = vpop.xlane.xlu1 %6294  ;;  %v6188_v36 = vmul.f32 %v9211_v57, %v14310_v1  ;;  %v6108_v3 = vmul.f32 1.442695, %v5902_v62  ;;  %v6541_v26 = vpop.xlane.xlu0 %6540  ;;  %v6507_v46 = vmul.f32 %v13062_v45, %v13062_v45  ;;  %v5886_v2 = vadd.f32 %v13008_v25, %v12508_v31 }
 0x7d2   :  { %v6859_v52 = vsel %vm6790_vm2, %v7318_v8, %v6795_v24  ;;  %v6664_v28 = vmul.f32 -0.5, %v6541_v26  ;;  %v5907_v59 = vpop.f32.mrf.mxu1  ;;  %v6409_v44 = vadd.f32 %v12986_v18, %v4816_v22 }
 0x7d3   :  { %6923 = vst [vmem:[#allocation5 + $0x18] sm:$0xff] %v6859_v52  ;;  %v13083_v51 = vadd.f32 %v6188_v36, %v5880_v10  ;;  %9218 = vpow2.f32 %v6108_v3  ;;  %v5908_v50 = vadd.f32 %v5907_v59, %v12460_v20  ;;  %6610 = vadd.xlane.f32.xlu1 %v6507_v46  ;;  %6364 = vadd.xlane.f32.xlu0 %v5902_v62  ;;  %v14314_v52 = vld [vmem:[#allocation166_spill] sm:$0xff] }
 0x7d4   :  { %v9213_v47 = vpop.eup %9212  ;;  %v7319_v8 = vadd.f32 -14.703016, %v6664_v28  ;;  %v13092_v57 = vpop.f32.mrf.mxu1  ;;  %v4817_v3 = vadd.f32 %v14314_v52, %v3224_v61  ;;  %v14315_v28 = vld [vmem:[#allocation38_spill] sm:$0xff]  ;;  %v14318_v52 = vld [vmem:[#allocation39_spill] sm:$0xff] }
 0x7d5   :  { %v6543_v23 = vpop.xlane.xlu1 %6542  ;;  %v6189_v24 = vmul.f32 %v9213_v47, %v14313_v11  ;;  %v6110_v10 = vmul.f32 1.442695, %v5908_v50  ;;  %v13097_v36 = vpop.xlane.xlu0 %6296  ;;  %v6508_v62 = vmul.f32 %v13083_v51, %v13083_v51  ;;  %v14316_v59 = vld [vmem:[#allocation102_spill] sm:$0xff]  ;;  %v6797_v47 = vsel %vm6791_vm1, %v6409_v44, %v12615_v56 }
 0x7d6   :  { %v6665_v1 = vmul.f32 -0.5, %v6543_v23  ;;  %v6860_v7 = vsel %vm6790_vm2, %v7319_v8, %v6796_v41  ;;  %v5913_v18 = vpop.f32.mrf.mxu1  ;;  %v3225_v46 = vadd.f32 %v14316_v59, %v14315_v28  ;;  %v6410_v39 = vadd.f32 %v13013_v58, %v4817_v3  ;;  %v14317_v8 = vld [vmem:[#allocation111_spill] sm:$0xff]  ;;  %v14320_v59 = vld [vmem:[#allocation113_spill] sm:$0xff] }
 0x7d7   :  { %v13104_v34 = vadd.f32 %v6189_v24, %v5886_v2  ;;  %6924 = vst [vmem:[#allocation5 + $0x20] sm:$0xff] %v6860_v7  ;;  %9220 = vpow2.f32 %v6110_v10  ;;  %v5914_v26 = vadd.f32 %v5913_v18, %v12460_v20  ;;  %6366 = vadd.xlane.f32.xlu1 %v5908_v50  ;;  %6612 = vadd.xlane.f32.xlu0 %v6508_v62  ;;  %v14319_v3 = vld [vmem:[#allocation103_spill] sm:$0xff] }
 0x7d8   :  { %v7320_v25 = vadd.f32 -14.703016, %v6665_v1  ;;  %v9215_v22 = vpop.eup %9214  ;;  %v13113_v63 = vpop.f32.mrf.mxu1  ;;  %v5892_v41 = vadd.f32 %v13029_v29, %v12508_v31  ;;  %v4818_v56 = vadd.f32 %v12595_v9, %v3225_v46  ;;  %v3226_v7 = vadd.f32 %v14319_v3, %v14318_v52  ;;  %v14323_v3 = vld [vmem:[#allocation46_spill] sm:$0xff] }
 0x7d9   :  { %v13115_v61 = vpop.xlane.xlu1 %6298  ;;  %v6190_v23 = vmul.f32 %v9215_v22, %v14317_v8  ;;  %v6112_v11 = vmul.f32 1.442695, %v5914_v26  ;;  %v6545_v24 = vpop.xlane.xlu0 %6544  ;;  %v6509_v44 = vmul.f32 %v13104_v34, %v13104_v34  ;;  %v6798_v18 = vsel %vm6791_vm1, %v6410_v39, %v12635_v16 }
 0x7da   :  { %v6861_v2 = vsel %vm6790_vm2, %v7320_v25, %v6797_v47  ;;  %v6666_v58 = vmul.f32 -0.5, %v6545_v24  ;;  %v5919_v50 = vpop.f32.mrf.mxu1  ;;  %v6411_v9 = vadd.f32 %v13031_v33, %v4818_v56  ;;  %v5898_v28 = vadd.f32 %v13050_v0, %v12508_v31  ;;  %v14321_v24 = vld [vmem:[#allocation40_spill] sm:$0xff] }
 0x7db   :  { %6925 = vst [vmem:[#allocation5 + $0x28] sm:$0xff] %v6861_v2  ;;  %v13125_v10 = vadd.f32 %v6190_v23, %v5892_v41  ;;  %9222 = vpow2.f32 %v6112_v11  ;;  %v5920_v29 = vadd.f32 %v5919_v50, %v12460_v20  ;;  %6614 = vadd.xlane.f32.xlu1 %v6509_v44  ;;  %6368 = vadd.xlane.f32.xlu0 %v5914_v26  ;;  %v14322_v56 = vld [vmem:[#allocation104_spill] sm:$0xff] }
 0x7dc   :  { %v9217_v1 = vpop.eup %9216  ;;  %v7321_v62 = vadd.f32 -14.703016, %v6666_v58  ;;  %v13134_v25 = vpop.f32.mrf.mxu1  ;;  %v4819_v23 = vadd.f32 %v12600_v40, %v3226_v7  ;;  %v3227_v58 = vadd.f32 %v14322_v56, %v14321_v24  ;;  %v6799_v40 = vsel %vm6791_vm1, %v6411_v9, %v12651_v60 }
 0x7dd   :  { %v6547_v22 = vpop.xlane.xlu1 %6546  ;;  %v6191_v46 = vmul.f32 %v9217_v1, %v14320_v59  ;;  %v6114_v47 = vmul.f32 1.442695, %v5920_v29  ;;  %v13139_v8 = vpop.xlane.xlu0 %6300  ;;  %v6510_v26 = vmul.f32 %v13125_v10, %v13125_v10  ;;  %v5904_v52 = vadd.f32 %v13071_v5, %v12508_v31 }
 0x7de   :  { %v6667_v41 = vmul.f32 -0.5, %v6547_v22  ;;  %v6862_v16 = vsel %vm6790_vm2, %v7321_v62, %v6798_v18  ;;  %v5925_v33 = vpop.f32.mrf.mxu1  ;;  %v6412_v50 = vadd.f32 %v13055_v15, %v4819_v23  ;;  %v4820_v60 = vadd.f32 %v12613_v32, %v3227_v58 }
 0x7df   :  { %v13146_v39 = vadd.f32 %v6191_v46, %v5898_v28  ;;  %6926 = vst [vmem:[#allocation5 + $0x30] sm:$0xff] %v6862_v16  ;;  %9224 = vpow2.f32 %v6114_v47  ;;  %v5926_v2 = vadd.f32 %v5925_v33, %v12460_v20  ;;  %6370 = vadd.xlane.f32.xlu1 %v5920_v29  ;;  %6616 = vadd.xlane.f32.xlu0 %v6510_v26  ;;  %v14324_v46 = vld [vmem:[#allocation41_spill] sm:$0xff]  ;;  %v14325_v47 = vld [vmem:[#allocation106_spill] sm:$0xff] }
 0x7e0   :  { %v7322_v0 = vadd.f32 -14.703016, %v6667_v41  ;;  %v9219_v11 = vpop.eup %9218  ;;  %v13155_v44 = vpop.f32.mrf.mxu1  ;;  %v3228_v41 = vadd.f32 %v14325_v47, %v14324_v46  ;;  %v6800_v23 = vsel %vm6791_vm1, %v6412_v50, %v12667_v37  ;;  %v6413_v32 = vadd.f32 %v13073_v30, %v4820_v60  ;;  %v14330_v47 = vld [vmem:[#allocation49_spill] sm:$0xff] }
 0x7e1   :  { %v13157_v1 = vpop.xlane.xlu1 %6302  ;;  %v6192_v7 = vmul.f32 %v9219_v11, %v14323_v3  ;;  %v6116_v62 = vmul.f32 1.442695, %v5926_v2  ;;  %v6549_v22 = vpop.xlane.xlu0 %6548  ;;  %v6511_v9 = vmul.f32 %v13146_v39, %v13146_v39  ;;  %v14326_v11 = vld [vmem:[#allocation116_spill] sm:$0xff]  ;;  %v5916_v46 = vadd.f32 %v13113_v63, %v12508_v31 }
 0x7e2   :  { %v6863_v18 = vsel %vm6790_vm2, %v7322_v0, %v6799_v40  ;;  %v6668_v15 = vmul.f32 -0.5, %v6549_v22  ;;  %v5931_v29 = vpop.f32.mrf.mxu1  ;;  %v5910_v0 = vadd.f32 %v13092_v57, %v12508_v31  ;;  %v14329_v22 = vld [vmem:[#allocation108_spill] sm:$0xff] }
 0x7e3   :  { %6927 = vst [vmem:[#allocation5 + $0x38] sm:$0xff] %v6863_v18  ;;  %v13167_v28 = vadd.f32 %v6192_v7, %v5904_v52  ;;  %9226 = vpow2.f32 %v6116_v62  ;;  %v5932_v5 = vadd.f32 %v5931_v29, %v12460_v20  ;;  %6618 = vadd.xlane.f32.xlu1 %v6511_v9  ;;  %6372 = vadd.xlane.f32.xlu0 %v5926_v2  ;;  %v14327_v52 = vld [vmem:[#allocation167_spill] sm:$0xff]  ;;  %v14328_v62 = vld [vmem:[#allocation42_spill] sm:$0xff] }
 0x7e4   :  { %v9221_v59 = vpop.eup %9220  ;;  %v7323_v16 = vadd.f32 -14.703016, %v6668_v15  ;;  %v13176_v33 = vpop.f32.mrf.mxu1  ;;  %v4821_v3 = vadd.f32 %v14327_v52, %v3228_v41  ;;  %v3229_v60 = vadd.f32 %v14329_v22, %v14328_v62  ;;  %v6801_v15 = vsel %vm6791_vm1, %v6413_v32, %v12683_v42  ;;  %v14334_v62 = vld [vmem:[#allocation119_spill] sm:$0xff] }
 0x7e5   :  { %v6551_v26 = vpop.xlane.xlu1 %6550  ;;  %v6193_v24 = vmul.f32 %v9221_v59, %v14326_v11  ;;  %v6118_v56 = vmul.f32 1.442695, %v5932_v5  ;;  %v13181_v40 = vpop.xlane.xlu0 %6304  ;;  %v6512_v2 = vmul.f32 %v13167_v28, %v13167_v28 }
 0x7e6   :  { %v6669_v58 = vmul.f32 -0.5, %v6551_v26  ;;  %v6864_v37 = vsel %vm6790_vm2, %v7323_v16, %v6800_v23  ;;  %v5937_v30 = vpop.f32.mrf.mxu1  ;;  %v6414_v29 = vadd.f32 %v13097_v36, %v4821_v3 }
 0x7e7   :  { %v13188_v50 = vadd.f32 %v6193_v24, %v5910_v0  ;;  %6928 = vst [vmem:[#allocation5 + $0x40] sm:$0xff] %v6864_v37  ;;  %9228 = vpow2.f32 %v6118_v56  ;;  %v5938_v7 = vadd.f32 %v5937_v30, %v12460_v20  ;;  %6374 = vadd.xlane.f32.xlu1 %v5932_v5  ;;  %6620 = vadd.xlane.f32.xlu0 %v6512_v2  ;;  %v14331_v0 = vld [vmem:[#allocation168_spill] sm:$0xff]  ;;  %v14332_v56 = vld [vmem:[#allocation43_spill] sm:$0xff] }
 0x7e8   :  { %v7324_v57 = vadd.f32 -14.703016, %v6669_v58  ;;  %v9223_v18 = vpop.eup %9222  ;;  %v13197_v9 = vpop.f32.mrf.mxu1  ;;  %v4822_v42 = vadd.f32 %v14331_v0, %v3229_v60  ;;  %v14333_v58 = vld [vmem:[#allocation110_spill] sm:$0xff]  ;;  %v6802_v3 = vsel %vm6791_vm1, %v6414_v29, %v12697_v49  ;;  %v14337_v0 = vld [vmem:[#allocation112_spill] sm:$0xff] }
 0x7e9   :  { %v13199_v59 = vpop.xlane.xlu1 %6306  ;;  %v6194_v41 = vmul.f32 %v9223_v18, %v14330_v47  ;;  %v6120_v16 = vmul.f32 1.442695, %v5938_v7  ;;  %v6553_v26 = vpop.xlane.xlu0 %6552  ;;  %v6513_v32 = vmul.f32 %v13188_v50, %v13188_v50  ;;  %v3230_v52 = vadd.f32 %v14333_v58, %v14332_v56  ;;  %v14335_v47 = vld [vmem:[#allocation169_spill] sm:$0xff] }
 0x7ea   :  { %v6865_v23 = vsel %vm6790_vm2, %v7324_v57, %v6801_v15  ;;  %v6670_v36 = vmul.f32 -0.5, %v6553_v26  ;;  %v5943_v5 = vpop.f32.mrf.mxu1  ;;  %v6415_v37 = vadd.f32 %v13115_v61, %v4822_v42  ;;  %v5922_v18 = vadd.f32 %v13134_v25, %v12508_v31  ;;  %v14336_v26 = vld [vmem:[#allocation44_spill] sm:$0xff]  ;;  %v14338_v58 = vld [vmem:[#allocation121_spill] sm:$0xff] }
 0x7eb   :  { %6929 = vst [vmem:[#allocation5 + $0x48] sm:$0xff] %v6865_v23  ;;  %v13209_v11 = vadd.f32 %v6194_v41, %v5916_v46  ;;  %9230 = vpow2.f32 %v6120_v16  ;;  %v5944_v63 = vadd.f32 %v5943_v5, %v12460_v20  ;;  %6622 = vadd.xlane.f32.xlu1 %v6513_v32  ;;  %6376 = vadd.xlane.f32.xlu0 %v5938_v7 }
 0x7ec   :  { %v9225_v24 = vpop.eup %9224  ;;  %v7325_v30 = vadd.f32 -14.703016, %v6670_v36  ;;  %v13218_v2 = vpop.f32.mrf.mxu1  ;;  %v4823_v41 = vadd.f32 %v14335_v47, %v3230_v52  ;;  %v3231_v42 = vadd.f32 %v14337_v0, %v14336_v26  ;;  %v6803_v36 = vsel %vm6791_vm1, %v6415_v37, %v12709_v6  ;;  %v14342_v26 = vld [vmem:[#allocation24_spill] sm:$0xff] }
 0x7ed   :  { %v6555_v57 = vpop.xlane.xlu1 %6554  ;;  %v6195_v22 = vmul.f32 %v9225_v24, %v14334_v62  ;;  %v6122_v60 = vmul.f32 1.442695, %v5944_v63  ;;  %v13223_v46 = vpop.xlane.xlu0 %6308  ;;  %v6514_v7 = vmul.f32 %v13209_v11, %v13209_v11  ;;  %v5928_v56 = vadd.f32 %v13155_v44, %v12508_v31 }
 0x7ee   :  { %v6671_v15 = vmul.f32 -0.5, %v6555_v57  ;;  %v6866_v49 = vsel %vm6790_vm2, %v7325_v30, %v6802_v3  ;;  %v5949_v61 = vpop.f32.mrf.mxu1  ;;  %v6416_v5 = vadd.f32 %v13139_v8, %v4823_v41 }
 0x7ef   :  { %v13230_v29 = vadd.f32 %v6195_v22, %v5922_v18  ;;  %6930 = vst [vmem:[#allocation5 + $0x50] sm:$0xff] %v6866_v49  ;;  %9232 = vpow2.f32 %v6122_v60  ;;  %v5950_v23 = vadd.f32 %v5949_v61, %v12460_v20  ;;  %6378 = vadd.xlane.f32.xlu1 %v5944_v63  ;;  %6624 = vadd.xlane.f32.xlu0 %v6514_v7  ;;  %v14339_v18 = vld [vmem:[#allocation170_spill] sm:$0xff]  ;;  %v14340_v60 = vld [vmem:[#allocation45_spill] sm:$0xff] }
 0x7f0   :  { %v7326_v25 = vadd.f32 -14.703016, %v6671_v15  ;;  %v9227_v16 = vpop.eup %9226  ;;  %v13239_v32 = vpop.f32.mrf.mxu1  ;;  %v4824_v6 = vadd.f32 %v14339_v18, %v3231_v42  ;;  %v14341_v15 = vld [vmem:[#allocation114_spill] sm:$0xff]  ;;  %v6804_v41 = vsel %vm6791_vm1, %v6416_v5, %v12721_v13  ;;  %v14345_v18 = vld [vmem:[#allocation115_spill] sm:$0xff] }
 0x7f1   :  { %v13241_v24 = vpop.xlane.xlu1 %6310  ;;  %v6196_v52 = vmul.f32 %v9227_v16, %v14338_v58  ;;  %v6124_v30 = vmul.f32 1.442695, %v5950_v23  ;;  %v6557_v57 = vpop.xlane.xlu0 %6556  ;;  %v6515_v37 = vmul.f32 %v13230_v29, %v13230_v29  ;;  %v3232_v47 = vadd.f32 %v14341_v15, %v14340_v60  ;;  %v14343_v58 = vld [vmem:[#allocation171_spill] sm:$0xff]  ;;  %v14346_v15 = vld [vmem:[#allocation53_spill] sm:$0xff] }
 0x7f2   :  { %v6867_v3 = vsel %vm6790_vm2, %v7326_v25, %v6803_v36  ;;  %v6672_v8 = vmul.f32 -0.5, %v6557_v57  ;;  %v5955_v63 = vpop.f32.mrf.mxu1  ;;  %v6417_v49 = vadd.f32 %v13157_v1, %v4824_v6  ;;  %v5934_v16 = vadd.f32 %v13176_v33, %v12508_v31  ;;  %v14344_v57 = vld [vmem:[#allocation47_spill] sm:$0xff] }
 0x7f3   :  { %6931 = vst [vmem:[#allocation5 + $0x58] sm:$0xff] %v6867_v3  ;;  %v13251_v62 = vadd.f32 %v6196_v52, %v5928_v56  ;;  %9234 = vpow2.f32 %v6124_v30  ;;  %v5956_v44 = vadd.f32 %v5955_v63, %v12460_v20  ;;  %6626 = vadd.xlane.f32.xlu1 %v6515_v37  ;;  %6380 = vadd.xlane.f32.xlu0 %v5950_v23 }
 0x7f4   :  { %v9229_v22 = vpop.eup %9228  ;;  %v7327_v61 = vadd.f32 -14.703016, %v6672_v8  ;;  %v13260_v7 = vpop.f32.mrf.mxu1  ;;  %v4825_v52 = vadd.f32 %v14343_v58, %v3232_v47  ;;  %v3233_v6 = vadd.f32 %v14345_v18, %v14344_v57  ;;  %v6805_v8 = vsel %vm6791_vm1, %v6417_v49, %v12733_v53  ;;  %v14350_v57 = vld [vmem:[#allocation55_spill] sm:$0xff] }
 0x7f5   :  { %v6559_v25 = vpop.xlane.xlu1 %6558  ;;  %v6197_v0 = vmul.f32 %v9229_v22, %v14342_v26  ;;  %v6126_v42 = vmul.f32 1.442695, %v5956_v44  ;;  %v13265_v56 = vpop.xlane.xlu0 %6312  ;;  %v6516_v23 = vmul.f32 %v13251_v62, %v13251_v62  ;;  %v5940_v60 = vadd.f32 %v13197_v9, %v12508_v31 }
 0x7f6   :  { %v6673_v36 = vmul.f32 -0.5, %v6559_v25  ;;  %v6868_v13 = vsel %vm6790_vm2, %v7327_v61, %v6804_v41  ;;  %v5961_v1 = vpop.f32.mrf.mxu1  ;;  %v6418_v63 = vadd.f32 %v13181_v40, %v4825_v52 }
 0x7f7   :  { %v13272_v5 = vadd.f32 %v6197_v0, %v5934_v16  ;;  %6932 = vst [vmem:[#allocation5 + $0x60] sm:$0xff] %v6868_v13  ;;  %9236 = vpow2.f32 %v6126_v42  ;;  %v5962_v3 = vadd.f32 %v5961_v1, %v12460_v20  ;;  %6382 = vadd.xlane.f32.xlu1 %v5956_v44  ;;  %6628 = vadd.xlane.f32.xlu0 %v6516_v23  ;;  %v14347_v16 = vld [vmem:[#allocation172_spill] sm:$0xff]  ;;  %v14348_v42 = vld [vmem:[#allocation23_spill] sm:$0xff] }
 0x7f8   :  { %v7328_v33 = vadd.f32 -14.703016, %v6673_v36  ;;  %v9231_v30 = vpop.eup %9230  ;;  %v13281_v37 = vpop.f32.mrf.mxu1  ;;  %v4826_v53 = vadd.f32 %v14347_v16, %v3233_v6  ;;  %v14349_v36 = vld [vmem:[#allocation117_spill] sm:$0xff]  ;;  %v6806_v52 = vsel %vm6791_vm1, %v6418_v63, %v12744_v17  ;;  %v14353_v16 = vld [vmem:[#allocation118_spill] sm:$0xff] }
 0x7f9   :  { %v13283_v22 = vpop.xlane.xlu1 %6314  ;;  %v6198_v47 = vmul.f32 %v9231_v30, %v14346_v15  ;;  %v6128_v61 = vmul.f32 1.442695, %v5962_v3  ;;  %v6561_v25 = vpop.xlane.xlu0 %6560  ;;  %v6517_v49 = vmul.f32 %v13272_v5, %v13272_v5  ;;  %v3234_v58 = vadd.f32 %v14349_v36, %v14348_v42  ;;  %v14351_v15 = vld [vmem:[#allocation173_spill] sm:$0xff] }
 0x7fa   :  { %v6869_v41 = vsel %vm6790_vm2, %v7328_v33, %v6805_v8  ;;  %v6674_v40 = vmul.f32 -0.5, %v6561_v25  ;;  %v5967_v44 = vpop.f32.mrf.mxu1  ;;  %v6419_v13 = vadd.f32 %v13199_v59, %v4826_v53  ;;  %v5946_v30 = vadd.f32 %v13218_v2, %v12508_v31  ;;  %v14352_v25 = vld [vmem:[#allocation51_spill] sm:$0xff]  ;;  %v14354_v36 = vld [vmem:[#allocation57_spill] sm:$0xff] }
 0x7fb   :  { %6933 = vst [vmem:[#allocation5 + $0x68] sm:$0xff] %v6869_v41  ;;  %v13293_v26 = vadd.f32 %v6198_v47, %v5940_v60  ;;  %9238 = vpow2.f32 %v6128_v61  ;;  %v5968_v9 = vadd.f32 %v5967_v44, %v12460_v20  ;;  %6630 = vadd.xlane.f32.xlu1 %v6517_v49  ;;  %6384 = vadd.xlane.f32.xlu0 %v5962_v3 }
 0x7fc   :  { %v9233_v0 = vpop.eup %9232  ;;  %v7329_v1 = vadd.f32 -14.703016, %v6674_v40  ;;  %v13302_v23 = vpop.f32.mrf.mxu1  ;;  %v4827_v47 = vadd.f32 %v14351_v15, %v3234_v58  ;;  %v3235_v53 = vadd.f32 %v14353_v16, %v14352_v25  ;;  %v6807_v40 = vsel %vm6791_vm1, %v6419_v13, %v12755_v38  ;;  %v14358_v25 = vld [vmem:[#allocation59_spill] sm:$0xff] }
 0x7fd   :  { %v6563_v33 = vpop.xlane.xlu1 %6562  ;;  %v6199_v18 = vmul.f32 %v9233_v0, %v14350_v57  ;;  %v6130_v6 = vmul.f32 1.442695, %v5968_v9  ;;  %v13307_v60 = vpop.xlane.xlu0 %6316  ;;  %v6518_v3 = vmul.f32 %v13293_v26, %v13293_v26  ;;  %v5952_v42 = vadd.f32 %v13239_v32, %v12508_v31 }
 0x7fe   :  { %v6675_v8 = vmul.f32 -0.5, %v6563_v33  ;;  %v6870_v17 = vsel %vm6790_vm2, %v7329_v1, %v6806_v52  ;;  %v5973_v59 = vpop.f32.mrf.mxu1  ;;  %v6420_v44 = vadd.f32 %v13223_v46, %v4827_v47 }
 0x7ff   :  { %v13314_v63 = vadd.f32 %v6199_v18, %v5946_v30  ;;  %6934 = vst [vmem:[#allocation5 + $0x70] sm:$0xff] %v6870_v17  ;;  %9240 = vpow2.f32 %v6130_v6  ;;  %v5974_v41 = vadd.f32 %v5973_v59, %v12460_v20  ;;  %6386 = vadd.xlane.f32.xlu1 %v5968_v9  ;;  %6632 = vadd.xlane.f32.xlu0 %v6518_v3  ;;  %v14355_v30 = vld [vmem:[#allocation174_spill] sm:$0xff]  ;;  %v14356_v6 = vld [vmem:[#allocation56_spill] sm:$0xff] }
 0x800   :  { %v7330_v2 = vadd.f32 -14.703016, %v6675_v8  ;;  %v9235_v61 = vpop.eup %9234  ;;  %v13323_v49 = vpop.f32.mrf.mxu1  ;;  %v4828_v38 = vadd.f32 %v14355_v30, %v3235_v53  ;;  %v14357_v8 = vld [vmem:[#allocation120_spill] sm:$0xff]  ;;  %v6808_v47 = vsel %vm6791_vm1, %v6420_v44, %v12766_v21  ;;  %v14361_v30 = vld [vmem:[#allocation122_spill] sm:$0xff] }
 0x801   :  { %v13325_v0 = vpop.xlane.xlu1 %6318  ;;  %v6200_v58 = vmul.f32 %v9235_v61, %v14354_v36  ;;  %v6132_v1 = vmul.f32 1.442695, %v5974_v41  ;;  %v6565_v33 = vpop.xlane.xlu0 %6564  ;;  %v6519_v13 = vmul.f32 %v13314_v63, %v13314_v63  ;;  %v3236_v15 = vadd.f32 %v14357_v8, %v14356_v6  ;;  %v14359_v36 = vld [vmem:[#allocation175_spill] sm:$0xff] }
 0x802   :  { %v6871_v52 = vsel %vm6790_vm2, %v7330_v2, %v6807_v40  ;;  %v6676_v46 = vmul.f32 -0.5, %v6565_v33  ;;  %v5979_v9 = vpop.f32.mrf.mxu1  ;;  %v6421_v17 = vadd.f32 %v13241_v24, %v4828_v38  ;;  %v5958_v61 = vadd.f32 %v13260_v7, %v12508_v31  ;;  %v14360_v33 = vld [vmem:[#allocation58_spill] sm:$0xff] }
 0x803   :  { %6935 = vst [vmem:[#allocation5 + $0x78] sm:$0xff] %v6871_v52  ;;  %v13335_v57 = vadd.f32 %v6200_v58, %v5952_v42  ;;  %9242 = vpow2.f32 %v6132_v1  ;;  %v5980_v32 = vadd.f32 %v5979_v9, %v12460_v20  ;;  %6634 = vadd.xlane.f32.xlu1 %v6519_v13  ;;  %6388 = vadd.xlane.f32.xlu0 %v5974_v41 }
 0x804   :  { %v9237_v18 = vpop.eup %9236  ;;  %v7331_v59 = vadd.f32 -14.703016, %v6676_v46  ;;  %v13344_v3 = vpop.f32.mrf.mxu1  ;;  %v4829_v58 = vadd.f32 %v14359_v36, %v3236_v15  ;;  %v3237_v38 = vadd.f32 %v14361_v30, %v14360_v33  ;;  %v14362_v46 = vld [vmem:[#allocation191_spill] sm:$0xff]  ;;  %v5964_v8 = vadd.f32 %v13281_v37, %v12508_v31  ;;  %v14363_v15 = vld [vmem:[#allocation61_spill] sm:$0xff] }
 0x805   :  { %v6567_v2 = vpop.xlane.xlu1 %6566  ;;  %v6201_v16 = vmul.f32 %v9237_v18, %v14358_v25  ;;  %v6134_v53 = vmul.f32 1.442695, %v5980_v32  ;;  %v13349_v42 = vpop.xlane.xlu0 %6320  ;;  %v6520_v41 = vmul.f32 %v13335_v57, %v13335_v57  ;;  %v6809_v9 = vsel %vm6791_vm1, %v6421_v17, %v14362_v46  ;;  %v14364_v25 = vld [vmem:[#allocation176_spill] sm:$0xff]  ;;  %v14365_v36 = vld [vmem:[#allocation63_spill] sm:$0xff]  ;;  %v14368_v46 = vld [vmem:[#allocation25_spill] sm:$0xff] }
 0x806   :  { %v6677_v40 = vmul.f32 -0.5, %v6567_v2  ;;  %v6872_v21 = vsel %vm6790_vm2, %v7331_v59, %v6808_v47  ;;  %v5985_v24 = vpop.f32.mrf.mxu1  ;;  %v6422_v13 = vadd.f32 %v13265_v56, %v4829_v58  ;;  %v4830_v17 = vadd.f32 %v14364_v25, %v3237_v38  ;;  %v14366_v58 = vld [vmem:[#allocation123_spill] sm:$0xff] }
 0x807   :  { %v13356_v44 = vadd.f32 %v6201_v16, %v5958_v61  ;;  %6936 = vst [vmem:[#allocation5 + $0x80] sm:$0xff] %v6872_v21  ;;  %9244 = vpow2.f32 %v6134_v53  ;;  %v5986_v52 = vadd.f32 %v5985_v24, %v12460_v20  ;;  %6390 = vadd.xlane.f32.xlu1 %v5980_v32  ;;  %6636 = vadd.xlane.f32.xlu0 %v6520_v41  ;;  %v14367_v24 = vld [vmem:[#allocation194_spill] sm:$0xff] }
 0x808   :  { %v7332_v7 = vadd.f32 -14.703016, %v6677_v40  ;;  %v9239_v1 = vpop.eup %9238  ;;  %v13365_v18 = vpop.f32.mrf.mxu1  ;;  %v3238_v21 = vadd.f32 %v14366_v58, %v14365_v36  ;;  %v6810_v41 = vsel %vm6791_vm1, %v6422_v13, %v14367_v24  ;;  %v5970_v38 = vadd.f32 %v13302_v23, %v12508_v31 }
 0x809   :  { %v13367_v6 = vpop.xlane.xlu1 %6322  ;;  %v6202_v47 = vmul.f32 %v9239_v1, %v14363_v15  ;;  %v6136_v2 = vmul.f32 1.442695, %v5986_v52  ;;  %v6569_v61 = vpop.xlane.xlu0 %6568  ;;  %v6521_v16 = vmul.f32 %v13356_v44, %v13356_v44 }
 0x80a   :  { %v6873_v59 = vsel %vm6790_vm2, %v7332_v7, %v6809_v9  ;;  %v6678_v56 = vmul.f32 -0.5, %v6569_v61  ;;  %v5991_v32 = vpop.f32.mrf.mxu1  ;;  %v6423_v7 = vadd.f32 %v13283_v22, %v4830_v17 }
 0x80b   :  { %6937 = vst [vmem:[#allocation5 + $0x88] sm:$0xff] %v6873_v59  ;;  %v13377_v53 = vadd.f32 %v6202_v47, %v5964_v8  ;;  %9246 = vpow2.f32 %v6136_v2  ;;  %v5992_v37 = vadd.f32 %v5991_v32, %v12460_v20  ;;  %6638 = vadd.xlane.f32.xlu1 %v6521_v16  ;;  %6392 = vadd.xlane.f32.xlu0 %v5986_v52  ;;  %v14369_v59 = vld [vmem:[#allocation177_spill] sm:$0xff]  ;;  %v14371_v32 = vld [vmem:[#allocation124_spill] sm:$0xff] }
 0x80c   :  { %v9241_v40 = vpop.eup %9240  ;;  %v7333_v1 = vadd.f32 -14.703016, %v6678_v56  ;;  %v13386_v33 = vpop.f32.mrf.mxu1  ;;  %v4831_v2 = vadd.f32 %v14369_v59, %v3238_v21  ;;  %v14370_v56 = vld [vmem:[#allocation64_spill] sm:$0xff] }
 0x80d   :  { %v6571_v30 = vpop.xlane.xlu1 %6570  ;;  %v6203_v9 = vmul.f32 %v9241_v40, %v14368_v46  ;;  %v6138_v8 = vmul.f32 1.442695, %v5992_v37  ;;  %v13391_v47 = vpop.xlane.xlu0 %6324  ;;  %v6522_v52 = vmul.f32 %v13377_v53, %v13377_v53  ;;  %v3239_v16 = vadd.f32 %v14371_v32, %v14370_v56  ;;  %v14372_v40 = vld [vmem:[#allocation196_spill] sm:$0xff] }
 0x80e   :  { %v6679_v15 = vmul.f32 -0.5, %v6571_v30  ;;  %v6874_v22 = vsel %vm6790_vm2, %v7333_v1, %v6810_v41  ;;  %v5997_v13 = vpop.f32.mrf.mxu1  ;;  %v6811_v36 = vsel %vm6791_vm1, %v6423_v7, %v14372_v40  ;;  %v6424_v58 = vadd.f32 %v13307_v60, %v4831_v2  ;;  %v14373_v1 = vld [vmem:[#allocation26_spill] sm:$0xff] }
 0x80f   :  { %v13398_v61 = vadd.f32 %v6203_v9, %v5970_v38  ;;  %6938 = vst [vmem:[#allocation5 + $0x90] sm:$0xff] %v6874_v22  ;;  %9248 = vpow2.f32 %v6138_v8  ;;  %v5998_v25 = vadd.f32 %v5997_v13, %v12460_v20  ;;  %6394 = vadd.xlane.f32.xlu1 %v5992_v37  ;;  %6640 = vadd.xlane.f32.xlu0 %v6522_v52  ;;  %v14374_v8 = vld [vmem:[#allocation178_spill] sm:$0xff]  ;;  %v14375_v22 = vld [vmem:[#allocation67_spill] sm:$0xff]  ;;  %v14376_v13 = vld [vmem:[#allocation125_spill] sm:$0xff] }
 0x810   :  { %v7334_v23 = vadd.f32 -14.703016, %v6679_v15  ;;  %v9243_v17 = vpop.eup %9242  ;;  %v13407_v21 = vpop.f32.mrf.mxu1  ;;  %v5976_v41 = vadd.f32 %v13323_v49, %v12508_v31  ;;  %v4832_v7 = vadd.f32 %v14374_v8, %v3239_v16  ;;  %v3240_v52 = vadd.f32 %v14376_v13, %v14375_v22 }
 0x811   :  { %v13409_v24 = vpop.xlane.xlu1 %6326  ;;  %v6204_v30 = vmul.f32 %v9243_v17, %v14373_v1  ;;  %v6140_v46 = vmul.f32 1.442695, %v5998_v25  ;;  %v6573_v9 = vpop.xlane.xlu0 %6572  ;;  %v6523_v15 = vmul.f32 %v13398_v61, %v13398_v61 }
 0x812   :  { %v6875_v38 = vsel %vm6790_vm2, %v7334_v23, %v6811_v36  ;;  %v6680_v60 = vmul.f32 -0.5, %v6573_v9  ;;  %v6003_v37 = vpop.f32.mrf.mxu1  ;;  %v14377_v23 = vld [vmem:[#allocation198_spill] sm:$0xff]  ;;  %v6425_v56 = vadd.f32 %v13325_v0, %v4832_v7  ;;  %v5982_v36 = vadd.f32 %v13344_v3, %v12508_v31  ;;  %v14379_v9 = vld [vmem:[#allocation179_spill] sm:$0xff] }
 0x813   :  { %6939 = vst [vmem:[#allocation5 + $0x98] sm:$0xff] %v6875_v38  ;;  %v13419_v59 = vadd.f32 %v6204_v30, %v5976_v41  ;;  %9250 = vpow2.f32 %v6140_v46  ;;  %v6004_v49 = vadd.f32 %v6003_v37, %v12460_v20  ;;  %v6812_v17 = vsel %vm6791_vm1, %v6424_v58, %v14377_v23  ;;  %6642 = vadd.xlane.f32.xlu1 %v6523_v15  ;;  %v14378_v41 = vld [vmem:[#allocation27_spill] sm:$0xff]  ;;  %v14380_v15 = vld [vmem:[#allocation68_spill] sm:$0xff] }
 0x814   :  { %v9245_v2 = vpop.eup %9244  ;;  %v7335_v32 = vadd.f32 -14.703016, %v6680_v60  ;;  %6396 = vadd.xlane.f32.xlu0 %v5998_v25  ;;  %v13428_v16 = vpop.f32.mrf.mxu1  ;;  %v4833_v8 = vadd.f32 %v14379_v9, %v3240_v52  ;;  %v6813_v13 = vsel %vm6791_vm1, %v6425_v56, %v12821_v55 }
 0x815   :  { %v6575_v40 = vpop.xlane.xlu1 %6574  ;;  %v6205_v1 = vmul.f32 %v9245_v2, %v14378_v41  ;;  %v6142_v30 = vmul.f32 1.442695, %v6004_v49  ;;  %v13433_v46 = vpop.xlane.xlu0 %6328  ;;  %v6524_v25 = vmul.f32 %v13419_v59, %v13419_v59  ;;  %v14381_v2 = vld [vmem:[#allocation126_spill] sm:$0xff] }
 0x816   :  { %v6681_v38 = vmul.f32 -0.5, %v6575_v40  ;;  %v6876_v0 = vsel %vm6790_vm2, %v7335_v32, %v6812_v17  ;;  %v6009_v58 = vpop.f32.mrf.mxu1  ;;  %v3241_v22 = vadd.f32 %v14381_v2, %v14380_v15  ;;  %v6426_v52 = vadd.f32 %v13349_v42, %v4833_v8  ;;  %v14382_v40 = vld [vmem:[#allocation28_spill] sm:$0xff] }
 0x817   :  { %v13440_v7 = vadd.f32 %v6205_v1, %v5982_v36  ;;  %6940 = vst [vmem:[#allocation5 + $0xa0] sm:$0xff] %v6876_v0  ;;  %9252 = vpow2.f32 %v6142_v30  ;;  %v6010_v60 = vadd.f32 %v6009_v58, %v12460_v20  ;;  %6398 = vadd.xlane.f32.xlu1 %v6004_v49  ;;  %v5988_v32 = vadd.f32 %v13365_v18, %v12508_v31  ;;  %v14384_v0 = vld [vmem:[#allocation71_spill] sm:$0xff] }
 0x818   :  { %v7336_v3 = vadd.f32 -14.703016, %v6681_v38  ;;  %v9247_v37 = vpop.eup %9246  ;;  %6644 = vadd.xlane.f32.xlu0 %v6524_v25  ;;  %v13449_v23 = vpop.f32.mrf.mxu1  ;;  %v14383_v38 = vld [vmem:[#allocation180_spill] sm:$0xff]  ;;  %v14385_v58 = vld [vmem:[#allocation127_spill] sm:$0xff] }
 0x819   :  { %v13451_v17 = vpop.xlane.xlu1 %6330  ;;  %v6206_v36 = vmul.f32 %v9247_v37, %v14382_v40  ;;  %v6144_v1 = vmul.f32 1.442695, %v6010_v60  ;;  %v6577_v30 = vpop.xlane.xlu0 %6576  ;;  %v4834_v55 = vadd.f32 %v14383_v38, %v3241_v22  ;;  %v6525_v56 = vmul.f32 %v13440_v7, %v13440_v7  ;;  %v14389_v38 = vld [vmem:[#allocation128_spill] sm:$0xff] }
 0x81a   :  { %v6877_v41 = vsel %vm6790_vm2, %v7336_v3, %v6813_v13  ;;  %v6682_v42 = vmul.f32 -0.5, %v6577_v30  ;;  %v6015_v49 = vpop.f32.mrf.mxu1  ;;  %v3242_v25 = vadd.f32 %v14385_v58, %v14384_v0  ;;  %v6814_v3 = vsel %vm6791_vm1, %v6426_v52, %v12832_v35  ;;  %v14386_v13 = vld [vmem:[#allocation29_spill] sm:$0xff]  ;;  %v14388_v30 = vld [vmem:[#allocation72_spill] sm:$0xff]  ;;  %v14390_v0 = vld [vmem:[#allocation30_spill] sm:$0xff] }
 0x81b   :  { %6941 = vst [vmem:[#allocation5 + $0xa8] sm:$0xff] %v6877_v41  ;;  %v13461_v9 = vadd.f32 %v6206_v36, %v5988_v32  ;;  %9254 = vpow2.f32 %v6144_v1  ;;  %v6016_v18 = vadd.f32 %v6015_v49, %v12460_v20  ;;  %v6427_v37 = vadd.f32 %v13367_v6, %v4834_v55  ;;  %6646 = vadd.xlane.f32.xlu1 %v6525_v56  ;;  %v14387_v41 = vld [vmem:[#allocation181_spill] sm:$0xff] }
 0x81c   :  { %v9249_v8 = vpop.eup %9248  ;;  %v7337_v15 = vadd.f32 -14.703016, %v6682_v42  ;;  %6400 = vadd.xlane.f32.xlu0 %v6010_v60  ;;  %v5994_v22 = vadd.f32 %v13386_v33, %v12508_v31  ;;  %v4835_v1 = vadd.f32 %v14387_v41, %v3242_v25  ;;  %v3243_v55 = vadd.f32 %v14389_v38, %v14388_v30  ;;  %v14395_v38 = vld [vmem:[#allocation183_spill] sm:$0xff] }
 0x81d   :  { %v6579_v2 = vpop.xlane.xlu1 %6578  ;;  %v6207_v32 = vmul.f32 %v9249_v8, %v14386_v13  ;;  %v6146_v20 = vmul.f32 1.442695, %v6016_v18  ;;  %v13473_v36 = vpop.xlane.xlu0 %6332  ;;  %v6526_v6 = vmul.f32 %v13461_v9, %v13461_v9  ;;  %v6815_v42 = vsel %vm6791_vm1, %v6427_v37, %v12843_v27  ;;  %v14393_v13 = vld [vmem:[#allocation129_spill] sm:$0xff] }
 0x81e   :  { %v6683_v40 = vmul.f32 -0.5, %v6579_v2  ;;  %v6878_v35 = vsel %vm6790_vm2, %v7337_v15, %v6814_v3  ;;  %v6428_v49 = vadd.f32 %v13391_v47, %v4835_v1  ;;  %v6000_v8 = vadd.f32 %v13407_v21, %v12508_v31  ;;  %v14391_v2 = vld [vmem:[#allocation182_spill] sm:$0xff] }
 0x81f   :  { %v13480_v52 = vadd.f32 %v6207_v32, %v5994_v22  ;;  %6942 = vst [vmem:[#allocation5 + $0xb0] sm:$0xff] %v6878_v35  ;;  %9256 = vpow2.f32 %v6146_v20  ;;  %6402 = vadd.xlane.f32.xlu1 %v6016_v18  ;;  %v4836_v27 = vadd.f32 %v14391_v2, %v3243_v55  ;;  %v14392_v22 = vld [vmem:[#allocation75_spill] sm:$0xff]  ;;  %v6006_v1 = vadd.f32 %v13428_v16, %v12508_v31  ;;  %v14396_v16 = vld [vmem:[#allocation76_spill] sm:$0xff] }
 0x820   :  { %v7338_v60 = vadd.f32 -14.703016, %v6683_v40  ;;  %v9251_v33 = vpop.eup %9250  ;;  %6648 = vadd.xlane.f32.xlu0 %v6526_v6  ;;  %v3244_v32 = vadd.f32 %v14393_v13, %v14392_v22  ;;  %v6816_v21 = vsel %vm6791_vm1, %v6428_v49, %v12854_v48  ;;  %v14394_v35 = vld [vmem:[#allocation31_spill] sm:$0xff]  ;;  %v14398_v2 = vld [vmem:[#allocation32_spill] sm:$0xff] }
 0x821   :  { %v13488_v56 = vpop.xlane.xlu1 %6334  ;;  %v6208_v58 = vmul.f32 %v9251_v33, %v14390_v0  ;;  %v6581_v3 = vpop.xlane.xlu0 %6580  ;;  %v6527_v15 = vmul.f32 %v13480_v52, %v13480_v52  ;;  %v6429_v20 = vadd.f32 %v13409_v24, %v4836_v27  ;;  %v14399_v13 = vld [vmem:[#allocation184_spill] sm:$0xff] }
 0x822   :  { %v6879_v25 = vsel %vm6790_vm2, %v7338_v60, %v6815_v42  ;;  %v6684_v47 = vmul.f32 -0.5, %v6581_v3  ;;  %v4837_v55 = vadd.f32 %v14395_v38, %v3244_v32 }
 0x823   :  { %6943 = vst [vmem:[#allocation5 + $0xb8] sm:$0xff] %v6879_v25  ;;  %v13498_v18 = vadd.f32 %v6208_v58, %v6000_v8  ;;  %6650 = vadd.xlane.f32.xlu1 %v6527_v15  ;;  %v14397_v8 = vld [vmem:[#allocation130_spill] sm:$0xff]  ;;  %v6817_v58 = vsel %vm6791_vm1, %v6429_v20, %v12865_v14  ;;  %v6012_v15 = vadd.f32 %v13449_v23, %v12508_v31  ;;  %v14401_v23 = vld [vmem:[#allocation131_spill] sm:$0xff] }
 0x824   :  { %v9253_v37 = vpop.eup %9252  ;;  %v7339_v40 = vadd.f32 -14.703016, %v6684_v47  ;;  %v3245_v0 = vadd.f32 %v14397_v8, %v14396_v16  ;;  %v6430_v25 = vadd.f32 %v13433_v46, %v4837_v55  ;;  %v14403_v55 = vld [vmem:[#allocation33_spill] sm:$0xff] }
 0x825   :  { %v6583_v41 = vpop.xlane.xlu1 %6582  ;;  %v6209_v6 = vmul.f32 %v9253_v37, %v14394_v35  ;;  %v13509_v33 = vpop.xlane.xlu0 %6336  ;;  %v6528_v30 = vmul.f32 %v13498_v18, %v13498_v18 }
 0x826   :  { %v6685_v60 = vmul.f32 -0.5, %v6583_v41  ;;  %v6880_v48 = vsel %vm6790_vm2, %v7339_v40, %v6816_v21  ;;  %v4838_v32 = vadd.f32 %v14399_v13, %v3245_v0  ;;  %v6017_v21 = vpop.f32.mrf.mxu1  ;;  %v14400_v40 = vld [vmem:[#allocation79_spill] sm:$0xff]  ;;  %v14404_v0 = vld [vmem:[#allocation185_spill] sm:$0xff] }
 0x827   :  { %v13516_v24 = vadd.f32 %v6209_v6, %v6006_v1  ;;  %6944 = vst [vmem:[#allocation5 + $0xc0] sm:$0xff] %v6880_v48  ;;  %6652 = vadd.xlane.f32.xlu0 %v6528_v30  ;;  %v3246_v41 = vadd.f32 %v14401_v23, %v14400_v40  ;;  %v14402_v1 = vld [vmem:[#allocation209_spill] sm:$0xff]  ;;  %v6018_v38 = vadd.f32 %v6017_v21, %v12508_v31 }
 0x828   :  { %v7340_v42 = vadd.f32 -14.703016, %v6685_v60  ;;  %v9255_v49 = vpop.eup %9254  ;;  %v6818_v35 = vsel %vm6791_vm1, %v6430_v25, %v14402_v1  ;;  %v6431_v6 = vadd.f32 %v13451_v17, %v4838_v32  ;;  %v14405_v25 = vld [vmem:[#allocation80_spill] sm:$0xff] }
 0x829   :  { %v13524_v3 = vpop.xlane.xlu1 %6338  ;;  %v6210_v27 = vmul.f32 %v9255_v49, %v14398_v2  ;;  %v6585_v37 = vpop.xlane.xlu0 %6584  ;;  %v6529_v22 = vmul.f32 %v13516_v24, %v13516_v24  ;;  %v14406_v2 = vld [vmem:[#allocation132_spill] sm:$0xff] }
 0x82a   :  { %v6881_v47 = vsel %vm6790_vm2, %v7340_v42, %v6817_v58  ;;  %v6686_v14 = vmul.f32 -0.5, %v6585_v37  ;;  %v4839_v58 = vadd.f32 %v14404_v0, %v3246_v41  ;;  %v3247_v31 = vadd.f32 %v14406_v2, %v14405_v25  ;;  %v14413_v0 = vld [vmem:[#allocation218_spill] sm:$0xff] }
 0x82b   :  { %6945 = vst [vmem:[#allocation5 + $0xc8] sm:$0xff] %v6881_v47  ;;  %v13534_v46 = vadd.f32 %v6210_v27, %v6012_v15  ;;  %6654 = vadd.xlane.f32.xlu1 %v6529_v22  ;;  %v14407_v27 = vld [vmem:[#allocation212_spill] sm:$0xff]  ;;  %v14415_v25 = vld [vmem:[#allocation134_spill] sm:$0xff] }
 0x82c   :  { %v9257_v20 = vpop.eup %9256  ;;  %v7341_v60 = vadd.f32 -14.703016, %v6686_v14  ;;  %v6819_v47 = vsel %vm6791_vm1, %v6431_v6, %v14407_v27  ;;  %v6432_v22 = vadd.f32 %v13473_v36, %v4839_v58  ;;  %v14408_v14 = vld [vmem:[#allocation186_spill] sm:$0xff]  ;;  %v14410_v6 = vld [vmem:[#allocation133_spill] sm:$0xff]  ;;  %v14411_v36 = vld [vmem:[#allocation215_spill] sm:$0xff] }
 0x82d   :  { %v6587_v30 = vpop.xlane.xlu1 %6586  ;;  %v6211_v48 = vmul.f32 %v9257_v20, %v14403_v55  ;;  %v6341_v49 = vpop.xlane.xlu0 %6340  ;;  %v6530_v16 = vmul.f32 %v13534_v46, %v13534_v46  ;;  %v4840_v20 = vadd.f32 %v14408_v14, %v3247_v31  ;;  %v14417_v14 = vld [vmem:[#allocation52_spill] sm:$0xff] }
 0x82e   :  { %v6687_v42 = vmul.f32 -0.5, %v6587_v30  ;;  %v6882_v8 = vsel %vm6790_vm2, %v7341_v60, %v6818_v35  ;;  %v14409_v35 = vld [vmem:[#allocation48_spill] sm:$0xff]  ;;  %v6820_v30 = vsel %vm6791_vm1, %v6432_v22, %v14411_v36  ;;  %v14420_v36 = vld [vmem:[#allocation189_spill] sm:$0xff] }
 0x82f   :  { %v13549_v15 = vadd.f32 %v6211_v48, %v6018_v38  ;;  %6946 = vst [vmem:[#allocation5 + $0xd0] sm:$0xff] %v6882_v8  ;;  %6656 = vadd.xlane.f32.xlu0 %v6530_v16  ;;  %v6433_v23 = vadd.f32 %v13488_v56, %v4840_v20  ;;  %v3248_v60 = vadd.f32 %v14410_v6, %v14409_v35  ;;  %v14418_v20 = vld [vmem:[#allocation135_spill] sm:$0xff] }
 0x830   :  { %v7342_v17 = vadd.f32 -14.703016, %v6687_v42  ;;  %v14412_v42 = vld [vmem:[#allocation187_spill] sm:$0xff] }
 0x831   :  { %v6343_v37 = vpop.xlane.xlu1 %6342  ;;  %v6589_v32 = vpop.xlane.xlu0 %6588  ;;  %v6531_v21 = vmul.f32 %v13549_v15, %v13549_v15  ;;  %v4841_v16 = vadd.f32 %v14412_v42, %v3248_v60  ;;  %v6821_v56 = vsel %vm6791_vm1, %v6433_v23, %v14413_v0  ;;  %v14422_v42 = vld [vmem:[#allocation136_spill] sm:$0xff] }
 0x832   :  { %v6883_v13 = vsel %vm6790_vm2, %v7342_v17, %v6819_v47  ;;  %v6688_v40 = vmul.f32 -0.5, %v6589_v32  ;;  %v14414_v17 = vld [vmem:[#allocation50_spill] sm:$0xff] }
 0x833   :  { %6947 = vst [vmem:[#allocation5 + $0xd8] sm:$0xff] %v6883_v13  ;;  %6658 = vadd.xlane.f32.xlu1 %v6531_v21  ;;  %v3249_v2 = vadd.f32 %v14415_v25, %v14414_v17  ;;  %v6434_v31 = vadd.f32 %v13509_v33, %v4841_v16  ;;  %v14416_v13 = vld [vmem:[#allocation188_spill] sm:$0xff] }
 0x834   :  { %v7343_v41 = vadd.f32 -14.703016, %v6688_v40  ;;  %v3250_v40 = vadd.f32 %v14418_v20, %v14417_v14 }
 0x835   :  { %v6591_v1 = vpop.xlane.xlu1 %6590  ;;  %v6345_v55 = vpop.xlane.xlu0 %6344  ;;  %v4842_v32 = vadd.f32 %v14416_v13, %v3249_v2  ;;  %v14426_v13 = vld [vmem:[#allocation137_spill] sm:$0xff] }
 0x836   :  { %v6689_v38 = vmul.f32 -0.5, %v6591_v1  ;;  %v6884_v48 = vsel %vm6790_vm2, %v7343_v41, %v6820_v30  ;;  %v14419_v41 = vld [vmem:[#allocation221_spill] sm:$0xff]  ;;  %v4843_v30 = vadd.f32 %v14420_v36, %v3250_v40  ;;  %v14430_v36 = vld [vmem:[#allocation138_spill] sm:$0xff] }
 0x837   :  { %6948 = vst [vmem:[#allocation5 + $0xe0] sm:$0xff] %v6884_v48  ;;  %v6822_v23 = vsel %vm6791_vm1, %v6434_v31, %v14419_v41  ;;  %v6435_v1 = vadd.f32 %v13524_v3, %v4842_v32  ;;  %v14421_v48 = vld [vmem:[#allocation54_spill] sm:$0xff] }
 0x838   :  { %v7344_v8 = vadd.f32 -14.703016, %v6689_v38  ;;  %v3251_v16 = vadd.f32 %v14422_v42, %v14421_v48  ;;  %v14424_v31 = vld [vmem:[#allocation190_spill] sm:$0xff] }
 0x839   :  { %v6347_v58 = vpop.xlane.xlu1 %6346  ;;  %v6593_v47 = vpop.xlane.xlu0 %6592 }
 0x83a   :  { %v6885_v27 = vsel %vm6790_vm2, %v7344_v8, %v6821_v56  ;;  %v6690_v22 = vmul.f32 -0.5, %v6593_v47  ;;  %v14423_v8 = vld [vmem:[#allocation224_spill] sm:$0xff]  ;;  %v6436_v56 = vadd.f32 %v6341_v49, %v4843_v30 }
 0x83b   :  { %6949 = vst [vmem:[#allocation5 + $0xe8] sm:$0xff] %v6885_v27  ;;  %v6823_v0 = vsel %vm6791_vm1, %v6435_v1, %v14423_v8  ;;  %v4844_v27 = vadd.f32 %v14424_v31, %v3251_v16  ;;  %v14428_v1 = vld [vmem:[#allocation192_spill] sm:$0xff]  ;;  %v14434_v31 = vld [vmem:[#allocation139_spill] sm:$0xff] }
 0x83c   :  { %v7345_v21 = vadd.f32 -14.703016, %v6690_v22  ;;  %v14425_v22 = vld [vmem:[#allocation60_spill] sm:$0xff] }
 0x83d   :  { %v6595_v35 = vpop.xlane.xlu1 %6594  ;;  %v6349_v33 = vpop.xlane.xlu0 %6348  ;;  %v3252_v32 = vadd.f32 %v14426_v13, %v14425_v22  ;;  %v6437_v20 = vadd.f32 %v6343_v37, %v4844_v27 }
 0x83e   :  { %v6886_v6 = vsel %vm6790_vm2, %v7345_v21, %v6822_v23  ;;  %v6691_v60 = vmul.f32 -0.5, %v6595_v35  ;;  %v14427_v21 = vld [vmem:[#allocation227_spill] sm:$0xff] }
 0x83f   :  { %6950 = vst [vmem:[#allocation5 + $0xf0] sm:$0xff] %v6886_v6  ;;  %v6824_v14 = vsel %vm6791_vm1, %v6436_v56, %v14427_v21  ;;  %v4845_v35 = vadd.f32 %v14428_v1, %v3252_v32  ;;  %v14432_v56 = vld [vmem:[#allocation193_spill] sm:$0xff] }
 0x840   :  { %v7346_v38 = vadd.f32 -14.703016, %v6691_v60  ;;  %v14429_v60 = vld [vmem:[#allocation62_spill] sm:$0xff] }
 0x841   :  { %v6351_v17 = vpop.xlane.xlu1 %6350  ;;  %v6597_v3 = vpop.xlane.xlu0 %6596  ;;  %v3253_v30 = vadd.f32 %v14430_v36, %v14429_v60  ;;  %v6438_v42 = vadd.f32 %v6345_v55, %v4845_v35  ;;  %v14438_v35 = vld [vmem:[#allocation20_spill] sm:$0xff] }
 0x842   :  { %v6887_v25 = vsel %vm6790_vm2, %v7346_v38, %v6823_v0  ;;  %v6692_v2 = vmul.f32 -0.5, %v6597_v3  ;;  %v14431_v38 = vld [vmem:[#allocation228_spill] sm:$0xff] }
 0x843   :  { %6951 = vst [vmem:[#allocation5 + $0xf8] sm:$0xff] %v6887_v25  ;;  %v6825_v48 = vsel %vm6791_vm1, %v6437_v20, %v14431_v38  ;;  %v4846_v3 = vadd.f32 %v14432_v56, %v3253_v30  ;;  %v14439_v38 = vld [vmem:[#allocation15_spill] sm:$0xff] }
 0x844   :  { %v7347_v47 = vadd.f32 -14.703016, %v6692_v2  ;;  %v14433_v2 = vld [vmem:[#allocation65_spill] sm:$0xff] }
 0x845   :  { %v6599_v40 = vpop.xlane.xlu1 %6598  ;;  %v6353_v49 = vpop.xlane.xlu0 %6352  ;;  %v3254_v27 = vadd.f32 %v14434_v31, %v14433_v2  ;;  %v6439_v22 = vadd.f32 %v6347_v58, %v4846_v3 }
 0x846   :  { %v6888_v41 = vsel %vm6790_vm2, %v7347_v47, %v6824_v14  ;;  %v6693_v23 = vmul.f32 -0.5, %v6599_v40  ;;  %v6826_v47 = vsel %vm6791_vm1, %v6438_v42, %v12964_v43  ;;  %v14435_v14 = vld [vmem:[#allocation195_spill] sm:$0xff] }
 0x847   :  { %6952 = vst [vmem:[#allocation5 + $0x100] sm:$0xff] %v6888_v41  ;;  %v4847_v20 = vadd.f32 %v14435_v14, %v3254_v27  ;;  %v14436_v41 = vld [vmem:[#allocation66_spill] sm:$0xff]  ;;  %v14442_v27 = vld [vmem:[#allocation197_spill] sm:$0xff] }
 0x848   :  { %v7348_v6 = vadd.f32 -14.703016, %v6693_v23  ;;  %v14437_v23 = vld [vmem:[#allocation140_spill] sm:$0xff] }
 0x849   :  { %v6355_v16 = vpop.xlane.xlu1 %6354  ;;  %v6601_v37 = vpop.xlane.xlu0 %6600  ;;  %v3255_v1 = vadd.f32 %v14437_v23, %v14436_v41  ;;  %v6440_v60 = vadd.f32 %v6349_v33, %v4847_v20  ;;  %v14445_v23 = vld [vmem:[#allocation87_spill] sm:$0xff] }
 0x84a   :  { %v6889_v8 = vsel %vm6790_vm2, %v7348_v6, %v6825_v48  ;;  %v6694_v0 = vmul.f32 -0.5, %v6601_v37  ;;  %v6827_v6 = vsel %vm6791_vm1, %v6439_v22, %v14438_v35  ;;  %v14440_v37 = vld [vmem:[#allocation69_spill] sm:$0xff] }
 0x84b   :  { %6953 = vst [vmem:[#allocation5 + $0x108] sm:$0xff] %v6889_v8  ;;  %v4848_v48 = vadd.f32 %v14439_v38, %v3255_v1  ;;  %v14441_v8 = vld [vmem:[#allocation141_spill] sm:$0xff]  ;;  %v6828_v56 = vsel %vm6791_vm1, %v6440_v60, %v12999_v4  ;;  %v14447_v60 = vld [vmem:[#allocation143_spill] sm:$0xff] }
 0x84c   :  { %v7349_v25 = vadd.f32 -14.703016, %v6694_v0  ;;  %v3256_v0 = vadd.f32 %v14441_v8, %v14440_v37 }
 0x84d   :  { %v6603_v13 = vpop.xlane.xlu1 %6602  ;;  %v6357_v55 = vpop.xlane.xlu0 %6356  ;;  %v6441_v3 = vadd.f32 %v6351_v17, %v4848_v48 }
 0x84e   :  { %v6890_v32 = vsel %vm6790_vm2, %v7349_v25, %v6826_v47  ;;  %v6695_v21 = vmul.f32 -0.5, %v6603_v13  ;;  %v4849_v47 = vadd.f32 %v14442_v27, %v3256_v0  ;;  %v14443_v13 = vld [vmem:[#allocation70_spill] sm:$0xff] }
 0x84f   :  { %6954 = vst [vmem:[#allocation5 + $0x110] sm:$0xff] %v6890_v32  ;;  %v14444_v32 = vld [vmem:[#allocation142_spill] sm:$0xff]  ;;  %v6829_v14 = vsel %vm6791_vm1, %v6441_v3, %v13020_v54 }
 0x850   :  { %v7350_v40 = vadd.f32 -14.703016, %v6695_v21  ;;  %v3257_v21 = vadd.f32 %v14444_v32, %v14443_v13  ;;  %v6442_v20 = vadd.f32 %v6353_v49, %v4849_v47  ;;  %v14449_v0 = vld [vmem:[#allocation74_spill] sm:$0xff]  ;;  %v14451_v47 = vld [vmem:[#allocation89_spill] sm:$0xff] }
 0x851   :  { %v6359_v43 = vpop.xlane.xlu1 %6358  ;;  %v6605_v58 = vpop.xlane.xlu0 %6604  ;;  %v14452_v32 = vld [vmem:[#allocation77_spill] sm:$0xff] }
 0x852   :  { %v6891_v36 = vsel %vm6790_vm2, %v7350_v40, %v6827_v6  ;;  %v6696_v30 = vmul.f32 -0.5, %v6605_v58  ;;  %v4850_v1 = vadd.f32 %v14445_v23, %v3257_v21  ;;  %v14446_v6 = vld [vmem:[#allocation73_spill] sm:$0xff]  ;;  %v14454_v23 = vld [vmem:[#allocation200_spill] sm:$0xff] }
 0x853   :  { %6955 = vst [vmem:[#allocation5 + $0x118] sm:$0xff] %v6891_v36  ;;  %v3258_v58 = vadd.f32 %v14447_v60, %v14446_v6  ;;  %v6830_v36 = vsel %vm6791_vm1, %v6442_v20, %v13041_v12  ;;  %v14453_v21 = vld [vmem:[#allocation145_spill] sm:$0xff]  ;;  %v14455_v6 = vld [vmem:[#allocation78_spill] sm:$0xff] }
 0x854   :  { %v7351_v42 = vadd.f32 -14.703016, %v6696_v30  ;;  %v6443_v30 = vadd.f32 %v6355_v16, %v4850_v1  ;;  %v14456_v60 = vld [vmem:[#allocation146_spill] sm:$0xff] }
 0x855   :  { %v6607_v25 = vpop.xlane.xlu1 %6606  ;;  %v6361_v33 = vpop.xlane.xlu0 %6360 }
 0x856   :  { %v6892_v2 = vsel %vm6790_vm2, %v7351_v42, %v6828_v56  ;;  %v6697_v31 = vmul.f32 -0.5, %v6607_v25  ;;  %v14448_v42 = vld [vmem:[#allocation199_spill] sm:$0xff]  ;;  %v14450_v56 = vld [vmem:[#allocation144_spill] sm:$0xff]  ;;  %v6831_v25 = vsel %vm6791_vm1, %v6443_v30, %v13062_v45 }
 0x857   :  { %6956 = vst [vmem:[#allocation5 + $0x120] sm:$0xff] %v6892_v2  ;;  %v4851_v37 = vadd.f32 %v14448_v42, %v3258_v58  ;;  %v3259_v3 = vadd.f32 %v14450_v56, %v14449_v0  ;;  %v3261_v58 = vadd.f32 %v14456_v60, %v14455_v6  ;;  %v14459_v0 = vld [vmem:[#allocation147_spill] sm:$0xff] }
 0x858   :  { %v7352_v22 = vadd.f32 -14.703016, %v6697_v31 }
 0x859   :  { %v6363_v4 = vpop.xlane.xlu1 %6362  ;;  %v6609_v17 = vpop.xlane.xlu0 %6608  ;;  %v6444_v2 = vadd.f32 %v6357_v55, %v4851_v37 }
 0x85a   :  { %v6893_v40 = vsel %vm6790_vm2, %v7352_v22, %v6829_v14  ;;  %v6698_v41 = vmul.f32 -0.5, %v6609_v17  ;;  %v4852_v22 = vadd.f32 %v14451_v47, %v3259_v3  ;;  %v3260_v14 = vadd.f32 %v14453_v21, %v14452_v32 }
 0x85b   :  { %6957 = vst [vmem:[#allocation5 + $0x128] sm:$0xff] %v6893_v40  ;;  %v6832_v20 = vsel %vm6791_vm1, %v6444_v2, %v13083_v51 }
 0x85c   :  { %v7353_v35 = vadd.f32 -14.703016, %v6698_v41  ;;  %v6445_v17 = vadd.f32 %v6359_v43, %v4852_v22  ;;  %v4853_v1 = vadd.f32 %v14454_v23, %v3260_v14  ;;  %v14461_v22 = vld [vmem:[#allocation82_spill] sm:$0xff]  ;;  %v14464_v23 = vld [vmem:[#allocation83_spill] sm:$0xff] }
 0x85d   :  { %v6611_v54 = vpop.xlane.xlu1 %6610  ;;  %v6365_v49 = vpop.xlane.xlu0 %6364 }
 0x85e   :  { %v6894_v38 = vsel %vm6790_vm2, %v7353_v35, %v6830_v36  ;;  %v6699_v48 = vmul.f32 -0.5, %v6611_v54  ;;  %v6833_v36 = vsel %vm6791_vm1, %v6445_v17, %v13104_v34  ;;  %v6446_v30 = vadd.f32 %v6361_v33, %v4853_v1  ;;  %v14465_v1 = vld [vmem:[#allocation149_spill] sm:$0xff] }
 0x85f   :  { %6958 = vst [vmem:[#allocation5 + $0x130] sm:$0xff] %v6894_v38 }
 0x860   :  { %v7354_v8 = vadd.f32 -14.703016, %v6699_v48  ;;  %v14457_v48 = vld [vmem:[#allocation16_spill] sm:$0xff]  ;;  %v6834_v3 = vsel %vm6791_vm1, %v6446_v30, %v13125_v10  ;;  %v14466_v30 = vld [vmem:[#allocation203_spill] sm:$0xff] }
 0x861   :  { %v6367_v12 = vpop.xlane.xlu1 %6366  ;;  %v6613_v16 = vpop.xlane.xlu0 %6612  ;;  %v4854_v42 = vadd.f32 %v14457_v48, %v3261_v58  ;;  %v14468_v48 = vld [vmem:[#allocation150_spill] sm:$0xff] }
 0x862   :  { %v6895_v31 = vsel %vm6790_vm2, %v7354_v8, %v6831_v25  ;;  %v6700_v27 = vmul.f32 -0.5, %v6613_v16  ;;  %v14458_v8 = vld [vmem:[#allocation81_spill] sm:$0xff] }
 0x863   :  { %6959 = vst [vmem:[#allocation5 + $0x138] sm:$0xff] %v6895_v31  ;;  %v3262_v56 = vadd.f32 %v14459_v0, %v14458_v8  ;;  %v6447_v25 = vadd.f32 %v6363_v4, %v4854_v42  ;;  %v14460_v31 = vld [vmem:[#allocation201_spill] sm:$0xff] }
 0x864   :  { %v7355_v13 = vadd.f32 -14.703016, %v6700_v27 }
 0x865   :  { %v6615_v45 = vpop.xlane.xlu1 %6614  ;;  %v6369_v55 = vpop.xlane.xlu0 %6368  ;;  %v4855_v27 = vadd.f32 %v14460_v31, %v3262_v56  ;;  %v6835_v21 = vsel %vm6791_vm1, %v6447_v25, %v13146_v39 }
 0x866   :  { %v6896_v40 = vsel %vm6790_vm2, %v7355_v13, %v6832_v20  ;;  %v6701_v41 = vmul.f32 -0.5, %v6615_v45  ;;  %v14462_v13 = vld [vmem:[#allocation148_spill] sm:$0xff]  ;;  %v14463_v45 = vld [vmem:[#allocation202_spill] sm:$0xff] }
 0x867   :  { %6960 = vst [vmem:[#allocation5 + $0x140] sm:$0xff] %v6896_v40  ;;  %v3263_v32 = vadd.f32 %v14462_v13, %v14461_v22  ;;  %v6448_v14 = vadd.f32 %v6365_v49, %v4855_v27 }
 0x868   :  { %v7356_v35 = vadd.f32 -14.703016, %v6701_v41 }
 0x869   :  { %v6371_v51 = vpop.xlane.xlu1 %6370  ;;  %v6617_v43 = vpop.xlane.xlu0 %6616  ;;  %v4856_v40 = vadd.f32 %v14463_v45, %v3263_v32  ;;  %v6836_v6 = vsel %vm6791_vm1, %v6448_v14, %v13167_v28  ;;  %v14472_v32 = vld [vmem:[#allocation205_spill] sm:$0xff] }
 0x86a   :  { %v6897_v54 = vsel %vm6790_vm2, %v7356_v35, %v6833_v36  ;;  %v6702_v38 = vmul.f32 -0.5, %v6617_v43  ;;  %v3264_v35 = vadd.f32 %v14465_v1, %v14464_v23  ;;  %v14475_v1 = vld [vmem:[#allocation206_spill] sm:$0xff] }
 0x86b   :  { %6961 = vst [vmem:[#allocation5 + $0x148] sm:$0xff] %v6897_v54  ;;  %v6449_v60 = vadd.f32 %v6367_v12, %v4856_v40 }
 0x86c   :  { %v7357_v37 = vadd.f32 -14.703016, %v6702_v38  ;;  %v4857_v43 = vadd.f32 %v14466_v30, %v3264_v35  ;;  %v14467_v38 = vld [vmem:[#allocation84_spill] sm:$0xff] }
 0x86d   :  { %v6619_v34 = vpop.xlane.xlu1 %6618  ;;  %v6373_v33 = vpop.xlane.xlu0 %6372  ;;  %v3265_v42 = vadd.f32 %v14468_v48, %v14467_v38  ;;  %v14478_v38 = vld [vmem:[#allocation207_spill] sm:$0xff] }
 0x86e   :  { %v6898_v2 = vsel %vm6790_vm2, %v7357_v37, %v6834_v3  ;;  %v6703_v16 = vmul.f32 -0.5, %v6619_v34  ;;  %v6837_v37 = vsel %vm6791_vm1, %v6449_v60, %v13188_v50  ;;  %v6450_v8 = vadd.f32 %v6369_v55, %v4857_v43  ;;  %v14469_v3 = vld [vmem:[#allocation204_spill] sm:$0xff]  ;;  %v14476_v60 = vld [vmem:[#allocation11_spill] sm:$0xff] }
 0x86f   :  { %6962 = vst [vmem:[#allocation5 + $0x150] sm:$0xff] %v6898_v2  ;;  %v4858_v25 = vadd.f32 %v14469_v3, %v3265_v42  ;;  %v14470_v2 = vld [vmem:[#allocation85_spill] sm:$0xff] }
 0x870   :  { %v7358_v47 = vadd.f32 -14.703016, %v6703_v16  ;;  %v14471_v16 = vld [vmem:[#allocation151_spill] sm:$0xff]  ;;  %v6838_v27 = vsel %vm6791_vm1, %v6450_v8, %v13209_v11  ;;  %v14480_v8 = vld [vmem:[#allocation154_spill] sm:$0xff] }
 0x871   :  { %v6375_v10 = vpop.xlane.xlu1 %6374  ;;  %v6621_v4 = vpop.xlane.xlu0 %6620  ;;  %v3266_v31 = vadd.f32 %v14471_v16, %v14470_v2 }
 0x872   :  { %v6899_v20 = vsel %vm6790_vm2, %v7358_v47, %v6835_v21  ;;  %v6704_v17 = vmul.f32 -0.5, %v6621_v4  ;;  %v6451_v47 = vadd.f32 %v6371_v51, %v4858_v25  ;;  %v14473_v4 = vld [vmem:[#allocation10_spill] sm:$0xff] }
 0x873   :  { %6963 = vst [vmem:[#allocation5 + $0x158] sm:$0xff] %v6899_v20  ;;  %v4859_v21 = vadd.f32 %v14472_v32, %v3266_v31  ;;  %v14474_v20 = vld [vmem:[#allocation152_spill] sm:$0xff]  ;;  %v14482_v31 = vld [vmem:[#allocation13_spill] sm:$0xff] }
 0x874   :  { %v7359_v41 = vadd.f32 -14.703016, %v6704_v17  ;;  %v3267_v17 = vadd.f32 %v14474_v20, %v14473_v4  ;;  %v6839_v45 = vsel %vm6791_vm1, %v6451_v47, %v13230_v29  ;;  %v14485_v20 = vld [vmem:[#allocation14_spill] sm:$0xff] }
 0x875   :  { %v6623_v39 = vpop.xlane.xlu1 %6622  ;;  %v6377_v49 = vpop.xlane.xlu0 %6376  ;;  %v6452_v40 = vadd.f32 %v6373_v33, %v4859_v21  ;;  %v14484_v21 = vld [vmem:[#allocation210_spill] sm:$0xff] }
 0x876   :  { %v6900_v58 = vsel %vm6790_vm2, %v7359_v41, %v6836_v6  ;;  %v6705_v36 = vmul.f32 -0.5, %v6623_v39  ;;  %v4860_v35 = vadd.f32 %v14475_v1, %v3267_v17  ;;  %v14477_v39 = vld [vmem:[#allocation153_spill] sm:$0xff]  ;;  %v14486_v17 = vld [vmem:[#allocation155_spill] sm:$0xff] }
 0x877   :  { %6964 = vst [vmem:[#allocation5 + $0x160] sm:$0xff] %v6900_v58  ;;  %v3268_v58 = vadd.f32 %v14477_v39, %v14476_v60  ;;  %v14487_v1 = vld [vmem:[#allocation211_spill] sm:$0xff]  ;;  %v14488_v60 = vld [vmem:[#allocation86_spill] sm:$0xff]  ;;  %v14489_v39 = vld [vmem:[#allocation156_spill] sm:$0xff] }
 0x878   :  { %v7360_v54 = vadd.f32 -14.703016, %v6705_v36  ;;  %v6840_v36 = vsel %vm6791_vm1, %v6452_v40, %v13251_v62  ;;  %v6453_v30 = vadd.f32 %v6375_v10, %v4860_v35 }
 0x879   :  { %v6379_v28 = vpop.xlane.xlu1 %6378  ;;  %v6625_v12 = vpop.xlane.xlu0 %6624  ;;  %v4861_v48 = vadd.f32 %v14478_v38, %v3268_v58  ;;  %v3272_v58 = vadd.f32 %v14489_v39, %v14488_v60 }
 0x87a   :  { %v6901_v0 = vsel %vm6790_vm2, %v7360_v54, %v6837_v37  ;;  %v6706_v56 = vmul.f32 -0.5, %v6625_v12  ;;  %v14479_v37 = vld [vmem:[#allocation12_spill] sm:$0xff] }
 0x87b   :  { %6965 = vst [vmem:[#allocation5 + $0x168] sm:$0xff] %v6901_v0  ;;  %v3269_v12 = vadd.f32 %v14480_v8, %v14479_v37  ;;  %v6841_v0 = vsel %vm6791_vm1, %v6453_v30, %v13272_v5  ;;  %v14492_v37 = vld [vmem:[#allocation157_spill] sm:$0xff] }
 0x87c   :  { %v7361_v34 = vadd.f32 -14.703016, %v6706_v56  ;;  %v6454_v56 = vadd.f32 %v6377_v49, %v4861_v48 }
 0x87d   :  { %v6627_v50 = vpop.xlane.xlu1 %6626  ;;  %v6381_v55 = vpop.xlane.xlu0 %6380 }
 0x87e   :  { %v6902_v22 = vsel %vm6790_vm2, %v7361_v34, %v6838_v27  ;;  %v6707_v13 = vmul.f32 -0.5, %v6627_v50  ;;  %v14481_v34 = vld [vmem:[#allocation208_spill] sm:$0xff]  ;;  %v6842_v50 = vsel %vm6791_vm1, %v6454_v56, %v13293_v26 }
 0x87f   :  { %6966 = vst [vmem:[#allocation5 + $0x170] sm:$0xff] %v6902_v22  ;;  %v4862_v2 = vadd.f32 %v14481_v34, %v3269_v12  ;;  %v14483_v27 = vld [vmem:[#allocation8_spill] sm:$0xff] }
 0x880   :  { %v7362_v14 = vadd.f32 -14.703016, %v6707_v13  ;;  %v3270_v47 = vadd.f32 %v14483_v27, %v14482_v31 }
 0x881   :  { %v6383_v11 = vpop.xlane.xlu1 %6382  ;;  %v6629_v51 = vpop.xlane.xlu0 %6628  ;;  %v6455_v22 = vadd.f32 %v6379_v28, %v4862_v2  ;;  %v14494_v2 = vld [vmem:[#allocation90_spill] sm:$0xff] }
 0x882   :  { %v6903_v41 = vsel %vm6790_vm2, %v7362_v14, %v6839_v45  ;;  %v6708_v23 = vmul.f32 -0.5, %v6629_v51  ;;  %v4863_v14 = vadd.f32 %v14484_v21, %v3270_v47  ;;  %v3271_v45 = vadd.f32 %v14486_v17, %v14485_v20  ;;  %v14497_v21 = vld [vmem:[#allocation91_spill] sm:$0xff] }
 0x883   :  { %6967 = vst [vmem:[#allocation5 + $0x178] sm:$0xff] %v6903_v41  ;;  %v6843_v40 = vsel %vm6791_vm1, %v6455_v22, %v13314_v63 }
 0x884   :  { %v7363_v6 = vadd.f32 -14.703016, %v6708_v23  ;;  %v6456_v51 = vadd.f32 %v6381_v55, %v4863_v14  ;;  %v4864_v35 = vadd.f32 %v14487_v1, %v3271_v45  ;;  %v14498_v14 = vld [vmem:[#allocation159_spill] sm:$0xff]  ;;  %v14501_v1 = vld [vmem:[#allocation160_spill] sm:$0xff] }
 0x885   :  { %v6631_v29 = vpop.xlane.xlu1 %6630  ;;  %v6385_v33 = vpop.xlane.xlu0 %6384 }
 0x886   :  { %v6904_v43 = vsel %vm6790_vm2, %v7363_v6, %v6840_v36  ;;  %v6709_v54 = vmul.f32 -0.5, %v6631_v29  ;;  %v6844_v36 = vsel %vm6791_vm1, %v6456_v51, %v13335_v57  ;;  %v6457_v30 = vadd.f32 %v6383_v11, %v4864_v35  ;;  %v14499_v51 = vld [vmem:[#allocation217_spill] sm:$0xff] }
 0x887   :  { %6968 = vst [vmem:[#allocation5 + $0x180] sm:$0xff] %v6904_v43 }
 0x888   :  { %v7364_v42 = vadd.f32 -14.703016, %v6709_v54  ;;  %v14490_v54 = vld [vmem:[#allocation213_spill] sm:$0xff]  ;;  %v6845_v12 = vsel %vm6791_vm1, %v6457_v30, %v13356_v44 }
 0x889   :  { %v6387_v62 = vpop.xlane.xlu1 %6386  ;;  %v6633_v10 = vpop.xlane.xlu0 %6632  ;;  %v4865_v38 = vadd.f32 %v14490_v54, %v3272_v58 }
 0x88a   :  { %v6905_v3 = vsel %vm6790_vm2, %v7364_v42, %v6841_v0  ;;  %v6710_v25 = vmul.f32 -0.5, %v6633_v10  ;;  %v14491_v42 = vld [vmem:[#allocation88_spill] sm:$0xff] }
 0x88b   :  { %6969 = vst [vmem:[#allocation5 + $0x188] sm:$0xff] %v6905_v3  ;;  %v3273_v8 = vadd.f32 %v14492_v37, %v14491_v42  ;;  %v6458_v0 = vadd.f32 %v6385_v33, %v4865_v38  ;;  %v14493_v3 = vld [vmem:[#allocation214_spill] sm:$0xff] }
 0x88c   :  { %v7365_v16 = vadd.f32 -14.703016, %v6710_v25 }
 0x88d   :  { %v6635_v5 = vpop.xlane.xlu1 %6634  ;;  %v6389_v49 = vpop.xlane.xlu0 %6388  ;;  %v4866_v25 = vadd.f32 %v14493_v3, %v3273_v8  ;;  %v6846_v27 = vsel %vm6791_vm1, %v6458_v0, %v13377_v53  ;;  %v14505_v8 = vld [vmem:[#allocation220_spill] sm:$0xff]  ;;  %v14506_v0 = vld [vmem:[#allocation19_spill] sm:$0xff] }
 0x88e   :  { %v6906_v13 = vsel %vm6790_vm2, %v7365_v16, %v6842_v50  ;;  %v6711_v32 = vmul.f32 -0.5, %v6635_v5  ;;  %v14495_v16 = vld [vmem:[#allocation158_spill] sm:$0xff]  ;;  %v14496_v5 = vld [vmem:[#allocation216_spill] sm:$0xff] }
 0x88f   :  { %6970 = vst [vmem:[#allocation5 + $0x190] sm:$0xff] %v6906_v13  ;;  %v3274_v31 = vadd.f32 %v14495_v16, %v14494_v2  ;;  %v6459_v47 = vadd.f32 %v6387_v62, %v4866_v25 }
 0x890   :  { %v7366_v4 = vadd.f32 -14.703016, %v6711_v32 }
 0x891   :  { %v6391_v26 = vpop.xlane.xlu1 %6390  ;;  %v6637_v28 = vpop.xlane.xlu0 %6636  ;;  %v4867_v13 = vadd.f32 %v14496_v5, %v3274_v31  ;;  %v6847_v20 = vsel %vm6791_vm1, %v6459_v47, %v13398_v61  ;;  %v14509_v31 = vld [vmem:[#allocation92_spill] sm:$0xff] }
 0x892   :  { %v6907_v41 = vsel %vm6790_vm2, %v7366_v4, %v6843_v40  ;;  %v6712_v23 = vmul.f32 -0.5, %v6637_v28  ;;  %v3275_v4 = vadd.f32 %v14498_v14, %v14497_v21  ;;  %v14512_v14 = vld [vmem:[#allocation93_spill] sm:$0xff] }
 0x893   :  { %6971 = vst [vmem:[#allocation5 + $0x198] sm:$0xff] %v6907_v41  ;;  %v6460_v17 = vadd.f32 %v6389_v49, %v4867_v13 }
 0x894   :  { %v7367_v6 = vadd.f32 -14.703016, %v6712_v23  ;;  %v4868_v28 = vadd.f32 %v14499_v51, %v3275_v4  ;;  %v14500_v23 = vld [vmem:[#allocation17_spill] sm:$0xff]  ;;  %v14513_v4 = vld [vmem:[#allocation163_spill] sm:$0xff] }
 0x895   :  { %v6639_v63 = vpop.xlane.xlu1 %6638  ;;  %v6393_v55 = vpop.xlane.xlu0 %6392  ;;  %v3276_v35 = vadd.f32 %v14501_v1, %v14500_v23  ;;  %v14516_v23 = vld [vmem:[#allocation164_spill] sm:$0xff] }
 0x896   :  { %v6908_v29 = vsel %vm6790_vm2, %v7367_v6, %v6844_v36  ;;  %v6713_v43 = vmul.f32 -0.5, %v6639_v63  ;;  %v6848_v6 = vsel %vm6791_vm1, %v6460_v17, %v13419_v59  ;;  %v6461_v60 = vadd.f32 %v6391_v26, %v4868_v28  ;;  %v14502_v36 = vld [vmem:[#allocation219_spill] sm:$0xff] }
 0x897   :  { %6972 = vst [vmem:[#allocation5 + $0x1a0] sm:$0xff] %v6908_v29  ;;  %v4869_v30 = vadd.f32 %v14502_v36, %v3276_v35  ;;  %v14503_v29 = vld [vmem:[#allocation18_spill] sm:$0xff] }
 0x898   :  { %v7368_v48 = vadd.f32 -14.703016, %v6713_v43  ;;  %v14504_v43 = vld [vmem:[#allocation161_spill] sm:$0xff]  ;;  %v6849_v38 = vsel %vm6791_vm1, %v6461_v60, %v13440_v7 }
 0x899   :  { %v6395_v57 = vpop.xlane.xlu1 %6394  ;;  %v6641_v11 = vpop.xlane.xlu0 %6640  ;;  %v3277_v54 = vadd.f32 %v14504_v43, %v14503_v29 }
 0x89a   :  { %v6909_v56 = vsel %vm6790_vm2, %v7368_v48, %v6845_v12  ;;  %v6714_v10 = vmul.f32 -0.5, %v6641_v11  ;;  %v6462_v48 = vadd.f32 %v6393_v55, %v4869_v30  ;;  %v14507_v11 = vld [vmem:[#allocation162_spill] sm:$0xff] }
 0x89b   :  { %6973 = vst [vmem:[#allocation5 + $0x1a8] sm:$0xff] %v6909_v56  ;;  %v4870_v12 = vadd.f32 %v14505_v8, %v3277_v54  ;;  %v3278_v56 = vadd.f32 %v14507_v11, %v14506_v0  ;;  %v14508_v55 = vld [vmem:[#allocation222_spill] sm:$0xff] }
 0x89c   :  { %v7369_v34 = vadd.f32 -14.703016, %v6714_v10  ;;  %v6850_v3 = vsel %vm6791_vm1, %v6462_v48, %v13461_v9 }
 0x89d   :  { %v6643_v44 = vpop.xlane.xlu1 %6642  ;;  %v6397_v33 = vpop.xlane.xlu0 %6396  ;;  %v6463_v25 = vadd.f32 %v6395_v57, %v4870_v12  ;;  %v14511_v57 = vld [vmem:[#allocation223_spill] sm:$0xff] }
 0x89e   :  { %v6910_v50 = vsel %vm6790_vm2, %v7369_v34, %v6846_v27  ;;  %v6715_v22 = vmul.f32 -0.5, %v6643_v44  ;;  %v4871_v34 = vadd.f32 %v14508_v55, %v3278_v56  ;;  %v14510_v27 = vld [vmem:[#allocation9_spill] sm:$0xff] }
 0x89f   :  { %6974 = vst [vmem:[#allocation5 + $0x1b0] sm:$0xff] %v6910_v50  ;;  %v3279_v47 = vadd.f32 %v14510_v27, %v14509_v31  ;;  %v6851_v5 = vsel %vm6791_vm1, %v6463_v25, %v13480_v52 }
 0x8a0   :  { %v7370_v32 = vadd.f32 -14.703016, %v6715_v22  ;;  %v6464_v44 = vadd.f32 %v6397_v33, %v4871_v34 }
 0x8a1   :  { %v6399_v53 = vpop.xlane.xlu1 %6398  ;;  %v6645_v62 = vpop.xlane.xlu0 %6644  ;;  %v4872_v13 = vadd.f32 %v14511_v57, %v3279_v47 }
 0x8a2   :  { %v6911_v45 = vsel %vm6790_vm2, %v7370_v32, %v6847_v20  ;;  %v6716_v40 = vmul.f32 -0.5, %v6645_v62  ;;  %v3280_v20 = vadd.f32 %v14513_v4, %v14512_v14  ;;  %v6852_v33 = vsel %vm6791_vm1, %v6464_v44, %v13498_v18 }
 0x8a3   :  { %6975 = vst [vmem:[#allocation5 + $0x1b8] sm:$0xff] %v6911_v45  ;;  %v6465_v17 = vadd.f32 %v6399_v53, %v4872_v13 }
 0x8a4   :  { %v7371_v41 = vadd.f32 -14.703016, %v6716_v40  ;;  %v14514_v40 = vld [vmem:[#allocation225_spill] sm:$0xff] }
 0x8a5   :  { %v6647_v61 = vpop.xlane.xlu1 %6646  ;;  %v6401_v49 = vpop.xlane.xlu0 %6400  ;;  %v4873_v51 = vadd.f32 %v14514_v40, %v3280_v20  ;;  %v6853_v35 = vsel %vm6791_vm1, %v6465_v17, %v13516_v24 }
 0x8a6   :  { %v6912_v39 = vsel %vm6790_vm2, %v7371_v41, %v6848_v6  ;;  %v6717_v58 = vmul.f32 -0.5, %v6647_v61  ;;  %v14515_v41 = vld [vmem:[#allocation94_spill] sm:$0xff] }
 0x8a7   :  { %6976 = vst [vmem:[#allocation5 + $0x1c0] sm:$0xff] %v6912_v39  ;;  %v3281_v1 = vadd.f32 %v14516_v23, %v14515_v41  ;;  %v6466_v6 = vadd.f32 %v6401_v49, %v4873_v51  ;;  %v14517_v61 = vld [vmem:[#allocation226_spill] sm:$0xff] }
 0x8a8   :  { %v7372_v63 = vadd.f32 -14.703016, %v6717_v58 }
 0x8a9   :  { %v6403_v59 = vpop.xlane.xlu1 %6402  ;;  %v6649_v26 = vpop.xlane.xlu0 %6648  ;;  %v4874_v39 = vadd.f32 %v14517_v61, %v3281_v1  ;;  %v6854_v36 = vsel %vm6791_vm1, %v6466_v6, %v13534_v46 }
 0x8aa   :  { %v6913_v42 = vsel %vm6790_vm2, %v7372_v63, %v6849_v38  ;;  %v6718_v37 = vmul.f32 -0.5, %v6649_v26 }
 0x8ab   :  { %6977 = vst [vmem:[#allocation5 + $0x1c8] sm:$0xff] %v6913_v42  ;;  %v6467_v30 = vadd.f32 %v6403_v59, %v4874_v39 }
 0x8ac   :  { %v7373_v10 = vadd.f32 -14.703016, %v6718_v37 }
 0x8ad   :  { %v6651_v7 = vpop.xlane.xlu1 %6650  ;;  %v6855_v43 = vsel %vm6791_vm1, %v6467_v30, %v13549_v15 }
 0x8ae   :  { %v6914_v2 = vsel %vm6790_vm2, %v7373_v10, %v6850_v3  ;;  %v6719_v16 = vmul.f32 -0.5, %v6651_v7 }
 0x8af   :  { %6978 = vst [vmem:[#allocation5 + $0x1d0] sm:$0xff] %v6914_v2 }
 0x8b0   :  { %v7374_v50 = vadd.f32 -14.703016, %v6719_v16  ;;  %v6653_v22 = vpop.xlane.xlu0 %6652 }
 0x8b1   :  { %v6720_v9 = vmul.f32 -0.5, %v6653_v22 }
 0x8b2   :  { %v6915_v32 = vsel %vm6790_vm2, %v7374_v50, %v6851_v5 }
 0x8b3   :  { %6979 = vst [vmem:[#allocation5 + $0x1d8] sm:$0xff] %v6915_v32  ;;  %v7375_v21 = vadd.f32 -14.703016, %v6720_v9 }
 0x8b4   :  { %v6655_v62 = vpop.xlane.xlu1 %6654 }
 0x8b5   :  { %v6916_v52 = vsel %vm6790_vm2, %v7375_v21, %v6852_v33  ;;  %v6721_v45 = vmul.f32 -0.5, %v6655_v62 }
 0x8b6   :  { %6980 = vst [vmem:[#allocation5 + $0x1e0] sm:$0xff] %v6916_v52 }
 0x8b7   :  { %v7376_v28 = vadd.f32 -14.703016, %v6721_v45 }
 0x8b8   :  { %v6657_v60 = vpop.xlane.xlu0 %6656 }
 0x8b9   :  { %v6917_v18 = vsel %vm6790_vm2, %v7376_v28, %v6853_v35  ;;  %v6722_v53 = vmul.f32 -0.5, %v6657_v60 }
 0x8ba   :  { %6981 = vst [vmem:[#allocation5 + $0x1e8] sm:$0xff] %v6917_v18 }
 0x8bb   :  { %v7377_v58 = vadd.f32 -14.703016, %v6722_v53 }
 0x8bc   :  { %v6659_v63 = vpop.xlane.xlu1 %6658 }
 0x8bd   :  { %v6918_v29 = vsel %vm6790_vm2, %v7377_v58, %v6854_v36  ;;  %v6723_v24 = vmul.f32 -0.5, %v6659_v63 }
 0x8be   :  { %6982 = vst [vmem:[#allocation5 + $0x1f0] sm:$0xff] %v6918_v29 }
 0x8bf   :  { %v7378_v49 = vadd.f32 -14.703016, %v6723_v24 }
 0x8c1   :  { %v6919_v54 = vsel %vm6790_vm2, %v7378_v49, %v6855_v43 }
 0x8c2   :  { %6983 = vst [vmem:[#allocation5 + $0x1f8] sm:$0xff] %v6919_v54 }
 0x8c3   :  { %9356 = shalt.err (!%p9353_p9)
}
 0x8c4   :  { %s9374_s12 = smov 128   ;;  %s9375_s0 = smov 8  }
 0x8c5   :  { %6995 = dma.vmem_to_hbm [thread:$0]  %s6990_s10, 8192, %s13855_s5, [#allocation4], %s9374_s12, %s9374_s12, %s9375_s0  }
 0x8c6   :  { %9367 = dma.done.wait [#allocation4], 8192  }
 0x8c7   :  { %9368 = vsyncadd [#allocation4], 4294959104 }
 0x8c8   :  { %6999 = vsyncpa [#allocation3], 1 }
 0x8c9   :  { %7000 = vsyncpa [#allocation4], 1 }

</bundles_post_ra>
